<compile_context>
chip_gen: v6e
topology: v6e:2x2x1
jax: 0.10.0
libtpu: 0.0.40
codegen_flags: <defaults>
</compile_context>

<pallas_src>
import numpy as np
import jax
import jax.numpy as jnp
from jax.experimental import pallas as pl
from jax.experimental.pallas import tpu as pltpu

# ----------------- module config (matches PyTorch __init__) -----------------
CONDITION_CODE_SIZE = 69
MLP_WIDTH = 128
MLP_DEPTH = 6          # => 6 Linear+ReLU blocks + final Linear(128, 3)
BOUND = 1.0
NUM_LEVELS = 8
LEVEL_DIM = 2
BASE_RES = 16
LOG2_HASHMAP = 19
DESIRED_RES = int(2048 * BOUND)
ENC_OUT_DIM = NUM_LEVELS * LEVEL_DIM            # 16
IN_DIM = ENC_OUT_DIM + CONDITION_CODE_SIZE      # 85
OUT_DIM = 3
MAX_TILE = 8192                                 # max rows per grid step
N_LINEAR = MLP_DEPTH + 1                        # 7 linear layers total
VMEM_LIMIT_BYTES = 32 * 1024 * 1024             # ~14 MB peak at TILE=8192 + margin

# ----------------- hash-grid encoder setup (torch-ngp GridEncoder) ----------
_PER_LEVEL_SCALE = float(np.exp2(np.log2(DESIRED_RES / BASE_RES) / (NUM_LEVELS - 1)))
_MAX_PARAMS = 2 ** LOG2_HASHMAP
_PRIMES = (np.uint32(1), np.uint32(2654435761), np.uint32(805459861))

_resolutions, _offsets, _hashmap_sizes = [], [], []
_off = 0
for _l in range(NUM_LEVELS):
    _res = int(np.ceil(BASE_RES * _PER_LEVEL_SCALE ** _l))
    _params = min(_MAX_PARAMS, (_res + 1) ** 3)          # align_corners=False
    _params = int(np.ceil(_params / 8) * 8)
    _resolutions.append(_res)
    _offsets.append(_off)
    _hashmap_sizes.append(_params)
    _off += _params
TOTAL_HASH_PARAMS = _off

# corner bit patterns (8 corners x 3 dims), host-side constants
_CORNER_BITS = np.asarray([[(c >> d) & 1 for d in range(3)] for c in range(8)],
                          dtype=np.uint32)               # [8, 3]


def hash_grid_encode(xyz, embeddings, bound=BOUND):
    """torch-ngp style multires hash encoding, fully vectorized (one gather).

    xyz: [N, 3] in [-bound, bound] -> [N, NUM_LEVELS*LEVEL_DIM] f32.
    embeddings may be bf16 (storage); the weighted sum is done in f32.
    """
    n = xyz.shape[0]
    x = (xyz + bound) / (2.0 * bound)                     # map to [0, 1]
    x = jnp.clip(x, 0.0, 1.0)                             # [N, 3]

    scales = jnp.asarray([float(r - 1) for r in _resolutions], jnp.float32)  # [L]
    pos = x[:, None, :] * scales[None, :, None] + 0.5     # [N, L, 3] (align_corners=False)
    pos_floor = jnp.floor(pos)
    frac = pos - pos_floor                                # [N, L, 3]
    grid = pos_floor.astype(jnp.uint32)                   # [N, L, 3]

    cb = jnp.asarray(_CORNER_BITS)                        # [8, 3] uint32
    cb_f = jnp.asarray(_CORNER_BITS.astype(np.float32))   # [8, 3] f32
    cg = grid[:, :, None, :] + cb[None, None, :, :]       # [N, L, 8, 3]

    # trilinear weights: prod over d of (frac or 1-frac)
    w = jnp.prod(jnp.where(cb_f[None, None, :, :] == 1.0,
                           frac[:, :, None, :],
                           1.0 - frac[:, :, None, :]), axis=-1)            # [N, L, 8]

    strides = jnp.asarray([r + 1 for r in _resolutions], jnp.uint32)       # [L]
    hsizes = jnp.asarray(_hashmap_sizes, jnp.uint32)                       # [L]
    offs = jnp.asarray(_offsets, jnp.int32)                                # [L]
    dense_mask = jnp.asarray([(r + 1) ** 3 <= h
                              for r, h in zip(_resolutions, _hashmap_sizes)])  # [L]

    s = strides[None, :, None]                                             # [1, L, 1]
    dense_idx = cg[..., 0] + cg[..., 1] * s + cg[..., 2] * s * s           # [N, L, 8]
    hash_idx = ((cg[..., 0] * _PRIMES[0]) ^ (cg[..., 1] * _PRIMES[1]) ^
                (cg[..., 2] * _PRIMES[2]))                                 # [N, L, 8]
    idx = jnp.where(dense_mask[None, :, None], dense_idx, hash_idx)
    idx = (idx % hsizes[None, :, None]).astype(jnp.int32) + offs[None, :, None]

    # single batched gather over the whole (bf16) table
    corner_feat = jnp.take(embeddings, idx.reshape(n, -1), axis=0)         # [N, L*8, 2]
    corner_feat = corner_feat.reshape(n, NUM_LEVELS, 8, LEVEL_DIM)
    feats = jnp.sum(w[..., None] * corner_feat.astype(jnp.float32), axis=2)  # [N, L, 2]
    return feats.reshape(n, ENC_OUT_DIM)                                   # level-major [N, 16]

# TODO(synk): the hash-grid gather stays in plain JAX; fusing it into the Pallas
# kernel with the bf16 table VMEM-resident is the remaining end-to-end win.


# ----------------------------- Pallas MLP kernel -----------------------------
def mlp_kernel(cond_ref, enc_ref, *refs):
    # refs = (w0c, w0e, b0, w1, b1, ..., w6, b6, o_ref)
    o_ref = refs[-1]
    wb = refs[:-1]

    # layer 0, split over the (condition_code, encoding) inputs (bf16 MXU, f32 acc)
    w0c = wb[0][...]
    w0e = wb[1][...]
    b0 = wb[2][...].astype(jnp.float32)
    h = (jnp.dot(cond_ref[...], w0c, preferred_element_type=jnp.float32)
         + jnp.dot(enc_ref[...], w0e, preferred_element_type=jnp.float32)
         + b0)
    h = jnp.maximum(h, 0.0)

    # hidden layers 1..5 (bf16 weights, f32 acc) and final f32 layer 6
    idx = 3
    for li in range(1, N_LINEAR):
        w = wb[idx][...]
        b = wb[idx + 1][...].astype(jnp.float32)
        idx += 2
        lhs = h if w.dtype == jnp.float32 else h.astype(w.dtype)
        h = jnp.dot(lhs, w, preferred_element_type=jnp.float32) + b
        if li < N_LINEAR - 1:
            h = jnp.maximum(h, 0.0)
    o_ref[...] = h


# ----------------------------- tile / grid policy ----------------------------
def _tensorcores_per_chip():
    """Conservative TC-per-chip detection (defaults to 1 = no forced split)."""
    try:
        kind = jax.devices()[0].device_kind.lower()
    except Exception:
        return 1
    if any(tag in kind for tag in ("v7", "v4", "v5p")):   # megacore / 2 TCs
        return 2
    return 1                                              # v5e / v6e: 1 TC


def _round8(n):
    return max(8, ((n + 7) // 8) * 8)


def _grid_plan(n):
    """Pick (tile, n_pad).  1 TC: single large tile.  2 TCs: even step count."""
    cores = _tensorcores_per_chip()
    n8 = _round8(n)
    if cores <= 1:
        tile = min(MAX_TILE, n8)
        n_pad = pl.cdiv(n8, tile) * tile
    else:
        tile = min(MAX_TILE, _round8(pl.cdiv(n8, cores)))
        step = cores * tile
        n_pad = pl.cdiv(n8, step) * step                  # even number of grid steps
    return tile, n_pad


def run_mlp(condition_code, h_enc, params):
    """condition_code: [N, 69] f32, h_enc: [N, 16] f32, params: 7 (W, b) pairs (f32)."""
    n = condition_code.shape[0]
    assert condition_code.shape[1] == CONDITION_CODE_SIZE
    assert h_enc.shape == (n, ENC_OUT_DIM)

    tile, n_pad = _grid_plan(n)

    # bf16 streaming inputs (hidden matmuls are bf16 LHS anyway; f32 accumulation).
    cond = condition_code.astype(jnp.bfloat16)
    enc = h_enc.astype(jnp.bfloat16)
    if n_pad != n:
        cond = jnp.pad(cond, ((0, n_pad - n), (0, 0)))
        enc = jnp.pad(enc, ((0, n_pad - n), (0, 0)))

    # split W0 to match torch.cat([condition_code, h_enc], -1) ordering
    (w0, b0) = params[0]
    w0c = w0[:CONDITION_CODE_SIZE].astype(jnp.bfloat16)   # [69, 128]
    w0e = w0[CONDITION_CODE_SIZE:].astype(jnp.bfloat16)   # [16, 128]

    flat = [w0c, w0e, b0]
    in_specs = [
        pl.BlockSpec((tile, CONDITION_CODE_SIZE), lambda i: (i, 0)),
        pl.BlockSpec((tile, ENC_OUT_DIM), lambda i: (i, 0)),
        pl.BlockSpec(w0c.shape, lambda i: (0, 0)),
        pl.BlockSpec(w0e.shape, lambda i: (0, 0)),
        pl.BlockSpec(b0.shape, lambda i: (0, 0)),
    ]
    for li in range(1, N_LINEAR):
        w, b = params[li]
        if li < N_LINEAR - 1:
            w = w.astype(jnp.bfloat16)                    # bf16 weights, f32 acc
        # final 128->3 layer stays f32 (1e-5 magnitude weights)
        in_specs.append(pl.BlockSpec(w.shape, lambda i: (0, 0)))
        in_specs.append(pl.BlockSpec(b.shape, lambda i: (0, 0)))
        flat += [w, b]

    out = pl.pallas_call(
        mlp_kernel,
        out_shape=jax.ShapeDtypeStruct((n_pad, OUT_DIM), jnp.float32),
        grid=(n_pad // tile,),
        in_specs=in_specs,
        # lane-sparse (tile, 3) output kept: store path is negligible here.
        out_specs=pl.BlockSpec((tile, OUT_DIM), lambda i: (i, 0)),
        compiler_params=pltpu.CompilerParams(
            dimension_semantics=("parallel",),            # shards row steps across 2-TC parts
            vmem_limit_bytes=VMEM_LIMIT_BYTES,
        ),
    )(cond, enc, *flat)
    return out[:n]


# ----------------------------- parameter creation ----------------------------
def init_params(key):
    params = []
    dims = [IN_DIM] + [MLP_WIDTH] * MLP_DEPTH + [OUT_DIM]
    keys = jax.random.split(key, 2 * N_LINEAR + 1)
    for li in range(N_LINEAR):
        fan_in, fan_out = dims[li], dims[li + 1]
        kw, kb = keys[2 * li], keys[2 * li + 1]
        if li == N_LINEAR - 1:
            # last layer: uniform(-1e-5, 1e-5) weights, zero bias (as in __init__)
            w = jax.random.uniform(kw, (fan_in, fan_out), jnp.float32, -1e-5, 1e-5)
            b = jnp.zeros((1, fan_out), jnp.float32)
        else:
            lim = float(np.sqrt(6.0 / (fan_in + fan_out)))   # xavier-uniform style (initseq)
            w = jax.random.uniform(kw, (fan_in, fan_out), jnp.float32, -lim, lim)
            b = jax.random.uniform(kb, (1, fan_out), jnp.float32, -0.01, 0.01)
        params.append((w, b))
    # hash-table embeddings: uniform(-1e-4, 1e-4) like torch-ngp, stored bf16
    emb = jax.random.uniform(keys[-1], (TOTAL_HASH_PARAMS, LEVEL_DIM),
                             jnp.float32, -1e-4, 1e-4).astype(jnp.bfloat16)
    return params, emb


def non_rigid_motion_mlp_forward(xyz, condition_code, params, embeddings):
    h_enc = hash_grid_encode(xyz.reshape(-1, 3), embeddings, bound=BOUND)   # [N, 16]
    # cat([condition_code, h_enc]) is implemented inside the kernel via the
    # W0 split, so no concatenated [N, 85] tensor is ever materialized.
    return run_mlp(condition_code, h_enc, params)                           # [N, 3]


# ------------------------------------ main ------------------------------------
if __name__ == "__main__":
    key = jax.random.PRNGKey(0)
    k_param, k_xyz, k_cond = jax.random.split(key, 3)

    N = 1000   # non-multiple of the tile to exercise the row-padding path
    xyz = jax.random.uniform(k_xyz, (N, 3), jnp.float32, -1.0, 1.0)
    condition_code = jax.random.normal(k_cond, (N, CONDITION_CODE_SIZE), jnp.float32) * 0.1

    params, embeddings = init_params(k_param)

    fwd = jax.jit(non_rigid_motion_mlp_forward)
    out = fwd(xyz, condition_code, params, embeddings)
    out = jax.block_until_ready(out)
    assert out.shape == (N, OUT_DIM) and out.dtype == jnp.float32
    assert bool(jnp.all(jnp.isfinite(out)))
    print("KERNEL_OK")
</pallas_src>

<mosaic_0001>
module attributes {stable_mosaic.version = 11 : i64} {
  func.func @mlp_kernel(%arg0: i32, %arg1: memref<1000x69xbf16, #tpu.memory_space<vmem>>, %arg2: memref<1000x16xbf16, #tpu.memory_space<vmem>>, %arg3: memref<69x128xbf16, #tpu.memory_space<vmem>>, %arg4: memref<16x128xbf16, #tpu.memory_space<vmem>>, %arg5: memref<1x128xf32, #tpu.memory_space<vmem>>, %arg6: memref<128x128xbf16, #tpu.memory_space<vmem>>, %arg7: memref<1x128xf32, #tpu.memory_space<vmem>>, %arg8: memref<128x128xbf16, #tpu.memory_space<vmem>>, %arg9: memref<1x128xf32, #tpu.memory_space<vmem>>, %arg10: memref<128x128xbf16, #tpu.memory_space<vmem>>, %arg11: memref<1x128xf32, #tpu.memory_space<vmem>>, %arg12: memref<128x128xbf16, #tpu.memory_space<vmem>>, %arg13: memref<1x128xf32, #tpu.memory_space<vmem>>, %arg14: memref<128x128xbf16, #tpu.memory_space<vmem>>, %arg15: memref<1x128xf32, #tpu.memory_space<vmem>>, %arg16: memref<128x3xf32, #tpu.memory_space<vmem>>, %arg17: memref<1x3xf32, #tpu.memory_space<vmem>>, %arg18: memref<1000x3xf32, #tpu.memory_space<vmem>>) attributes {dimension_semantics = [#tpu.dimension_semantics<parallel>], iteration_bounds = array<i64: 1>, scalar_prefetch = 0 : i64, scratch_operands = 0 : i64, tpu.core_type = #tpu.core_type<tc>, window_params = [{transform_indices = @transform_0, window_bounds = array<i64: 1000, 69>}, {transform_indices = @transform_1, window_bounds = array<i64: 1000, 16>}, {pipeline_mode = #tpu.pipeline_mode<synchronous>, transform_indices = @transform_2, window_bounds = array<i64: 69, 128>}, {pipeline_mode = #tpu.pipeline_mode<synchronous>, transform_indices = @transform_3, window_bounds = array<i64: 16, 128>}, {pipeline_mode = #tpu.pipeline_mode<synchronous>, transform_indices = @transform_4, window_bounds = array<i64: 1, 128>}, {pipeline_mode = #tpu.pipeline_mode<synchronous>, transform_indices = @transform_5, window_bounds = array<i64: 128, 128>}, {pipeline_mode = #tpu.pipeline_mode<synchronous>, transform_indices = @transform_6, window_bounds = array<i64: 1, 128>}, {pipeline_mode = #tpu.pipeline_mode<synchronous>, transform_indices = @transform_7, window_bounds = array<i64: 128, 128>}, {pipeline_mode = #tpu.pipeline_mode<synchronous>, transform_indices = @transform_8, window_bounds = array<i64: 1, 128>}, {pipeline_mode = #tpu.pipeline_mode<synchronous>, transform_indices = @transform_9, window_bounds = array<i64: 128, 128>}, {pipeline_mode = #tpu.pipeline_mode<synchronous>, transform_indices = @transform_10, window_bounds = array<i64: 1, 128>}, {pipeline_mode = #tpu.pipeline_mode<synchronous>, transform_indices = @transform_11, window_bounds = array<i64: 128, 128>}, {pipeline_mode = #tpu.pipeline_mode<synchronous>, transform_indices = @transform_12, window_bounds = array<i64: 1, 128>}, {pipeline_mode = #tpu.pipeline_mode<synchronous>, transform_indices = @transform_13, window_bounds = array<i64: 128, 128>}, {pipeline_mode = #tpu.pipeline_mode<synchronous>, transform_indices = @transform_14, window_bounds = array<i64: 1, 128>}, {pipeline_mode = #tpu.pipeline_mode<synchronous>, transform_indices = @transform_15, window_bounds = array<i64: 128, 3>}, {pipeline_mode = #tpu.pipeline_mode<synchronous>, transform_indices = @transform_16, window_bounds = array<i64: 1, 3>}, {transform_indices = @transform_17, window_bounds = array<i64: 1000, 3>}]} {
    %c0 = arith.constant 0 : index
    %c0_0 = arith.constant 0 : index
    %0 = vector.load %arg3[%c0, %c0_0] : memref<69x128xbf16, #tpu.memory_space<vmem>>, vector<69x128xbf16>
    %c0_1 = arith.constant 0 : index
    %c0_2 = arith.constant 0 : index
    %1 = vector.load %arg4[%c0_1, %c0_2] : memref<16x128xbf16, #tpu.memory_space<vmem>>, vector<16x128xbf16>
    %c0_3 = arith.constant 0 : index
    %c0_4 = arith.constant 0 : index
    %2 = vector.load %arg5[%c0_3, %c0_4] : memref<1x128xf32, #tpu.memory_space<vmem>>, vector<1x128xf32>
    %c0_5 = arith.constant 0 : index
    %c0_6 = arith.constant 0 : index
    %3 = vector.load %arg1[%c0_5, %c0_6] : memref<1000x69xbf16, #tpu.memory_space<vmem>>, vector<1000x69xbf16>
    %cst = arith.constant dense<0.000000e+00> : vector<1000x128xf32>
    %4 = tpu.matmul %3, %0, %cst {dimension_numbers = #tpu.dot_dimension_numbers<[1], [0], [0], [1], [0, 0, 1, 1], [], []>} : vector<1000x69xbf16>, vector<69x128xbf16>, vector<1000x128xf32> -> vector<1000x128xf32>
    %c0_7 = arith.constant 0 : index
    %c0_8 = arith.constant 0 : index
    %5 = vector.load %arg2[%c0_7, %c0_8] : memref<1000x16xbf16, #tpu.memory_space<vmem>>, vector<1000x16xbf16>
    %cst_9 = arith.constant dense<0.000000e+00> : vector<1000x128xf32>
    %6 = tpu.matmul %5, %1, %cst_9 {dimension_numbers = #tpu.dot_dimension_numbers<[1], [0], [0], [1], [0, 0, 1, 1], [], []>} : vector<1000x16xbf16>, vector<16x128xbf16>, vector<1000x128xf32> -> vector<1000x128xf32>
    %7 = arith.addf %4, %6 : vector<1000x128xf32>
    %8 = vector.broadcast %2 : vector<1x128xf32> to vector<1000x128xf32>
    %9 = arith.addf %7, %8 : vector<1000x128xf32>
    %cst_10 = arith.constant 0.000000e+00 : f32
    %10 = vector.broadcast %cst_10 : f32 to vector<1000x128xf32>
    %11 = arith.maximumf %9, %10 : vector<1000x128xf32>
    %c0_11 = arith.constant 0 : index
    %c0_12 = arith.constant 0 : index
    %12 = vector.load %arg6[%c0_11, %c0_12] : memref<128x128xbf16, #tpu.memory_space<vmem>>, vector<128x128xbf16>
    %c0_13 = arith.constant 0 : index
    %c0_14 = arith.constant 0 : index
    %13 = vector.load %arg7[%c0_13, %c0_14] : memref<1x128xf32, #tpu.memory_space<vmem>>, vector<1x128xf32>
    %14 = arith.truncf %11 : vector<1000x128xf32> to vector<1000x128xbf16>
    %cst_15 = arith.constant dense<0.000000e+00> : vector<1000x128xf32>
    %15 = tpu.matmul %14, %12, %cst_15 {dimension_numbers = #tpu.dot_dimension_numbers<[1], [0], [0], [1], [0, 0, 1, 1], [], []>} : vector<1000x128xbf16>, vector<128x128xbf16>, vector<1000x128xf32> -> vector<1000x128xf32>
    %16 = vector.broadcast %13 : vector<1x128xf32> to vector<1000x128xf32>
    %17 = arith.addf %15, %16 : vector<1000x128xf32>
    %cst_16 = arith.constant 0.000000e+00 : f32
    %18 = vector.broadcast %cst_16 : f32 to vector<1000x128xf32>
    %19 = arith.maximumf %17, %18 : vector<1000x128xf32>
    %c0_17 = arith.constant 0 : index
    %c0_18 = arith.constant 0 : index
    %20 = vector.load %arg8[%c0_17, %c0_18] : memref<128x128xbf16, #tpu.memory_space<vmem>>, vector<128x128xbf16>
    %c0_19 = arith.constant 0 : index
    %c0_20 = arith.constant 0 : index
    %21 = vector.load %arg9[%c0_19, %c0_20] : memref<1x128xf32, #tpu.memory_space<vmem>>, vector<1x128xf32>
    %22 = arith.truncf %19 : vector<1000x128xf32> to vector<1000x128xbf16>
    %cst_21 = arith.constant dense<0.000000e+00> : vector<1000x128xf32>
    %23 = tpu.matmul %22, %20, %cst_21 {dimension_numbers = #tpu.dot_dimension_numbers<[1], [0], [0], [1], [0, 0, 1, 1], [], []>} : vector<1000x128xbf16>, vector<128x128xbf16>, vector<1000x128xf32> -> vector<1000x128xf32>
    %24 = vector.broadcast %21 : vector<1x128xf32> to vector<1000x128xf32>
    %25 = arith.addf %23, %24 : vector<1000x128xf32>
    %cst_22 = arith.constant 0.000000e+00 : f32
    %26 = vector.broadcast %cst_22 : f32 to vector<1000x128xf32>
    %27 = arith.maximumf %25, %26 : vector<1000x128xf32>
    %c0_23 = arith.constant 0 : index
    %c0_24 = arith.constant 0 : index
    %28 = vector.load %arg10[%c0_23, %c0_24] : memref<128x128xbf16, #tpu.memory_space<vmem>>, vector<128x128xbf16>
    %c0_25 = arith.constant 0 : index
    %c0_26 = arith.constant 0 : index
    %29 = vector.load %arg11[%c0_25, %c0_26] : memref<1x128xf32, #tpu.memory_space<vmem>>, vector<1x128xf32>
    %30 = arith.truncf %27 : vector<1000x128xf32> to vector<1000x128xbf16>
    %cst_27 = arith.constant dense<0.000000e+00> : vector<1000x128xf32>
    %31 = tpu.matmul %30, %28, %cst_27 {dimension_numbers = #tpu.dot_dimension_numbers<[1], [0], [0], [1], [0, 0, 1, 1], [], []>} : vector<1000x128xbf16>, vector<128x128xbf16>, vector<1000x128xf32> -> vector<1000x128xf32>
    %32 = vector.broadcast %29 : vector<1x128xf32> to vector<1000x128xf32>
    %33 = arith.addf %31, %32 : vector<1000x128xf32>
    %cst_28 = arith.constant 0.000000e+00 : f32
    %34 = vector.broadcast %cst_28 : f32 to vector<1000x128xf32>
    %35 = arith.maximumf %33, %34 : vector<1000x128xf32>
    %c0_29 = arith.constant 0 : index
    %c0_30 = arith.constant 0 : index
    %36 = vector.load %arg12[%c0_29, %c0_30] : memref<128x128xbf16, #tpu.memory_space<vmem>>, vector<128x128xbf16>
    %c0_31 = arith.constant 0 : index
    %c0_32 = arith.constant 0 : index
    %37 = vector.load %arg13[%c0_31, %c0_32] : memref<1x128xf32, #tpu.memory_space<vmem>>, vector<1x128xf32>
    %38 = arith.truncf %35 : vector<1000x128xf32> to vector<1000x128xbf16>
    %cst_33 = arith.constant dense<0.000000e+00> : vector<1000x128xf32>
    %39 = tpu.matmul %38, %36, %cst_33 {dimension_numbers = #tpu.dot_dimension_numbers<[1], [0], [0], [1], [0, 0, 1, 1], [], []>} : vector<1000x128xbf16>, vector<128x128xbf16>, vector<1000x128xf32> -> vector<1000x128xf32>
    %40 = vector.broadcast %37 : vector<1x128xf32> to vector<1000x128xf32>
    %41 = arith.addf %39, %40 : vector<1000x128xf32>
    %cst_34 = arith.constant 0.000000e+00 : f32
    %42 = vector.broadcast %cst_34 : f32 to vector<1000x128xf32>
    %43 = arith.maximumf %41, %42 : vector<1000x128xf32>
    %c0_35 = arith.constant 0 : index
    %c0_36 = arith.constant 0 : index
    %44 = vector.load %arg14[%c0_35, %c0_36] : memref<128x128xbf16, #tpu.memory_space<vmem>>, vector<128x128xbf16>
    %c0_37 = arith.constant 0 : index
    %c0_38 = arith.constant 0 : index
    %45 = vector.load %arg15[%c0_37, %c0_38] : memref<1x128xf32, #tpu.memory_space<vmem>>, vector<1x128xf32>
    %46 = arith.truncf %43 : vector<1000x128xf32> to vector<1000x128xbf16>
    %cst_39 = arith.constant dense<0.000000e+00> : vector<1000x128xf32>
    %47 = tpu.matmul %46, %44, %cst_39 {dimension_numbers = #tpu.dot_dimension_numbers<[1], [0], [0], [1], [0, 0, 1, 1], [], []>} : vector<1000x128xbf16>, vector<128x128xbf16>, vector<1000x128xf32> -> vector<1000x128xf32>
    %48 = vector.broadcast %45 : vector<1x128xf32> to vector<1000x128xf32>
    %49 = arith.addf %47, %48 : vector<1000x128xf32>
    %cst_40 = arith.constant 0.000000e+00 : f32
    %50 = vector.broadcast %cst_40 : f32 to vector<1000x128xf32>
    %51 = arith.maximumf %49, %50 : vector<1000x128xf32>
    %c0_41 = arith.constant 0 : index
    %c0_42 = arith.constant 0 : index
    %52 = vector.load %arg16[%c0_41, %c0_42] : memref<128x3xf32, #tpu.memory_space<vmem>>, vector<128x3xf32>
    %c0_43 = arith.constant 0 : index
    %c0_44 = arith.constant 0 : index
    %53 = vector.load %arg17[%c0_43, %c0_44] : memref<1x3xf32, #tpu.memory_space<vmem>>, vector<1x3xf32>
    %cst_45 = arith.constant dense<0.000000e+00> : vector<1000x3xf32>
    %54 = tpu.matmul %51, %52, %cst_45 {dimension_numbers = #tpu.dot_dimension_numbers<[1], [0], [0], [1], [0, 0, 1, 1], [], []>} : vector<1000x128xf32>, vector<128x3xf32>, vector<1000x3xf32> -> vector<1000x3xf32>
    %55 = vector.broadcast %53 : vector<1x3xf32> to vector<1000x3xf32>
    %56 = arith.addf %54, %55 : vector<1000x3xf32>
    %c0_46 = arith.constant 0 : index
    %c0_47 = arith.constant 0 : index
    %57 = vector.load %arg18[%c0_46, %c0_47] : memref<1000x3xf32, #tpu.memory_space<vmem>>, vector<1000x3xf32>
    tpu.vector_store %arg18[%c0_46, %c0_47], %56 {strides = array<i32>} : memref<1000x3xf32, #tpu.memory_space<vmem>>, vector<1000x3xf32>,
    return
  }
  func.func @transform_0(%arg0: i32) -> (i32, i32) {
    %c0_i32 = arith.constant 0 : i32
    %c0_i32_0 = arith.constant 0 : i32
    return %arg0, %c0_i32 : i32, i32
  }
  func.func @transform_1(%arg0: i32) -> (i32, i32) {
    %c0_i32 = arith.constant 0 : i32
    %c0_i32_0 = arith.constant 0 : i32
    return %arg0, %c0_i32 : i32, i32
  }
  func.func @transform_2(%arg0: i32) -> (i32, i32) {
    %c0_i32 = arith.constant 0 : i32
    %c0_i32_0 = arith.constant 0 : i32
    %c0_i32_1 = arith.constant 0 : i32
    return %c0_i32, %c0_i32_0 : i32, i32
  }
  func.func @transform_3(%arg0: i32) -> (i32, i32) {
    %c0_i32 = arith.constant 0 : i32
    %c0_i32_0 = arith.constant 0 : i32
    %c0_i32_1 = arith.constant 0 : i32
    return %c0_i32, %c0_i32_0 : i32, i32
  }
  func.func @transform_4(%arg0: i32) -> (i32, i32) {
    %c0_i32 = arith.constant 0 : i32
    %c0_i32_0 = arith.constant 0 : i32
    %c0_i32_1 = arith.constant 0 : i32
    return %c0_i32, %c0_i32_0 : i32, i32
  }
  func.func @transform_5(%arg0: i32) -> (i32, i32) {
    %c0_i32 = arith.constant 0 : i32
    %c0_i32_0 = arith.constant 0 : i32
    %c0_i32_1 = arith.constant 0 : i32
    return %c0_i32, %c0_i32_0 : i32, i32
  }
  func.func @transform_6(%arg0: i32) -> (i32, i32) {
    %c0_i32 = arith.constant 0 : i32
    %c0_i32_0 = arith.constant 0 : i32
    %c0_i32_1 = arith.constant 0 : i32
    return %c0_i32, %c0_i32_0 : i32, i32
  }
  func.func @transform_7(%arg0: i32) -> (i32, i32) {
    %c0_i32 = arith.constant 0 : i32
    %c0_i32_0 = arith.constant 0 : i32
    %c0_i32_1 = arith.constant 0 : i32
    return %c0_i32, %c0_i32_0 : i32, i32
  }
  func.func @transform_8(%arg0: i32) -> (i32, i32) {
    %c0_i32 = arith.constant 0 : i32
    %c0_i32_0 = arith.constant 0 : i32
    %c0_i32_1 = arith.constant 0 : i32
    return %c0_i32, %c0_i32_0 : i32, i32
  }
  func.func @transform_9(%arg0: i32) -> (i32, i32) {
    %c0_i32 = arith.constant 0 : i32
    %c0_i32_0 = arith.constant 0 : i32
    %c0_i32_1 = arith.constant 0 : i32
    return %c0_i32, %c0_i32_0 : i32, i32
  }
  func.func @transform_10(%arg0: i32) -> (i32, i32) {
    %c0_i32 = arith.constant 0 : i32
    %c0_i32_0 = arith.constant 0 : i32
    %c0_i32_1 = arith.constant 0 : i32
    return %c0_i32, %c0_i32_0 : i32, i32
  }
  func.func @transform_11(%arg0: i32) -> (i32, i32) {
    %c0_i32 = arith.constant 0 : i32
    %c0_i32_0 = arith.constant 0 : i32
    %c0_i32_1 = arith.constant 0 : i32
    return %c0_i32, %c0_i32_0 : i32, i32
  }
  func.func @transform_12(%arg0: i32) -> (i32, i32) {
    %c0_i32 = arith.constant 0 : i32
    %c0_i32_0 = arith.constant 0 : i32
    %c0_i32_1 = arith.constant 0 : i32
    return %c0_i32, %c0_i32_0 : i32, i32
  }
  func.func @transform_13(%arg0: i32) -> (i32, i32) {
    %c0_i32 = arith.constant 0 : i32
    %c0_i32_0 = arith.constant 0 : i32
    %c0_i32_1 = arith.constant 0 : i32
    return %c0_i32, %c0_i32_0 : i32, i32
  }
  func.func @transform_14(%arg0: i32) -> (i32, i32) {
    %c0_i32 = arith.constant 0 : i32
    %c0_i32_0 = arith.constant 0 : i32
    %c0_i32_1 = arith.constant 0 : i32
    return %c0_i32, %c0_i32_0 : i32, i32
  }
  func.func @transform_15(%arg0: i32) -> (i32, i32) {
    %c0_i32 = arith.constant 0 : i32
    %c0_i32_0 = arith.constant 0 : i32
    %c0_i32_1 = arith.constant 0 : i32
    return %c0_i32, %c0_i32_0 : i32, i32
  }
  func.func @transform_16(%arg0: i32) -> (i32, i32) {
    %c0_i32 = arith.constant 0 : i32
    %c0_i32_0 = arith.constant 0 : i32
    %c0_i32_1 = arith.constant 0 : i32
    return %c0_i32, %c0_i32_0 : i32, i32
  }
  func.func @transform_17(%arg0: i32) -> (i32, i32) {
    %c0_i32 = arith.constant 0 : i32
    %c0_i32_0 = arith.constant 0 : i32
    return %arg0, %c0_i32 : i32, i32
  }
}

</mosaic_0001>

<bundles_post_ra>
// kernel: non_rigid_motion_mlp_forward.1
= control target key start
LH: loop header
LB: loop body
LE: loop exit
PB: predicated region body
PF: predicated region fallthrough
CT: control target
= control target key end

     0   :  { %vm1894_vm0 = vcmask 1041408   ;;  %vm1895_vm1 = vcmask 1042432   ;;  %v10939_v0 = vmov 0.0   ;;  %vm10940_vm2 = vmmov 0   ;;  %s15030_s3 = inlined_call_operand.vmem [shape: bf16[16,128], index: 3, kind: input, shape index: {}]   ;;  %s15031_s2 = inlined_call_operand.vmem [shape: bf16[69,128], index: 2, kind: input, shape index: {}]   ;;  %s15032_s1 = inlined_call_operand.vmem [shape: bf16[1000,16], index: 1, kind: input, shape index: {}]   ;;  %s15033_s5 = inlined_call_operand.vmem [shape: bf16[128,128], index: 5, kind: input, shape index: {}]   ;;  %s15034_s0 = inlined_call_operand.vmem [shape: bf16[1000,69], index: 0, kind: input, shape index: {}]   ;;  %s15035_s7 = inlined_call_operand.vmem [shape: bf16[128,128], index: 7, kind: input, shape index: {}]   ;;  %s15036_s4 = inlined_call_operand.vmem [shape: f32[1,128], index: 4, kind: input, shape index: {}]   ;;  %s15037_s9 = inlined_call_operand.vmem [shape: bf16[128,128], index: 9, kind: input, shape index: {}]   ;;  %s15038_s11 = inlined_call_operand.vmem [shape: bf16[128,128], index: 11, kind: input, shape index: {}]   ;;  %s15039_s6 = inlined_call_operand.vmem [shape: f32[1,128], index: 6, kind: input, shape index: {}]   ;;  %s15040_s13 = inlined_call_operand.vmem [shape: bf16[128,128], index: 13, kind: input, shape index: {}]   ;;  %s15041_s8 = inlined_call_operand.vmem [shape: f32[1,128], index: 8, kind: input, shape index: {}]   ;;  %s15042_s10 = inlined_call_operand.vmem [shape: f32[1,128], index: 10, kind: input, shape index: {}]   ;;  %s15043_s15 = inlined_call_operand.vmem [shape: f32[128,3], index: 15, kind: input, shape index: {}]   ;;  %s15044_s12 = inlined_call_operand.vmem [shape: f32[1,128], index: 12, kind: input, shape index: {}]   ;;  %s15045_s14 = inlined_call_operand.vmem [shape: f32[1,128], index: 14, kind: input, shape index: {}]   ;;  %s15046_s16 = inlined_call_operand.vmem [shape: f32[1,3], index: 16, kind: input, shape index: {}]   ;;  %s15047_s17 = inlined_call_operand.vmem [shape: f32[1000,3], index: 17, kind: output, shape index: {}]  }
   0x1   :  { %15049 = sst [smem:[#allocation2_spill]] %s15030_s3  ;;  %8444 = vmatprep.subr.bf16.mxu0 %v10939_v0  ;;  %8698 = vmatprep.subr.bf16.mxu1 %v10939_v0  ;;  %v10941_v3 = vmov 65535   ;;  %v10744_v6 = vld [vmem:[%s15032_s1] sm:$0xff]   ;;  %vm638_vm3 = vcmask 130048   ;;  %v10745_v8 = vld [vmem:[%s15033_s5 + $0x38] sm:$0xff]   ;;  %v10748_v11 = vld [vmem:[%s15032_s1 + $0x8] sm:$0xff]  }
   0x2   :  { %15050 = sst [smem:[#allocation3_spill]] %s15031_s2  ;;  %8446 = vmatprep.mubr.msk.bf16.mxu0 %vm10940_vm2, %v10939_v0  ;;  %v1896_v4 = vsel %vm1894_vm0, 4294967295, %v10941_v3  ;;  %8708 = vmatprep.mubr.msk.bf16.mxu1 %vm10940_vm2, %v10939_v0  ;;  %v10751_v14 = vld [vmem:[%s15032_s1 + $0x10] sm:$0xff]   ;;  %v10752_v15 = vld [vmem:[%s15034_s0] sm:$0xff]   ;;  %vm1704_vm4 = vcmask 564224   ;;  %v10753_v17 = vld [vmem:[%s15032_s1 + $0x18] sm:$0xff]  }
   0x3   :  { %s15051_s26 = sld [smem:[#allocation2_spill]]  ;;  %v1897_v5 = vsel %vm1895_vm1, %v1896_v4, 0  ;;  %v10764_v16 = vld [vmem:[%s15033_s5 + $0x30] sm:$0xff]   ;;  %v10754_v18 = vld [vmem:[%s15034_s0 + $0x8] sm:$0xff]   ;;  %v10755_v19 = vld [vmem:[%s15032_s1 + $0x20] sm:$0xff]   ;;  %vm7381_vm5 = vcmask 23552  }
   0x4   :  { %s15052_s29 = sld [smem:[#allocation3_spill]]  ;;  %v10756_v20 = vld [vmem:[%s15034_s0 + $0x10] sm:$0xff]   ;;  %v10780_v21 = vld [vmem:[%s15033_s5 + $0x28] sm:$0xff]   ;;  %v10758_v23 = vld [vmem:[%s15034_s0 + $0x18] sm:$0xff]  }
   0x5   :  { %v10757_v22 = vld [vmem:[%s15032_s1 + $0x28] sm:$0xff]   ;;  %v10759_v24 = vld [vmem:[%s15032_s1 + $0x30] sm:$0xff]   ;;  %v10760_v25 = vld [vmem:[%s15034_s0 + $0x20] sm:$0xff]  }
   0x6   :  { %v10761_v26 = vld [vmem:[%s15032_s1 + $0x38] sm:$0xff]   ;;  %v10762_v27 = vld [vmem:[%s15034_s0 + $0x28] sm:$0xff]   ;;  %v10763_v28 = vld [vmem:[%s15032_s1 + $0x40] sm:$0xff]  }
   0x7   :  { %v10797_v29 = vld [vmem:[%s15033_s5 + $0x20] sm:$0xff]   ;;  %v10765_v30 = vld [vmem:[%s15034_s0 + $0x30] sm:$0xff]   ;;  %v10766_v31 = vld [vmem:[%s15032_s1 + $0x48] sm:$0xff]  }
   0x8   :  { %v10767_v32 = vld [vmem:[%s15034_s0 + $0x38] sm:$0xff]   ;;  %v10768_v33 = vld [vmem:[%s15032_s1 + $0x50] sm:$0xff]   ;;  %v10769_v35 = vld [vmem:[%s15034_s0 + $0x40] sm:$0xff]  }
   0x9   :  { %v10742_v1 = vld [vmem:[%s15051_s26] sm:$0xff]   ;;  %v10802_v34 = vld [vmem:[%s15035_s7 + $0x38] sm:$0xff]   ;;  %v10771_v37 = vld [vmem:[%s15034_s0 + $0x48] sm:$0xff]  }
   0xa   :  { %v10743_v2 = vld [vmem:[%s15052_s29 + $0x20] ss:$0 sps:$4 sm:$0x77]   ;;  %8445 = vmatpush3.bf16.msra.mxu0 %v10742_v1  ;;  %v10746_v9 = vld [vmem:[%s15052_s29 + $0x18] sm:$0xff]   ;;  %v10747_v10 = vld [vmem:[%s15052_s29 + $0x10] sm:$0xff]  }
   0xb   :  { %v1899_v7 = vand.u32 %v10743_v2, %v1897_v5  ;;  %8960 = vmatprep.subr.bf16.mxu0 %v10939_v0  ;;  %v10749_v12 = vld [vmem:[%s15052_s29 + $0x8] sm:$0xff]   ;;  %v10750_v13 = vld [vmem:[%s15052_s29] sm:$0xff]   ;;  %v10770_v36 = vld [vmem:[%s15032_s1 + $0x58] sm:$0xff]  }
   0xc   :  { %v10772_v38 = vld [vmem:[%s15032_s1 + $0x60] sm:$0xff]   ;;  %v10773_v39 = vld [vmem:[%s15034_s0 + $0x50] sm:$0xff]   ;;  %v10774_v40 = vld [vmem:[%s15032_s1 + $0x68] sm:$0xff]  }
   0xd   :  { %8699 = vmatpush3.bf16.msra.mxu1 %v1899_v7  ;;  %8447 = vmatmul.mubr.msk.bf16.vlgmr.msra.gmra.mxu0 %vm638_vm3, %v10744_v6  ;;  %v10775_v41 = vld [vmem:[%s15034_s0 + $0x58] sm:$0xff]   ;;  %v10776_v42 = vld [vmem:[%s15032_s1 + $0x70] sm:$0xff]   ;;  %v10777_v43 = vld [vmem:[%s15034_s0 + $0x60] sm:$0xff]  }
   0xe   :  { %8961 = vmatpush3.bf16.msra.mxu0 %v10745_v8  ;;  %8700 = vmatprep.subr.bf16.mxu1 %v10939_v0  ;;  %v10778_v44 = vld [vmem:[%s15032_s1 + $0x78] sm:$0xff]   ;;  %v10779_v45 = vld [vmem:[%s15034_s0 + $0x68] sm:$0xff]   ;;  %v10781_v46 = vld [vmem:[%s15032_s1 + $0x80] sm:$0xff]  }
   0xf   :  { %8450 = vmatprep.mubr.msk.bf16.mxu0 %vm10940_vm2, %v10939_v0  ;;  %8962 = vmatprep.subr.bf16.mxu0 %v10939_v0  ;;  %v10782_v47 = vld [vmem:[%s15034_s0 + $0x70] sm:$0xff]   ;;  %v10815_v48 = vld [vmem:[%s15033_s5 + $0x18] sm:$0xff]   ;;  %v10783_v49 = vld [vmem:[%s15032_s1 + $0x88] sm:$0xff]  }
  0x10   :  { %v10784_v50 = vld [vmem:[%s15034_s0 + $0x78] sm:$0xff]   ;;  %v10785_v51 = vld [vmem:[%s15032_s1 + $0x90] sm:$0xff]   ;;  %v10786_v52 = vld [vmem:[%s15034_s0 + $0x80] sm:$0xff]  }
  0x11   :  { %8701 = vmatpush3.bf16.msra.mxu1 %v10746_v9  ;;  %v10820_v53 = vld [vmem:[%s15035_s7 + $0x30] sm:$0xff]   ;;  %v10787_v54 = vld [vmem:[%s15032_s1 + $0x98] sm:$0xff]   ;;  %v10788_v55 = vld [vmem:[%s15034_s0 + $0x88] sm:$0xff]  }
  0x12   :  { %8702 = vmatprep.subr.bf16.mxu1 %v10939_v0  ;;  %8963 = vmatpush3.bf16.msra.mxu0 %v10764_v16  ;;  %v10789_v56 = vld [vmem:[%s15032_s1 + $0xa0] sm:$0xff]   ;;  %v10790_v57 = vld [vmem:[%s15034_s0 + $0x90] sm:$0xff]   ;;  %v10791_v58 = vld [vmem:[%s15032_s1 + $0xa8] sm:$0xff]  }
  0x13   :  { %8964 = vmatprep.subr.bf16.mxu0 %v10939_v0  ;;  %v10792_v59 = vld [vmem:[%s15034_s0 + $0x98] sm:$0xff]   ;;  %v10793_v60 = vld [vmem:[%s15032_s1 + $0xb0] sm:$0xff]   ;;  %v10794_v61 = vld [vmem:[%s15034_s0 + $0xa0] sm:$0xff]  }
  0x14   :  { %v10795_v62 = vld [vmem:[%s15032_s1 + $0xb8] sm:$0xff]   ;;  %v10796_v63 = vld [vmem:[%s15034_s0 + $0xa8] sm:$0xff]   ;;  %v10798_v1 = vld [vmem:[%s15032_s1 + $0xc0] sm:$0xff]  }
  0x15   :  { %8703 = vmatpush3.bf16.msra.mxu1 %v10747_v10  ;;  %8451 = vmatmul.mubr.msk.bf16.gmra.mxu0 %vm638_vm3, %v10748_v11  ;;  %v10799_v2 = vld [vmem:[%s15034_s0 + $0xb0] sm:$0xff]   ;;  %v10800_v7 = vld [vmem:[%s15032_s1 + $0xc8] sm:$0xff]   ;;  %v10801_v9 = vld [vmem:[%s15034_s0 + $0xb8] sm:$0xff]  }
  0x16   :  { %8704 = vmatprep.subr.bf16.mxu1 %v10939_v0  ;;  %8454 = vmatprep.mubr.msk.bf16.mxu0 %vm10940_vm2, %v10939_v0  ;;  %v10833_v4 = vld [vmem:[%s15033_s5 + $0x10] sm:$0xff]  }
  0x17   :  { %8965 = vmatpush3.bf16.msra.mxu0 %v10780_v21 }
  0x18   :  { %8966 = vmatprep.subr.bf16.mxu0 %v10939_v0 }
  0x19   :  { %8705 = vmatpush3.bf16.msra.mxu1 %v10749_v12 }
  0x1a   :  { %8706 = vmatprep.subr.bf16.mxu1 %v10939_v0 }
  0x1b   :  { %8967 = vmatpush3.bf16.msra.mxu0 %v10797_v29 }
  0x1c   :  { %8968 = vmatprep.subr.bf16.mxu0 %v10939_v0 }
  0x1d   :  { %8707 = vmatpush3.bf16.msra.mxu1 %v10750_v13  ;;  %8455 = vmatmul.mubr.msk.bf16.gmra.mxu0 %vm638_vm3, %v10751_v14  ;;  %v10803_v13 = vld [vmem:[%s15032_s1 + $0xd0] sm:$0xff]  }
  0x1e   :  { %8458 = vmatprep.mubr.msk.bf16.mxu0 %vm10940_vm2, %v10939_v0  ;;  %9228 = vmatprep.subr.bf16.mxu1 %v10939_v0 }
  0x1f   :  { %8969 = vmatpush3.bf16.msra.mxu0 %v10815_v48 }
  0x20   :  { %8709 = vmatmul.mubr.msk.bf16.vlgmr.msra.gmra.mxu1 %vm1704_vm4, %v10752_v15  ;;  %8970 = vmatprep.subr.bf16.mxu0 %v10939_v0  ;;  %v10804_v15 = vld [vmem:[%s15034_s0 + $0xc0] sm:$0xff]  }
  0x21   :  { %8712 = vmatprep.mubr.msk.bf16.mxu1 %vm10940_vm2, %v10939_v0  ;;  %9229 = vmatpush3.bf16.msra.mxu1 %v10802_v34 }
  0x22   :  { %9230 = vmatprep.subr.bf16.mxu1 %v10939_v0 }
  0x23   :  { %8971 = vmatpush3.bf16.msra.mxu0 %v10833_v4 }
  0x24   :  { %8972 = vmatprep.subr.bf16.mxu0 %v10939_v0 }
  0x25   :  { %8459 = vmatmul.mubr.msk.bf16.gmra.mxu0 %vm638_vm3, %v10753_v17  ;;  %9231 = vmatpush3.bf16.msra.mxu1 %v10820_v53  ;;  %v10838_v17 = vld [vmem:[%s15035_s7 + $0x28] sm:$0xff]  }
  0x26   :  { %8462 = vmatprep.mubr.msk.bf16.mxu0 %vm10940_vm2, %v10939_v0  ;;  %9232 = vmatprep.subr.bf16.mxu1 %v10939_v0 }
  0x28   :  { %8713 = vmatmul.mubr.msk.bf16.gmra.mxu1 %vm1704_vm4, %v10754_v18 }
  0x29   :  { %8716 = vmatprep.mubr.msk.bf16.mxu1 %vm10940_vm2, %v10939_v0  ;;  %9233 = vmatpush3.bf16.msra.mxu1 %v10838_v17 }
  0x2a   :  { %9234 = vmatprep.subr.bf16.mxu1 %v10939_v0 }
  0x2d   :  { %8463 = vmatmul.mubr.msk.bf16.gmra.mxu0 %vm638_vm3, %v10755_v19 }
  0x2e   :  { %8466 = vmatprep.mubr.msk.bf16.mxu0 %vm10940_vm2, %v10939_v0 }
  0x30   :  { %8717 = vmatmul.mubr.msk.bf16.gmra.mxu1 %vm1704_vm4, %v10756_v20 }
  0x31   :  { %8720 = vmatprep.mubr.msk.bf16.mxu1 %vm10940_vm2, %v10939_v0 }
  0x35   :  { %8467 = vmatmul.mubr.msk.bf16.gmra.mxu0 %vm638_vm3, %v10757_v22  ;;  %v10805_v22 = vld [vmem:[%s15032_s1 + $0xd8] sm:$0xff]  }
  0x36   :  { %8470 = vmatprep.mubr.msk.bf16.mxu0 %vm10940_vm2, %v10939_v0 }
  0x38   :  { %8721 = vmatmul.mubr.msk.bf16.gmra.mxu1 %vm1704_vm4, %v10758_v23  ;;  %v11416_v23 = vld [vmem:[%s15036_s4] ss:$0 sm:$0xff] }
  0x39   :  { %8724 = vmatprep.mubr.msk.bf16.mxu1 %vm10940_vm2, %v10939_v0 }
  0x3d   :  { %8471 = vmatmul.mubr.msk.bf16.gmra.mxu0 %vm638_vm3, %v10759_v24 }
  0x3e   :  { %8474 = vmatprep.mubr.msk.bf16.mxu0 %vm10940_vm2, %v10939_v0 }
  0x40   :  { %8725 = vmatmul.mubr.msk.bf16.gmra.mxu1 %vm1704_vm4, %v10760_v25 }
  0x41   :  { %8728 = vmatprep.mubr.msk.bf16.mxu1 %vm10940_vm2, %v10939_v0 }
  0x45   :  { %8475 = vmatmul.mubr.msk.bf16.gmra.mxu0 %vm638_vm3, %v10761_v26 }
  0x46   :  { %8478 = vmatprep.mubr.msk.bf16.mxu0 %vm10940_vm2, %v10939_v0 }
  0x48   :  { %8729 = vmatmul.mubr.msk.bf16.gmra.mxu1 %vm1704_vm4, %v10762_v27  ;;  %v10806_v27 = vld [vmem:[%s15034_s0 + $0xc8] sm:$0xff]  }
  0x49   :  { %8732 = vmatprep.mubr.msk.bf16.mxu1 %vm10940_vm2, %v10939_v0 }
  0x4d   :  { %8479 = vmatmul.mubr.msk.bf16.gmra.mxu0 %vm638_vm3, %v10763_v28 }
  0x4e   :  { %8482 = vmatprep.mubr.msk.bf16.mxu0 %vm10940_vm2, %v10939_v0 }
  0x50   :  { %8733 = vmatmul.mubr.msk.bf16.gmra.mxu1 %vm1704_vm4, %v10765_v30 }
  0x51   :  { %8736 = vmatprep.mubr.msk.bf16.mxu1 %vm10940_vm2, %v10939_v0 }
  0x55   :  { %8483 = vmatmul.mubr.msk.bf16.gmra.mxu0 %vm638_vm3, %v10766_v31 }
  0x56   :  { %8486 = vmatprep.mubr.msk.bf16.mxu0 %vm10940_vm2, %v10939_v0 }
  0x58   :  { %8737 = vmatmul.mubr.msk.bf16.gmra.mxu1 %vm1704_vm4, %v10767_v32 }
  0x59   :  { %8740 = vmatprep.mubr.msk.bf16.mxu1 %vm10940_vm2, %v10939_v0 }
  0x5d   :  { %8487 = vmatmul.mubr.msk.bf16.gmra.mxu0 %vm638_vm3, %v10768_v33 }
  0x5e   :  { %8490 = vmatprep.mubr.msk.bf16.mxu0 %vm10940_vm2, %v10939_v0 }
  0x60   :  { %8741 = vmatmul.mubr.msk.bf16.gmra.mxu1 %vm1704_vm4, %v10769_v35 }
  0x61   :  { %8744 = vmatprep.mubr.msk.bf16.mxu1 %vm10940_vm2, %v10939_v0 }
  0x65   :  { %8491 = vmatmul.mubr.msk.bf16.gmra.mxu0 %vm638_vm3, %v10770_v36 }
  0x66   :  { %8494 = vmatprep.mubr.msk.bf16.mxu0 %vm10940_vm2, %v10939_v0 }
  0x68   :  { %8745 = vmatmul.mubr.msk.bf16.gmra.mxu1 %vm1704_vm4, %v10771_v37 }
  0x69   :  { %8748 = vmatprep.mubr.msk.bf16.mxu1 %vm10940_vm2, %v10939_v0 }
  0x6d   :  { %8495 = vmatmul.mubr.msk.bf16.gmra.mxu0 %vm638_vm3, %v10772_v38 }
  0x6e   :  { %8498 = vmatprep.mubr.msk.bf16.mxu0 %vm10940_vm2, %v10939_v0 }
  0x70   :  { %8749 = vmatmul.mubr.msk.bf16.gmra.mxu1 %vm1704_vm4, %v10773_v39  ;;  %v10807_v39 = vld [vmem:[%s15032_s1 + $0xe0] sm:$0xff]  }
  0x71   :  { %8752 = vmatprep.mubr.msk.bf16.mxu1 %vm10940_vm2, %v10939_v0 }
  0x75   :  { %8499 = vmatmul.mubr.msk.bf16.gmra.mxu0 %vm638_vm3, %v10774_v40 }
  0x76   :  { %8502 = vmatprep.mubr.msk.bf16.mxu0 %vm10940_vm2, %v10939_v0 }
  0x78   :  { %8753 = vmatmul.mubr.msk.bf16.gmra.mxu1 %vm1704_vm4, %v10775_v41 }
  0x79   :  { %8756 = vmatprep.mubr.msk.bf16.mxu1 %vm10940_vm2, %v10939_v0 }
  0x7d   :  { %8503 = vmatmul.mubr.msk.bf16.gmra.mxu0 %vm638_vm3, %v10776_v42 }
  0x7e   :  { %8506 = vmatprep.mubr.msk.bf16.mxu0 %vm10940_vm2, %v10939_v0 }
  0x80   :  { %8757 = vmatmul.mubr.msk.bf16.gmra.mxu1 %vm1704_vm4, %v10777_v43 }
  0x81   :  { %8760 = vmatprep.mubr.msk.bf16.mxu1 %vm10940_vm2, %v10939_v0 }
  0x85   :  { %8507 = vmatmul.mubr.msk.bf16.gmra.mxu0 %vm638_vm3, %v10778_v44  ;;  %v10808_v44 = vld [vmem:[%s15034_s0 + $0xd0] sm:$0xff]  }
  0x86   :  { %8510 = vmatprep.mubr.msk.bf16.mxu0 %vm10940_vm2, %v10939_v0 }
  0x88   :  { %8761 = vmatmul.mubr.msk.bf16.gmra.mxu1 %vm1704_vm4, %v10779_v45 }
  0x89   :  { %8764 = vmatprep.mubr.msk.bf16.mxu1 %vm10940_vm2, %v10939_v0 }
  0x8d   :  { %8511 = vmatmul.mubr.msk.bf16.gmra.mxu0 %vm638_vm3, %v10781_v46 }
  0x8e   :  { %8514 = vmatprep.mubr.msk.bf16.mxu0 %vm10940_vm2, %v10939_v0 }
  0x90   :  { %8765 = vmatmul.mubr.msk.bf16.gmra.mxu1 %vm1704_vm4, %v10782_v47 }
  0x91   :  { %8768 = vmatprep.mubr.msk.bf16.mxu1 %vm10940_vm2, %v10939_v0 }
  0x95   :  { %8515 = vmatmul.mubr.msk.bf16.gmra.mxu0 %vm638_vm3, %v10783_v49 }
  0x96   :  { %8518 = vmatprep.mubr.msk.bf16.mxu0 %vm10940_vm2, %v10939_v0 }
  0x98   :  { %8769 = vmatmul.mubr.msk.bf16.gmra.mxu1 %vm1704_vm4, %v10784_v50 }
  0x99   :  { %8772 = vmatprep.mubr.msk.bf16.mxu1 %vm10940_vm2, %v10939_v0 }
  0x9d   :  { %8519 = vmatmul.mubr.msk.bf16.gmra.mxu0 %vm638_vm3, %v10785_v51 }
  0x9e   :  { %8522 = vmatprep.mubr.msk.bf16.mxu0 %vm10940_vm2, %v10939_v0 }
  0xa0   :  { %8773 = vmatmul.mubr.msk.bf16.gmra.mxu1 %vm1704_vm4, %v10786_v52 }
  0xa1   :  { %8776 = vmatprep.mubr.msk.bf16.mxu1 %vm10940_vm2, %v10939_v0 }
  0xa5   :  { %8523 = vmatmul.mubr.msk.bf16.gmra.mxu0 %vm638_vm3, %v10787_v54 }
  0xa6   :  { %8526 = vmatprep.mubr.msk.bf16.mxu0 %vm10940_vm2, %v10939_v0 }
  0xa8   :  { %8777 = vmatmul.mubr.msk.bf16.gmra.mxu1 %vm1704_vm4, %v10788_v55 }
  0xa9   :  { %8780 = vmatprep.mubr.msk.bf16.mxu1 %vm10940_vm2, %v10939_v0 }
  0xad   :  { %8527 = vmatmul.mubr.msk.bf16.gmra.mxu0 %vm638_vm3, %v10789_v56  ;;  %v10809_v56 = vld [vmem:[%s15032_s1 + $0xe8] sm:$0xff]  }
  0xae   :  { %8530 = vmatprep.mubr.msk.bf16.mxu0 %vm10940_vm2, %v10939_v0 }
  0xb0   :  { %8781 = vmatmul.mubr.msk.bf16.gmra.mxu1 %vm1704_vm4, %v10790_v57 }
  0xb1   :  { %8784 = vmatprep.mubr.msk.bf16.mxu1 %vm10940_vm2, %v10939_v0 }
  0xb5   :  { %8531 = vmatmul.mubr.msk.bf16.gmra.mxu0 %vm638_vm3, %v10791_v58 }
  0xb6   :  { %8534 = vmatprep.mubr.msk.bf16.mxu0 %vm10940_vm2, %v10939_v0 }
  0xb8   :  { %8785 = vmatmul.mubr.msk.bf16.gmra.mxu1 %vm1704_vm4, %v10792_v59 }
  0xb9   :  { %8788 = vmatprep.mubr.msk.bf16.mxu1 %vm10940_vm2, %v10939_v0 }
  0xbd   :  { %8535 = vmatmul.mubr.msk.bf16.gmra.mxu0 %vm638_vm3, %v10793_v60 }
  0xbe   :  { %8538 = vmatprep.mubr.msk.bf16.mxu0 %vm10940_vm2, %v10939_v0 }
  0xc0   :  { %8789 = vmatmul.mubr.msk.bf16.gmra.mxu1 %vm1704_vm4, %v10794_v61  ;;  %v10810_v61 = vld [vmem:[%s15034_s0 + $0xd8] sm:$0xff]  }
  0xc1   :  { %8792 = vmatprep.mubr.msk.bf16.mxu1 %vm10940_vm2, %v10939_v0 }
  0xc5   :  { %8539 = vmatmul.mubr.msk.bf16.gmra.mxu0 %vm638_vm3, %v10795_v62 }
  0xc6   :  { %8542 = vmatprep.mubr.msk.bf16.mxu0 %vm10940_vm2, %v10939_v0 }
  0xc8   :  { %8793 = vmatmul.mubr.msk.bf16.gmra.mxu1 %vm1704_vm4, %v10796_v63 }
  0xc9   :  { %8796 = vmatprep.mubr.msk.bf16.mxu1 %vm10940_vm2, %v10939_v0 }
  0xcd   :  { %v862_v3 = vpop.f32.mrf.mxu0  ;;  %8543 = vmatmul.mubr.msk.bf16.gmra.mxu0 %vm638_vm3, %v10798_v1 }
  0xce   :  { %8546 = vmatprep.mubr.msk.bf16.mxu0 %vm10940_vm2, %v10939_v0 }
  0xcf   :  { %v8448_v5 = vpop.f32.mrf.mxu0 }
  0xd0   :  { %8797 = vmatmul.mubr.msk.bf16.gmra.mxu1 %vm1704_vm4, %v10799_v2 }
  0xd1   :  { %v865_v6 = vpop.f32.mrf.mxu0  ;;  %8800 = vmatprep.mubr.msk.bf16.mxu1 %vm10940_vm2, %v10939_v0 }
  0xd3   :  { %v8449_v8 = vpop.f32.mrf.mxu0 }
  0xd5   :  { %v870_v10 = vpop.f32.mrf.mxu0  ;;  %8547 = vmatmul.mubr.msk.bf16.gmra.mxu0 %vm638_vm3, %v10800_v7 }
  0xd6   :  { %8550 = vmatprep.mubr.msk.bf16.mxu0 %vm10940_vm2, %v10939_v0 }
  0xd7   :  { %v8452_v11 = vpop.f32.mrf.mxu0 }
  0xd8   :  { %8801 = vmatmul.mubr.msk.bf16.gmra.mxu1 %vm1704_vm4, %v10801_v9 }
  0xd9   :  { %v873_v12 = vpop.f32.mrf.mxu0  ;;  %8804 = vmatprep.mubr.msk.bf16.mxu1 %vm10940_vm2, %v10939_v0 }
  0xdb   :  { %v8453_v14 = vpop.f32.mrf.mxu0 }
  0xdd   :  { %v878_v16 = vpop.f32.mrf.mxu0  ;;  %8551 = vmatmul.mubr.msk.bf16.gmra.mxu0 %vm638_vm3, %v10803_v13 }
  0xde   :  { %8554 = vmatprep.mubr.msk.bf16.mxu0 %vm10940_vm2, %v10939_v0 }
  0xdf   :  { %v8456_v18 = vpop.f32.mrf.mxu0 }
  0xe0   :  { %v1935_v19 = vpop.f32.mrf.mxu1  ;;  %8805 = vmatmul.mubr.msk.bf16.gmra.mxu1 %vm1704_vm4, %v10804_v15  ;;  %v10812_v15 = vld [vmem:[%s15034_s0 + $0xe0] sm:$0xff]  }
  0xe1   :  { %v1936_v20 = vadd.f32 %v1935_v19, %v862_v3  ;;  %v881_v21 = vpop.f32.mrf.mxu0  ;;  %8808 = vmatprep.mubr.msk.bf16.mxu1 %vm10940_vm2, %v10939_v0 }
  0xe2   :  { %v8710_v24 = vpop.f32.mrf.mxu1 }
  0xe3   :  { %v8457_v25 = vpop.f32.mrf.mxu0  ;;  %v2443_v28 = vadd.f32 %v11416_v23, %v1936_v20 }
  0xe4   :  { %v1938_v26 = vpop.f32.mrf.mxu1 }
  0xe5   :  { %v1939_v29 = vadd.f32 %v1938_v26, %v865_v6  ;;  %v886_v30 = vpop.f32.mrf.mxu0  ;;  %8555 = vmatmul.mubr.msk.bf16.gmra.mxu0 %vm638_vm3, %v10805_v22  ;;  %v2568_v35 = vmax.f32 %v2443_v28, 0.0  ;;  %v10813_v28 = vld [vmem:[%s15032_s1 + $0xf8] sm:$0xff]  }
  0xe6   :  { %v8711_v31 = vpop.f32.mrf.mxu1  ;;  %8558 = vmatprep.mubr.msk.bf16.mxu0 %vm10940_vm2, %v10939_v0 }
  0xe7   :  { %v2444_v32 = vadd.f32 %v11416_v23, %v1939_v29  ;;  %v8460_v33 = vpop.f32.mrf.mxu0 }
  0xe8   :  { %v1943_v34 = vpop.f32.mrf.mxu1  ;;  %8809 = vmatmul.mubr.msk.bf16.gmra.mxu1 %vm1704_vm4, %v10806_v27  ;;  %v10814_v33 = vld [vmem:[%s15034_s0 + $0xe8] sm:$0xff]  }
  0xe9   :  { %v2569_v36 = vmax.f32 %v2444_v32, 0.0  ;;  %v1944_v37 = vadd.f32 %v1943_v34, %v870_v10  ;;  %v889_v38 = vpop.f32.mrf.mxu0  ;;  %8812 = vmatprep.mubr.msk.bf16.mxu1 %vm10940_vm2, %v10939_v0  ;;  %v10811_v10 = vld [vmem:[%s15032_s1 + $0xf0] sm:$0xff]  }
  0xea   :  { %v8714_v40 = vpop.f32.mrf.mxu1 }
  0xeb   :  { %v11432_v41 = vpack.c.bf16 %v2569_v36, %v2568_v35  ;;  %v8461_v42 = vpop.f32.mrf.mxu0  ;;  %v2445_v45 = vadd.f32 %v11416_v23, %v1944_v37 }
  0xec   :  { %v1946_v43 = vpop.f32.mrf.mxu1 }
  0xed   :  { %v1947_v46 = vadd.f32 %v1946_v43, %v873_v12  ;;  %v894_v47 = vpop.f32.mrf.mxu0  ;;  %8559 = vmatmul.mubr.msk.bf16.gmra.mxu0 %vm638_vm3, %v10807_v39  ;;  %v2570_v52 = vmax.f32 %v2445_v45, 0.0 }
  0xee   :  { %v8715_v48 = vpop.f32.mrf.mxu1  ;;  %8562 = vmatprep.mubr.msk.bf16.mxu0 %vm10940_vm2, %v10939_v0 }
  0xef   :  { %v2446_v49 = vadd.f32 %v11416_v23, %v1947_v46  ;;  %v8464_v50 = vpop.f32.mrf.mxu0  ;;  %v10816_v46 = vld [vmem:[%s15032_s1 + $0x100] sm:$0xff]  }
  0xf0   :  { %v1951_v51 = vpop.f32.mrf.mxu1  ;;  %8813 = vmatmul.mubr.msk.bf16.gmra.mxu1 %vm1704_vm4, %v10808_v44 }
  0xf1   :  { %v2571_v53 = vmax.f32 %v2446_v49, 0.0  ;;  %v1952_v54 = vadd.f32 %v1951_v51, %v878_v16  ;;  %v897_v55 = vpop.f32.mrf.mxu0  ;;  %8816 = vmatprep.mubr.msk.bf16.mxu1 %vm10940_vm2, %v10939_v0  ;;  %v10817_v51 = vld [vmem:[%s15034_s0 + $0xf0] sm:$0xff]  }
  0xf2   :  { %v8718_v57 = vpop.f32.mrf.mxu1 }
  0xf3   :  { %v11448_v58 = vpack.c.bf16 %v2571_v53, %v2570_v52  ;;  %v8465_v59 = vpop.f32.mrf.mxu0  ;;  %v2447_v62 = vadd.f32 %v11416_v23, %v1952_v54 }
  0xf4   :  { %v1954_v60 = vpop.f32.mrf.mxu1 }
  0xf5   :  { %v1955_v63 = vadd.f32 %v1954_v60, %v881_v21  ;;  %v902_v1 = vpop.f32.mrf.mxu0  ;;  %8563 = vmatmul.mubr.msk.bf16.gmra.mxu0 %vm638_vm3, %v10809_v56  ;;  %v2572_v6 = vmax.f32 %v2447_v62, 0.0 }
  0xf6   :  { %v8719_v2 = vpop.f32.mrf.mxu1  ;;  %8566 = vmatprep.mubr.msk.bf16.mxu0 %vm10940_vm2, %v10939_v0 }
  0xf7   :  { %v2448_v3 = vadd.f32 %v11416_v23, %v1955_v63  ;;  %v8468_v4 = vpop.f32.mrf.mxu0  ;;  %v10818_v2 = vld [vmem:[%s15032_s1 + $0x108] sm:$0xff]  }
  0xf8   :  { %v1959_v5 = vpop.f32.mrf.mxu1  ;;  %8817 = vmatmul.mubr.msk.bf16.gmra.mxu1 %vm1704_vm4, %v10810_v61 }
  0xf9   :  { %v2573_v7 = vmax.f32 %v2448_v3, 0.0  ;;  %v1960_v8 = vadd.f32 %v1959_v5, %v886_v30  ;;  %v905_v9 = vpop.f32.mrf.mxu0  ;;  %8820 = vmatprep.mubr.msk.bf16.mxu1 %vm10940_vm2, %v10939_v0 }
  0xfa   :  { %v8722_v11 = vpop.f32.mrf.mxu1 }
  0xfb   :  { %v11464_v12 = vpack.c.bf16 %v2573_v7, %v2572_v6  ;;  %v8469_v13 = vpop.f32.mrf.mxu0  ;;  %v2449_v16 = vadd.f32 %v11416_v23, %v1960_v8  ;;  %v10819_v7 = vld [vmem:[%s15034_s0 + $0xf8] sm:$0xff]  }
  0xfc   :  { %v1962_v14 = vpop.f32.mrf.mxu1 }
  0xfd   :  { %v1963_v17 = vadd.f32 %v1962_v14, %v889_v38  ;;  %v910_v18 = vpop.f32.mrf.mxu0  ;;  %8567 = vmatmul.mubr.msk.bf16.gmra.mxu0 %vm638_vm3, %v10811_v10  ;;  %v2574_v24 = vmax.f32 %v2449_v16, 0.0 }
  0xfe   :  { %v8723_v19 = vpop.f32.mrf.mxu1  ;;  %8570 = vmatprep.mubr.msk.bf16.mxu0 %vm10940_vm2, %v10939_v0 }
  0xff   :  { %v2450_v20 = vadd.f32 %v11416_v23, %v1963_v17  ;;  %v8472_v21 = vpop.f32.mrf.mxu0 }
 0x100   :  { %v1967_v22 = vpop.f32.mrf.mxu1  ;;  %8821 = vmatmul.mubr.msk.bf16.gmra.mxu1 %vm1704_vm4, %v10812_v15 }
 0x101   :  { %v2575_v25 = vmax.f32 %v2450_v20, 0.0  ;;  %v1968_v26 = vadd.f32 %v1967_v22, %v894_v47  ;;  %v913_v27 = vpop.f32.mrf.mxu0  ;;  %8824 = vmatprep.mubr.msk.bf16.mxu1 %vm10940_vm2, %v10939_v0  ;;  %v10821_v20 = vld [vmem:[%s15032_s1 + $0x110] sm:$0xff]  }
 0x102   :  { %v8726_v29 = vpop.f32.mrf.mxu1 }
 0x103   :  { %v11480_v30 = vpack.c.bf16 %v2575_v25, %v2574_v24  ;;  %v8473_v31 = vpop.f32.mrf.mxu0  ;;  %v2451_v34 = vadd.f32 %v11416_v23, %v1968_v26  ;;  %v10855_v25 = vld [vmem:[%s15035_s7 + $0x20] sm:$0xff]  }
 0x104   :  { %v1970_v32 = vpop.f32.mrf.mxu1  ;;  %9235 = vmatpush3.bf16.msra.mxu1 %v10855_v25 }
 0x105   :  { %v1971_v35 = vadd.f32 %v1970_v32, %v897_v55  ;;  %v918_v36 = vpop.f32.mrf.mxu0  ;;  %8571 = vmatmul.mubr.msk.bf16.gmra.mxu0 %vm638_vm3, %v10813_v28  ;;  %v2576_v42 = vmax.f32 %v2451_v34, 0.0  ;;  %v10851_v55 = vld [vmem:[%s15033_s5 + $0x8] sm:$0xff]   ;;  %9236 = vmatprep.subr.bf16.mxu1 %v10939_v0 }
 0x106   :  { %v8727_v37 = vpop.f32.mrf.mxu1  ;;  %8574 = vmatprep.mubr.msk.bf16.mxu0 %vm10940_vm2, %v10939_v0  ;;  %8973 = vmatpush3.bf16.msra.mxu0 %v10851_v55 }
 0x107   :  { %v2452_v38 = vadd.f32 %v11416_v23, %v1971_v35  ;;  %v8476_v39 = vpop.f32.mrf.mxu0  ;;  %8974 = vmatprep.subr.bf16.mxu0 %v10939_v0 }
 0x108   :  { %v1975_v40 = vpop.f32.mrf.mxu1  ;;  %8825 = vmatmul.mubr.msk.bf16.gmra.mxu1 %vm1704_vm4, %v10814_v33 }
 0x109   :  { %v2577_v43 = vmax.f32 %v2452_v38, 0.0  ;;  %v1976_v44 = vadd.f32 %v1975_v40, %v902_v1  ;;  %v921_v45 = vpop.f32.mrf.mxu0  ;;  %8828 = vmatprep.mubr.msk.bf16.mxu1 %vm10940_vm2, %v10939_v0  ;;  %v10823_v40 = vld [vmem:[%s15032_s1 + $0x118] sm:$0xff]  }
 0x10a   :  { %v8730_v47 = vpop.f32.mrf.mxu1 }
 0x10b   :  { %v11496_v48 = vpack.c.bf16 %v2577_v43, %v2576_v42  ;;  %v8477_v49 = vpop.f32.mrf.mxu0  ;;  %v2453_v52 = vadd.f32 %v11416_v23, %v1976_v44 }
 0x10c   :  { %v1978_v50 = vpop.f32.mrf.mxu1 }
 0x10d   :  { %v1979_v53 = vadd.f32 %v1978_v50, %v905_v9  ;;  %v926_v54 = vpop.f32.mrf.mxu0  ;;  %8575 = vmatmul.mubr.msk.bf16.gmra.mxu0 %vm638_vm3, %v10816_v46  ;;  %v2578_v61 = vmax.f32 %v2453_v52, 0.0  ;;  %v10824_v46 = vld [vmem:[%s15034_s0 + $0x108] sm:$0xff]  }
 0x10e   :  { %v8731_v56 = vpop.f32.mrf.mxu1  ;;  %8578 = vmatprep.mubr.msk.bf16.mxu0 %vm10940_vm2, %v10939_v0 }
 0x10f   :  { %v2454_v57 = vadd.f32 %v11416_v23, %v1979_v53  ;;  %v8480_v59 = vpop.f32.mrf.mxu0 }
 0x110   :  { %v1983_v60 = vpop.f32.mrf.mxu1  ;;  %8829 = vmatmul.mubr.msk.bf16.gmra.mxu1 %vm1704_vm4, %v10817_v51 }
 0x111   :  { %v2579_v62 = vmax.f32 %v2454_v57, 0.0  ;;  %v1984_v63 = vadd.f32 %v1983_v60, %v910_v18  ;;  %v929_v1 = vpop.f32.mrf.mxu0  ;;  %8832 = vmatprep.mubr.msk.bf16.mxu1 %vm10940_vm2, %v10939_v0  ;;  %v10825_v60 = vld [vmem:[%s15032_s1 + $0x120] sm:$0xff]  }
 0x112   :  { %v8734_v3 = vpop.f32.mrf.mxu1 }
 0x113   :  { %v11516_v4 = vpack.c.bf16 %v2579_v62, %v2578_v61  ;;  %v8481_v5 = vpop.f32.mrf.mxu0  ;;  %v2455_v8 = vadd.f32 %v11416_v23, %v1984_v63 }
 0x114   :  { %v1986_v6 = vpop.f32.mrf.mxu1 }
 0x115   :  { %v1987_v9 = vadd.f32 %v1986_v6, %v913_v27  ;;  %v934_v10 = vpop.f32.mrf.mxu0  ;;  %8579 = vmatmul.mubr.msk.bf16.gmra.mxu0 %vm638_vm3, %v10818_v2  ;;  %v2580_v16 = vmax.f32 %v2455_v8, 0.0  ;;  %v10822_v27 = vld [vmem:[%s15034_s0 + $0x100] sm:$0xff]   ;;  %v10826_v2 = vld [vmem:[%s15034_s0 + $0x110] sm:$0xff]  }
 0x116   :  { %v8735_v11 = vpop.f32.mrf.mxu1  ;;  %8582 = vmatprep.mubr.msk.bf16.mxu0 %vm10940_vm2, %v10939_v0 }
 0x117   :  { %v2456_v13 = vadd.f32 %v11416_v23, %v1987_v9  ;;  %v8484_v14 = vpop.f32.mrf.mxu0 }
 0x118   :  { %v1991_v15 = vpop.f32.mrf.mxu1  ;;  %8833 = vmatmul.mubr.msk.bf16.gmra.mxu1 %vm1704_vm4, %v10819_v7 }
 0x119   :  { %v2581_v17 = vmax.f32 %v2456_v13, 0.0  ;;  %v1992_v18 = vadd.f32 %v1991_v15, %v918_v36  ;;  %v937_v19 = vpop.f32.mrf.mxu0  ;;  %8836 = vmatprep.mubr.msk.bf16.mxu1 %vm10940_vm2, %v10939_v0 }
 0x11a   :  { %v8738_v21 = vpop.f32.mrf.mxu1 }
 0x11b   :  { %v11532_v22 = vpack.c.bf16 %v2581_v17, %v2580_v16  ;;  %v8485_v24 = vpop.f32.mrf.mxu0  ;;  %v2457_v28 = vadd.f32 %v11416_v23, %v1992_v18  ;;  %v10827_v16 = vld [vmem:[%s15032_s1 + $0x128] sm:$0xff]   ;;  %v10828_v21 = vld [vmem:[%s15034_s0 + $0x118] sm:$0xff]  }
 0x11c   :  { %v1994_v26 = vpop.f32.mrf.mxu1 }
 0x11d   :  { %v1995_v29 = vadd.f32 %v1994_v26, %v921_v45  ;;  %v942_v31 = vpop.f32.mrf.mxu0  ;;  %8583 = vmatmul.mubr.msk.bf16.gmra.mxu0 %vm638_vm3, %v10821_v20  ;;  %v2582_v36 = vmax.f32 %v2457_v28, 0.0 }
 0x11e   :  { %v8739_v32 = vpop.f32.mrf.mxu1  ;;  %8586 = vmatprep.mubr.msk.bf16.mxu0 %vm10940_vm2, %v10939_v0 }
 0x11f   :  { %v2458_v33 = vadd.f32 %v11416_v23, %v1995_v29  ;;  %v8488_v34 = vpop.f32.mrf.mxu0 }
 0x120   :  { %v1999_v35 = vpop.f32.mrf.mxu1  ;;  %8837 = vmatmul.mubr.msk.bf16.gmra.mxu1 %vm1704_vm4, %v10822_v27 }
 0x121   :  { %v2583_v37 = vmax.f32 %v2458_v33, 0.0  ;;  %v2000_v38 = vadd.f32 %v1999_v35, %v926_v54  ;;  %v945_v39 = vpop.f32.mrf.mxu0  ;;  %8840 = vmatprep.mubr.msk.bf16.mxu1 %vm10940_vm2, %v10939_v0 }
 0x122   :  { %v8742_v42 = vpop.f32.mrf.mxu1 }
 0x123   :  { %v11552_v43 = vpack.c.bf16 %v2583_v37, %v2582_v36  ;;  %v8489_v44 = vpop.f32.mrf.mxu0  ;;  %v2459_v47 = vadd.f32 %v11416_v23, %v2000_v38  ;;  %v10829_v36 = vld [vmem:[%s15032_s1 + $0x130] sm:$0xff]   ;;  %v10830_v42 = vld [vmem:[%s15034_s0 + $0x120] sm:$0xff]  }
 0x124   :  { %v2002_v45 = vpop.f32.mrf.mxu1 }
 0x125   :  { %v2003_v49 = vadd.f32 %v2002_v45, %v929_v1  ;;  %v950_v50 = vpop.f32.mrf.mxu0  ;;  %8587 = vmatmul.mubr.msk.bf16.gmra.mxu0 %vm638_vm3, %v10823_v40  ;;  %v2584_v55 = vmax.f32 %v2459_v47, 0.0 }
 0x126   :  { %v8743_v51 = vpop.f32.mrf.mxu1  ;;  %8590 = vmatprep.mubr.msk.bf16.mxu0 %vm10940_vm2, %v10939_v0 }
 0x127   :  { %v2460_v52 = vadd.f32 %v11416_v23, %v2003_v49  ;;  %v8492_v53 = vpop.f32.mrf.mxu0 }
 0x128   :  { %v2007_v54 = vpop.f32.mrf.mxu1  ;;  %8841 = vmatmul.mubr.msk.bf16.gmra.mxu1 %vm1704_vm4, %v10824_v46 }
 0x129   :  { %v2585_v56 = vmax.f32 %v2460_v52, 0.0  ;;  %v2008_v57 = vadd.f32 %v2007_v54, %v934_v10  ;;  %v953_v59 = vpop.f32.mrf.mxu0  ;;  %8844 = vmatprep.mubr.msk.bf16.mxu1 %vm10940_vm2, %v10939_v0 }
 0x12a   :  { %v8746_v61 = vpop.f32.mrf.mxu1 }
 0x12b   :  { %v11568_v62 = vpack.c.bf16 %v2585_v56, %v2584_v55  ;;  %v8493_v63 = vpop.f32.mrf.mxu0  ;;  %v2461_v3 = vadd.f32 %v11416_v23, %v2008_v57  ;;  %v10831_v56 = vld [vmem:[%s15032_s1 + $0x138] sm:$0xff]  }
 0x12c   :  { %v2010_v1 = vpop.f32.mrf.mxu1  ;;  %v10832_v63 = vld [vmem:[%s15034_s0 + $0x128] sm:$0xff]  }
 0x12d   :  { %v2011_v5 = vadd.f32 %v2010_v1, %v937_v19  ;;  %v958_v6 = vpop.f32.mrf.mxu0  ;;  %8591 = vmatmul.mubr.msk.bf16.gmra.mxu0 %vm638_vm3, %v10825_v60  ;;  %v2586_v11 = vmax.f32 %v2461_v3, 0.0 }
 0x12e   :  { %v8747_v7 = vpop.f32.mrf.mxu1  ;;  %8594 = vmatprep.mubr.msk.bf16.mxu0 %vm10940_vm2, %v10939_v0 }
 0x12f   :  { %v2462_v8 = vadd.f32 %v11416_v23, %v2011_v5  ;;  %v8496_v9 = vpop.f32.mrf.mxu0 }
 0x130   :  { %v2015_v10 = vpop.f32.mrf.mxu1  ;;  %8845 = vmatmul.mubr.msk.bf16.gmra.mxu1 %vm1704_vm4, %v10826_v2 }
 0x131   :  { %v2587_v13 = vmax.f32 %v2462_v8, 0.0  ;;  %v2016_v14 = vadd.f32 %v2015_v10, %v942_v31  ;;  %v961_v15 = vpop.f32.mrf.mxu0  ;;  %8848 = vmatprep.mubr.msk.bf16.mxu1 %vm10940_vm2, %v10939_v0 }
 0x132   :  { %v8750_v17 = vpop.f32.mrf.mxu1 }
 0x133   :  { %v11584_v18 = vpack.c.bf16 %v2587_v13, %v2586_v11  ;;  %v8497_v19 = vpop.f32.mrf.mxu0  ;;  %v2463_v24 = vadd.f32 %v11416_v23, %v2016_v14  ;;  %v10834_v14 = vld [vmem:[%s15032_s1 + $0x140] sm:$0xff]  }
 0x134   :  { %v2018_v20 = vpop.f32.mrf.mxu1 }
 0x135   :  { %v2019_v25 = vadd.f32 %v2018_v20, %v945_v39  ;;  %v966_v26 = vpop.f32.mrf.mxu0  ;;  %8595 = vmatmul.mubr.msk.bf16.gmra.mxu0 %vm638_vm3, %v10827_v16  ;;  %v2588_v32 = vmax.f32 %v2463_v24, 0.0  ;;  %v10835_v20 = vld [vmem:[%s15034_s0 + $0x130] sm:$0xff]  }
 0x136   :  { %v8751_v27 = vpop.f32.mrf.mxu1  ;;  %8598 = vmatprep.mubr.msk.bf16.mxu0 %vm10940_vm2, %v10939_v0 }
 0x137   :  { %v2464_v28 = vadd.f32 %v11416_v23, %v2019_v25  ;;  %v8500_v29 = vpop.f32.mrf.mxu0 }
 0x138   :  { %v2023_v31 = vpop.f32.mrf.mxu1  ;;  %8849 = vmatmul.mubr.msk.bf16.gmra.mxu1 %vm1704_vm4, %v10828_v21 }
 0x139   :  { %v2589_v33 = vmax.f32 %v2464_v28, 0.0  ;;  %v2024_v34 = vadd.f32 %v2023_v31, %v950_v50  ;;  %v969_v35 = vpop.f32.mrf.mxu0  ;;  %8852 = vmatprep.mubr.msk.bf16.mxu1 %vm10940_vm2, %v10939_v0 }
 0x13a   :  { %v8754_v37 = vpop.f32.mrf.mxu1 }
 0x13b   :  { %v11600_v38 = vpack.c.bf16 %v2589_v33, %v2588_v32  ;;  %v8501_v39 = vpop.f32.mrf.mxu0  ;;  %v2465_v44 = vadd.f32 %v11416_v23, %v2024_v34 }
 0x13c   :  { %v2026_v40 = vpop.f32.mrf.mxu1 }
 0x13d   :  { %v2027_v45 = vadd.f32 %v2026_v40, %v953_v59  ;;  %v974_v46 = vpop.f32.mrf.mxu0  ;;  %8599 = vmatmul.mubr.msk.bf16.gmra.mxu0 %vm638_vm3, %v10829_v36  ;;  %v2590_v52 = vmax.f32 %v2465_v44, 0.0  ;;  %v10836_v36 = vld [vmem:[%s15032_s1 + $0x148] sm:$0xff]   ;;  %v10837_v44 = vld [vmem:[%s15034_s0 + $0x138] sm:$0xff]  }
 0x13e   :  { %v8755_v47 = vpop.f32.mrf.mxu1  ;;  %8602 = vmatprep.mubr.msk.bf16.mxu0 %vm10940_vm2, %v10939_v0 }
 0x13f   :  { %v2466_v49 = vadd.f32 %v11416_v23, %v2027_v45  ;;  %v8504_v50 = vpop.f32.mrf.mxu0 }
 0x140   :  { %v2031_v51 = vpop.f32.mrf.mxu1  ;;  %8853 = vmatmul.mubr.msk.bf16.gmra.mxu1 %vm1704_vm4, %v10830_v42 }
 0x141   :  { %v2591_v53 = vmax.f32 %v2466_v49, 0.0  ;;  %v2032_v54 = vadd.f32 %v2031_v51, %v958_v6  ;;  %v977_v55 = vpop.f32.mrf.mxu0  ;;  %8856 = vmatprep.mubr.msk.bf16.mxu1 %vm10940_vm2, %v10939_v0 }
 0x142   :  { %v8758_v57 = vpop.f32.mrf.mxu1 }
 0x143   :  { %v11616_v59 = vpack.c.bf16 %v2591_v53, %v2590_v52  ;;  %v8505_v60 = vpop.f32.mrf.mxu0  ;;  %v2467_v1 = vadd.f32 %v11416_v23, %v2032_v54 }
 0x144   :  { %v2034_v61 = vpop.f32.mrf.mxu1 }
 0x145   :  { %v2035_v2 = vadd.f32 %v2034_v61, %v961_v15  ;;  %v982_v3 = vpop.f32.mrf.mxu0  ;;  %8603 = vmatmul.mubr.msk.bf16.gmra.mxu0 %vm638_vm3, %v10831_v56  ;;  %v2592_v9 = vmax.f32 %v2467_v1, 0.0  ;;  %v10873_v1 = vld [vmem:[%s15035_s7 + $0x18] sm:$0xff]  }
 0x146   :  { %v8759_v5 = vpop.f32.mrf.mxu1  ;;  %8606 = vmatprep.mubr.msk.bf16.mxu0 %vm10940_vm2, %v10939_v0  ;;  %9237 = vmatpush3.bf16.msra.mxu1 %v10873_v1 }
 0x147   :  { %v2468_v6 = vadd.f32 %v11416_v23, %v2035_v2  ;;  %v8508_v7 = vpop.f32.mrf.mxu0  ;;  %9238 = vmatprep.subr.bf16.mxu1 %v10939_v0 }
 0x148   :  { %v2039_v8 = vpop.f32.mrf.mxu1  ;;  %8857 = vmatmul.mubr.msk.bf16.gmra.mxu1 %vm1704_vm4, %v10832_v63 }
 0x149   :  { %v2593_v10 = vmax.f32 %v2468_v6, 0.0  ;;  %v2040_v11 = vadd.f32 %v2039_v8, %v966_v26  ;;  %v985_v13 = vpop.f32.mrf.mxu0  ;;  %8860 = vmatprep.mubr.msk.bf16.mxu1 %vm10940_vm2, %v10939_v0  ;;  %v10869_v26 = vld [vmem:[%s15033_s5] sm:$0xff]  }
 0x14a   :  { %v8762_v15 = vpop.f32.mrf.mxu1  ;;  %8975 = vmatpush3.bf16.msra.mxu0 %v10869_v26 }
 0x14b   :  { %v11632_v16 = vpack.c.bf16 %v2593_v10, %v2592_v9  ;;  %v8509_v17 = vpop.f32.mrf.mxu0  ;;  %v2469_v21 = vadd.f32 %v11416_v23, %v2040_v11  ;;  %9496 = vmatprep.subr.bf16.mxu0 %v10939_v0 }
 0x14c   :  { %v2042_v19 = vpop.f32.mrf.mxu1 }
 0x14d   :  { %v2043_v24 = vadd.f32 %v2042_v19, %v969_v35  ;;  %v990_v25 = vpop.f32.mrf.mxu0  ;;  %8607 = vmatmul.mubr.msk.bf16.gmra.mxu0 %vm638_vm3, %v10834_v14  ;;  %v2594_v32 = vmax.f32 %v2469_v21, 0.0  ;;  %v10841_v19 = vld [vmem:[%s15032_s1 + $0x158] sm:$0xff]  }
 0x14e   :  { %v8763_v27 = vpop.f32.mrf.mxu1  ;;  %8610 = vmatprep.mubr.msk.bf16.mxu0 %vm10940_vm2, %v10939_v0 }
 0x14f   :  { %v2470_v28 = vadd.f32 %v11416_v23, %v2043_v24  ;;  %v8512_v29 = vpop.f32.mrf.mxu0  ;;  %v10842_v27 = vld [vmem:[%s15034_s0 + $0x148] sm:$0xff]  }
 0x150   :  { %v2047_v31 = vpop.f32.mrf.mxu1  ;;  %8861 = vmatmul.mubr.msk.bf16.gmra.mxu1 %vm1704_vm4, %v10835_v20 }
 0x151   :  { %v2595_v33 = vmax.f32 %v2470_v28, 0.0  ;;  %v2048_v34 = vadd.f32 %v2047_v31, %v974_v46  ;;  %v993_v35 = vpop.f32.mrf.mxu0  ;;  %8864 = vmatprep.mubr.msk.bf16.mxu1 %vm10940_vm2, %v10939_v0 }
 0x152   :  { %v8766_v37 = vpop.f32.mrf.mxu1 }
 0x153   :  { %v11652_v39 = vpack.c.bf16 %v2595_v33, %v2594_v32  ;;  %v8513_v40 = vpop.f32.mrf.mxu0  ;;  %v2471_v45 = vadd.f32 %v11416_v23, %v2048_v34 }
 0x154   :  { %v2050_v42 = vpop.f32.mrf.mxu1 }
 0x155   :  { %v2051_v46 = vadd.f32 %v2050_v42, %v977_v55  ;;  %v998_v47 = vpop.f32.mrf.mxu0  ;;  %8611 = vmatmul.mubr.msk.bf16.gmra.mxu0 %vm638_vm3, %v10836_v36  ;;  %v2596_v53 = vmax.f32 %v2471_v45, 0.0  ;;  %v10839_v55 = vld [vmem:[%s15032_s1 + $0x150] sm:$0xff]  }
 0x156   :  { %v8767_v49 = vpop.f32.mrf.mxu1  ;;  %8614 = vmatprep.mubr.msk.bf16.mxu0 %vm10940_vm2, %v10939_v0 }
 0x157   :  { %v2472_v50 = vadd.f32 %v11416_v23, %v2051_v46  ;;  %v8516_v51 = vpop.f32.mrf.mxu0 }
 0x158   :  { %v2055_v52 = vpop.f32.mrf.mxu1  ;;  %8865 = vmatmul.mubr.msk.bf16.gmra.mxu1 %vm1704_vm4, %v10837_v44 }
 0x159   :  { %v2597_v54 = vmax.f32 %v2472_v50, 0.0  ;;  %v2056_v56 = vadd.f32 %v2055_v52, %v982_v3  ;;  %v1001_v57 = vpop.f32.mrf.mxu0  ;;  %8868 = vmatprep.mubr.msk.bf16.mxu1 %vm10940_vm2, %v10939_v0  ;;  %v10840_v3 = vld [vmem:[%s15034_s0 + $0x140] sm:$0xff]   ;;  %v10844_v50 = vld [vmem:[%s15034_s0 + $0x150] sm:$0xff]  }
 0x15a   :  { %v8770_v60 = vpop.f32.mrf.mxu1 }
 0x15b   :  { %v11668_v61 = vpack.c.bf16 %v2597_v54, %v2596_v53  ;;  %v8517_v63 = vpop.f32.mrf.mxu0  ;;  %v2473_v5 = vadd.f32 %v11416_v23, %v2056_v56 }
 0x15c   :  { %v2058_v2 = vpop.f32.mrf.mxu1 }
 0x15d   :  { %v2059_v6 = vadd.f32 %v2058_v2, %v985_v13  ;;  %v1006_v7 = vpop.f32.mrf.mxu0  ;;  %8615 = vmatmul.mubr.msk.bf16.gmra.mxu0 %vm638_vm3, %v10839_v55  ;;  %v2598_v14 = vmax.f32 %v2473_v5, 0.0 }
 0x15e   :  { %v8771_v8 = vpop.f32.mrf.mxu1  ;;  %8618 = vmatprep.mubr.msk.bf16.mxu0 %vm10940_vm2, %v10939_v0 }
 0x15f   :  { %v2474_v9 = vadd.f32 %v11416_v23, %v2059_v6  ;;  %v8520_v10 = vpop.f32.mrf.mxu0 }
 0x160   :  { %v2063_v11 = vpop.f32.mrf.mxu1  ;;  %8869 = vmatmul.mubr.msk.bf16.gmra.mxu1 %vm1704_vm4, %v10840_v3 }
 0x161   :  { %v2599_v15 = vmax.f32 %v2474_v9, 0.0  ;;  %v2064_v17 = vadd.f32 %v2063_v11, %v990_v25  ;;  %v1009_v13 = vpop.f32.mrf.mxu0  ;;  %8872 = vmatprep.mubr.msk.bf16.mxu1 %vm10940_vm2, %v10939_v0  ;;  %v10846_v9 = vld [vmem:[%s15034_s0 + $0x158] sm:$0xff]  }
 0x162   :  { %v8774_v20 = vpop.f32.mrf.mxu1 }
 0x163   :  { %v11688_v21 = vpack.c.bf16 %v2599_v15, %v2598_v14  ;;  %v8521_v24 = vpop.f32.mrf.mxu0  ;;  %v2475_v28 = vadd.f32 %v11416_v23, %v2064_v17 }
 0x164   :  { %v2066_v26 = vpop.f32.mrf.mxu1 }
 0x165   :  { %v2067_v25 = vadd.f32 %v2066_v26, %v993_v35  ;;  %v1014_v29 = vpop.f32.mrf.mxu0  ;;  %8619 = vmatmul.mubr.msk.bf16.gmra.mxu0 %vm638_vm3, %v10841_v19  ;;  %v2600_v36 = vmax.f32 %v2475_v28, 0.0  ;;  %v10843_v35 = vld [vmem:[%s15032_s1 + $0x160] sm:$0xff]  }
 0x166   :  { %v8775_v31 = vpop.f32.mrf.mxu1  ;;  %8622 = vmatprep.mubr.msk.bf16.mxu0 %vm10940_vm2, %v10939_v0 }
 0x167   :  { %v2476_v32 = vadd.f32 %v11416_v23, %v2067_v25  ;;  %v8524_v33 = vpop.f32.mrf.mxu0 }
 0x168   :  { %v2071_v34 = vpop.f32.mrf.mxu1  ;;  %8873 = vmatmul.mubr.msk.bf16.gmra.mxu1 %vm1704_vm4, %v10842_v27  ;;  %v10848_v33 = vld [vmem:[%s15034_s0 + $0x160] sm:$0xff]  }
 0x169   :  { %v2601_v37 = vmax.f32 %v2476_v32, 0.0  ;;  %v2072_v40 = vadd.f32 %v2071_v34, %v998_v47  ;;  %v1017_v42 = vpop.f32.mrf.mxu0  ;;  %8876 = vmatprep.mubr.msk.bf16.mxu1 %vm10940_vm2, %v10939_v0 }
 0x16a   :  { %v8778_v44 = vpop.f32.mrf.mxu1 }
 0x16b   :  { %v11704_v45 = vpack.c.bf16 %v2601_v37, %v2600_v36  ;;  %v8525_v46 = vpop.f32.mrf.mxu0  ;;  %v2477_v51 = vadd.f32 %v11416_v23, %v2072_v40 }
 0x16c   :  { %v2074_v49 = vpop.f32.mrf.mxu1 }
 0x16d   :  { %v2075_v47 = vadd.f32 %v2074_v49, %v1001_v57  ;;  %v1022_v52 = vpop.f32.mrf.mxu0  ;;  %8623 = vmatmul.mubr.msk.bf16.gmra.mxu0 %vm638_vm3, %v10843_v35  ;;  %v2602_v60 = vmax.f32 %v2477_v51, 0.0  ;;  %v10845_v57 = vld [vmem:[%s15032_s1 + $0x168] sm:$0xff]  }
 0x16e   :  { %v8779_v53 = vpop.f32.mrf.mxu1  ;;  %8626 = vmatprep.mubr.msk.bf16.mxu0 %vm10940_vm2, %v10939_v0 }
 0x16f   :  { %v2478_v54 = vadd.f32 %v11416_v23, %v2075_v47  ;;  %v8528_v56 = vpop.f32.mrf.mxu0 }
 0x170   :  { %v2079_v55 = vpop.f32.mrf.mxu1  ;;  %8877 = vmatmul.mubr.msk.bf16.gmra.mxu1 %vm1704_vm4, %v10844_v50 }
 0x171   :  { %v2603_v63 = vmax.f32 %v2478_v54, 0.0  ;;  %v2080_v1 = vadd.f32 %v2079_v55, %v1006_v7  ;;  %v1025_v2 = vpop.f32.mrf.mxu0  ;;  %8880 = vmatprep.mubr.msk.bf16.mxu1 %vm10940_vm2, %v10939_v0  ;;  %v10850_v55 = vld [vmem:[%s15034_s0 + $0x168] sm:$0xff]  }
 0x172   :  { %v8782_v3 = vpop.f32.mrf.mxu1 }
 0x173   :  { %v11720_v5 = vpack.c.bf16 %v2603_v63, %v2602_v60  ;;  %v8529_v6 = vpop.f32.mrf.mxu0  ;;  %v2479_v10 = vadd.f32 %v11416_v23, %v2080_v1 }
 0x174   :  { %v2082_v8 = vpop.f32.mrf.mxu1 }
 0x175   :  { %v2083_v7 = vadd.f32 %v2082_v8, %v1009_v13  ;;  %v1030_v11 = vpop.f32.mrf.mxu0  ;;  %8627 = vmatmul.mubr.msk.bf16.gmra.mxu0 %vm638_vm3, %v10845_v57  ;;  %v2604_v20 = vmax.f32 %v2479_v10, 0.0  ;;  %v10847_v13 = vld [vmem:[%s15032_s1 + $0x170] sm:$0xff]  }
 0x176   :  { %v8783_v14 = vpop.f32.mrf.mxu1  ;;  %8630 = vmatprep.mubr.msk.bf16.mxu0 %vm10940_vm2, %v10939_v0 }
 0x177   :  { %v2480_v15 = vadd.f32 %v11416_v23, %v2083_v7  ;;  %v8532_v17 = vpop.f32.mrf.mxu0 }
 0x178   :  { %v2087_v19 = vpop.f32.mrf.mxu1  ;;  %8881 = vmatmul.mubr.msk.bf16.gmra.mxu1 %vm1704_vm4, %v10846_v9 }
 0x179   :  { %v2605_v24 = vmax.f32 %v2480_v15, 0.0  ;;  %v2088_v26 = vadd.f32 %v2087_v19, %v1014_v29  ;;  %v1033_v27 = vpop.f32.mrf.mxu0  ;;  %8884 = vmatprep.mubr.msk.bf16.mxu1 %vm10940_vm2, %v10939_v0 }
 0x17a   :  { %v8786_v28 = vpop.f32.mrf.mxu1 }
 0x17b   :  { %v11736_v25 = vpack.c.bf16 %v2605_v24, %v2604_v20  ;;  %v8533_v31 = vpop.f32.mrf.mxu0  ;;  %v2481_v34 = vadd.f32 %v11416_v23, %v2088_v26  ;;  %v10853_v20 = vld [vmem:[%s15034_s0 + $0x170] sm:$0xff]  }
 0x17c   :  { %v2090_v32 = vpop.f32.mrf.mxu1 }
 0x17d   :  { %v2091_v29 = vadd.f32 %v2090_v32, %v1017_v42  ;;  %v1038_v36 = vpop.f32.mrf.mxu0  ;;  %8631 = vmatmul.mubr.msk.bf16.gmra.mxu0 %vm638_vm3, %v10847_v13  ;;  %v2606_v46 = vmax.f32 %v2481_v34, 0.0  ;;  %v10849_v42 = vld [vmem:[%s15032_s1 + $0x178] sm:$0xff]   ;;  %v10854_v32 = vld [vmem:[%s15032_s1 + $0x188] sm:$0xff]  }
 0x17e   :  { %v8787_v37 = vpop.f32.mrf.mxu1  ;;  %8634 = vmatprep.mubr.msk.bf16.mxu0 %vm10940_vm2, %v10939_v0 }
 0x17f   :  { %v2482_v40 = vadd.f32 %v11416_v23, %v2091_v29  ;;  %v8536_v35 = vpop.f32.mrf.mxu0 }
 0x180   :  { %v2095_v44 = vpop.f32.mrf.mxu1  ;;  %8885 = vmatmul.mubr.msk.bf16.gmra.mxu1 %vm1704_vm4, %v10848_v33 }
 0x181   :  { %v2607_v49 = vmax.f32 %v2482_v40, 0.0  ;;  %v2096_v50 = vadd.f32 %v2095_v44, %v1022_v52  ;;  %v1041_v51 = vpop.f32.mrf.mxu0  ;;  %8888 = vmatprep.mubr.msk.bf16.mxu1 %vm10940_vm2, %v10939_v0 }
 0x182   :  { %v8790_v47 = vpop.f32.mrf.mxu1 }
 0x183   :  { %v11752_v53 = vpack.c.bf16 %v2607_v49, %v2606_v46  ;;  %v8537_v54 = vpop.f32.mrf.mxu0  ;;  %v2483_v60 = vadd.f32 %v11416_v23, %v2096_v50  ;;  %v10856_v49 = vld [vmem:[%s15034_s0 + $0x178] sm:$0xff]  }
 0x184   :  { %v2098_v56 = vpop.f32.mrf.mxu1 }
 0x185   :  { %v2099_v52 = vadd.f32 %v2098_v56, %v1025_v2  ;;  %v1046_v63 = vpop.f32.mrf.mxu0  ;;  %8635 = vmatmul.mubr.msk.bf16.gmra.mxu0 %vm638_vm3, %v10849_v42  ;;  %v2608_v8 = vmax.f32 %v2483_v60, 0.0  ;;  %v10852_v2 = vld [vmem:[%s15032_s1 + $0x180] sm:$0xff]  }
 0x186   :  { %v8791_v1 = vpop.f32.mrf.mxu1  ;;  %8638 = vmatprep.mubr.msk.bf16.mxu0 %vm10940_vm2, %v10939_v0 }
 0x187   :  { %v2484_v57 = vadd.f32 %v11416_v23, %v2099_v52  ;;  %v8540_v3 = vpop.f32.mrf.mxu0 }
 0x188   :  { %v2103_v6 = vpop.f32.mrf.mxu1  ;;  %8889 = vmatmul.mubr.msk.bf16.gmra.mxu1 %vm1704_vm4, %v10850_v55 }
 0x189   :  { %v2609_v9 = vmax.f32 %v2484_v57, 0.0  ;;  %v2104_v10 = vadd.f32 %v2103_v6, %v1030_v11  ;;  %v1049_v7 = vpop.f32.mrf.mxu0  ;;  %8892 = vmatprep.mubr.msk.bf16.mxu1 %vm10940_vm2, %v10939_v0 }
 0x18a   :  { %v8794_v14 = vpop.f32.mrf.mxu1 }
 0x18b   :  { %v11768_v15 = vpack.c.bf16 %v2609_v9, %v2608_v8  ;;  %v8541_v17 = vpop.f32.mrf.mxu0  ;;  %v2485_v24 = vadd.f32 %v11416_v23, %v2104_v10  ;;  %v11811_v10 = vld [vmem:[%s15036_s4] ss:$0 sm:$0xff] }
 0x18c   :  { %v2106_v19 = vpop.f32.mrf.mxu1 }
 0x18d   :  { %v2107_v11 = vadd.f32 %v2106_v19, %v1033_v27  ;;  %v1054_v26 = vpop.f32.mrf.mxu0  ;;  %8639 = vmatmul.mubr.msk.bf16.gmra.mxu0 %vm638_vm3, %v10852_v2  ;;  %v2610_v34 = vmax.f32 %v2485_v24, 0.0 }
 0x18e   :  { %v8795_v13 = vpop.f32.mrf.mxu1  ;;  %8642 = vmatprep.mubr.msk.bf16.mxu0 %vm10940_vm2, %v10939_v0 }
 0x18f   :  { %v2486_v28 = vadd.f32 %v11416_v23, %v2107_v11  ;;  %v8544_v31 = vpop.f32.mrf.mxu0 }
 0x190   :  { %v2111_v33 = vpop.f32.mrf.mxu1  ;;  %8893 = vmatmul.mubr.msk.bf16.gmra.mxu1 %vm1704_vm4, %v10853_v20 }
 0x191   :  { %v2611_v29 = vmax.f32 %v2486_v28, 0.0  ;;  %v2112_v27 = vadd.f32 %v2111_v33, %v1038_v36  ;;  %v1057_v37 = vpop.f32.mrf.mxu0  ;;  %8896 = vmatprep.mubr.msk.bf16.mxu1 %vm10940_vm2, %v10939_v0 }
 0x192   :  { %v8798_v40 = vpop.f32.mrf.mxu1 }
 0x193   :  { %v11784_v35 = vpack.c.bf16 %v2611_v29, %v2610_v34  ;;  %v8545_v44 = vpop.f32.mrf.mxu0  ;;  %v2487_v50 = vadd.f32 %v11416_v23, %v2112_v27  ;;  %v10860_v40 = vld [vmem:[%s15034_s0 + $0x188] sm:$0xff]  }
 0x194   :  { %v2114_v46 = vpop.f32.mrf.mxu1 }
 0x195   :  { %v2115_v42 = vadd.f32 %v2114_v46, %v1041_v51  ;;  %v1062_v47 = vpop.f32.mrf.mxu0  ;;  %8643 = vmatmul.mubr.msk.bf16.gmra.mxu0 %vm638_vm3, %v10854_v32  ;;  %v2612_v60 = vmax.f32 %v2487_v50, 0.0  ;;  %v10857_v51 = vld [vmem:[%s15032_s1 + $0x190] sm:$0xff]   ;;  %v10859_v32 = vld [vmem:[%s15032_s1 + $0x198] sm:$0xff]  }
 0x196   :  { %v8799_v36 = vpop.f32.mrf.mxu1  ;;  %8646 = vmatprep.mubr.msk.bf16.mxu0 %vm10940_vm2, %v10939_v0 }
 0x197   :  { %v2488_v54 = vadd.f32 %v11416_v23, %v2115_v42  ;;  %v8548_v56 = vpop.f32.mrf.mxu0  ;;  %v10888_v23 = vld [vmem:[%s15035_s7 + $0x10] sm:$0xff]  }
 0x198   :  { %v2119_v55 = vpop.f32.mrf.mxu1  ;;  %8897 = vmatmul.mubr.msk.bf16.gmra.mxu1 %vm1704_vm4, %v10856_v49 }
 0x199   :  { %v2613_v52 = vmax.f32 %v2488_v54, 0.0  ;;  %v2120_v1 = vadd.f32 %v2119_v55, %v1046_v63  ;;  %v1065_v57 = vpop.f32.mrf.mxu0  ;;  %8900 = vmatprep.mubr.msk.bf16.mxu1 %vm10940_vm2, %v10939_v0  ;;  %v10858_v63 = vld [vmem:[%s15034_s0 + $0x180] sm:$0xff]   ;;  %9239 = vmatpush3.bf16.msra.mxu1 %v10888_v23 }
 0x19a   :  { %v8802_v3 = vpop.f32.mrf.mxu1  ;;  %9240 = vmatprep.subr.bf16.mxu1 %v10939_v0 }
 0x19b   :  { %v11800_v6 = vpack.c.bf16 %v2613_v52, %v2612_v60  ;;  %v8549_v8 = vpop.f32.mrf.mxu0  ;;  %v2489_v2 = vadd.f32 %v11811_v10, %v2120_v1 }
 0x19c   :  { %v2122_v9 = vpop.f32.mrf.mxu1  ;;  %v10862_v8 = vld [vmem:[%s15034_s0 + $0x190] sm:$0xff]  }
 0x19d   :  { %v2123_v14 = vadd.f32 %v2122_v9, %v1049_v7  ;;  %v1070_v17 = vpop.f32.mrf.mxu0  ;;  %8647 = vmatmul.mubr.msk.bf16.gmra.mxu0 %vm638_vm3, %v10857_v51  ;;  %v2614_v13 = vmax.f32 %v2489_v2, 0.0 }
 0x19e   :  { %v8803_v19 = vpop.f32.mrf.mxu1  ;;  %8650 = vmatprep.mubr.msk.bf16.mxu0 %vm10940_vm2, %v10939_v0 }
 0x19f   :  { %v2490_v20 = vadd.f32 %v11811_v10, %v2123_v14  ;;  %v8552_v24 = vpop.f32.mrf.mxu0 }
 0x1a0   :  { %v2127_v11 = vpop.f32.mrf.mxu1  ;;  %8901 = vmatmul.mubr.msk.bf16.gmra.mxu1 %vm1704_vm4, %v10858_v63 }
 0x1a1   :  { %v2615_v28 = vmax.f32 %v2490_v20, 0.0  ;;  %v2128_v31 = vadd.f32 %v2127_v11, %v1054_v26  ;;  %v1073_v7 = vpop.f32.mrf.mxu0  ;;  %8904 = vmatprep.mubr.msk.bf16.mxu1 %vm10940_vm2, %v10939_v0 }
 0x1a2   :  { %v8806_v33 = vpop.f32.mrf.mxu1 }
 0x1a3   :  { %v11825_v34 = vpack.c.bf16 %v2615_v28, %v2614_v13  ;;  %v8553_v29 = vpop.f32.mrf.mxu0  ;;  %v2491_v44 = vadd.f32 %v11811_v10, %v2128_v31 }
 0x1a4   :  { %v2130_v27 = vpop.f32.mrf.mxu1  ;;  %v10864_v29 = vld [vmem:[%s15034_s0 + $0x198] sm:$0xff]  }
 0x1a5   :  { %v2131_v26 = vadd.f32 %v2130_v27, %v1057_v37  ;;  %v1078_v46 = vpop.f32.mrf.mxu0  ;;  %8651 = vmatmul.mubr.msk.bf16.gmra.mxu0 %vm638_vm3, %v10859_v32  ;;  %v2616_v54 = vmax.f32 %v2491_v44, 0.0  ;;  %v10861_v37 = vld [vmem:[%s15032_s1 + $0x1a0] sm:$0xff]  }
 0x1a6   :  { %v8807_v49 = vpop.f32.mrf.mxu1  ;;  %8654 = vmatprep.mubr.msk.bf16.mxu0 %vm10940_vm2, %v10939_v0 }
 0x1a7   :  { %v2492_v50 = vadd.f32 %v11811_v10, %v2131_v26  ;;  %v8556_v42 = vpop.f32.mrf.mxu0 }
 0x1a8   :  { %v2135_v36 = vpop.f32.mrf.mxu1  ;;  %8905 = vmatmul.mubr.msk.bf16.gmra.mxu1 %vm1704_vm4, %v10860_v40 }
 0x1a9   :  { %v2617_v56 = vmax.f32 %v2492_v50, 0.0  ;;  %v2136_v55 = vadd.f32 %v2135_v36, %v1062_v47  ;;  %v1081_v60 = vpop.f32.mrf.mxu0  ;;  %8908 = vmatprep.mubr.msk.bf16.mxu1 %vm10940_vm2, %v10939_v0 }
 0x1aa   :  { %v8810_v52 = vpop.f32.mrf.mxu1 }
 0x1ab   :  { %v11841_v1 = vpack.c.bf16 %v2617_v56, %v2616_v54  ;;  %v8557_v51 = vpop.f32.mrf.mxu0  ;;  %v2493_v23 = vadd.f32 %v11811_v10, %v2136_v55 }
 0x1ac   :  { %v2138_v3 = vpop.f32.mrf.mxu1 }
 0x1ad   :  { %v2139_v47 = vadd.f32 %v2138_v3, %v1065_v57  ;;  %v1086_v9 = vpop.f32.mrf.mxu0  ;;  %8655 = vmatmul.mubr.msk.bf16.gmra.mxu0 %vm638_vm3, %v10861_v37  ;;  %v2618_v20 = vmax.f32 %v2493_v23, 0.0  ;;  %v10863_v57 = vld [vmem:[%s15032_s1 + $0x1a8] sm:$0xff]   ;;  %v10866_v3 = vld [vmem:[%s15034_s0 + $0x1a0] sm:$0xff]  }
 0x1ae   :  { %v8811_v63 = vpop.f32.mrf.mxu1  ;;  %8658 = vmatprep.mubr.msk.bf16.mxu0 %vm10940_vm2, %v10939_v0 }
 0x1af   :  { %v2494_v2 = vadd.f32 %v11811_v10, %v2139_v47  ;;  %v8560_v14 = vpop.f32.mrf.mxu0 }
 0x1b0   :  { %v2143_v19 = vpop.f32.mrf.mxu1  ;;  %8909 = vmatmul.mubr.msk.bf16.gmra.mxu1 %vm1704_vm4, %v10862_v8 }
 0x1b1   :  { %v2619_v24 = vmax.f32 %v2494_v2, 0.0  ;;  %v2144_v11 = vadd.f32 %v2143_v19, %v1070_v17  ;;  %v1089_v13 = vpop.f32.mrf.mxu0  ;;  %8912 = vmatprep.mubr.msk.bf16.mxu1 %vm10940_vm2, %v10939_v0 }
 0x1b2   :  { %v8814_v28 = vpop.f32.mrf.mxu1 }
 0x1b3   :  { %v11857_v31 = vpack.c.bf16 %v2619_v24, %v2618_v20  ;;  %v8561_v32 = vpop.f32.mrf.mxu0  ;;  %v2495_v27 = vadd.f32 %v11811_v10, %v2144_v11 }
 0x1b4   :  { %v2146_v33 = vpop.f32.mrf.mxu1 }
 0x1b5   :  { %v2147_v17 = vadd.f32 %v2146_v33, %v1073_v7  ;;  %v1094_v40 = vpop.f32.mrf.mxu0  ;;  %8659 = vmatmul.mubr.msk.bf16.gmra.mxu0 %vm638_vm3, %v10863_v57  ;;  %v2620_v42 = vmax.f32 %v2495_v27, 0.0  ;;  %v10865_v7 = vld [vmem:[%s15032_s1 + $0x1b0] sm:$0xff]  }
 0x1b6   :  { %v8815_v44 = vpop.f32.mrf.mxu1  ;;  %8662 = vmatprep.mubr.msk.bf16.mxu0 %vm10940_vm2, %v10939_v0 }
 0x1b7   :  { %v2496_v26 = vadd.f32 %v11811_v10, %v2147_v17  ;;  %v8564_v49 = vpop.f32.mrf.mxu0 }
 0x1b8   :  { %v2151_v50 = vpop.f32.mrf.mxu1  ;;  %8913 = vmatmul.mubr.msk.bf16.gmra.mxu1 %vm1704_vm4, %v10864_v29  ;;  %v10868_v29 = vld [vmem:[%s15034_s0 + $0x1a8] sm:$0xff]  }
 0x1b9   :  { %v2621_v36 = vmax.f32 %v2496_v26, 0.0  ;;  %v2152_v54 = vadd.f32 %v2151_v50, %v1078_v46  ;;  %v1097_v56 = vpop.f32.mrf.mxu0  ;;  %8916 = vmatprep.mubr.msk.bf16.mxu1 %vm10940_vm2, %v10939_v0 }
 0x1ba   :  { %v8818_v55 = vpop.f32.mrf.mxu1 }
 0x1bb   :  { %v11873_v37 = vpack.c.bf16 %v2621_v36, %v2620_v42  ;;  %v8565_v52 = vpop.f32.mrf.mxu0  ;;  %v2497_v8 = vadd.f32 %v11811_v10, %v2152_v54 }
 0x1bc   :  { %v2154_v51 = vpop.f32.mrf.mxu1 }
 0x1bd   :  { %v2155_v46 = vadd.f32 %v2154_v51, %v1081_v60  ;;  %v1102_v23 = vpop.f32.mrf.mxu0  ;;  %8663 = vmatmul.mubr.msk.bf16.gmra.mxu0 %vm638_vm3, %v10865_v7  ;;  %v2622_v19 = vmax.f32 %v2497_v8, 0.0  ;;  %v10867_v60 = vld [vmem:[%s15032_s1 + $0x1b8] sm:$0xff]   ;;  %v10871_v8 = vld [vmem:[%s15034_s0 + $0x1b0] sm:$0xff]  }
 0x1be   :  { %v8819_v47 = vpop.f32.mrf.mxu1  ;;  %8666 = vmatprep.mubr.msk.bf16.mxu0 %vm10940_vm2, %v10939_v0 }
 0x1bf   :  { %v2498_v63 = vadd.f32 %v11811_v10, %v2155_v46  ;;  %v8568_v2 = vpop.f32.mrf.mxu0 }
 0x1c0   :  { %v2159_v14 = vpop.f32.mrf.mxu1  ;;  %8917 = vmatmul.mubr.msk.bf16.gmra.mxu1 %vm1704_vm4, %v10866_v3 }
 0x1c1   :  { %v2623_v20 = vmax.f32 %v2498_v63, 0.0  ;;  %v2160_v24 = vadd.f32 %v2159_v14, %v1086_v9  ;;  %v1105_v11 = vpop.f32.mrf.mxu0  ;;  %8920 = vmatprep.mubr.msk.bf16.mxu1 %vm10940_vm2, %v10939_v0 }
 0x1c2   :  { %v8822_v57 = vpop.f32.mrf.mxu1 }
 0x1c3   :  { %v11889_v28 = vpack.c.bf16 %v2623_v20, %v2622_v19  ;;  %v8569_v32 = vpop.f32.mrf.mxu0  ;;  %v2499_v27 = vadd.f32 %v11811_v10, %v2160_v24 }
 0x1c4   :  { %v2162_v33 = vpop.f32.mrf.mxu1 }
 0x1c5   :  { %v2163_v9 = vadd.f32 %v2162_v33, %v1089_v13  ;;  %v1110_v17 = vpop.f32.mrf.mxu0  ;;  %8667 = vmatmul.mubr.msk.bf16.gmra.mxu0 %vm638_vm3, %v10867_v60  ;;  %v2624_v42 = vmax.f32 %v2499_v27, 0.0  ;;  %v10870_v13 = vld [vmem:[%s15032_s1 + $0x1c0] sm:$0xff]  }
 0x1c6   :  { %v8823_v44 = vpop.f32.mrf.mxu1  ;;  %8670 = vmatprep.mubr.msk.bf16.mxu0 %vm10940_vm2, %v10939_v0 }
 0x1c7   :  { %v2500_v26 = vadd.f32 %v11811_v10, %v2163_v9  ;;  %v8572_v49 = vpop.f32.mrf.mxu0  ;;  %v10874_v9 = vld [vmem:[%s15034_s0 + $0x1b8] sm:$0xff]  }
 0x1c8   :  { %v2167_v50 = vpop.f32.mrf.mxu1  ;;  %8921 = vmatmul.mubr.msk.bf16.gmra.mxu1 %vm1704_vm4, %v10868_v29 }
 0x1c9   :  { %v2625_v36 = vmax.f32 %v2500_v26, 0.0  ;;  %v2168_v54 = vadd.f32 %v2167_v50, %v1094_v40  ;;  %v1113_v7 = vpop.f32.mrf.mxu0  ;;  %8924 = vmatprep.mubr.msk.bf16.mxu1 %vm10940_vm2, %v10939_v0 }
 0x1ca   :  { %v8826_v55 = vpop.f32.mrf.mxu1 }
 0x1cb   :  { %v11905_v52 = vpack.c.bf16 %v2625_v36, %v2624_v42  ;;  %v8573_v51 = vpop.f32.mrf.mxu0  ;;  %v2501_v46 = vadd.f32 %v11811_v10, %v2168_v54 }
 0x1cc   :  { %v2170_v3 = vpop.f32.mrf.mxu1 }
 0x1cd   :  { %v2171_v40 = vadd.f32 %v2170_v3, %v1097_v56  ;;  %v1118_v47 = vpop.f32.mrf.mxu0  ;;  %8671 = vmatmul.mubr.msk.bf16.gmra.mxu0 %vm638_vm3, %v10870_v13  ;;  %v2626_v20 = vmax.f32 %v2501_v46, 0.0  ;;  %v10872_v56 = vld [vmem:[%s15032_s1 + $0x1c8] sm:$0xff]  }
 0x1ce   :  { %v8827_v63 = vpop.f32.mrf.mxu1  ;;  %8674 = vmatprep.mubr.msk.bf16.mxu0 %vm10940_vm2, %v10939_v0 }
 0x1cf   :  { %v2502_v2 = vadd.f32 %v11811_v10, %v2171_v40  ;;  %v8576_v14 = vpop.f32.mrf.mxu0  ;;  %v10890_v40 = vld [vmem:[%s15035_s7 + $0x8] sm:$0xff]  }
 0x1d0   :  { %v2175_v19 = vpop.f32.mrf.mxu1  ;;  %8925 = vmatmul.mubr.msk.bf16.gmra.mxu1 %vm1704_vm4, %v10871_v8 }
 0x1d1   :  { %v2627_v24 = vmax.f32 %v2502_v2, 0.0  ;;  %v2176_v60 = vadd.f32 %v2175_v19, %v1102_v23  ;;  %v1121_v57 = vpop.f32.mrf.mxu0  ;;  %8928 = vmatprep.mubr.msk.bf16.mxu1 %vm10940_vm2, %v10939_v0  ;;  %9241 = vmatpush3.bf16.msra.mxu1 %v10890_v40 }
 0x1d2   :  { %v8830_v32 = vpop.f32.mrf.mxu1  ;;  %9242 = vmatprep.subr.bf16.mxu1 %v10939_v0 }
 0x1d3   :  { %v11921_v33 = vpack.c.bf16 %v2627_v24, %v2626_v20  ;;  %v8577_v29 = vpop.f32.mrf.mxu0  ;;  %v2503_v44 = vadd.f32 %v11811_v10, %v2176_v60 }
 0x1d4   :  { %v2178_v27 = vpop.f32.mrf.mxu1 }
 0x1d5   :  { %v2179_v23 = vadd.f32 %v2178_v27, %v1105_v11  ;;  %v1126_v26 = vpop.f32.mrf.mxu0  ;;  %8675 = vmatmul.mubr.msk.bf16.gmra.mxu0 %vm638_vm3, %v10872_v56  ;;  %v2628_v54 = vmax.f32 %v2503_v44, 0.0  ;;  %v10875_v11 = vld [vmem:[%s15032_s1 + $0x1d0] sm:$0xff]  }
 0x1d6   :  { %v8831_v49 = vpop.f32.mrf.mxu1  ;;  %8678 = vmatprep.mubr.msk.bf16.mxu0 %vm10940_vm2, %v10939_v0 }
 0x1d7   :  { %v2504_v50 = vadd.f32 %v11811_v10, %v2179_v23  ;;  %v8580_v42 = vpop.f32.mrf.mxu0 }
 0x1d8   :  { %v2183_v36 = vpop.f32.mrf.mxu1  ;;  %8929 = vmatmul.mubr.msk.bf16.gmra.mxu1 %vm1704_vm4, %v10874_v9  ;;  %v10877_v9 = vld [vmem:[%s15032_s1 + $0x1d8] sm:$0xff]   ;;  %v10878_v42 = vld [vmem:[%s15034_s0 + $0x1c8] sm:$0xff]  }
 0x1d9   :  { %v2629_v13 = vmax.f32 %v2504_v50, 0.0  ;;  %v2184_v55 = vadd.f32 %v2183_v36, %v1110_v17  ;;  %v1129_v51 = vpop.f32.mrf.mxu0  ;;  %8932 = vmatprep.mubr.msk.bf16.mxu1 %vm10940_vm2, %v10939_v0  ;;  %v10876_v17 = vld [vmem:[%s15034_s0 + $0x1c0] sm:$0xff]  }
 0x1da   :  { %v8834_v3 = vpop.f32.mrf.mxu1 }
 0x1db   :  { %v11937_v8 = vpack.c.bf16 %v2629_v13, %v2628_v54  ;;  %v8581_v46 = vpop.f32.mrf.mxu0  ;;  %v2505_v2 = vadd.f32 %v11811_v10, %v2184_v55 }
 0x1dc   :  { %v2186_v63 = vpop.f32.mrf.mxu1 }
 0x1dd   :  { %v2187_v14 = vadd.f32 %v2186_v63, %v1113_v7  ;;  %v1134_v19 = vpop.f32.mrf.mxu0  ;;  %8679 = vmatmul.mubr.msk.bf16.gmra.mxu0 %vm638_vm3, %v10875_v11  ;;  %v2630_v32 = vmax.f32 %v2505_v2, 0.0 }
 0x1de   :  { %v8835_v20 = vpop.f32.mrf.mxu1  ;;  %8682 = vmatprep.mubr.msk.bf16.mxu0 %vm10940_vm2, %v10939_v0 }
 0x1df   :  { %v2506_v24 = vadd.f32 %v11811_v10, %v2187_v14  ;;  %v8584_v60 = vpop.f32.mrf.mxu0 }
 0x1e0   :  { %v2191_v56 = vpop.f32.mrf.mxu1  ;;  %8933 = vmatmul.mubr.msk.bf16.gmra.mxu1 %vm1704_vm4, %v10876_v17  ;;  %v10880_v60 = vld [vmem:[%s15034_s0 + $0x1d0] sm:$0xff]  }
 0x1e1   :  { %v2631_v29 = vmax.f32 %v2506_v24, 0.0  ;;  %v2192_v27 = vadd.f32 %v2191_v56, %v1118_v47  ;;  %v1137_v7 = vpop.f32.mrf.mxu0  ;;  %8936 = vmatprep.mubr.msk.bf16.mxu1 %vm10940_vm2, %v10939_v0 }
 0x1e2   :  { %v8838_v44 = vpop.f32.mrf.mxu1 }
 0x1e3   :  { %v11957_v23 = vpack.c.bf16 %v2631_v29, %v2630_v32  ;;  %v8585_v49 = vpop.f32.mrf.mxu0  ;;  %v2507_v36 = vadd.f32 %v11811_v10, %v2192_v27 }
 0x1e4   :  { %v2194_v50 = vpop.f32.mrf.mxu1 }
 0x1e5   :  { %v2195_v47 = vadd.f32 %v2194_v50, %v1121_v57  ;;  %v1142_v54 = vpop.f32.mrf.mxu0  ;;  %8683 = vmatmul.mubr.msk.bf16.gmra.mxu0 %vm638_vm3, %v10877_v9  ;;  %v2632_v46 = vmax.f32 %v2507_v36, 0.0  ;;  %v10879_v57 = vld [vmem:[%s15032_s1 + $0x1e0] sm:$0xff]  }
 0x1e6   :  { %v8839_v13 = vpop.f32.mrf.mxu1  ;;  %8686 = vmatprep.mubr.msk.bf16.mxu0 %vm10940_vm2, %v10939_v0 }
 0x1e7   :  { %v2508_v55 = vadd.f32 %v11811_v10, %v2195_v47  ;;  %v8588_v11 = vpop.f32.mrf.mxu0 }
 0x1e8   :  { %v2199_v3 = vpop.f32.mrf.mxu1  ;;  %8937 = vmatmul.mubr.msk.bf16.gmra.mxu1 %vm1704_vm4, %v10878_v42 }
 0x1e9   :  { %v2633_v40 = vmax.f32 %v2508_v55, 0.0  ;;  %v2200_v63 = vadd.f32 %v2199_v3, %v1126_v26  ;;  %v1145_v17 = vpop.f32.mrf.mxu0  ;;  %8940 = vmatprep.mubr.msk.bf16.mxu1 %vm10940_vm2, %v10939_v0  ;;  %v10882_v3 = vld [vmem:[%s15034_s0 + $0x1d8] sm:$0xff]  }
 0x1ea   :  { %v8842_v2 = vpop.f32.mrf.mxu1 }
 0x1eb   :  { %v11973_v14 = vpack.c.bf16 %v2633_v40, %v2632_v46  ;;  %v8589_v20 = vpop.f32.mrf.mxu0  ;;  %v2509_v56 = vadd.f32 %v11811_v10, %v2200_v63 }
 0x1ec   :  { %v2202_v24 = vpop.f32.mrf.mxu1 }
 0x1ed   :  { %v2203_v26 = vadd.f32 %v2202_v24, %v1129_v51  ;;  %v1150_v32 = vpop.f32.mrf.mxu0  ;;  %8687 = vmatmul.mubr.msk.bf16.gmra.mxu0 %vm638_vm3, %v10879_v57  ;;  %v2634_v49 = vmax.f32 %v2509_v56, 0.0  ;;  %v10881_v51 = vld [vmem:[%s15032_s1 + $0x1e8] sm:$0xff]  }
 0x1ee   :  { %v8843_v29 = vpop.f32.mrf.mxu1  ;;  %8690 = vmatprep.mubr.msk.bf16.mxu0 %vm10940_vm2, %v10939_v0 }
 0x1ef   :  { %v2510_v27 = vadd.f32 %v11811_v10, %v2203_v26  ;;  %v8592_v9 = vpop.f32.mrf.mxu0 }
 0x1f0   :  { %v2207_v44 = vpop.f32.mrf.mxu1  ;;  %8941 = vmatmul.mubr.msk.bf16.gmra.mxu1 %vm1704_vm4, %v10880_v60 }
 0x1f1   :  { %v2635_v50 = vmax.f32 %v2510_v27, 0.0  ;;  %v2208_v42 = vadd.f32 %v2207_v44, %v1134_v19  ;;  %v1153_v36 = vpop.f32.mrf.mxu0  ;;  %8944 = vmatprep.mubr.msk.bf16.mxu1 %vm10940_vm2, %v10939_v0 }
 0x1f2   :  { %v8846_v47 = vpop.f32.mrf.mxu1 }
 0x1f3   :  { %v11989_v13 = vpack.c.bf16 %v2635_v50, %v2634_v49  ;;  %v8593_v55 = vpop.f32.mrf.mxu0  ;;  %v2511_v46 = vadd.f32 %v11811_v10, %v2208_v42  ;;  %v10884_v49 = vld [vmem:[%s15034_s0 + $0x1e0] sm:$0xff]  }
 0x1f4   :  { %v2210_v11 = vpop.f32.mrf.mxu1 }
 0x1f5   :  { %v2211_v19 = vadd.f32 %v2210_v11, %v1137_v7  ;;  %v1158_v40 = vpop.f32.mrf.mxu0  ;;  %8691 = vmatmul.mubr.msk.bf16.gmra.mxu0 %vm638_vm3, %v10881_v51  ;;  %v2636_v24 = vmax.f32 %v2511_v46, 0.0  ;;  %v10883_v7 = vld [vmem:[%s15032_s1 + $0x1f0] ss:$0 sps:$4 sm:$0xff]  }
 0x1f6   :  { %v8847_v63 = vpop.f32.mrf.mxu1  ;;  %8694 = vmatprep.mubr.msk.bf16.mxu0 %vm10940_vm2, %v10939_v0 }
 0x1f7   :  { %v2512_v57 = vadd.f32 %v11811_v10, %v2211_v19  ;;  %v8596_v2 = vpop.f32.mrf.mxu0 }
 0x1f8   :  { %v2215_v20 = vpop.f32.mrf.mxu1  ;;  %8945 = vmatmul.mubr.msk.bf16.gmra.mxu1 %vm1704_vm4, %v10882_v3 }
 0x1f9   :  { %v2637_v60 = vmax.f32 %v2512_v57, 0.0  ;;  %v2216_v56 = vadd.f32 %v2215_v20, %v1142_v54  ;;  %v1161_v26 = vpop.f32.mrf.mxu0  ;;  %8948 = vmatprep.mubr.msk.bf16.mxu1 %vm10940_vm2, %v10939_v0  ;;  %v10885_v57 = vld [vmem:[%s15037_s9 + $0x38] sm:$0xff]  }
 0x1fa   :  { %v8850_v29 = vpop.f32.mrf.mxu1 }
 0x1fb   :  { %v12005_v27 = vpack.c.bf16 %v2637_v60, %v2636_v24  ;;  %v8597_v9 = vpop.f32.mrf.mxu0  ;;  %v2513_v50 = vadd.f32 %v11811_v10, %v2216_v56  ;;  %v10886_v60 = vld [vmem:[%s15034_s0 + $0x1e8] sm:$0xff]  }
 0x1fc   :  { %v2218_v44 = vpop.f32.mrf.mxu1  ;;  %v10889_v9 = vld [vmem:[%s15037_s9 + $0x30] sm:$0xff]  }
 0x1fd   :  { %v2219_v54 = vadd.f32 %v2218_v44, %v1145_v17  ;;  %v1166_v42 = vpop.f32.mrf.mxu0  ;;  %8695 = vmatmul.mubr.msk.bf16.gmra.mxu0 %vm638_vm3, %v10883_v7  ;;  %v2638_v3 = vmax.f32 %v2513_v50, 0.0 }
 0x1fe   :  { %v8851_v51 = vpop.f32.mrf.mxu1  ;;  %8976 = vmatprep.mubr.msk.bf16.mxu0 %vm10940_vm2, %v10939_v0 }
 0x1ff   :  { %v2514_v47 = vadd.f32 %v11811_v10, %v2219_v54  ;;  %v8600_v55 = vpop.f32.mrf.mxu0 }
 0x200   :  { %v2223_v11 = vpop.f32.mrf.mxu1  ;;  %8949 = vmatmul.mubr.msk.bf16.gmra.mxu1 %vm1704_vm4, %v10884_v49 }
 0x201   :  { %v2639_v46 = vmax.f32 %v2514_v47, 0.0  ;;  %v2224_v19 = vadd.f32 %v2223_v11, %v1150_v32  ;;  %v1169_v63 = vpop.f32.mrf.mxu0  ;;  %8952 = vmatprep.mubr.msk.bf16.mxu1 %vm10940_vm2, %v10939_v0 }
 0x202   :  { %v8854_v17 = vpop.f32.mrf.mxu1 }
 0x203   :  { %v12021_v2 = vpack.c.bf16 %v2639_v46, %v2638_v3  ;;  %v8601_v20 = vpop.f32.mrf.mxu0  ;;  %v2515_v56 = vadd.f32 %v11811_v10, %v2224_v19  ;;  %v10891_v3 = vld [vmem:[%s15037_s9 + $0x28] sm:$0xff]  }
 0x204   :  { %v2226_v24 = vpop.f32.mrf.mxu1 }
 0x205   :  { %v2227_v32 = vadd.f32 %v2226_v24, %v1153_v36  ;;  %v1174_v7 = vpop.f32.mrf.mxu0  ;;  %8977 = vmatmul.mubr.bf16.vlgmr.msra.gmra.mxu0 %v11432_v41  ;;  %v2640_v36 = vmax.f32 %v2515_v56, 0.0 }
 0x206   :  { %v8855_v29 = vpop.f32.mrf.mxu1  ;;  %9497 = vmatpush3.bf16.msra.mxu0 %v10885_v57  ;;  %8980 = vmatprep.mubr.msk.bf16.mxu0 %vm10940_vm2, %v10939_v0 }
 0x207   :  { %v2516_v44 = vadd.f32 %v11811_v10, %v2227_v32  ;;  %v8604_v49 = vpop.f32.mrf.mxu0  ;;  %9498 = vmatprep.subr.bf16.mxu0 %v10939_v0 }
 0x208   :  { %v2231_v50 = vpop.f32.mrf.mxu1  ;;  %8953 = vmatmul.mubr.msk.bf16.gmra.mxu1 %vm1704_vm4, %v10886_v60 }
 0x209   :  { %v2641_v54 = vmax.f32 %v2516_v44, 0.0  ;;  %v2232_v41 = vadd.f32 %v2231_v50, %v1158_v40  ;;  %v1177_v51 = vpop.f32.mrf.mxu0  ;;  %8956 = vmatprep.mubr.msk.bf16.mxu1 %vm10940_vm2, %v10939_v0  ;;  %v10887_v40 = vld [vmem:[%s15034_s0 + $0x1f0] ss:$0 sps:$4 sm:$0xff]  }
 0x20a   :  { %v8858_v47 = vpop.f32.mrf.mxu1  ;;  %9499 = vmatpush3.bf16.msra.mxu0 %v10889_v9 }
 0x20b   :  { %v12038_v55 = vpack.c.bf16 %v2641_v54, %v2640_v36  ;;  %v8605_v11 = vpop.f32.mrf.mxu0  ;;  %9500 = vmatprep.subr.bf16.mxu0 %v10939_v0  ;;  %v2517_v19 = vadd.f32 %v11811_v10, %v2232_v41  ;;  %v10892_v47 = vld [vmem:[%s15035_s7] sm:$0xff]  }
 0x20c   :  { %v2234_v46 = vpop.f32.mrf.mxu1  ;;  %9243 = vmatpush3.bf16.msra.mxu1 %v10892_v47 }
 0x20d   :  { %v2235_v17 = vadd.f32 %v2234_v46, %v1161_v26  ;;  %v1182_v57 = vpop.f32.mrf.mxu0  ;;  %8981 = vmatmul.mubr.bf16.gmra.mxu0 %v11448_v58  ;;  %v2642_v32 = vmax.f32 %v2517_v19, 0.0  ;;  %9764 = vmatprep.subr.bf16.mxu1 %v10939_v0 }
 0x20e   :  { %v8859_v20 = vpop.f32.mrf.mxu1  ;;  %8984 = vmatprep.mubr.msk.bf16.mxu0 %vm10940_vm2, %v10939_v0  ;;  %9501 = vmatpush3.bf16.msra.mxu0 %v10891_v3 }
 0x20f   :  { %v2518_v24 = vadd.f32 %v11811_v10, %v2235_v17  ;;  %v8608_v60 = vpop.f32.mrf.mxu0  ;;  %9502 = vmatprep.subr.bf16.mxu0 %v10939_v0 }
 0x210   :  { %v2239_v56 = vpop.f32.mrf.mxu1  ;;  %8957 = vmatmul.mubr.msk.bf16.gmra.mxu1 %vm1704_vm4, %v10887_v40 }
 0x211   :  { %v2643_v29 = vmax.f32 %v2518_v24, 0.0  ;;  %v2240_v9 = vadd.f32 %v2239_v56, %v1166_v42  ;;  %v1185_v26 = vpop.f32.mrf.mxu0  ;;  %9244 = vmatprep.mubr.msk.bf16.mxu1 %vm10940_vm2, %v10939_v0 }
 0x212   :  { %v8862_v58 = vpop.f32.mrf.mxu1 }
 0x213   :  { %v12056_v44 = vpack.c.bf16 %v2643_v29, %v2642_v32  ;;  %v8609_v49 = vpop.f32.mrf.mxu0  ;;  %v2519_v36 = vadd.f32 %v11811_v10, %v2240_v9 }
 0x214   :  { %v2242_v50 = vpop.f32.mrf.mxu1 }
 0x215   :  { %v2243_v54 = vadd.f32 %v2242_v50, %v1169_v63  ;;  %v1190_v41 = vpop.f32.mrf.mxu0  ;;  %8985 = vmatmul.mubr.bf16.gmra.mxu0 %v11464_v12  ;;  %v2644_v40 = vmax.f32 %v2519_v36, 0.0 }
 0x216   :  { %v8863_v42 = vpop.f32.mrf.mxu1  ;;  %8988 = vmatprep.mubr.msk.bf16.mxu0 %vm10940_vm2, %v10939_v0 }
 0x217   :  { %v2520_v11 = vadd.f32 %v11811_v10, %v2243_v54  ;;  %v8612_v3 = vpop.f32.mrf.mxu0 }
 0x218   :  { %v2247_v46 = vpop.f32.mrf.mxu1 }
 0x219   :  { %v2645_v63 = vmax.f32 %v2520_v11, 0.0  ;;  %v2248_v19 = vadd.f32 %v2247_v46, %v1174_v7  ;;  %v1193_v17 = vpop.f32.mrf.mxu0 }
 0x21a   :  { %v8866_v12 = vpop.f32.mrf.mxu1 }
 0x21b   :  { %v12067_v20 = vpack.c.bf16 %v2645_v63, %v2644_v40  ;;  %v8613_v24 = vpop.f32.mrf.mxu0  ;;  %v2521_v56 = vadd.f32 %v11811_v10, %v2248_v19 }
 0x21c   :  { %v2250_v60 = vpop.f32.mrf.mxu1 }
 0x21d   :  { %v2251_v32 = vadd.f32 %v2250_v60, %v1177_v51  ;;  %v1198_v29 = vpop.f32.mrf.mxu0  ;;  %8989 = vmatmul.mubr.bf16.gmra.mxu0 %v11480_v30  ;;  %v2646_v50 = vmax.f32 %v2521_v56, 0.0 }
 0x21e   :  { %v8867_v9 = vpop.f32.mrf.mxu1  ;;  %8992 = vmatprep.mubr.msk.bf16.mxu0 %vm10940_vm2, %v10939_v0 }
 0x21f   :  { %v2522_v58 = vadd.f32 %v11811_v10, %v2251_v32  ;;  %v8616_v49 = vpop.f32.mrf.mxu0 }
 0x220   :  { %v2255_v7 = vpop.f32.mrf.mxu1 }
 0x221   :  { %v2647_v36 = vmax.f32 %v2522_v58, 0.0  ;;  %v2256_v54 = vadd.f32 %v2255_v7, %v1182_v57  ;;  %v1201_v47 = vpop.f32.mrf.mxu0 }
 0x222   :  { %v8870_v42 = vpop.f32.mrf.mxu1 }
 0x223   :  { %v12074_v11 = vpack.c.bf16 %v2647_v36, %v2646_v50  ;;  %v8617_v3 = vpop.f32.mrf.mxu0  ;;  %v2523_v46 = vadd.f32 %v11811_v10, %v2256_v54 }
 0x224   :  { %v2258_v51 = vpop.f32.mrf.mxu1 }
 0x225   :  { %v2259_v30 = vadd.f32 %v2258_v51, %v1185_v26  ;;  %v1206_v40 = vpop.f32.mrf.mxu0  ;;  %8993 = vmatmul.mubr.bf16.gmra.mxu0 %v11496_v48  ;;  %v2648_v24 = vmax.f32 %v2523_v46, 0.0 }
 0x226   :  { %v8871_v63 = vpop.f32.mrf.mxu1  ;;  %8996 = vmatprep.mubr.msk.bf16.mxu0 %vm10940_vm2, %v10939_v0 }
 0x227   :  { %v2524_v19 = vadd.f32 %v11811_v10, %v2259_v30  ;;  %v8620_v12 = vpop.f32.mrf.mxu0 }
 0x228   :  { %v2263_v57 = vpop.f32.mrf.mxu1 }
 0x229   :  { %v2649_v60 = vmax.f32 %v2524_v19, 0.0  ;;  %v2264_v56 = vadd.f32 %v2263_v57, %v1190_v41  ;;  %v1209_v32 = vpop.f32.mrf.mxu0 }
 0x22a   :  { %v8874_v9 = vpop.f32.mrf.mxu1 }
 0x22b   :  { %v12081_v58 = vpack.c.bf16 %v2649_v60, %v2648_v24  ;;  %v8621_v49 = vpop.f32.mrf.mxu0  ;;  %v2525_v7 = vadd.f32 %v11811_v10, %v2264_v56 }
 0x22c   :  { %v2266_v26 = vpop.f32.mrf.mxu1 }
 0x22d   :  { %v2267_v48 = vadd.f32 %v2266_v26, %v1193_v17  ;;  %v1214_v50 = vpop.f32.mrf.mxu0  ;;  %8997 = vmatmul.mubr.bf16.gmra.mxu0 %v11516_v4  ;;  %v2650_v3 = vmax.f32 %v2525_v7, 0.0 }
 0x22e   :  { %v8875_v36 = vpop.f32.mrf.mxu1  ;;  %9000 = vmatprep.mubr.msk.bf16.mxu0 %vm10940_vm2, %v10939_v0 }
 0x22f   :  { %v2526_v54 = vadd.f32 %v11811_v10, %v2267_v48  ;;  %v8624_v42 = vpop.f32.mrf.mxu0 }
 0x230   :  { %v2271_v41 = vpop.f32.mrf.mxu1 }
 0x231   :  { %v2651_v51 = vmax.f32 %v2526_v54, 0.0  ;;  %v2272_v46 = vadd.f32 %v2271_v41, %v1198_v29  ;;  %v1217_v30 = vpop.f32.mrf.mxu0 }
 0x232   :  { %v8878_v63 = vpop.f32.mrf.mxu1 }
 0x233   :  { %v12088_v19 = vpack.c.bf16 %v2651_v51, %v2650_v3  ;;  %v8625_v12 = vpop.f32.mrf.mxu0  ;;  %v2527_v57 = vadd.f32 %v11811_v10, %v2272_v46 }
 0x234   :  { %v2274_v17 = vpop.f32.mrf.mxu1 }
 0x235   :  { %v2275_v4 = vadd.f32 %v2274_v17, %v1201_v47  ;;  %v1222_v24 = vpop.f32.mrf.mxu0  ;;  %9001 = vmatmul.mubr.bf16.gmra.mxu0 %v11532_v22  ;;  %v2652_v49 = vmax.f32 %v2527_v57, 0.0 }
 0x236   :  { %v8879_v60 = vpop.f32.mrf.mxu1  ;;  %9004 = vmatprep.mubr.msk.bf16.mxu0 %vm10940_vm2, %v10939_v0 }
 0x237   :  { %v2528_v56 = vadd.f32 %v11811_v10, %v2275_v4  ;;  %v8628_v9 = vpop.f32.mrf.mxu0 }
 0x238   :  { %v2279_v29 = vpop.f32.mrf.mxu1 }
 0x239   :  { %v2653_v26 = vmax.f32 %v2528_v56, 0.0  ;;  %v2280_v7 = vadd.f32 %v2279_v29, %v1206_v40  ;;  %v1225_v48 = vpop.f32.mrf.mxu0 }
 0x23a   :  { %v8882_v36 = vpop.f32.mrf.mxu1 }
 0x23b   :  { %v12095_v54 = vpack.c.bf16 %v2653_v26, %v2652_v49  ;;  %v8629_v42 = vpop.f32.mrf.mxu0  ;;  %v2529_v41 = vadd.f32 %v11811_v10, %v2280_v7 }
 0x23c   :  { %v2282_v47 = vpop.f32.mrf.mxu1 }
 0x23d   :  { %v2283_v22 = vadd.f32 %v2282_v47, %v1209_v32  ;;  %v1230_v3 = vpop.f32.mrf.mxu0  ;;  %9005 = vmatmul.mubr.bf16.gmra.mxu0 %v11552_v43  ;;  %v2654_v12 = vmax.f32 %v2529_v41, 0.0 }
 0x23e   :  { %v8883_v51 = vpop.f32.mrf.mxu1  ;;  %9008 = vmatprep.mubr.msk.bf16.mxu0 %vm10940_vm2, %v10939_v0 }
 0x23f   :  { %v2530_v46 = vadd.f32 %v11811_v10, %v2283_v22  ;;  %v8632_v63 = vpop.f32.mrf.mxu0 }
 0x240   :  { %v2287_v40 = vpop.f32.mrf.mxu1 }
 0x241   :  { %v2655_v17 = vmax.f32 %v2530_v46, 0.0  ;;  %v2288_v57 = vadd.f32 %v2287_v40, %v1214_v50  ;;  %v1233_v4 = vpop.f32.mrf.mxu0 }
 0x242   :  { %v8886_v60 = vpop.f32.mrf.mxu1 }
 0x243   :  { %v12102_v56 = vpack.c.bf16 %v2655_v17, %v2654_v12  ;;  %v8633_v9 = vpop.f32.mrf.mxu0  ;;  %v2531_v29 = vadd.f32 %v11811_v10, %v2288_v57 }
 0x244   :  { %v2290_v32 = vpop.f32.mrf.mxu1 }
 0x245   :  { %v2291_v43 = vadd.f32 %v2290_v32, %v1217_v30  ;;  %v1238_v49 = vpop.f32.mrf.mxu0  ;;  %9009 = vmatmul.mubr.bf16.gmra.mxu0 %v11568_v62  ;;  %v2656_v42 = vmax.f32 %v2531_v29, 0.0  ;;  %v10893_v62 = vld [vmem:[%s15037_s9 + $0x20] sm:$0xff]  }
 0x246   :  { %v8887_v26 = vpop.f32.mrf.mxu1  ;;  %9012 = vmatprep.mubr.msk.bf16.mxu0 %vm10940_vm2, %v10939_v0  ;;  %9503 = vmatpush3.bf16.msra.mxu0 %v10893_v62 }
 0x247   :  { %v2532_v7 = vadd.f32 %v11811_v10, %v2291_v43  ;;  %v8636_v36 = vpop.f32.mrf.mxu0  ;;  %9504 = vmatprep.subr.bf16.mxu0 %v10939_v0 }
 0x248   :  { %v2295_v50 = vpop.f32.mrf.mxu1 }
 0x249   :  { %v2657_v47 = vmax.f32 %v2532_v7, 0.0  ;;  %v2296_v41 = vadd.f32 %v2295_v50, %v1222_v24  ;;  %v1241_v22 = vpop.f32.mrf.mxu0 }
 0x24a   :  { %v8890_v51 = vpop.f32.mrf.mxu1 }
 0x24b   :  { %v12109_v46 = vpack.c.bf16 %v2657_v47, %v2656_v42  ;;  %v8637_v63 = vpop.f32.mrf.mxu0  ;;  %v2533_v40 = vadd.f32 %v11811_v10, %v2296_v41 }
 0x24c   :  { %v2298_v30 = vpop.f32.mrf.mxu1 }
 0x24d   :  { %v2299_v12 = vadd.f32 %v2298_v30, %v1225_v48  ;;  %v1246_v17 = vpop.f32.mrf.mxu0  ;;  %9013 = vmatmul.mubr.bf16.gmra.mxu0 %v11584_v18  ;;  %v2658_v32 = vmax.f32 %v2533_v40, 0.0 }
 0x24e   :  { %v8891_v57 = vpop.f32.mrf.mxu1  ;;  %9016 = vmatprep.mubr.msk.bf16.mxu0 %vm10940_vm2, %v10939_v0 }
 0x24f   :  { %v2534_v24 = vadd.f32 %v11811_v10, %v2299_v12  ;;  %v8640_v60 = vpop.f32.mrf.mxu0 }
 0x250   :  { %v2303_v9 = vpop.f32.mrf.mxu1 }
 0x251   :  { %v2659_v29 = vmax.f32 %v2534_v24, 0.0  ;;  %v2304_v43 = vadd.f32 %v2303_v9, %v1230_v3  ;;  %v1249_v26 = vpop.f32.mrf.mxu0 }
 0x252   :  { %v8894_v7 = vpop.f32.mrf.mxu1 }
 0x253   :  { %v12120_v48 = vpack.c.bf16 %v2659_v29, %v2658_v32  ;;  %v8641_v36 = vpop.f32.mrf.mxu0  ;;  %v2535_v50 = vadd.f32 %v11811_v10, %v2304_v43 }
 0x254   :  { %v2306_v18 = vpop.f32.mrf.mxu1 }
 0x255   :  { %v2307_v42 = vadd.f32 %v2306_v18, %v1233_v4  ;;  %v1254_v47 = vpop.f32.mrf.mxu0  ;;  %9017 = vmatmul.mubr.bf16.gmra.mxu0 %v11600_v38  ;;  %v2660_v62 = vmax.f32 %v2535_v50, 0.0 }
 0x256   :  { %v8895_v41 = vpop.f32.mrf.mxu1  ;;  %9020 = vmatprep.mubr.msk.bf16.mxu0 %vm10940_vm2, %v10939_v0 }
 0x257   :  { %v2536_v51 = vadd.f32 %v11811_v10, %v2307_v42  ;;  %v8644_v63 = vpop.f32.mrf.mxu0 }
 0x258   :  { %v2311_v3 = vpop.f32.mrf.mxu1 }
 0x259   :  { %v2661_v30 = vmax.f32 %v2536_v51, 0.0  ;;  %v2312_v40 = vadd.f32 %v2311_v3, %v1238_v49  ;;  %v1257_v12 = vpop.f32.mrf.mxu0 }
 0x25a   :  { %v8898_v57 = vpop.f32.mrf.mxu1 }
 0x25b   :  { %v12127_v24 = vpack.c.bf16 %v2661_v30, %v2660_v62  ;;  %v8645_v60 = vpop.f32.mrf.mxu0  ;;  %v2537_v9 = vadd.f32 %v11811_v10, %v2312_v40 }
 0x25c   :  { %v2314_v4 = vpop.f32.mrf.mxu1 }
 0x25d   :  { %v2315_v38 = vadd.f32 %v2314_v4, %v1241_v22  ;;  %v1262_v32 = vpop.f32.mrf.mxu0  ;;  %9021 = vmatmul.mubr.bf16.gmra.mxu0 %v11616_v59  ;;  %v2662_v36 = vmax.f32 %v2537_v9, 0.0  ;;  %v12139_v59 = vld [vmem:[%s15036_s4] ss:$0 sm:$0xff] }
 0x25e   :  { %v8899_v29 = vpop.f32.mrf.mxu1  ;;  %9024 = vmatprep.mubr.msk.bf16.mxu0 %vm10940_vm2, %v10939_v0 }
 0x25f   :  { %v2538_v43 = vadd.f32 %v11811_v10, %v2315_v38  ;;  %v8648_v7 = vpop.f32.mrf.mxu0 }
 0x260   :  { %v2319_v49 = vpop.f32.mrf.mxu1 }
 0x261   :  { %v2663_v18 = vmax.f32 %v2538_v43, 0.0  ;;  %v2320_v50 = vadd.f32 %v2319_v49, %v1246_v17  ;;  %v1265_v42 = vpop.f32.mrf.mxu0 }
 0x262   :  { %v8902_v41 = vpop.f32.mrf.mxu1 }
 0x263   :  { %v12134_v51 = vpack.c.bf16 %v2663_v18, %v2662_v36  ;;  %v8649_v63 = vpop.f32.mrf.mxu0  ;;  %v2539_v3 = vadd.f32 %v12139_v59, %v2320_v50 }
 0x264   :  { %v2322_v22 = vpop.f32.mrf.mxu1 }
 0x265   :  { %v2323_v62 = vadd.f32 %v2322_v22, %v1249_v26  ;;  %v1270_v10 = vpop.f32.mrf.mxu0  ;;  %9025 = vmatmul.mubr.bf16.gmra.mxu0 %v11632_v16  ;;  %v2664_v60 = vmax.f32 %v2539_v3, 0.0 }
 0x266   :  { %v8903_v30 = vpop.f32.mrf.mxu1  ;;  %9028 = vmatprep.mubr.msk.bf16.mxu0 %vm10940_vm2, %v10939_v0 }
 0x267   :  { %v2540_v17 = vadd.f32 %v12139_v59, %v2323_v62  ;;  %v8652_v40 = vpop.f32.mrf.mxu0 }
 0x268   :  { %v2327_v57 = vpop.f32.mrf.mxu1 }
 0x269   :  { %v2665_v4 = vmax.f32 %v2540_v17, 0.0  ;;  %v2328_v9 = vadd.f32 %v2327_v57, %v1254_v47  ;;  %v1273_v38 = vpop.f32.mrf.mxu0 }
 0x26a   :  { %v8906_v29 = vpop.f32.mrf.mxu1 }
 0x26b   :  { %v12146_v43 = vpack.c.bf16 %v2665_v4, %v2664_v60  ;;  %v8653_v7 = vpop.f32.mrf.mxu0  ;;  %v2541_v49 = vadd.f32 %v12139_v59, %v2328_v9 }
 0x26c   :  { %v2330_v26 = vpop.f32.mrf.mxu1 }
 0x26d   :  { %v2331_v16 = vadd.f32 %v2330_v26, %v1257_v12  ;;  %v1278_v36 = vpop.f32.mrf.mxu0  ;;  %9029 = vmatmul.mubr.bf16.gmra.mxu0 %v11652_v39  ;;  %v2666_v63 = vmax.f32 %v2541_v49, 0.0 }
 0x26e   :  { %v8907_v18 = vpop.f32.mrf.mxu1  ;;  %9032 = vmatprep.mubr.msk.bf16.mxu0 %vm10940_vm2, %v10939_v0 }
 0x26f   :  { %v2542_v50 = vadd.f32 %v12139_v59, %v2331_v16  ;;  %v8656_v41 = vpop.f32.mrf.mxu0 }
 0x270   :  { %v2335_v47 = vpop.f32.mrf.mxu1 }
 0x271   :  { %v2667_v22 = vmax.f32 %v2542_v50, 0.0  ;;  %v2336_v3 = vadd.f32 %v2335_v47, %v1262_v32  ;;  %v1281_v62 = vpop.f32.mrf.mxu0 }
 0x272   :  { %v8910_v30 = vpop.f32.mrf.mxu1 }
 0x273   :  { %v12153_v17 = vpack.c.bf16 %v2667_v22, %v2666_v63  ;;  %v8657_v40 = vpop.f32.mrf.mxu0  ;;  %v2543_v57 = vadd.f32 %v12139_v59, %v2336_v3 }
 0x274   :  { %v2338_v12 = vpop.f32.mrf.mxu1 }
 0x275   :  { %v2339_v39 = vadd.f32 %v2338_v12, %v1265_v42  ;;  %v1286_v60 = vpop.f32.mrf.mxu0  ;;  %9033 = vmatmul.mubr.bf16.gmra.mxu0 %v11668_v61  ;;  %v2668_v7 = vmax.f32 %v2543_v57, 0.0 }
 0x276   :  { %v8911_v4 = vpop.f32.mrf.mxu1  ;;  %9036 = vmatprep.mubr.msk.bf16.mxu0 %vm10940_vm2, %v10939_v0 }
 0x277   :  { %v2544_v9 = vadd.f32 %v12139_v59, %v2339_v39  ;;  %v8660_v29 = vpop.f32.mrf.mxu0 }
 0x278   :  { %v2343_v32 = vpop.f32.mrf.mxu1 }
 0x279   :  { %v2669_v26 = vmax.f32 %v2544_v9, 0.0  ;;  %v2344_v49 = vadd.f32 %v2343_v32, %v1270_v10  ;;  %v1289_v16 = vpop.f32.mrf.mxu0 }
 0x27a   :  { %v8914_v18 = vpop.f32.mrf.mxu1 }
 0x27b   :  { %v12160_v50 = vpack.c.bf16 %v2669_v26, %v2668_v7  ;;  %v8661_v41 = vpop.f32.mrf.mxu0  ;;  %v2545_v47 = vadd.f32 %v12139_v59, %v2344_v49 }
 0x27c   :  { %v2346_v42 = vpop.f32.mrf.mxu1 }
 0x27d   :  { %v2347_v61 = vadd.f32 %v2346_v42, %v1273_v38  ;;  %v1294_v63 = vpop.f32.mrf.mxu0  ;;  %9037 = vmatmul.mubr.bf16.gmra.mxu0 %v11688_v21  ;;  %v2670_v40 = vmax.f32 %v2545_v47, 0.0 }
 0x27e   :  { %v8915_v22 = vpop.f32.mrf.mxu1  ;;  %9040 = vmatprep.mubr.msk.bf16.mxu0 %vm10940_vm2, %v10939_v0 }
 0x27f   :  { %v2546_v3 = vadd.f32 %v12139_v59, %v2347_v61  ;;  %v8664_v30 = vpop.f32.mrf.mxu0 }
 0x280   :  { %v2351_v10 = vpop.f32.mrf.mxu1 }
 0x281   :  { %v2671_v12 = vmax.f32 %v2546_v3, 0.0  ;;  %v2352_v57 = vadd.f32 %v2351_v10, %v1278_v36  ;;  %v1297_v39 = vpop.f32.mrf.mxu0  ;;  %v10895_v36 = vld [vmem:[%s15037_s9 + $0x18] sm:$0xff]  }
 0x282   :  { %v8918_v4 = vpop.f32.mrf.mxu1  ;;  %9505 = vmatpush3.bf16.msra.mxu0 %v10895_v36 }
 0x283   :  { %v12167_v9 = vpack.c.bf16 %v2671_v12, %v2670_v40  ;;  %v8665_v29 = vpop.f32.mrf.mxu0  ;;  %v2547_v32 = vadd.f32 %v12139_v59, %v2352_v57  ;;  %9506 = vmatprep.subr.bf16.mxu0 %v10939_v0 }
 0x284   :  { %v2354_v38 = vpop.f32.mrf.mxu1 }
 0x285   :  { %v2355_v21 = vadd.f32 %v2354_v38, %v1281_v62  ;;  %v1302_v7 = vpop.f32.mrf.mxu0  ;;  %9041 = vmatmul.mubr.bf16.gmra.mxu0 %v11704_v45  ;;  %v2672_v42 = vmax.f32 %v2547_v32, 0.0 }
 0x286   :  { %v8919_v26 = vpop.f32.mrf.mxu1  ;;  %9044 = vmatprep.mubr.msk.bf16.mxu0 %vm10940_vm2, %v10939_v0 }
 0x287   :  { %v2548_v49 = vadd.f32 %v12139_v59, %v2355_v21  ;;  %v8668_v18 = vpop.f32.mrf.mxu0 }
 0x288   :  { %v2359_v41 = vpop.f32.mrf.mxu1 }
 0x289   :  { %v2673_v47 = vmax.f32 %v2548_v49, 0.0  ;;  %v2360_v61 = vadd.f32 %v2359_v41, %v1286_v60  ;;  %v1305_v62 = vpop.f32.mrf.mxu0 }
 0x28a   :  { %v8922_v45 = vpop.f32.mrf.mxu1 }
 0x28b   :  { %v12178_v22 = vpack.c.bf16 %v2673_v47, %v2672_v42  ;;  %v8669_v3 = vpop.f32.mrf.mxu0  ;;  %v2549_v10 = vadd.f32 %v12139_v59, %v2360_v61 }
 0x28c   :  { %v2362_v30 = vpop.f32.mrf.mxu1 }
 0x28d   :  { %v2363_v40 = vadd.f32 %v2362_v30, %v1289_v16  ;;  %v1310_v12 = vpop.f32.mrf.mxu0  ;;  %9045 = vmatmul.mubr.bf16.gmra.mxu0 %v11720_v5  ;;  %v2674_v38 = vmax.f32 %v2549_v10, 0.0 }
 0x28e   :  { %v8923_v57 = vpop.f32.mrf.mxu1  ;;  %9048 = vmatprep.mubr.msk.bf16.mxu0 %vm10940_vm2, %v10939_v0 }
 0x28f   :  { %v2550_v60 = vadd.f32 %v12139_v59, %v2363_v40  ;;  %v8672_v4 = vpop.f32.mrf.mxu0 }
 0x290   :  { %v2367_v29 = vpop.f32.mrf.mxu1 }
 0x291   :  { %v2675_v32 = vmax.f32 %v2550_v60, 0.0  ;;  %v2368_v21 = vadd.f32 %v2367_v29, %v1294_v63  ;;  %v1313_v26 = vpop.f32.mrf.mxu0 }
 0x292   :  { %v8926_v36 = vpop.f32.mrf.mxu1 }
 0x293   :  { %v12185_v49 = vpack.c.bf16 %v2675_v32, %v2674_v38  ;;  %v8673_v18 = vpop.f32.mrf.mxu0  ;;  %v2551_v41 = vadd.f32 %v12139_v59, %v2368_v21 }
 0x294   :  { %v2370_v16 = vpop.f32.mrf.mxu1 }
 0x295   :  { %v2371_v5 = vadd.f32 %v2370_v16, %v1297_v39  ;;  %v1318_v42 = vpop.f32.mrf.mxu0  ;;  %9049 = vmatmul.mubr.bf16.gmra.mxu0 %v11736_v25  ;;  %v2676_v3 = vmax.f32 %v2551_v41, 0.0 }
 0x296   :  { %v8927_v47 = vpop.f32.mrf.mxu1  ;;  %9052 = vmatprep.mubr.msk.bf16.mxu0 %vm10940_vm2, %v10939_v0 }
 0x297   :  { %v2552_v61 = vadd.f32 %v12139_v59, %v2371_v5  ;;  %v8676_v45 = vpop.f32.mrf.mxu0 }
 0x298   :  { %v2375_v63 = vpop.f32.mrf.mxu1 }
 0x299   :  { %v2677_v30 = vmax.f32 %v2552_v61, 0.0  ;;  %v2376_v10 = vadd.f32 %v2375_v63, %v1302_v7  ;;  %v1321_v40 = vpop.f32.mrf.mxu0 }
 0x29a   :  { %v8930_v57 = vpop.f32.mrf.mxu1 }
 0x29b   :  { %v12192_v60 = vpack.c.bf16 %v2677_v30, %v2676_v3  ;;  %v8677_v4 = vpop.f32.mrf.mxu0  ;;  %v2553_v29 = vadd.f32 %v12139_v59, %v2376_v10 }
 0x29c   :  { %v2378_v39 = vpop.f32.mrf.mxu1 }
 0x29d   :  { %v2379_v25 = vadd.f32 %v2378_v39, %v1305_v62  ;;  %v1326_v38 = vpop.f32.mrf.mxu0  ;;  %9053 = vmatmul.mubr.bf16.gmra.mxu0 %v11752_v53  ;;  %v2678_v18 = vmax.f32 %v2553_v29, 0.0 }
 0x29e   :  { %v8931_v32 = vpop.f32.mrf.mxu1  ;;  %9056 = vmatprep.mubr.msk.bf16.mxu0 %vm10940_vm2, %v10939_v0 }
 0x29f   :  { %v2554_v21 = vadd.f32 %v12139_v59, %v2379_v25  ;;  %v8680_v36 = vpop.f32.mrf.mxu0 }
 0x2a0   :  { %v2383_v7 = vpop.f32.mrf.mxu1 }
 0x2a1   :  { %v2679_v16 = vmax.f32 %v2554_v21, 0.0  ;;  %v2384_v41 = vadd.f32 %v2383_v7, %v1310_v12  ;;  %v1329_v5 = vpop.f32.mrf.mxu0 }
 0x2a2   :  { %v8934_v47 = vpop.f32.mrf.mxu1 }
 0x2a3   :  { %v12199_v61 = vpack.c.bf16 %v2679_v16, %v2678_v18  ;;  %v8681_v45 = vpop.f32.mrf.mxu0  ;;  %v2555_v63 = vadd.f32 %v12139_v59, %v2384_v41 }
 0x2a4   :  { %v2386_v62 = vpop.f32.mrf.mxu1 }
 0x2a5   :  { %v2387_v53 = vadd.f32 %v2386_v62, %v1313_v26  ;;  %v1334_v3 = vpop.f32.mrf.mxu0  ;;  %9057 = vmatmul.mubr.bf16.gmra.mxu0 %v11768_v15  ;;  %v2680_v4 = vmax.f32 %v2555_v63, 0.0 }
 0x2a6   :  { %v8935_v30 = vpop.f32.mrf.mxu1  ;;  %9060 = vmatprep.mubr.msk.bf16.mxu0 %vm10940_vm2, %v10939_v0 }
 0x2a7   :  { %v2556_v10 = vadd.f32 %v12139_v59, %v2387_v53  ;;  %v8684_v57 = vpop.f32.mrf.mxu0 }
 0x2a8   :  { %v2391_v12 = vpop.f32.mrf.mxu1 }
 0x2a9   :  { %v2681_v39 = vmax.f32 %v2556_v10, 0.0  ;;  %v2392_v29 = vadd.f32 %v2391_v12, %v1318_v42  ;;  %v1337_v25 = vpop.f32.mrf.mxu0 }
 0x2aa   :  { %v8938_v32 = vpop.f32.mrf.mxu1 }
 0x2ab   :  { %v12206_v21 = vpack.c.bf16 %v2681_v39, %v2680_v4  ;;  %v8685_v36 = vpop.f32.mrf.mxu0  ;;  %v2557_v7 = vadd.f32 %v12139_v59, %v2392_v29 }
 0x2ac   :  { %v2394_v26 = vpop.f32.mrf.mxu1 }
 0x2ad   :  { %v2395_v15 = vadd.f32 %v2394_v26, %v1321_v40  ;;  %v1342_v18 = vpop.f32.mrf.mxu0  ;;  %9061 = vmatmul.mubr.bf16.gmra.mxu0 %v11784_v35  ;;  %v2682_v45 = vmax.f32 %v2557_v7, 0.0 }
 0x2ae   :  { %v8939_v16 = vpop.f32.mrf.mxu1  ;;  %9064 = vmatprep.mubr.msk.bf16.mxu0 %vm10940_vm2, %v10939_v0 }
 0x2af   :  { %v2558_v41 = vadd.f32 %v12139_v59, %v2395_v15  ;;  %v8688_v47 = vpop.f32.mrf.mxu0 }
 0x2b0   :  { %v2399_v42 = vpop.f32.mrf.mxu1 }
 0x2b1   :  { %v2683_v62 = vmax.f32 %v2558_v41, 0.0  ;;  %v2400_v63 = vadd.f32 %v2399_v42, %v1326_v38  ;;  %v1345_v53 = vpop.f32.mrf.mxu0 }
 0x2b2   :  { %v8942_v30 = vpop.f32.mrf.mxu1 }
 0x2b3   :  { %v12213_v10 = vpack.c.bf16 %v2683_v62, %v2682_v45  ;;  %v8689_v57 = vpop.f32.mrf.mxu0  ;;  %v2559_v12 = vadd.f32 %v12139_v59, %v2400_v63 }
 0x2b4   :  { %v2402_v40 = vpop.f32.mrf.mxu1 }
 0x2b5   :  { %v2403_v35 = vadd.f32 %v2402_v40, %v1329_v5  ;;  %v1350_v4 = vpop.f32.mrf.mxu0  ;;  %9065 = vmatmul.mubr.bf16.gmra.mxu0 %v11800_v6  ;;  %v2684_v36 = vmax.f32 %v2559_v12, 0.0 }
 0x2b6   :  { %v8943_v39 = vpop.f32.mrf.mxu1  ;;  %9068 = vmatprep.mubr.msk.bf16.mxu0 %vm10940_vm2, %v10939_v0 }
 0x2b7   :  { %v2560_v29 = vadd.f32 %v12139_v59, %v2403_v35  ;;  %v8692_v32 = vpop.f32.mrf.mxu0 }
 0x2b8   :  { %v2407_v38 = vpop.f32.mrf.mxu1 }
 0x2b9   :  { %v2685_v26 = vmax.f32 %v2560_v29, 0.0  ;;  %v2408_v7 = vadd.f32 %v2407_v38, %v1334_v3  ;;  %v1353_v15 = vpop.f32.mrf.mxu0 }
 0x2ba   :  { %v8946_v16 = vpop.f32.mrf.mxu1 }
 0x2bb   :  { %v12220_v41 = vpack.c.bf16 %v2685_v26, %v2684_v36  ;;  %v8693_v47 = vpop.f32.mrf.mxu0  ;;  %v2561_v42 = vadd.f32 %v12139_v59, %v2408_v7  ;;  %v12233_v36 = vld [vmem:[%s15039_s6] ss:$0 sm:$0xff] }
 0x2bc   :  { %v2410_v5 = vpop.f32.mrf.mxu1 }
 0x2bd   :  { %v2411_v6 = vadd.f32 %v2410_v5, %v1337_v25  ;;  %v1358_v45 = vpop.f32.mrf.mxu0  ;;  %9069 = vmatmul.mubr.bf16.gmra.mxu0 %v11825_v34  ;;  %v2686_v57 = vmax.f32 %v2561_v42, 0.0 }
 0x2be   :  { %v8947_v62 = vpop.f32.mrf.mxu1  ;;  %9072 = vmatprep.mubr.msk.bf16.mxu0 %vm10940_vm2, %v10939_v0 }
 0x2bf   :  { %v2562_v63 = vadd.f32 %v12139_v59, %v2411_v6  ;;  %v8696_v30 = vpop.f32.mrf.mxu0 }
 0x2c0   :  { %v2415_v3 = vpop.f32.mrf.mxu1 }
 0x2c1   :  { %v2687_v40 = vmax.f32 %v2562_v63, 0.0  ;;  %v2416_v12 = vadd.f32 %v2415_v3, %v1342_v18  ;;  %v1361_v35 = vpop.f32.mrf.mxu0  ;;  %v10897_v18 = vld [vmem:[%s15037_s9 + $0x10] sm:$0xff]  }
 0x2c2   :  { %v8950_v39 = vpop.f32.mrf.mxu1  ;;  %9507 = vmatpush3.bf16.msra.mxu0 %v10897_v18 }
 0x2c3   :  { %v12227_v29 = vpack.c.bf16 %v2687_v40, %v2686_v57  ;;  %v8697_v32 = vpop.f32.mrf.mxu0  ;;  %v2563_v38 = vadd.f32 %v12139_v59, %v2416_v12  ;;  %9508 = vmatprep.subr.bf16.mxu0 %v10939_v0 }
 0x2c4   :  { %v2418_v25 = vpop.f32.mrf.mxu1 }
 0x2c5   :  { %v2419_v34 = vadd.f32 %v2418_v25, %v1345_v53  ;;  %v2861_v26 = vpop.f32.mrf.mxu0  ;;  %9073 = vmatmul.mubr.bf16.gmra.mxu0 %v11841_v1  ;;  %v2688_v42 = vmax.f32 %v2563_v38, 0.0 }
 0x2c6   :  { %v8951_v7 = vpop.f32.mrf.mxu1  ;;  %9076 = vmatprep.mubr.msk.bf16.mxu0 %vm10940_vm2, %v10939_v0  ;;  %v2862_v53 = vadd.f32 %v12233_v36, %v2861_v26 }
 0x2c7   :  { %v2564_v16 = vadd.f32 %v12139_v59, %v2419_v34  ;;  %v8978_v47 = vpop.f32.mrf.mxu0 }
 0x2c8   :  { %v2423_v5 = vpop.f32.mrf.mxu1  ;;  %v3363_v40 = vmax.f32 %v2862_v53, 0.0 }
 0x2c9   :  { %v2689_v6 = vmax.f32 %v2564_v16, 0.0  ;;  %v2424_v62 = vadd.f32 %v2423_v5, %v1350_v4  ;;  %v2864_v63 = vpop.f32.mrf.mxu0  ;;  %v10894_v4 = vld [vmem:[%s15038_s11 + $0x38] sm:$0xff]   ;;  %v10896_v5 = vld [vmem:[%s15038_s11 + $0x30] sm:$0xff]  }
 0x2ca   :  { %v8954_v1 = vpop.f32.mrf.mxu1  ;;  %v2865_v30 = vadd.f32 %v12233_v36, %v2864_v63 }
 0x2cb   :  { %v12245_v3 = vpack.c.bf16 %v2689_v6, %v2688_v42  ;;  %v8979_v57 = vpop.f32.mrf.mxu0  ;;  %v2565_v39 = vadd.f32 %v12139_v59, %v2424_v62 }
 0x2cc   :  { %v3364_v12 = vmax.f32 %v2865_v30, 0.0  ;;  %v2426_v35 = vpop.f32.mrf.mxu1  ;;  %v10898_v57 = vld [vmem:[%s15038_s11 + $0x28] sm:$0xff]  }
 0x2cd   :  { %v2427_v32 = vadd.f32 %v2426_v35, %v1353_v15  ;;  %v2869_v25 = vpop.f32.mrf.mxu0  ;;  %9077 = vmatmul.mubr.bf16.gmra.mxu0 %v11857_v31  ;;  %v2690_v15 = vmax.f32 %v2565_v39, 0.0 }
 0x2ce   :  { %v3505_v38 = vpack.c.bf16 %v3364_v12, %v3363_v40  ;;  %v8955_v34 = vpop.f32.mrf.mxu1  ;;  %9080 = vmatprep.mubr.msk.bf16.mxu0 %vm10940_vm2, %v10939_v0  ;;  %v2870_v18 = vadd.f32 %v12233_v36, %v2869_v25 }
 0x2cf   :  { %v2566_v26 = vadd.f32 %v12139_v59, %v2427_v32  ;;  %v8982_v7 = vpop.f32.mrf.mxu0 }
 0x2d0   :  { %v2431_v16 = vpop.f32.mrf.mxu1  ;;  %9245 = vmatmul.mubr.bf16.vlgmr.msra.gmra.mxu1 %v3505_v38  ;;  %v3365_v63 = vmax.f32 %v2870_v18, 0.0 }
 0x2d1   :  { %v2691_v47 = vmax.f32 %v2566_v26, 0.0  ;;  %v12256_v53 = vadd.f32 %v2431_v16, %v1358_v45  ;;  %v2872_v31 = vpop.f32.mrf.mxu0  ;;  %9765 = vmatpush3.bf16.msra.mxu1 %v10894_v4  ;;  %9248 = vmatprep.mubr.msk.bf16.mxu1 %vm10940_vm2, %v10939_v0 }
 0x2d2   :  { %v2873_v59 = vadd.f32 %v12233_v36, %v2872_v31  ;;  %9766 = vmatprep.subr.bf16.mxu1 %v10939_v0  ;;  %v8958_v42 = vpop.f32.mrf.mxu1 }
 0x2d3   :  { %v12265_v6 = vpack.c.bf16 %v2691_v47, %v2690_v15  ;;  %v8983_v62 = vpop.f32.mrf.mxu0 }
 0x2d4   :  { %v3366_v45 = vmax.f32 %v2873_v59, 0.0  ;;  %v2434_v1 = vpop.f32.mrf.mxu1 }
 0x2d5   :  { %v2877_v30 = vpop.f32.mrf.mxu0  ;;  %9081 = vmatmul.mubr.bf16.gmra.mxu0 %v11873_v37  ;;  %9767 = vmatpush3.bf16.msra.mxu1 %v10896_v5 }
 0x2d6   :  { %v3506_v40 = vpack.c.bf16 %v3366_v45, %v3365_v63  ;;  %9084 = vmatprep.mubr.msk.bf16.mxu0 %vm10940_vm2, %v10939_v0  ;;  %9768 = vmatprep.subr.bf16.mxu1 %v10939_v0  ;;  %v8959_v12 = vpop.f32.mrf.mxu1  ;;  %v2878_v39 = vadd.f32 %v12233_v36, %v2877_v30 }
 0x2d7   :  { %v8986_v35 = vpop.f32.mrf.mxu0 }
 0x2d8   :  { %9249 = vmatmul.mubr.bf16.gmra.mxu1 %v3506_v40  ;;  %v3367_v4 = vmax.f32 %v2878_v39, 0.0 }
 0x2d9   :  { %v2880_v32 = vpop.f32.mrf.mxu0  ;;  %9252 = vmatprep.mubr.msk.bf16.mxu1 %vm10940_vm2, %v10939_v0  ;;  %9769 = vmatpush3.bf16.msra.mxu1 %v10898_v57 }
 0x2da   :  { %v2881_v37 = vadd.f32 %v12233_v36, %v2880_v32  ;;  %9770 = vmatprep.subr.bf16.mxu1 %v10939_v0 }
 0x2db   :  { %v8987_v25 = vpop.f32.mrf.mxu0 }
 0x2dc   :  { %v3368_v38 = vmax.f32 %v2881_v37, 0.0 }
 0x2dd   :  { %v2885_v34 = vpop.f32.mrf.mxu0  ;;  %9085 = vmatmul.mubr.bf16.gmra.mxu0 %v11889_v28 }
 0x2de   :  { %v3507_v26 = vpack.c.bf16 %v3368_v38, %v3367_v4  ;;  %9088 = vmatprep.mubr.msk.bf16.mxu0 %vm10940_vm2, %v10939_v0  ;;  %v2886_v18 = vadd.f32 %v12233_v36, %v2885_v34 }
 0x2df   :  { %v8990_v7 = vpop.f32.mrf.mxu0 }
 0x2e0   :  { %9253 = vmatmul.mubr.bf16.gmra.mxu1 %v3507_v26  ;;  %v3369_v31 = vmax.f32 %v2886_v18, 0.0 }
 0x2e1   :  { %v2888_v16 = vpop.f32.mrf.mxu0  ;;  %9256 = vmatprep.mubr.msk.bf16.mxu1 %vm10940_vm2, %v10939_v0 }
 0x2e2   :  { %v2889_v15 = vadd.f32 %v12233_v36, %v2888_v16 }
 0x2e3   :  { %v8991_v47 = vpop.f32.mrf.mxu0 }
 0x2e4   :  { %v3370_v5 = vmax.f32 %v2889_v15, 0.0 }
 0x2e5   :  { %v2893_v59 = vpop.f32.mrf.mxu0  ;;  %9089 = vmatmul.mubr.bf16.gmra.mxu0 %v11905_v52 }
 0x2e6   :  { %v3508_v28 = vpack.c.bf16 %v3370_v5, %v3369_v31  ;;  %9092 = vmatprep.mubr.msk.bf16.mxu0 %vm10940_vm2, %v10939_v0  ;;  %v2894_v62 = vadd.f32 %v12233_v36, %v2893_v59 }
 0x2e7   :  { %v8994_v42 = vpop.f32.mrf.mxu0 }
 0x2e8   :  { %9257 = vmatmul.mubr.bf16.gmra.mxu1 %v3508_v28  ;;  %v3371_v30 = vmax.f32 %v2894_v62, 0.0  ;;  %v10899_v28 = vld [vmem:[%s15037_s9 + $0x8] sm:$0xff]  }
 0x2e9   :  { %v2896_v63 = vpop.f32.mrf.mxu0  ;;  %9260 = vmatprep.mubr.msk.bf16.mxu1 %vm10940_vm2, %v10939_v0  ;;  %9509 = vmatpush3.bf16.msra.mxu0 %v10899_v28 }
 0x2ea   :  { %v2897_v45 = vadd.f32 %v12233_v36, %v2896_v63  ;;  %9510 = vmatprep.subr.bf16.mxu0 %v10939_v0 }
 0x2eb   :  { %v8995_v1 = vpop.f32.mrf.mxu0 }
 0x2ec   :  { %v3372_v57 = vmax.f32 %v2897_v45, 0.0 }
 0x2ed   :  { %v2901_v40 = vpop.f32.mrf.mxu0  ;;  %9093 = vmatmul.mubr.bf16.gmra.mxu0 %v11921_v33 }
 0x2ee   :  { %v3509_v52 = vpack.c.bf16 %v3372_v57, %v3371_v30  ;;  %9096 = vmatprep.mubr.msk.bf16.mxu0 %vm10940_vm2, %v10939_v0  ;;  %v2902_v35 = vadd.f32 %v12233_v36, %v2901_v40 }
 0x2ef   :  { %v8998_v12 = vpop.f32.mrf.mxu0 }
 0x2f0   :  { %9261 = vmatmul.mubr.bf16.gmra.mxu1 %v3509_v52  ;;  %v3373_v25 = vmax.f32 %v2902_v35, 0.0 }
 0x2f1   :  { %v2904_v39 = vpop.f32.mrf.mxu0  ;;  %9264 = vmatprep.mubr.msk.bf16.mxu1 %vm10940_vm2, %v10939_v0 }
 0x2f2   :  { %v2905_v32 = vadd.f32 %v12233_v36, %v2904_v39 }
 0x2f3   :  { %v8999_v37 = vpop.f32.mrf.mxu0 }
 0x2f4   :  { %v3374_v4 = vmax.f32 %v2905_v32, 0.0 }
 0x2f5   :  { %v2909_v38 = vpop.f32.mrf.mxu0  ;;  %9097 = vmatmul.mubr.bf16.gmra.mxu0 %v11937_v8 }
 0x2f6   :  { %v3510_v33 = vpack.c.bf16 %v3374_v4, %v3373_v25  ;;  %9100 = vmatprep.mubr.msk.bf16.mxu0 %vm10940_vm2, %v10939_v0  ;;  %v2910_v26 = vadd.f32 %v12233_v36, %v2909_v38  ;;  %v10900_v38 = vld [vmem:[%s15038_s11 + $0x20] sm:$0xff]  }
 0x2f7   :  { %v9002_v34 = vpop.f32.mrf.mxu0  ;;  %9771 = vmatpush3.bf16.msra.mxu1 %v10900_v38 }
 0x2f8   :  { %9265 = vmatmul.mubr.bf16.gmra.mxu1 %v3510_v33  ;;  %v3375_v15 = vmax.f32 %v2910_v26, 0.0  ;;  %9772 = vmatprep.subr.bf16.mxu1 %v10939_v0 }
 0x2f9   :  { %v2912_v7 = vpop.f32.mrf.mxu0  ;;  %9268 = vmatprep.mubr.msk.bf16.mxu1 %vm10940_vm2, %v10939_v0 }
 0x2fa   :  { %v2913_v18 = vadd.f32 %v12233_v36, %v2912_v7 }
 0x2fb   :  { %v9003_v16 = vpop.f32.mrf.mxu0 }
 0x2fc   :  { %v3376_v47 = vmax.f32 %v2913_v18, 0.0 }
 0x2fd   :  { %v2917_v31 = vpop.f32.mrf.mxu0  ;;  %9101 = vmatmul.mubr.bf16.gmra.mxu0 %v11957_v23 }
 0x2fe   :  { %v3511_v8 = vpack.c.bf16 %v3376_v47, %v3375_v15  ;;  %9104 = vmatprep.mubr.msk.bf16.mxu0 %vm10940_vm2, %v10939_v0  ;;  %v2918_v59 = vadd.f32 %v12233_v36, %v2917_v31 }
 0x2ff   :  { %v9006_v5 = vpop.f32.mrf.mxu0 }
 0x300   :  { %9269 = vmatmul.mubr.bf16.gmra.mxu1 %v3511_v8  ;;  %v3377_v63 = vmax.f32 %v2918_v59, 0.0 }
 0x301   :  { %v2920_v42 = vpop.f32.mrf.mxu0  ;;  %9272 = vmatprep.mubr.msk.bf16.mxu1 %vm10940_vm2, %v10939_v0 }
 0x302   :  { %v2921_v62 = vadd.f32 %v12233_v36, %v2920_v42 }
 0x303   :  { %v9007_v23 = vpop.f32.mrf.mxu0 }
 0x304   :  { %v3378_v45 = vmax.f32 %v2921_v62, 0.0 }
 0x305   :  { %v2925_v1 = vpop.f32.mrf.mxu0  ;;  %9105 = vmatmul.mubr.bf16.gmra.mxu0 %v11973_v14 }
 0x306   :  { %v3512_v30 = vpack.c.bf16 %v3378_v45, %v3377_v63  ;;  %9108 = vmatprep.mubr.msk.bf16.mxu0 %vm10940_vm2, %v10939_v0  ;;  %v2926_v40 = vadd.f32 %v12233_v36, %v2925_v1 }
 0x307   :  { %v9010_v57 = vpop.f32.mrf.mxu0 }
 0x308   :  { %9273 = vmatmul.mubr.bf16.gmra.mxu1 %v3512_v30  ;;  %v3379_v39 = vmax.f32 %v2926_v40, 0.0 }
 0x309   :  { %v2928_v52 = vpop.f32.mrf.mxu0  ;;  %9276 = vmatprep.mubr.msk.bf16.mxu1 %vm10940_vm2, %v10939_v0 }
 0x30a   :  { %v2929_v12 = vadd.f32 %v12233_v36, %v2928_v52 }
 0x30b   :  { %v9011_v35 = vpop.f32.mrf.mxu0 }
 0x30c   :  { %v3380_v32 = vmax.f32 %v2929_v12, 0.0 }
 0x30d   :  { %v2933_v37 = vpop.f32.mrf.mxu0  ;;  %9109 = vmatmul.mubr.bf16.gmra.mxu0 %v11989_v13 }
 0x30e   :  { %v3513_v14 = vpack.c.bf16 %v3380_v32, %v3379_v39  ;;  %9112 = vmatprep.mubr.msk.bf16.mxu0 %vm10940_vm2, %v10939_v0  ;;  %v2934_v4 = vadd.f32 %v12233_v36, %v2933_v37 }
 0x30f   :  { %v9014_v25 = vpop.f32.mrf.mxu0 }
 0x310   :  { %9277 = vmatmul.mubr.bf16.gmra.mxu1 %v3513_v14  ;;  %v3381_v26 = vmax.f32 %v2934_v4, 0.0 }
 0x311   :  { %v2936_v33 = vpop.f32.mrf.mxu0  ;;  %9280 = vmatprep.mubr.msk.bf16.mxu1 %vm10940_vm2, %v10939_v0 }
 0x312   :  { %v2937_v34 = vadd.f32 %v12233_v36, %v2936_v33 }
 0x313   :  { %v9015_v13 = vpop.f32.mrf.mxu0 }
 0x314   :  { %v3382_v7 = vmax.f32 %v2937_v34, 0.0 }
 0x315   :  { %v2941_v18 = vpop.f32.mrf.mxu0  ;;  %9113 = vmatmul.mubr.bf16.gmra.mxu0 %v12005_v27 }
 0x316   :  { %v3514_v16 = vpack.c.bf16 %v3382_v7, %v3381_v26  ;;  %9116 = vmatprep.mubr.msk.bf16.mxu0 %vm10940_vm2, %v10939_v0  ;;  %v2942_v47 = vadd.f32 %v12233_v36, %v2941_v18 }
 0x317   :  { %v9018_v15 = vpop.f32.mrf.mxu0 }
 0x318   :  { %9281 = vmatmul.mubr.bf16.gmra.mxu1 %v3514_v16  ;;  %v3383_v59 = vmax.f32 %v2942_v47, 0.0 }
 0x319   :  { %v2944_v31 = vpop.f32.mrf.mxu0  ;;  %9284 = vmatprep.mubr.msk.bf16.mxu1 %vm10940_vm2, %v10939_v0 }
 0x31a   :  { %v2945_v8 = vadd.f32 %v12233_v36, %v2944_v31 }
 0x31b   :  { %v9019_v5 = vpop.f32.mrf.mxu0 }
 0x31c   :  { %v3384_v28 = vmax.f32 %v2945_v8, 0.0 }
 0x31d   :  { %v2949_v42 = vpop.f32.mrf.mxu0  ;;  %9117 = vmatmul.mubr.bf16.gmra.mxu0 %v12021_v2 }
 0x31e   :  { %v3515_v27 = vpack.c.bf16 %v3384_v28, %v3383_v59  ;;  %9120 = vmatprep.mubr.msk.bf16.mxu0 %vm10940_vm2, %v10939_v0  ;;  %v2950_v23 = vadd.f32 %v12233_v36, %v2949_v42 }
 0x31f   :  { %v9022_v62 = vpop.f32.mrf.mxu0 }
 0x320   :  { %9285 = vmatmul.mubr.bf16.gmra.mxu1 %v3515_v27  ;;  %v3385_v30 = vmax.f32 %v2950_v23, 0.0  ;;  %v10901_v23 = vld [vmem:[%s15037_s9] sm:$0xff]  }
 0x321   :  { %v2952_v63 = vpop.f32.mrf.mxu0  ;;  %9288 = vmatprep.mubr.msk.bf16.mxu1 %vm10940_vm2, %v10939_v0  ;;  %9511 = vmatpush3.bf16.msra.mxu0 %v10901_v23 }
 0x322   :  { %v2953_v45 = vadd.f32 %v12233_v36, %v2952_v63  ;;  %10032 = vmatprep.subr.bf16.mxu0 %v10939_v0 }
 0x323   :  { %v9023_v1 = vpop.f32.mrf.mxu0 }
 0x324   :  { %v3386_v57 = vmax.f32 %v2953_v45, 0.0 }
 0x325   :  { %v2957_v40 = vpop.f32.mrf.mxu0  ;;  %9121 = vmatmul.mubr.bf16.gmra.mxu0 %v12038_v55 }
 0x326   :  { %v3516_v2 = vpack.c.bf16 %v3386_v57, %v3385_v30  ;;  %9124 = vmatprep.mubr.msk.bf16.mxu0 %vm10940_vm2, %v10939_v0  ;;  %v2958_v12 = vadd.f32 %v12233_v36, %v2957_v40 }
 0x327   :  { %v9026_v52 = vpop.f32.mrf.mxu0 }
 0x328   :  { %9289 = vmatmul.mubr.bf16.gmra.mxu1 %v3516_v2  ;;  %v3387_v37 = vmax.f32 %v2958_v12, 0.0 }
 0x329   :  { %v2960_v35 = vpop.f32.mrf.mxu0  ;;  %9292 = vmatprep.mubr.msk.bf16.mxu1 %vm10940_vm2, %v10939_v0 }
 0x32a   :  { %v2961_v39 = vadd.f32 %v12233_v36, %v2960_v35 }
 0x32b   :  { %v9027_v32 = vpop.f32.mrf.mxu0 }
 0x32c   :  { %v3388_v14 = vmax.f32 %v2961_v39, 0.0 }
 0x32d   :  { %v2965_v25 = vpop.f32.mrf.mxu0  ;;  %9125 = vmatmul.mubr.bf16.gmra.mxu0 %v12056_v44 }
 0x32e   :  { %v3517_v55 = vpack.c.bf16 %v3388_v14, %v3387_v37  ;;  %9128 = vmatprep.mubr.msk.bf16.mxu0 %vm10940_vm2, %v10939_v0  ;;  %v2966_v38 = vadd.f32 %v12233_v36, %v2965_v25 }
 0x32f   :  { %v9030_v4 = vpop.f32.mrf.mxu0 }
 0x330   :  { %9293 = vmatmul.mubr.bf16.gmra.mxu1 %v3517_v55  ;;  %v3389_v26 = vmax.f32 %v2966_v38, 0.0  ;;  %v10902_v4 = vld [vmem:[%s15038_s11 + $0x18] sm:$0xff]  }
 0x331   :  { %v2968_v33 = vpop.f32.mrf.mxu0  ;;  %9296 = vmatprep.mubr.msk.bf16.mxu1 %vm10940_vm2, %v10939_v0  ;;  %9773 = vmatpush3.bf16.msra.mxu1 %v10902_v4 }
 0x332   :  { %v2969_v34 = vadd.f32 %v12233_v36, %v2968_v33  ;;  %9774 = vmatprep.subr.bf16.mxu1 %v10939_v0 }
 0x333   :  { %v9031_v13 = vpop.f32.mrf.mxu0 }
 0x334   :  { %v3390_v7 = vmax.f32 %v2969_v34, 0.0 }
 0x335   :  { %v2973_v18 = vpop.f32.mrf.mxu0  ;;  %9129 = vmatmul.mubr.bf16.gmra.mxu0 %v12067_v20 }
 0x336   :  { %v3518_v44 = vpack.c.bf16 %v3390_v7, %v3389_v26  ;;  %9132 = vmatprep.mubr.msk.bf16.mxu0 %vm10940_vm2, %v10939_v0  ;;  %v2974_v15 = vadd.f32 %v12233_v36, %v2973_v18 }
 0x337   :  { %v9034_v16 = vpop.f32.mrf.mxu0 }
 0x338   :  { %9297 = vmatmul.mubr.bf16.gmra.mxu1 %v3518_v44  ;;  %v3391_v5 = vmax.f32 %v2974_v15, 0.0 }
 0x339   :  { %v2976_v47 = vpop.f32.mrf.mxu0  ;;  %9300 = vmatprep.mubr.msk.bf16.mxu1 %vm10940_vm2, %v10939_v0 }
 0x33a   :  { %v2977_v31 = vadd.f32 %v12233_v36, %v2976_v47 }
 0x33b   :  { %v9035_v8 = vpop.f32.mrf.mxu0 }
 0x33c   :  { %v3392_v59 = vmax.f32 %v2977_v31, 0.0 }
 0x33d   :  { %v2981_v28 = vpop.f32.mrf.mxu0  ;;  %9133 = vmatmul.mubr.bf16.gmra.mxu0 %v12074_v11 }
 0x33e   :  { %v3519_v20 = vpack.c.bf16 %v3392_v59, %v3391_v5  ;;  %9136 = vmatprep.mubr.msk.bf16.mxu0 %vm10940_vm2, %v10939_v0  ;;  %v2982_v27 = vadd.f32 %v12233_v36, %v2981_v28 }
 0x33f   :  { %v9038_v42 = vpop.f32.mrf.mxu0 }
 0x340   :  { %9301 = vmatmul.mubr.bf16.gmra.mxu1 %v3519_v20  ;;  %v3393_v11 = vmax.f32 %v2982_v27, 0.0 }
 0x341   :  { %v2984_v62 = vpop.f32.mrf.mxu0  ;;  %9304 = vmatprep.mubr.msk.bf16.mxu1 %vm10940_vm2, %v10939_v0 }
 0x342   :  { %v2985_v63 = vadd.f32 %v12233_v36, %v2984_v62 }
 0x343   :  { %v9039_v45 = vpop.f32.mrf.mxu0 }
 0x344   :  { %v3394_v1 = vmax.f32 %v2985_v63, 0.0 }
 0x345   :  { %v2989_v30 = vpop.f32.mrf.mxu0  ;;  %9137 = vmatmul.mubr.bf16.gmra.mxu0 %v12081_v58 }
 0x346   :  { %v3520_v57 = vpack.c.bf16 %v3394_v1, %v3393_v11  ;;  %9140 = vmatprep.mubr.msk.bf16.mxu0 %vm10940_vm2, %v10939_v0  ;;  %v2990_v2 = vadd.f32 %v12233_v36, %v2989_v30 }
 0x347   :  { %v9042_v40 = vpop.f32.mrf.mxu0 }
 0x348   :  { %9305 = vmatmul.mubr.bf16.gmra.mxu1 %v3520_v57  ;;  %v3395_v39 = vmax.f32 %v2990_v2, 0.0 }
 0x349   :  { %v2992_v52 = vpop.f32.mrf.mxu0  ;;  %9308 = vmatprep.mubr.msk.bf16.mxu1 %vm10940_vm2, %v10939_v0 }
 0x34a   :  { %v2993_v12 = vadd.f32 %v12233_v36, %v2992_v52 }
 0x34b   :  { %v9043_v35 = vpop.f32.mrf.mxu0 }
 0x34c   :  { %v3396_v32 = vmax.f32 %v2993_v12, 0.0 }
 0x34d   :  { %v2997_v37 = vpop.f32.mrf.mxu0  ;;  %9141 = vmatmul.mubr.bf16.gmra.mxu0 %v12088_v19 }
 0x34e   :  { %v3521_v58 = vpack.c.bf16 %v3396_v32, %v3395_v39  ;;  %9144 = vmatprep.mubr.msk.bf16.mxu0 %vm10940_vm2, %v10939_v0  ;;  %v2998_v25 = vadd.f32 %v12233_v36, %v2997_v37 }
 0x34f   :  { %v9046_v14 = vpop.f32.mrf.mxu0 }
 0x350   :  { %9309 = vmatmul.mubr.bf16.gmra.mxu1 %v3521_v58  ;;  %v3397_v19 = vmax.f32 %v2998_v25, 0.0 }
 0x351   :  { %v3000_v55 = vpop.f32.mrf.mxu0  ;;  %9312 = vmatprep.mubr.msk.bf16.mxu1 %vm10940_vm2, %v10939_v0 }
 0x352   :  { %v3001_v38 = vadd.f32 %v12233_v36, %v3000_v55 }
 0x353   :  { %v9047_v33 = vpop.f32.mrf.mxu0 }
 0x354   :  { %v3398_v34 = vmax.f32 %v3001_v38, 0.0 }
 0x355   :  { %v3005_v13 = vpop.f32.mrf.mxu0  ;;  %9145 = vmatmul.mubr.bf16.gmra.mxu0 %v12095_v54 }
 0x356   :  { %v3522_v26 = vpack.c.bf16 %v3398_v34, %v3397_v19  ;;  %9148 = vmatprep.mubr.msk.bf16.mxu0 %vm10940_vm2, %v10939_v0  ;;  %v3006_v18 = vadd.f32 %v12233_v36, %v3005_v13 }
 0x357   :  { %v9050_v7 = vpop.f32.mrf.mxu0 }
 0x358   :  { %9313 = vmatmul.mubr.bf16.gmra.mxu1 %v3522_v26  ;;  %v3399_v47 = vmax.f32 %v3006_v18, 0.0 }
 0x359   :  { %v3008_v44 = vpop.f32.mrf.mxu0  ;;  %9316 = vmatprep.mubr.msk.bf16.mxu1 %vm10940_vm2, %v10939_v0 }
 0x35a   :  { %v3009_v16 = vadd.f32 %v12233_v36, %v3008_v44 }
 0x35b   :  { %v9051_v15 = vpop.f32.mrf.mxu0 }
 0x35c   :  { %v3400_v31 = vmax.f32 %v3009_v16, 0.0 }
 0x35d   :  { %v3013_v8 = vpop.f32.mrf.mxu0  ;;  %9149 = vmatmul.mubr.bf16.gmra.mxu0 %v12102_v56 }
 0x35e   :  { %v3523_v54 = vpack.c.bf16 %v3400_v31, %v3399_v47  ;;  %9152 = vmatprep.mubr.msk.bf16.mxu0 %vm10940_vm2, %v10939_v0  ;;  %v3014_v59 = vadd.f32 %v12233_v36, %v3013_v8 }
 0x35f   :  { %v9054_v5 = vpop.f32.mrf.mxu0 }
 0x360   :  { %9317 = vmatmul.mubr.bf16.gmra.mxu1 %v3523_v54  ;;  %v3401_v27 = vmax.f32 %v3014_v59, 0.0 }
 0x361   :  { %v3016_v28 = vpop.f32.mrf.mxu0  ;;  %9320 = vmatprep.mubr.msk.bf16.mxu1 %vm10940_vm2, %v10939_v0 }
 0x362   :  { %v3017_v20 = vadd.f32 %v12233_v36, %v3016_v28 }
 0x363   :  { %v9055_v42 = vpop.f32.mrf.mxu0 }
 0x364   :  { %v3402_v62 = vmax.f32 %v3017_v20, 0.0 }
 0x365   :  { %v3021_v23 = vpop.f32.mrf.mxu0  ;;  %9153 = vmatmul.mubr.bf16.gmra.mxu0 %v12109_v46 }
 0x366   :  { %v3524_v56 = vpack.c.bf16 %v3402_v62, %v3401_v27  ;;  %9156 = vmatprep.mubr.msk.bf16.mxu0 %vm10940_vm2, %v10939_v0  ;;  %v3022_v45 = vadd.f32 %v12233_v36, %v3021_v23 }
 0x367   :  { %v9058_v63 = vpop.f32.mrf.mxu0 }
 0x368   :  { %9321 = vmatmul.mubr.bf16.gmra.mxu1 %v3524_v56  ;;  %v3403_v57 = vmax.f32 %v3022_v45, 0.0  ;;  %v12456_v56 = vld [vmem:[%s15041_s8] ss:$0 sm:$0xff] }
 0x369   :  { %v3024_v11 = vpop.f32.mrf.mxu0  ;;  %9324 = vmatprep.mubr.msk.bf16.mxu1 %vm10940_vm2, %v10939_v0 }
 0x36a   :  { %v3025_v1 = vadd.f32 %v12233_v36, %v3024_v11 }
 0x36b   :  { %v9059_v30 = vpop.f32.mrf.mxu0 }
 0x36c   :  { %v3404_v40 = vmax.f32 %v3025_v1, 0.0 }
 0x36d   :  { %v3029_v2 = vpop.f32.mrf.mxu0  ;;  %9157 = vmatmul.mubr.bf16.gmra.mxu0 %v12120_v48 }
 0x36e   :  { %v3525_v46 = vpack.c.bf16 %v3404_v40, %v3403_v57  ;;  %9160 = vmatprep.mubr.msk.bf16.mxu0 %vm10940_vm2, %v10939_v0  ;;  %v3030_v12 = vadd.f32 %v12233_v36, %v3029_v2 }
 0x36f   :  { %v9062_v52 = vpop.f32.mrf.mxu0 }
 0x370   :  { %9325 = vmatmul.mubr.bf16.gmra.mxu1 %v3525_v46  ;;  %v3405_v37 = vmax.f32 %v3030_v12, 0.0 }
 0x371   :  { %v3032_v35 = vpop.f32.mrf.mxu0  ;;  %9328 = vmatprep.mubr.msk.bf16.mxu1 %vm10940_vm2, %v10939_v0 }
 0x372   :  { %v3033_v39 = vadd.f32 %v12233_v36, %v3032_v35 }
 0x373   :  { %v9063_v32 = vpop.f32.mrf.mxu0 }
 0x374   :  { %v3406_v58 = vmax.f32 %v3033_v39, 0.0 }
 0x375   :  { %v3037_v14 = vpop.f32.mrf.mxu0  ;;  %9161 = vmatmul.mubr.bf16.gmra.mxu0 %v12127_v24 }
 0x376   :  { %v3526_v48 = vpack.c.bf16 %v3406_v58, %v3405_v37  ;;  %9164 = vmatprep.mubr.msk.bf16.mxu0 %vm10940_vm2, %v10939_v0  ;;  %v3038_v55 = vadd.f32 %v12233_v36, %v3037_v14 }
 0x377   :  { %v9066_v25 = vpop.f32.mrf.mxu0 }
 0x378   :  { %9329 = vmatmul.mubr.bf16.gmra.mxu1 %v3526_v48  ;;  %v3407_v19 = vmax.f32 %v3038_v55, 0.0 }
 0x379   :  { %v3040_v4 = vpop.f32.mrf.mxu0  ;;  %9332 = vmatprep.mubr.msk.bf16.mxu1 %vm10940_vm2, %v10939_v0 }
 0x37a   :  { %v3041_v38 = vadd.f32 %v12233_v36, %v3040_v4 }
 0x37b   :  { %v9067_v33 = vpop.f32.mrf.mxu0 }
 0x37c   :  { %v3408_v34 = vmax.f32 %v3041_v38, 0.0 }
 0x37d   :  { %v3045_v13 = vpop.f32.mrf.mxu0  ;;  %9165 = vmatmul.mubr.bf16.gmra.mxu0 %v12134_v51 }
 0x37e   :  { %v3527_v24 = vpack.c.bf16 %v3408_v34, %v3407_v19  ;;  %9168 = vmatprep.mubr.msk.bf16.mxu0 %vm10940_vm2, %v10939_v0  ;;  %v3046_v7 = vadd.f32 %v12233_v36, %v3045_v13 }
 0x37f   :  { %v9070_v26 = vpop.f32.mrf.mxu0 }
 0x380   :  { %9333 = vmatmul.mubr.bf16.gmra.mxu1 %v3527_v24  ;;  %v3409_v15 = vmax.f32 %v3046_v7, 0.0 }
 0x381   :  { %v3048_v18 = vpop.f32.mrf.mxu0  ;;  %9336 = vmatprep.mubr.msk.bf16.mxu1 %vm10940_vm2, %v10939_v0 }
 0x382   :  { %v3049_v44 = vadd.f32 %v12233_v36, %v3048_v18 }
 0x383   :  { %v9071_v16 = vpop.f32.mrf.mxu0 }
 0x384   :  { %v3410_v47 = vmax.f32 %v3049_v44, 0.0 }
 0x385   :  { %v3053_v31 = vpop.f32.mrf.mxu0  ;;  %9169 = vmatmul.mubr.bf16.gmra.mxu0 %v12146_v43 }
 0x386   :  { %v3528_v51 = vpack.c.bf16 %v3410_v47, %v3409_v15  ;;  %9172 = vmatprep.mubr.msk.bf16.mxu0 %vm10940_vm2, %v10939_v0  ;;  %v3054_v54 = vadd.f32 %v12233_v36, %v3053_v31 }
 0x387   :  { %v9074_v8 = vpop.f32.mrf.mxu0 }
 0x388   :  { %9337 = vmatmul.mubr.bf16.gmra.mxu1 %v3528_v51  ;;  %v3411_v20 = vmax.f32 %v3054_v54, 0.0 }
 0x389   :  { %v3056_v5 = vpop.f32.mrf.mxu0  ;;  %9340 = vmatprep.mubr.msk.bf16.mxu1 %vm10940_vm2, %v10939_v0 }
 0x38a   :  { %v3057_v59 = vadd.f32 %v12233_v36, %v3056_v5 }
 0x38b   :  { %v9075_v28 = vpop.f32.mrf.mxu0 }
 0x38c   :  { %v3412_v42 = vmax.f32 %v3057_v59, 0.0 }
 0x38d   :  { %v3061_v27 = vpop.f32.mrf.mxu0  ;;  %9173 = vmatmul.mubr.bf16.gmra.mxu0 %v12153_v17  ;;  %v10904_v17 = vld [vmem:[%s15038_s11 + $0x10] sm:$0xff]  }
 0x38e   :  { %v3529_v43 = vpack.c.bf16 %v3412_v42, %v3411_v20  ;;  %9176 = vmatprep.mubr.msk.bf16.mxu0 %vm10940_vm2, %v10939_v0  ;;  %v3062_v23 = vadd.f32 %v12233_v36, %v3061_v27  ;;  %9775 = vmatpush3.bf16.msra.mxu1 %v10904_v17 }
 0x38f   :  { %v9078_v62 = vpop.f32.mrf.mxu0  ;;  %9776 = vmatprep.subr.bf16.mxu1 %v10939_v0 }
 0x390   :  { %v3656_v63 = vpop.f32.mrf.mxu1  ;;  %9341 = vmatmul.mubr.bf16.gmra.mxu1 %v3529_v43  ;;  %v3413_v40 = vmax.f32 %v3062_v23, 0.0 }
 0x391   :  { %v3064_v45 = vpop.f32.mrf.mxu0  ;;  %9344 = vmatprep.mubr.msk.bf16.mxu1 %vm10940_vm2, %v10939_v0  ;;  %v3657_v30 = vadd.f32 %v12456_v56, %v3656_v63 }
 0x392   :  { %v3065_v11 = vadd.f32 %v12233_v36, %v3064_v45  ;;  %v9246_v1 = vpop.f32.mrf.mxu1 }
 0x393   :  { %v9079_v57 = vpop.f32.mrf.mxu0  ;;  %v4158_v32 = vmax.f32 %v3657_v30, 0.0 }
 0x394   :  { %v3414_v2 = vmax.f32 %v3065_v11, 0.0  ;;  %v3659_v46 = vpop.f32.mrf.mxu1 }
 0x395   :  { %v3660_v52 = vadd.f32 %v12456_v56, %v3659_v46  ;;  %v3069_v12 = vpop.f32.mrf.mxu0  ;;  %9177 = vmatmul.mubr.bf16.gmra.mxu0 %v12160_v50 }
 0x396   :  { %v3530_v35 = vpack.c.bf16 %v3414_v2, %v3413_v40  ;;  %v9247_v39 = vpop.f32.mrf.mxu1  ;;  %9180 = vmatprep.mubr.msk.bf16.mxu0 %vm10940_vm2, %v10939_v0  ;;  %v3070_v14 = vadd.f32 %v12233_v36, %v3069_v12 }
 0x397   :  { %v4159_v37 = vmax.f32 %v3660_v52, 0.0  ;;  %v9082_v58 = vpop.f32.mrf.mxu0 }
 0x398   :  { %v3664_v48 = vpop.f32.mrf.mxu1  ;;  %9345 = vmatmul.mubr.bf16.gmra.mxu1 %v3530_v35  ;;  %v3415_v19 = vmax.f32 %v3070_v14, 0.0 }
 0x399   :  { %v12471_v25 = vpack.c.bf16 %v4159_v37, %v4158_v32  ;;  %v3072_v55 = vpop.f32.mrf.mxu0  ;;  %9348 = vmatprep.mubr.msk.bf16.mxu1 %vm10940_vm2, %v10939_v0  ;;  %v3665_v38 = vadd.f32 %v12456_v56, %v3664_v48 }
 0x39a   :  { %v3073_v50 = vadd.f32 %v12233_v36, %v3072_v55  ;;  %v9250_v4 = vpop.f32.mrf.mxu1 }
 0x39b   :  { %v9083_v33 = vpop.f32.mrf.mxu0  ;;  %v4160_v44 = vmax.f32 %v3665_v38, 0.0 }
 0x39c   :  { %v3416_v34 = vmax.f32 %v3073_v50, 0.0  ;;  %v3667_v13 = vpop.f32.mrf.mxu1 }
 0x39d   :  { %v3668_v24 = vadd.f32 %v12456_v56, %v3667_v13  ;;  %v3077_v26 = vpop.f32.mrf.mxu0  ;;  %9181 = vmatmul.mubr.bf16.gmra.mxu0 %v12167_v9 }
 0x39e   :  { %v3531_v7 = vpack.c.bf16 %v3416_v34, %v3415_v19  ;;  %v9251_v18 = vpop.f32.mrf.mxu1  ;;  %9184 = vmatprep.mubr.msk.bf16.mxu0 %vm10940_vm2, %v10939_v0  ;;  %v3078_v47 = vadd.f32 %v12233_v36, %v3077_v26 }
 0x39f   :  { %v4161_v16 = vmax.f32 %v3668_v24, 0.0  ;;  %v9086_v15 = vpop.f32.mrf.mxu0 }
 0x3a0   :  { %v3672_v31 = vpop.f32.mrf.mxu1  ;;  %9349 = vmatmul.mubr.bf16.gmra.mxu1 %v3531_v7  ;;  %v3417_v28 = vmax.f32 %v3078_v47, 0.0 }
 0x3a1   :  { %v12482_v51 = vpack.c.bf16 %v4161_v16, %v4160_v44  ;;  %v3080_v8 = vpop.f32.mrf.mxu0  ;;  %9352 = vmatprep.mubr.msk.bf16.mxu1 %vm10940_vm2, %v10939_v0  ;;  %v3673_v5 = vadd.f32 %v12456_v56, %v3672_v31 }
 0x3a2   :  { %v3081_v9 = vadd.f32 %v12233_v36, %v3080_v8  ;;  %v9254_v54 = vpop.f32.mrf.mxu1 }
 0x3a3   :  { %v9087_v59 = vpop.f32.mrf.mxu0  ;;  %v4162_v63 = vmax.f32 %v3673_v5, 0.0 }
 0x3a4   :  { %v3418_v20 = vmax.f32 %v3081_v9, 0.0  ;;  %v3675_v42 = vpop.f32.mrf.mxu1 }
 0x3a5   :  { %v3676_v27 = vadd.f32 %v12456_v56, %v3675_v42  ;;  %v3085_v43 = vpop.f32.mrf.mxu0  ;;  %9185 = vmatmul.mubr.bf16.gmra.mxu0 %v12178_v22 }
 0x3a6   :  { %v3532_v62 = vpack.c.bf16 %v3418_v20, %v3417_v28  ;;  %v9255_v23 = vpop.f32.mrf.mxu1  ;;  %9188 = vmatprep.mubr.msk.bf16.mxu0 %vm10940_vm2, %v10939_v0  ;;  %v3086_v11 = vadd.f32 %v12233_v36, %v3085_v43 }
 0x3a7   :  { %v4163_v45 = vmax.f32 %v3676_v27, 0.0  ;;  %v9090_v17 = vpop.f32.mrf.mxu0 }
 0x3a8   :  { %v3680_v1 = vpop.f32.mrf.mxu1  ;;  %9353 = vmatmul.mubr.bf16.gmra.mxu1 %v3532_v62  ;;  %v3419_v52 = vmax.f32 %v3086_v11, 0.0 }
 0x3a9   :  { %v12493_v30 = vpack.c.bf16 %v4163_v45, %v4162_v63  ;;  %v3088_v57 = vpop.f32.mrf.mxu0  ;;  %9356 = vmatprep.mubr.msk.bf16.mxu1 %vm10940_vm2, %v10939_v0  ;;  %v3681_v2 = vadd.f32 %v12456_v56, %v3680_v1 }
 0x3aa   :  { %v3089_v22 = vadd.f32 %v12233_v36, %v3088_v57  ;;  %v9258_v40 = vpop.f32.mrf.mxu1  ;;  %v12528_v57 = vld [vmem:[%s15039_s6] ss:$0 sm:$0xff] }
 0x3ab   :  { %v9091_v46 = vpop.f32.mrf.mxu0  ;;  %v4164_v14 = vmax.f32 %v3681_v2, 0.0 }
 0x3ac   :  { %v3420_v12 = vmax.f32 %v3089_v22, 0.0  ;;  %v3683_v35 = vpop.f32.mrf.mxu1 }
 0x3ad   :  { %v3684_v39 = vadd.f32 %v12456_v56, %v3683_v35  ;;  %v3093_v32 = vpop.f32.mrf.mxu0  ;;  %9189 = vmatmul.mubr.bf16.gmra.mxu0 %v12185_v49 }
 0x3ae   :  { %v3533_v37 = vpack.c.bf16 %v3420_v12, %v3419_v52  ;;  %v9259_v58 = vpop.f32.mrf.mxu1  ;;  %9192 = vmatprep.mubr.msk.bf16.mxu0 %vm10940_vm2, %v10939_v0  ;;  %v3094_v50 = vadd.f32 %v12233_v36, %v3093_v32 }
 0x3af   :  { %v4165_v48 = vmax.f32 %v3684_v39, 0.0  ;;  %v9094_v55 = vpop.f32.mrf.mxu0 }
 0x3b0   :  { %v3688_v4 = vpop.f32.mrf.mxu1  ;;  %9357 = vmatmul.mubr.bf16.gmra.mxu1 %v3533_v37  ;;  %v3421_v24 = vmax.f32 %v3094_v50, 0.0 }
 0x3b1   :  { %v12504_v38 = vpack.c.bf16 %v4165_v48, %v4164_v14  ;;  %v3096_v33 = vpop.f32.mrf.mxu0  ;;  %9360 = vmatprep.mubr.msk.bf16.mxu1 %vm10940_vm2, %v10939_v0  ;;  %v3689_v34 = vadd.f32 %v12456_v56, %v3688_v4 }
 0x3b2   :  { %v3097_v49 = vadd.f32 %v12233_v36, %v3096_v33  ;;  %v9262_v19 = vpop.f32.mrf.mxu1 }
 0x3b3   :  { %v9095_v13 = vpop.f32.mrf.mxu0  ;;  %v4166_v47 = vmax.f32 %v3689_v34, 0.0 }
 0x3b4   :  { %v3422_v26 = vmax.f32 %v3097_v49, 0.0  ;;  %v3691_v7 = vpop.f32.mrf.mxu1 }
 0x3b5   :  { %v3692_v18 = vadd.f32 %v12456_v56, %v3691_v7  ;;  %v3101_v44 = vpop.f32.mrf.mxu0  ;;  %9193 = vmatmul.mubr.bf16.gmra.mxu0 %v12192_v60 }
 0x3b6   :  { %v3534_v16 = vpack.c.bf16 %v3422_v26, %v3421_v24  ;;  %v9263_v15 = vpop.f32.mrf.mxu1  ;;  %9196 = vmatprep.mubr.msk.bf16.mxu0 %vm10940_vm2, %v10939_v0  ;;  %v3102_v9 = vadd.f32 %v12233_v36, %v3101_v44 }
 0x3b7   :  { %v4167_v31 = vmax.f32 %v3692_v18, 0.0  ;;  %v9098_v8 = vpop.f32.mrf.mxu0 }
 0x3b8   :  { %v3696_v54 = vpop.f32.mrf.mxu1  ;;  %9361 = vmatmul.mubr.bf16.gmra.mxu1 %v3534_v16  ;;  %v3423_v27 = vmax.f32 %v3102_v9, 0.0  ;;  %v10906_v9 = vld [vmem:[%s15038_s11 + $0x8] sm:$0xff]  }
 0x3b9   :  { %v12515_v5 = vpack.c.bf16 %v4167_v31, %v4166_v47  ;;  %v3104_v59 = vpop.f32.mrf.mxu0  ;;  %9364 = vmatprep.mubr.msk.bf16.mxu1 %vm10940_vm2, %v10939_v0  ;;  %v3697_v20 = vadd.f32 %v12456_v56, %v3696_v54  ;;  %9777 = vmatpush3.bf16.msra.mxu1 %v10906_v9 }
 0x3ba   :  { %v3105_v60 = vadd.f32 %v12233_v36, %v3104_v59  ;;  %v9266_v28 = vpop.f32.mrf.mxu1  ;;  %9778 = vmatprep.subr.bf16.mxu1 %v10939_v0 }
 0x3bb   :  { %v9099_v42 = vpop.f32.mrf.mxu0  ;;  %v4168_v11 = vmax.f32 %v3697_v20, 0.0 }
 0x3bc   :  { %v3424_v43 = vmax.f32 %v3105_v60, 0.0  ;;  %v3699_v62 = vpop.f32.mrf.mxu1 }
 0x3bd   :  { %v3700_v23 = vadd.f32 %v12456_v56, %v3699_v62  ;;  %v3109_v63 = vpop.f32.mrf.mxu0  ;;  %9197 = vmatmul.mubr.bf16.gmra.mxu0 %v12199_v61 }
 0x3be   :  { %v3535_v45 = vpack.c.bf16 %v3424_v43, %v3423_v27  ;;  %v9267_v17 = vpop.f32.mrf.mxu1  ;;  %9200 = vmatprep.mubr.msk.bf16.mxu0 %vm10940_vm2, %v10939_v0  ;;  %v3110_v22 = vadd.f32 %v12528_v57, %v3109_v63 }
 0x3bf   :  { %v4169_v1 = vmax.f32 %v3700_v23, 0.0  ;;  %v9102_v36 = vpop.f32.mrf.mxu0 }
 0x3c0   :  { %v3704_v40 = vpop.f32.mrf.mxu1  ;;  %9365 = vmatmul.mubr.bf16.gmra.mxu1 %v3535_v45  ;;  %v3425_v39 = vmax.f32 %v3110_v22, 0.0 }
 0x3c1   :  { %v12531_v2 = vpack.c.bf16 %v4169_v1, %v4168_v11  ;;  %v3112_v61 = vpop.f32.mrf.mxu0  ;;  %9368 = vmatprep.mubr.msk.bf16.mxu1 %vm10940_vm2, %v10939_v0  ;;  %v3705_v12 = vadd.f32 %v12456_v56, %v3704_v40 }
 0x3c2   :  { %v3113_v46 = vadd.f32 %v12528_v57, %v3112_v61  ;;  %v9270_v52 = vpop.f32.mrf.mxu1 }
 0x3c3   :  { %v9103_v35 = vpop.f32.mrf.mxu0  ;;  %v4170_v50 = vmax.f32 %v3705_v12, 0.0 }
 0x3c4   :  { %v3426_v32 = vmax.f32 %v3113_v46, 0.0  ;;  %v3707_v37 = vpop.f32.mrf.mxu1 }
 0x3c5   :  { %v3708_v58 = vadd.f32 %v12456_v56, %v3707_v37  ;;  %v3117_v14 = vpop.f32.mrf.mxu0  ;;  %9201 = vmatmul.mubr.bf16.gmra.mxu0 %v12206_v21 }
 0x3c6   :  { %v3536_v48 = vpack.c.bf16 %v3426_v32, %v3425_v39  ;;  %v9271_v55 = vpop.f32.mrf.mxu1  ;;  %9204 = vmatprep.mubr.msk.bf16.mxu0 %vm10940_vm2, %v10939_v0  ;;  %v3118_v49 = vadd.f32 %v12528_v57, %v3117_v14 }
 0x3c7   :  { %v4171_v4 = vmax.f32 %v3708_v58, 0.0  ;;  %v9106_v33 = vpop.f32.mrf.mxu0 }
 0x3c8   :  { %v3712_v19 = vpop.f32.mrf.mxu1  ;;  %9369 = vmatmul.mubr.bf16.gmra.mxu1 %v3536_v48  ;;  %v3427_v18 = vmax.f32 %v3118_v49, 0.0 }
 0x3c9   :  { %v12542_v34 = vpack.c.bf16 %v4171_v4, %v4170_v50  ;;  %v3120_v13 = vpop.f32.mrf.mxu0  ;;  %9372 = vmatprep.mubr.msk.bf16.mxu1 %vm10940_vm2, %v10939_v0  ;;  %v3713_v26 = vadd.f32 %v12456_v56, %v3712_v19 }
 0x3ca   :  { %v3121_v21 = vadd.f32 %v12528_v57, %v3120_v13  ;;  %v9274_v24 = vpop.f32.mrf.mxu1 }
 0x3cb   :  { %v9107_v7 = vpop.f32.mrf.mxu0  ;;  %v4172_v54 = vmax.f32 %v3713_v26, 0.0 }
 0x3cc   :  { %v3428_v44 = vmax.f32 %v3121_v21, 0.0  ;;  %v3715_v16 = vpop.f32.mrf.mxu1 }
 0x3cd   :  { %v3716_v15 = vadd.f32 %v12456_v56, %v3715_v16  ;;  %v3125_v47 = vpop.f32.mrf.mxu0  ;;  %9205 = vmatmul.mubr.bf16.gmra.mxu0 %v12213_v10 }
 0x3ce   :  { %v3537_v31 = vpack.c.bf16 %v3428_v44, %v3427_v18  ;;  %v9275_v8 = vpop.f32.mrf.mxu1  ;;  %9208 = vmatprep.mubr.msk.bf16.mxu0 %vm10940_vm2, %v10939_v0  ;;  %v3126_v28 = vadd.f32 %v12528_v57, %v3125_v47 }
 0x3cf   :  { %v4173_v59 = vmax.f32 %v3716_v15, 0.0  ;;  %v9110_v60 = vpop.f32.mrf.mxu0 }
 0x3d0   :  { %v3720_v20 = vpop.f32.mrf.mxu1  ;;  %9373 = vmatmul.mubr.bf16.gmra.mxu1 %v3537_v31  ;;  %v3429_v63 = vmax.f32 %v3126_v28, 0.0 }
 0x3d1   :  { %v12556_v42 = vpack.c.bf16 %v4173_v59, %v4172_v54  ;;  %v3128_v27 = vpop.f32.mrf.mxu0  ;;  %9376 = vmatprep.mubr.msk.bf16.mxu1 %vm10940_vm2, %v10939_v0  ;;  %v3721_v62 = vadd.f32 %v12456_v56, %v3720_v20 }
 0x3d2   :  { %v3129_v10 = vadd.f32 %v12528_v57, %v3128_v27  ;;  %v9278_v43 = vpop.f32.mrf.mxu1 }
 0x3d3   :  { %v9111_v23 = vpop.f32.mrf.mxu0  ;;  %v4174_v40 = vmax.f32 %v3721_v62, 0.0 }
 0x3d4   :  { %v3430_v45 = vmax.f32 %v3129_v10, 0.0  ;;  %v3723_v17 = vpop.f32.mrf.mxu1 }
 0x3d5   :  { %v3724_v11 = vadd.f32 %v12456_v56, %v3723_v17  ;;  %v3133_v1 = vpop.f32.mrf.mxu0  ;;  %9209 = vmatmul.mubr.bf16.gmra.mxu0 %v12220_v41 }
 0x3d6   :  { %v3538_v36 = vpack.c.bf16 %v3430_v45, %v3429_v63  ;;  %v9279_v22 = vpop.f32.mrf.mxu1  ;;  %9212 = vmatprep.mubr.msk.bf16.mxu0 %vm10940_vm2, %v10939_v0  ;;  %v3134_v52 = vadd.f32 %v12528_v57, %v3133_v1  ;;  %v10917_v45 = vld [vmem:[%s15036_s4] ss:$0 sm:$0xff] }
 0x3d7   :  { %v4175_v61 = vmax.f32 %v3724_v11, 0.0  ;;  %v9114_v46 = vpop.f32.mrf.mxu0  ;;  %v2567_v17 = vadd.f32 %v10917_v45, %v12256_v53  ;;  %v10905_v45 = vld [vmem:[%s15040_s13 + $0x30] sm:$0xff]  }
 0x3d8   :  { %v3728_v12 = vpop.f32.mrf.mxu1  ;;  %9377 = vmatmul.mubr.bf16.gmra.mxu1 %v3538_v36  ;;  %v3431_v14 = vmax.f32 %v3134_v52, 0.0 }
 0x3d9   :  { %v12568_v35 = vpack.c.bf16 %v4175_v61, %v4174_v40  ;;  %v3136_v39 = vpop.f32.mrf.mxu0  ;;  %9380 = vmatprep.mubr.msk.bf16.mxu1 %vm10940_vm2, %v10939_v0  ;;  %v3729_v37 = vadd.f32 %v12456_v56, %v3728_v12 }
 0x3da   :  { %v3137_v41 = vadd.f32 %v12528_v57, %v3136_v39  ;;  %v9282_v32 = vpop.f32.mrf.mxu1  ;;  %v2692_v39 = vmax.f32 %v2567_v17, 0.0 }
 0x3db   :  { %v9115_v58 = vpop.f32.mrf.mxu0  ;;  %v4176_v19 = vmax.f32 %v3729_v37, 0.0 }
 0x3dc   :  { %v3432_v48 = vmax.f32 %v3137_v41, 0.0  ;;  %v3731_v55 = vpop.f32.mrf.mxu1 }
 0x3dd   :  { %v3732_v50 = vadd.f32 %v12456_v56, %v3731_v55  ;;  %v3141_v4 = vpop.f32.mrf.mxu0  ;;  %9213 = vmatmul.mubr.bf16.gmra.mxu0 %v12227_v29 }
 0x3de   :  { %v3539_v33 = vpack.c.bf16 %v3432_v48, %v3431_v14  ;;  %v9283_v49 = vpop.f32.mrf.mxu1  ;;  %9216 = vmatprep.mubr.msk.bf16.mxu0 %vm10940_vm2, %v10939_v0  ;;  %v3142_v24 = vadd.f32 %v12528_v57, %v3141_v4 }
 0x3df   :  { %v4177_v13 = vmax.f32 %v3732_v50, 0.0  ;;  %v9118_v21 = vpop.f32.mrf.mxu0  ;;  %v2772_v50 = vpack.c.bf16 %v2692_v39, %v2692_v39 }
 0x3e0   :  { %v3736_v26 = vpop.f32.mrf.mxu1  ;;  %9381 = vmatmul.mubr.bf16.gmra.mxu1 %v3539_v33  ;;  %v3433_v47 = vmax.f32 %v3142_v24, 0.0 }
 0x3e1   :  { %v12579_v7 = vpack.c.bf16 %v4177_v13, %v4176_v19  ;;  %v3144_v18 = vpop.f32.mrf.mxu0  ;;  %9384 = vmatprep.mubr.msk.bf16.mxu1 %vm10940_vm2, %v10939_v0  ;;  %v3737_v16 = vadd.f32 %v12456_v56, %v3736_v26 }
 0x3e2   :  { %v3145_v29 = vadd.f32 %v12528_v57, %v3144_v18  ;;  %v9286_v44 = vpop.f32.mrf.mxu1 }
 0x3e3   :  { %v9119_v15 = vpop.f32.mrf.mxu0  ;;  %v4178_v28 = vmax.f32 %v3737_v16, 0.0 }
 0x3e4   :  { %v3434_v31 = vmax.f32 %v3145_v29, 0.0  ;;  %v3739_v8 = vpop.f32.mrf.mxu1 }
 0x3e5   :  { %v3740_v9 = vadd.f32 %v12456_v56, %v3739_v8  ;;  %v3149_v54 = vpop.f32.mrf.mxu0  ;;  %9217 = vmatmul.mubr.bf16.gmra.mxu0 %v12245_v3 }
 0x3e6   :  { %v3540_v59 = vpack.c.bf16 %v3434_v31, %v3433_v47  ;;  %v9287_v60 = vpop.f32.mrf.mxu1  ;;  %9220 = vmatprep.mubr.msk.bf16.mxu0 %vm10940_vm2, %v10939_v0  ;;  %v3150_v10 = vadd.f32 %v12528_v57, %v3149_v54 }
 0x3e7   :  { %v4179_v20 = vmax.f32 %v3740_v9, 0.0  ;;  %v9122_v27 = vpop.f32.mrf.mxu0 }
 0x3e8   :  { %v3744_v43 = vpop.f32.mrf.mxu1  ;;  %9385 = vmatmul.mubr.bf16.gmra.mxu1 %v3540_v59  ;;  %v3435_v36 = vmax.f32 %v3150_v10, 0.0  ;;  %v10903_v59 = vld [vmem:[%s15040_s13 + $0x38] sm:$0xff]  }
 0x3e9   :  { %v12590_v62 = vpack.c.bf16 %v4179_v20, %v4178_v28  ;;  %v3152_v23 = vpop.f32.mrf.mxu0  ;;  %9388 = vmatprep.mubr.msk.bf16.mxu1 %vm10940_vm2, %v10939_v0  ;;  %v3745_v11 = vadd.f32 %v12456_v56, %v3744_v43 }
 0x3ea   :  { %v3153_v3 = vadd.f32 %v12528_v57, %v3152_v23  ;;  %v9290_v63 = vpop.f32.mrf.mxu1 }
 0x3eb   :  { %v9123_v1 = vpop.f32.mrf.mxu0  ;;  %v4180_v41 = vmax.f32 %v3745_v11, 0.0 }
 0x3ec   :  { %v3436_v22 = vmax.f32 %v3153_v3, 0.0  ;;  %v3747_v40 = vpop.f32.mrf.mxu1 }
 0x3ed   :  { %v3748_v61 = vadd.f32 %v12456_v56, %v3747_v40  ;;  %v3157_v46 = vpop.f32.mrf.mxu0  ;;  %9221 = vmatmul.mubr.bf16.gmra.mxu0 %v12265_v6 }
 0x3ee   :  { %v3541_v52 = vpack.c.bf16 %v3436_v22, %v3435_v36  ;;  %v9291_v12 = vpop.f32.mrf.mxu1  ;;  %9224 = vmatprep.mubr.msk.bf16.mxu0 %vm10940_vm2, %v10939_v0  ;;  %v3158_v37 = vadd.f32 %v12528_v57, %v3157_v46 }
 0x3ef   :  { %v4181_v32 = vmax.f32 %v3748_v61, 0.0  ;;  %v9126_v53 = vpop.f32.mrf.mxu0 }
 0x3f0   :  { %v3752_v58 = vpop.f32.mrf.mxu1  ;;  %9389 = vmatmul.mubr.bf16.gmra.mxu1 %v3541_v52  ;;  %v3437_v49 = vmax.f32 %v3158_v37, 0.0  ;;  %v10907_v52 = vld [vmem:[%s15040_s13 + $0x28] sm:$0xff]  }
 0x3f1   :  { %v12605_v14 = vpack.c.bf16 %v4181_v32, %v4180_v41  ;;  %v3160_v48 = vpop.f32.mrf.mxu0  ;;  %9392 = vmatprep.mubr.msk.bf16.mxu1 %vm10940_vm2, %v10939_v0  ;;  %v3753_v4 = vadd.f32 %v12456_v56, %v3752_v58 }
 0x3f2   :  { %v3161_v6 = vadd.f32 %v12528_v57, %v3160_v48  ;;  %v9294_v55 = vpop.f32.mrf.mxu1 }
 0x3f3   :  { %v9127_v33 = vpop.f32.mrf.mxu0  ;;  %v4182_v29 = vmax.f32 %v3753_v4, 0.0 }
 0x3f4   :  { %v3438_v19 = vmax.f32 %v3161_v6, 0.0  ;;  %v3755_v13 = vpop.f32.mrf.mxu1 }
 0x3f5   :  { %v3756_v21 = vadd.f32 %v12456_v56, %v3755_v13  ;;  %v3165_v24 = vpop.f32.mrf.mxu0  ;;  %9225 = vmatmul.mubr.bf16.gmra.mxu0 %v2772_v50 }
 0x3f6   :  { %v3542_v26 = vpack.c.bf16 %v3438_v19, %v3437_v49  ;;  %v9295_v18 = vpop.f32.mrf.mxu1  ;;  %9512 = vmatprep.mubr.msk.bf16.mxu0 %vm10940_vm2, %v10939_v0  ;;  %v3166_v15 = vadd.f32 %v12528_v57, %v3165_v24 }
 0x3f7   :  { %v4183_v44 = vmax.f32 %v3756_v21, 0.0  ;;  %v9130_v16 = vpop.f32.mrf.mxu0 }
 0x3f8   :  { %v3760_v47 = vpop.f32.mrf.mxu1  ;;  %9393 = vmatmul.mubr.bf16.gmra.mxu1 %v3542_v26  ;;  %v3439_v20 = vmax.f32 %v3166_v15, 0.0 }
 0x3f9   :  { %v12615_v31 = vpack.c.bf16 %v4183_v44, %v4182_v29  ;;  %v3168_v8 = vpop.f32.mrf.mxu0  ;;  %9396 = vmatprep.mubr.msk.bf16.mxu1 %vm10940_vm2, %v10939_v0  ;;  %v3761_v60 = vadd.f32 %v12456_v56, %v3760_v47 }
 0x3fa   :  { %v3169_v9 = vadd.f32 %v12528_v57, %v3168_v8  ;;  %v9298_v54 = vpop.f32.mrf.mxu1 }
 0x3fb   :  { %v9131_v28 = vpop.f32.mrf.mxu0  ;;  %v4184_v17 = vmax.f32 %v3761_v60, 0.0 }
 0x3fc   :  { %v3440_v27 = vmax.f32 %v3169_v9, 0.0  ;;  %v3763_v10 = vpop.f32.mrf.mxu1  ;;  %v10908_v9 = vld [vmem:[%s15038_s11] sm:$0xff]  }
 0x3fd   :  { %v3764_v43 = vadd.f32 %v12456_v56, %v3763_v10  ;;  %v3173_v23 = vpop.f32.mrf.mxu0  ;;  %9513 = vmatmul.mubr.bf16.vlgmr.msra.gmra.mxu0 %v12471_v25  ;;  %9779 = vmatpush3.bf16.msra.mxu1 %v10908_v9 }
 0x3fe   :  { %v3543_v3 = vpack.c.bf16 %v3440_v27, %v3439_v20  ;;  %v9299_v63 = vpop.f32.mrf.mxu1  ;;  %10033 = vmatpush3.bf16.msra.mxu0 %v10903_v59  ;;  %9516 = vmatprep.mubr.msk.bf16.mxu0 %vm10940_vm2, %v10939_v0  ;;  %v3174_v36 = vadd.f32 %v12528_v57, %v3173_v23 }
 0x3ff   :  { %v4185_v11 = vmax.f32 %v3764_v43, 0.0  ;;  %v9134_v1 = vpop.f32.mrf.mxu0  ;;  %10034 = vmatprep.subr.bf16.mxu0 %v10939_v0  ;;  %10707 = vmatprep.subr.mxu1 %v10939_v0 }
 0x400   :  { %v3768_v22 = vpop.f32.mrf.mxu1  ;;  %9397 = vmatmul.mubr.bf16.gmra.mxu1 %v3543_v3  ;;  %v3441_v41 = vmax.f32 %v3174_v36, 0.0 }
 0x401   :  { %v12633_v25 = vpack.c.bf16 %v4185_v11, %v4184_v17  ;;  %v3176_v40 = vpop.f32.mrf.mxu0  ;;  %9400 = vmatprep.mubr.msk.bf16.mxu1 %vm10940_vm2, %v10939_v0  ;;  %v3769_v12 = vadd.f32 %v12456_v56, %v3768_v22 }
 0x402   :  { %v3177_v61 = vadd.f32 %v12528_v57, %v3176_v40  ;;  %v9302_v46 = vpop.f32.mrf.mxu1  ;;  %10035 = vmatpush3.bf16.msra.mxu0 %v10905_v45 }
 0x403   :  { %v9135_v39 = vpop.f32.mrf.mxu0  ;;  %10036 = vmatprep.subr.bf16.mxu0 %v10939_v0  ;;  %v4186_v55 = vmax.f32 %v3769_v12, 0.0 }
 0x404   :  { %v3442_v32 = vmax.f32 %v3177_v61, 0.0  ;;  %v3771_v53 = vpop.f32.mrf.mxu1 }
 0x405   :  { %v3772_v37 = vadd.f32 %v12456_v56, %v3771_v53  ;;  %v3181_v58 = vpop.f32.mrf.mxu0  ;;  %9517 = vmatmul.mubr.bf16.gmra.mxu0 %v12482_v51 }
 0x406   :  { %v3544_v48 = vpack.c.bf16 %v3442_v32, %v3441_v41  ;;  %v9303_v6 = vpop.f32.mrf.mxu1  ;;  %9520 = vmatprep.mubr.msk.bf16.mxu0 %vm10940_vm2, %v10939_v0  ;;  %10037 = vmatpush3.bf16.msra.mxu0 %v10907_v52  ;;  %v3182_v33 = vadd.f32 %v12528_v57, %v3181_v58 }
 0x407   :  { %v4187_v50 = vmax.f32 %v3772_v37, 0.0  ;;  %v9138_v4 = vpop.f32.mrf.mxu0  ;;  %10038 = vmatprep.subr.bf16.mxu0 %v10939_v0 }
 0x408   :  { %v3776_v49 = vpop.f32.mrf.mxu1  ;;  %9401 = vmatmul.mubr.bf16.gmra.mxu1 %v3544_v48  ;;  %v3443_v18 = vmax.f32 %v3182_v33, 0.0 }
 0x409   :  { %v12649_v19 = vpack.c.bf16 %v4187_v50, %v4186_v55  ;;  %v3184_v13 = vpop.f32.mrf.mxu0  ;;  %9404 = vmatprep.mubr.msk.bf16.mxu1 %vm10940_vm2, %v10939_v0  ;;  %v3777_v24 = vadd.f32 %v12456_v56, %v3776_v49 }
 0x40a   :  { %v3185_v51 = vadd.f32 %v12528_v57, %v3184_v13  ;;  %v9306_v21 = vpop.f32.mrf.mxu1 }
 0x40b   :  { %v9139_v26 = vpop.f32.mrf.mxu0  ;;  %v4188_v54 = vmax.f32 %v3777_v24, 0.0 }
 0x40c   :  { %v3444_v29 = vmax.f32 %v3185_v51, 0.0  ;;  %v3779_v44 = vpop.f32.mrf.mxu1 }
 0x40d   :  { %v3780_v16 = vadd.f32 %v12456_v56, %v3779_v44  ;;  %v3189_v15 = vpop.f32.mrf.mxu0  ;;  %9521 = vmatmul.mubr.bf16.gmra.mxu0 %v12493_v30 }
 0x40e   :  { %v3545_v47 = vpack.c.bf16 %v3444_v29, %v3443_v18  ;;  %v9307_v8 = vpop.f32.mrf.mxu1  ;;  %9524 = vmatprep.mubr.msk.bf16.mxu0 %vm10940_vm2, %v10939_v0  ;;  %v3190_v28 = vadd.f32 %v12528_v57, %v3189_v15 }
 0x40f   :  { %v4189_v59 = vmax.f32 %v3780_v16, 0.0  ;;  %v9142_v60 = vpop.f32.mrf.mxu0 }
 0x410   :  { %v3784_v20 = vpop.f32.mrf.mxu1  ;;  %9405 = vmatmul.mubr.bf16.gmra.mxu1 %v3545_v47  ;;  %v3445_v63 = vmax.f32 %v3190_v28, 0.0 }
 0x411   :  { %v12663_v27 = vpack.c.bf16 %v4189_v59, %v4188_v54  ;;  %v3192_v10 = vpop.f32.mrf.mxu0  ;;  %9408 = vmatprep.mubr.msk.bf16.mxu1 %vm10940_vm2, %v10939_v0  ;;  %v3785_v23 = vadd.f32 %v12456_v56, %v3784_v20 }
 0x412   :  { %v3193_v30 = vadd.f32 %v12528_v57, %v3192_v10  ;;  %v9310_v43 = vpop.f32.mrf.mxu1 }
 0x413   :  { %v9143_v3 = vpop.f32.mrf.mxu0  ;;  %v4190_v40 = vmax.f32 %v3785_v23, 0.0 }
 0x414   :  { %v3446_v45 = vmax.f32 %v3193_v30, 0.0  ;;  %v3787_v17 = vpop.f32.mrf.mxu1 }
 0x415   :  { %v3788_v11 = vadd.f32 %v12456_v56, %v3787_v17  ;;  %v3197_v1 = vpop.f32.mrf.mxu0  ;;  %9525 = vmatmul.mubr.bf16.gmra.mxu0 %v12504_v38 }
 0x416   :  { %v3546_v36 = vpack.c.bf16 %v3446_v45, %v3445_v63  ;;  %v9311_v22 = vpop.f32.mrf.mxu1  ;;  %9528 = vmatprep.mubr.msk.bf16.mxu0 %vm10940_vm2, %v10939_v0  ;;  %v3198_v52 = vadd.f32 %v12528_v57, %v3197_v1 }
 0x417   :  { %v4191_v61 = vmax.f32 %v3788_v11, 0.0  ;;  %v9146_v46 = vpop.f32.mrf.mxu0 }
 0x418   :  { %v3792_v12 = vpop.f32.mrf.mxu1  ;;  %9409 = vmatmul.mubr.bf16.gmra.mxu1 %v3546_v36  ;;  %v3447_v58 = vmax.f32 %v3198_v52, 0.0 }
 0x419   :  { %v12675_v39 = vpack.c.bf16 %v4191_v61, %v4190_v40  ;;  %v3200_v41 = vpop.f32.mrf.mxu0  ;;  %9412 = vmatprep.mubr.msk.bf16.mxu1 %vm10940_vm2, %v10939_v0  ;;  %v3793_v53 = vadd.f32 %v12456_v56, %v3792_v12 }
 0x41a   :  { %v3201_v38 = vadd.f32 %v12528_v57, %v3200_v41  ;;  %v9314_v32 = vpop.f32.mrf.mxu1 }
 0x41b   :  { %v9147_v37 = vpop.f32.mrf.mxu0  ;;  %v4192_v49 = vmax.f32 %v3793_v53, 0.0 }
 0x41c   :  { %v3448_v48 = vmax.f32 %v3201_v38, 0.0  ;;  %v3795_v6 = vpop.f32.mrf.mxu1 }
 0x41d   :  { %v3796_v55 = vadd.f32 %v12456_v56, %v3795_v6  ;;  %v3205_v50 = vpop.f32.mrf.mxu0  ;;  %9529 = vmatmul.mubr.bf16.gmra.mxu0 %v12515_v5 }
 0x41e   :  { %v3547_v4 = vpack.c.bf16 %v3448_v48, %v3447_v58  ;;  %v9315_v33 = vpop.f32.mrf.mxu1  ;;  %9532 = vmatprep.mubr.msk.bf16.mxu0 %vm10940_vm2, %v10939_v0  ;;  %v3206_v21 = vadd.f32 %v12528_v57, %v3205_v50 }
 0x41f   :  { %v4193_v13 = vmax.f32 %v3796_v55, 0.0  ;;  %v9150_v51 = vpop.f32.mrf.mxu0 }
 0x420   :  { %v3800_v24 = vpop.f32.mrf.mxu1  ;;  %9413 = vmatmul.mubr.bf16.gmra.mxu1 %v3547_v4  ;;  %v3449_v15 = vmax.f32 %v3206_v21, 0.0 }
 0x421   :  { %v12686_v26 = vpack.c.bf16 %v4193_v13, %v4192_v49  ;;  %v3208_v18 = vpop.f32.mrf.mxu0  ;;  %9416 = vmatprep.mubr.msk.bf16.mxu1 %vm10940_vm2, %v10939_v0  ;;  %v3801_v44 = vadd.f32 %v12456_v56, %v3800_v24 }
 0x422   :  { %v3209_v5 = vadd.f32 %v12528_v57, %v3208_v18  ;;  %v9318_v29 = vpop.f32.mrf.mxu1 }
 0x423   :  { %v9151_v16 = vpop.f32.mrf.mxu0  ;;  %v4194_v28 = vmax.f32 %v3801_v44, 0.0 }
 0x424   :  { %v3450_v47 = vmax.f32 %v3209_v5, 0.0  ;;  %v3803_v8 = vpop.f32.mrf.mxu1 }
 0x425   :  { %v3804_v9 = vadd.f32 %v12456_v56, %v3803_v8  ;;  %v3213_v54 = vpop.f32.mrf.mxu0  ;;  %9533 = vmatmul.mubr.bf16.gmra.mxu0 %v12531_v2 }
 0x426   :  { %v3548_v59 = vpack.c.bf16 %v3450_v47, %v3449_v15  ;;  %v9319_v60 = vpop.f32.mrf.mxu1  ;;  %9536 = vmatprep.mubr.msk.bf16.mxu0 %vm10940_vm2, %v10939_v0  ;;  %v3214_v30 = vadd.f32 %v12528_v57, %v3213_v54 }
 0x427   :  { %v4195_v20 = vmax.f32 %v3804_v9, 0.0  ;;  %v9154_v10 = vpop.f32.mrf.mxu0 }
 0x428   :  { %v3808_v43 = vpop.f32.mrf.mxu1  ;;  %9417 = vmatmul.mubr.bf16.gmra.mxu1 %v3548_v59  ;;  %v3451_v11 = vmax.f32 %v3214_v30, 0.0 }
 0x429   :  { %v12697_v23 = vpack.c.bf16 %v4195_v20, %v4194_v28  ;;  %v3216_v3 = vpop.f32.mrf.mxu0  ;;  %9420 = vmatprep.mubr.msk.bf16.mxu1 %vm10940_vm2, %v10939_v0  ;;  %v3809_v45 = vadd.f32 %v12456_v56, %v3808_v43 }
 0x42a   :  { %v3217_v2 = vadd.f32 %v12528_v57, %v3216_v3  ;;  %v9322_v63 = vpop.f32.mrf.mxu1 }
 0x42b   :  { %v9155_v17 = vpop.f32.mrf.mxu0  ;;  %v4196_v52 = vmax.f32 %v3809_v45, 0.0 }
 0x42c   :  { %v3452_v1 = vmax.f32 %v3217_v2, 0.0  ;;  %v3811_v36 = vpop.f32.mrf.mxu1 }
 0x42d   :  { %v3812_v22 = vadd.f32 %v12456_v56, %v3811_v36  ;;  %v3221_v40 = vpop.f32.mrf.mxu0  ;;  %9537 = vmatmul.mubr.bf16.gmra.mxu0 %v12542_v34 }
 0x42e   :  { %v3549_v61 = vpack.c.bf16 %v3452_v1, %v3451_v11  ;;  %v9323_v46 = vpop.f32.mrf.mxu1  ;;  %9540 = vmatprep.mubr.msk.bf16.mxu0 %vm10940_vm2, %v10939_v0  ;;  %v3222_v38 = vadd.f32 %v12528_v57, %v3221_v40  ;;  %v12741_v1 = vld [vmem:[%s15041_s8] ss:$0 sm:$0xff] }
 0x42f   :  { %v4197_v12 = vmax.f32 %v3812_v22, 0.0  ;;  %v9158_v41 = vpop.f32.mrf.mxu0 }
 0x430   :  { %v3816_v32 = vpop.f32.mrf.mxu1  ;;  %9421 = vmatmul.mubr.bf16.gmra.mxu1 %v3549_v61  ;;  %v3453_v55 = vmax.f32 %v3222_v38, 0.0 }
 0x431   :  { %v12708_v53 = vpack.c.bf16 %v4197_v12, %v4196_v52  ;;  %v3224_v37 = vpop.f32.mrf.mxu0  ;;  %9424 = vmatprep.mubr.msk.bf16.mxu1 %vm10940_vm2, %v10939_v0  ;;  %v3817_v48 = vadd.f32 %v12456_v56, %v3816_v32 }
 0x432   :  { %v3225_v34 = vadd.f32 %v12528_v57, %v3224_v37  ;;  %v9326_v58 = vpop.f32.mrf.mxu1 }
 0x433   :  { %v9159_v6 = vpop.f32.mrf.mxu0  ;;  %v4198_v21 = vmax.f32 %v3817_v48, 0.0 }
 0x434   :  { %v3454_v50 = vmax.f32 %v3225_v34, 0.0  ;;  %v3819_v4 = vpop.f32.mrf.mxu1 }
 0x435   :  { %v3820_v33 = vadd.f32 %v12456_v56, %v3819_v4  ;;  %v3229_v49 = vpop.f32.mrf.mxu0  ;;  %9541 = vmatmul.mubr.bf16.gmra.mxu0 %v12556_v42 }
 0x436   :  { %v3550_v13 = vpack.c.bf16 %v3454_v50, %v3453_v55  ;;  %v9327_v51 = vpop.f32.mrf.mxu1  ;;  %9544 = vmatprep.mubr.msk.bf16.mxu0 %vm10940_vm2, %v10939_v0  ;;  %v3230_v5 = vadd.f32 %v12528_v57, %v3229_v49 }
 0x437   :  { %v4199_v24 = vmax.f32 %v3820_v33, 0.0  ;;  %v9162_v18 = vpop.f32.mrf.mxu0 }
 0x438   :  { %v3824_v29 = vpop.f32.mrf.mxu1  ;;  %9425 = vmatmul.mubr.bf16.gmra.mxu1 %v3550_v13  ;;  %v3455_v9 = vmax.f32 %v3230_v5, 0.0 }
 0x439   :  { %v12719_v44 = vpack.c.bf16 %v4199_v24, %v4198_v21  ;;  %v3232_v16 = vpop.f32.mrf.mxu0  ;;  %9428 = vmatprep.mubr.msk.bf16.mxu1 %vm10940_vm2, %v10939_v0  ;;  %v3825_v47 = vadd.f32 %v12456_v56, %v3824_v29 }
 0x43a   :  { %v3233_v42 = vadd.f32 %v12528_v57, %v3232_v16  ;;  %v9330_v15 = vpop.f32.mrf.mxu1 }
 0x43b   :  { %v9163_v8 = vpop.f32.mrf.mxu0  ;;  %v4200_v30 = vmax.f32 %v3825_v47, 0.0 }
 0x43c   :  { %v3456_v54 = vmax.f32 %v3233_v42, 0.0  ;;  %v3827_v59 = vpop.f32.mrf.mxu1 }
 0x43d   :  { %v3828_v60 = vadd.f32 %v12456_v56, %v3827_v59  ;;  %v3237_v28 = vpop.f32.mrf.mxu0  ;;  %9545 = vmatmul.mubr.bf16.gmra.mxu0 %v12568_v35  ;;  %v10909_v56 = vld [vmem:[%s15040_s13 + $0x20] sm:$0xff]  }
 0x43e   :  { %v3551_v20 = vpack.c.bf16 %v3456_v54, %v3455_v9  ;;  %v9331_v10 = vpop.f32.mrf.mxu1  ;;  %9548 = vmatprep.mubr.msk.bf16.mxu0 %vm10940_vm2, %v10939_v0  ;;  %v3238_v2 = vadd.f32 %v12528_v57, %v3237_v28  ;;  %10039 = vmatpush3.bf16.msra.mxu0 %v10909_v56 }
 0x43f   :  { %v4201_v43 = vmax.f32 %v3828_v60, 0.0  ;;  %v9166_v3 = vpop.f32.mrf.mxu0  ;;  %10040 = vmatprep.subr.bf16.mxu0 %v10939_v0 }
 0x440   :  { %v3832_v63 = vpop.f32.mrf.mxu1  ;;  %9429 = vmatmul.mubr.bf16.gmra.mxu1 %v3551_v20  ;;  %v3457_v40 = vmax.f32 %v3238_v2, 0.0 }
 0x441   :  { %v12730_v45 = vpack.c.bf16 %v4201_v43, %v4200_v30  ;;  %v3240_v17 = vpop.f32.mrf.mxu0  ;;  %9432 = vmatprep.mubr.msk.bf16.mxu1 %vm10940_vm2, %v10939_v0  ;;  %v3833_v36 = vadd.f32 %v12741_v1, %v3832_v63 }
 0x442   :  { %v3241_v35 = vadd.f32 %v12528_v57, %v3240_v17  ;;  %v9334_v11 = vpop.f32.mrf.mxu1 }
 0x443   :  { %v9167_v22 = vpop.f32.mrf.mxu0  ;;  %v4202_v32 = vmax.f32 %v3833_v36, 0.0 }
 0x444   :  { %v3458_v61 = vmax.f32 %v3241_v35, 0.0  ;;  %v3835_v46 = vpop.f32.mrf.mxu1 }
 0x445   :  { %v3836_v52 = vadd.f32 %v12741_v1, %v3835_v46  ;;  %v3245_v12 = vpop.f32.mrf.mxu0  ;;  %9549 = vmatmul.mubr.bf16.gmra.mxu0 %v12579_v7 }
 0x446   :  { %v3552_v41 = vpack.c.bf16 %v3458_v61, %v3457_v40  ;;  %v9335_v38 = vpop.f32.mrf.mxu1  ;;  %9552 = vmatprep.mubr.msk.bf16.mxu0 %vm10940_vm2, %v10939_v0  ;;  %v3246_v58 = vadd.f32 %v12528_v57, %v3245_v12 }
 0x447   :  { %v4203_v37 = vmax.f32 %v3836_v52, 0.0  ;;  %v9170_v34 = vpop.f32.mrf.mxu0 }
 0x448   :  { %v3840_v48 = vpop.f32.mrf.mxu1  ;;  %9433 = vmatmul.mubr.bf16.gmra.mxu1 %v3552_v41  ;;  %v3459_v49 = vmax.f32 %v3246_v58, 0.0 }
 0x449   :  { %v12750_v6 = vpack.c.bf16 %v4203_v37, %v4202_v32  ;;  %v3248_v55 = vpop.f32.mrf.mxu0  ;;  %9436 = vmatprep.mubr.msk.bf16.mxu1 %vm10940_vm2, %v10939_v0  ;;  %v3841_v4 = vadd.f32 %v12741_v1, %v3840_v48 }
 0x44a   :  { %v3249_v7 = vadd.f32 %v12528_v57, %v3248_v55  ;;  %v9338_v50 = vpop.f32.mrf.mxu1 }
 0x44b   :  { %v9171_v33 = vpop.f32.mrf.mxu0  ;;  %v4204_v29 = vmax.f32 %v3841_v4, 0.0 }
 0x44c   :  { %v3460_v13 = vmax.f32 %v3249_v7, 0.0  ;;  %v3843_v51 = vpop.f32.mrf.mxu1 }
 0x44d   :  { %v3844_v21 = vadd.f32 %v12741_v1, %v3843_v51  ;;  %v3253_v24 = vpop.f32.mrf.mxu0  ;;  %9553 = vmatmul.mubr.bf16.gmra.mxu0 %v12590_v62 }
 0x44e   :  { %v3553_v18 = vpack.c.bf16 %v3460_v13, %v3459_v49  ;;  %v9339_v5 = vpop.f32.mrf.mxu1  ;;  %9556 = vmatprep.mubr.msk.bf16.mxu0 %vm10940_vm2, %v10939_v0  ;;  %v3254_v15 = vadd.f32 %v12528_v57, %v3253_v24 }
 0x44f   :  { %v4205_v16 = vmax.f32 %v3844_v21, 0.0  ;;  %v9174_v42 = vpop.f32.mrf.mxu0 }
 0x450   :  { %v3848_v47 = vpop.f32.mrf.mxu1  ;;  %9437 = vmatmul.mubr.bf16.gmra.mxu1 %v3553_v18  ;;  %v3461_v28 = vmax.f32 %v3254_v15, 0.0 }
 0x451   :  { %v12761_v8 = vpack.c.bf16 %v4205_v16, %v4204_v29  ;;  %v3256_v9 = vpop.f32.mrf.mxu0  ;;  %9440 = vmatprep.mubr.msk.bf16.mxu1 %vm10940_vm2, %v10939_v0  ;;  %v3849_v59 = vadd.f32 %v12741_v1, %v3848_v47 }
 0x452   :  { %v3257_v62 = vadd.f32 %v12528_v57, %v3256_v9  ;;  %v9342_v54 = vpop.f32.mrf.mxu1 }
 0x453   :  { %v9175_v60 = vpop.f32.mrf.mxu0  ;;  %v4206_v63 = vmax.f32 %v3849_v59, 0.0 }
 0x454   :  { %v3462_v20 = vmax.f32 %v3257_v62, 0.0  ;;  %v3851_v10 = vpop.f32.mrf.mxu1 }
 0x455   :  { %v3852_v30 = vadd.f32 %v12741_v1, %v3851_v10  ;;  %v3261_v43 = vpop.f32.mrf.mxu0  ;;  %9557 = vmatmul.mubr.bf16.gmra.mxu0 %v12605_v14 }
 0x456   :  { %v3554_v3 = vpack.c.bf16 %v3462_v20, %v3461_v28  ;;  %v9343_v2 = vpop.f32.mrf.mxu1  ;;  %9560 = vmatprep.mubr.msk.bf16.mxu0 %vm10940_vm2, %v10939_v0  ;;  %v3262_v35 = vadd.f32 %v12528_v57, %v3261_v43 }
 0x457   :  { %v4207_v17 = vmax.f32 %v3852_v30, 0.0  ;;  %v9178_v56 = vpop.f32.mrf.mxu0 }
 0x458   :  { %v3856_v11 = vpop.f32.mrf.mxu1  ;;  %9441 = vmatmul.mubr.bf16.gmra.mxu1 %v3554_v3  ;;  %v3463_v52 = vmax.f32 %v3262_v35, 0.0 }
 0x459   :  { %v12772_v36 = vpack.c.bf16 %v4207_v17, %v4206_v63  ;;  %v3264_v22 = vpop.f32.mrf.mxu0  ;;  %9444 = vmatprep.mubr.msk.bf16.mxu1 %vm10940_vm2, %v10939_v0  ;;  %v3857_v61 = vadd.f32 %v12741_v1, %v3856_v11 }
 0x45a   :  { %v3265_v14 = vadd.f32 %v12528_v57, %v3264_v22  ;;  %v9346_v40 = vpop.f32.mrf.mxu1 }
 0x45b   :  { %v9179_v46 = vpop.f32.mrf.mxu0  ;;  %v4208_v58 = vmax.f32 %v3857_v61, 0.0 }
 0x45c   :  { %v3464_v12 = vmax.f32 %v3265_v14, 0.0  ;;  %v3859_v41 = vpop.f32.mrf.mxu1 }
 0x45d   :  { %v3860_v38 = vadd.f32 %v12741_v1, %v3859_v41  ;;  %v3269_v32 = vpop.f32.mrf.mxu0  ;;  %9561 = vmatmul.mubr.bf16.gmra.mxu0 %v12615_v31 }
 0x45e   :  { %v3555_v37 = vpack.c.bf16 %v3464_v12, %v3463_v52  ;;  %v9347_v34 = vpop.f32.mrf.mxu1  ;;  %9564 = vmatprep.mubr.msk.bf16.mxu0 %vm10940_vm2, %v10939_v0  ;;  %v3270_v7 = vadd.f32 %v12528_v57, %v3269_v32 }
 0x45f   :  { %v4209_v48 = vmax.f32 %v3860_v38, 0.0  ;;  %v9182_v55 = vpop.f32.mrf.mxu0 }
 0x460   :  { %v3864_v50 = vpop.f32.mrf.mxu1  ;;  %9445 = vmatmul.mubr.bf16.gmra.mxu1 %v3555_v37  ;;  %v3465_v21 = vmax.f32 %v3270_v7, 0.0 }
 0x461   :  { %v12783_v4 = vpack.c.bf16 %v4209_v48, %v4208_v58  ;;  %v3272_v33 = vpop.f32.mrf.mxu0  ;;  %9448 = vmatprep.mubr.msk.bf16.mxu1 %vm10940_vm2, %v10939_v0  ;;  %v3865_v13 = vadd.f32 %v12741_v1, %v3864_v50 }
 0x462   :  { %v3273_v31 = vadd.f32 %v12528_v57, %v3272_v33  ;;  %v9350_v49 = vpop.f32.mrf.mxu1  ;;  %v12818_v33 = vld [vmem:[%s15039_s6] ss:$0 sm:$0xff] }
 0x463   :  { %v9183_v51 = vpop.f32.mrf.mxu0  ;;  %v4210_v15 = vmax.f32 %v3865_v13, 0.0 }
 0x464   :  { %v3466_v24 = vmax.f32 %v3273_v31, 0.0  ;;  %v3867_v18 = vpop.f32.mrf.mxu1 }
 0x465   :  { %v3868_v5 = vadd.f32 %v12741_v1, %v3867_v18  ;;  %v3277_v29 = vpop.f32.mrf.mxu0  ;;  %9565 = vmatmul.mubr.bf16.gmra.mxu0 %v12633_v25 }
 0x466   :  { %v3556_v16 = vpack.c.bf16 %v3466_v24, %v3465_v21  ;;  %v9351_v42 = vpop.f32.mrf.mxu1  ;;  %9568 = vmatprep.mubr.msk.bf16.mxu0 %vm10940_vm2, %v10939_v0  ;;  %v3278_v62 = vadd.f32 %v12528_v57, %v3277_v29 }
 0x467   :  { %v4211_v47 = vmax.f32 %v3868_v5, 0.0  ;;  %v9186_v9 = vpop.f32.mrf.mxu0 }
 0x468   :  { %v3872_v54 = vpop.f32.mrf.mxu1  ;;  %9449 = vmatmul.mubr.bf16.gmra.mxu1 %v3556_v16  ;;  %v3467_v30 = vmax.f32 %v3278_v62, 0.0 }
 0x469   :  { %v12794_v59 = vpack.c.bf16 %v4211_v47, %v4210_v15  ;;  %v3280_v60 = vpop.f32.mrf.mxu0  ;;  %9452 = vmatprep.mubr.msk.bf16.mxu1 %vm10940_vm2, %v10939_v0  ;;  %v3873_v20 = vadd.f32 %v12741_v1, %v3872_v54 }
 0x46a   :  { %v3281_v25 = vadd.f32 %v12528_v57, %v3280_v60  ;;  %v9354_v28 = vpop.f32.mrf.mxu1 }
 0x46b   :  { %v9187_v10 = vpop.f32.mrf.mxu0  ;;  %v4212_v35 = vmax.f32 %v3873_v20, 0.0 }
 0x46c   :  { %v3468_v43 = vmax.f32 %v3281_v25, 0.0  ;;  %v3875_v3 = vpop.f32.mrf.mxu1 }
 0x46d   :  { %v3876_v2 = vadd.f32 %v12741_v1, %v3875_v3  ;;  %v3285_v63 = vpop.f32.mrf.mxu0  ;;  %9569 = vmatmul.mubr.bf16.gmra.mxu0 %v12649_v19 }
 0x46e   :  { %v3557_v17 = vpack.c.bf16 %v3468_v43, %v3467_v30  ;;  %v9355_v56 = vpop.f32.mrf.mxu1  ;;  %9572 = vmatprep.mubr.msk.bf16.mxu0 %vm10940_vm2, %v10939_v0  ;;  %v3286_v14 = vadd.f32 %v12528_v57, %v3285_v63 }
 0x46f   :  { %v4213_v11 = vmax.f32 %v3876_v2, 0.0  ;;  %v9190_v22 = vpop.f32.mrf.mxu0 }
 0x470   :  { %v3880_v40 = vpop.f32.mrf.mxu1  ;;  %9453 = vmatmul.mubr.bf16.gmra.mxu1 %v3557_v17  ;;  %v3469_v38 = vmax.f32 %v3286_v14, 0.0 }
 0x471   :  { %v12805_v61 = vpack.c.bf16 %v4213_v11, %v4212_v35  ;;  %v3288_v46 = vpop.f32.mrf.mxu0  ;;  %9456 = vmatprep.mubr.msk.bf16.mxu1 %vm10940_vm2, %v10939_v0  ;;  %v3881_v12 = vadd.f32 %v12741_v1, %v3880_v40 }
 0x472   :  { %v3289_v19 = vadd.f32 %v12528_v57, %v3288_v46  ;;  %v9358_v52 = vpop.f32.mrf.mxu1 }
 0x473   :  { %v9191_v41 = vpop.f32.mrf.mxu0  ;;  %v4214_v7 = vmax.f32 %v3881_v12, 0.0 }
 0x474   :  { %v3470_v32 = vmax.f32 %v3289_v19, 0.0  ;;  %v3883_v37 = vpop.f32.mrf.mxu1 }
 0x475   :  { %v3884_v34 = vadd.f32 %v12741_v1, %v3883_v37  ;;  %v3293_v58 = vpop.f32.mrf.mxu0  ;;  %9573 = vmatmul.mubr.bf16.gmra.mxu0 %v12663_v27 }
 0x476   :  { %v3558_v48 = vpack.c.bf16 %v3470_v32, %v3469_v38  ;;  %v9359_v55 = vpop.f32.mrf.mxu1  ;;  %9576 = vmatprep.mubr.msk.bf16.mxu0 %vm10940_vm2, %v10939_v0  ;;  %v3294_v31 = vadd.f32 %v12818_v33, %v3293_v58 }
 0x477   :  { %v4215_v50 = vmax.f32 %v3884_v34, 0.0  ;;  %v9194_v57 = vpop.f32.mrf.mxu0 }
 0x478   :  { %v3888_v49 = vpop.f32.mrf.mxu1  ;;  %9457 = vmatmul.mubr.bf16.gmra.mxu1 %v3558_v48  ;;  %v3471_v5 = vmax.f32 %v3294_v31, 0.0 }
 0x479   :  { %v12821_v13 = vpack.c.bf16 %v4215_v50, %v4214_v7  ;;  %v3296_v27 = vpop.f32.mrf.mxu0  ;;  %9460 = vmatprep.mubr.msk.bf16.mxu1 %vm10940_vm2, %v10939_v0  ;;  %v3889_v24 = vadd.f32 %v12741_v1, %v3888_v49 }
 0x47a   :  { %v3297_v51 = vadd.f32 %v12818_v33, %v3296_v27  ;;  %v9362_v21 = vpop.f32.mrf.mxu1 }
 0x47b   :  { %v9195_v18 = vpop.f32.mrf.mxu0  ;;  %v4216_v62 = vmax.f32 %v3889_v24, 0.0 }
 0x47c   :  { %v3472_v29 = vmax.f32 %v3297_v51, 0.0  ;;  %v3891_v16 = vpop.f32.mrf.mxu1 }
 0x47d   :  { %v3892_v42 = vadd.f32 %v12741_v1, %v3891_v16  ;;  %v3301_v15 = vpop.f32.mrf.mxu0  ;;  %9577 = vmatmul.mubr.bf16.gmra.mxu0 %v12675_v39  ;;  %v10910_v39 = vld [vmem:[%s15040_s13 + $0x18] sm:$0xff]  }
 0x47e   :  { %v3559_v47 = vpack.c.bf16 %v3472_v29, %v3471_v5  ;;  %v9363_v9 = vpop.f32.mrf.mxu1  ;;  %9580 = vmatprep.mubr.msk.bf16.mxu0 %vm10940_vm2, %v10939_v0  ;;  %v3302_v25 = vadd.f32 %v12818_v33, %v3301_v15  ;;  %10041 = vmatpush3.bf16.msra.mxu0 %v10910_v39 }
 0x47f   :  { %v4217_v54 = vmax.f32 %v3892_v42, 0.0  ;;  %v9198_v60 = vpop.f32.mrf.mxu0  ;;  %10042 = vmatprep.subr.bf16.mxu0 %v10939_v0 }
 0x480   :  { %v3896_v28 = vpop.f32.mrf.mxu1  ;;  %9461 = vmatmul.mubr.bf16.gmra.mxu1 %v3559_v47  ;;  %v3473_v63 = vmax.f32 %v3302_v25, 0.0 }
 0x481   :  { %v12832_v20 = vpack.c.bf16 %v4217_v54, %v4216_v62  ;;  %v3304_v10 = vpop.f32.mrf.mxu0  ;;  %9464 = vmatprep.mubr.msk.bf16.mxu1 %vm10940_vm2, %v10939_v0  ;;  %v3897_v3 = vadd.f32 %v12741_v1, %v3896_v28 }
 0x482   :  { %v3305_v30 = vadd.f32 %v12818_v33, %v3304_v10  ;;  %v9366_v43 = vpop.f32.mrf.mxu1 }
 0x483   :  { %v9199_v2 = vpop.f32.mrf.mxu0  ;;  %v4218_v40 = vmax.f32 %v3897_v3, 0.0 }
 0x484   :  { %v3474_v17 = vmax.f32 %v3305_v30, 0.0  ;;  %v3899_v56 = vpop.f32.mrf.mxu1 }
 0x485   :  { %v3900_v35 = vadd.f32 %v12741_v1, %v3899_v56  ;;  %v3309_v11 = vpop.f32.mrf.mxu0  ;;  %9581 = vmatmul.mubr.bf16.gmra.mxu0 %v12686_v26 }
 0x486   :  { %v3560_v22 = vpack.c.bf16 %v3474_v17, %v3473_v63  ;;  %v9367_v14 = vpop.f32.mrf.mxu1  ;;  %9584 = vmatprep.mubr.msk.bf16.mxu0 %vm10940_vm2, %v10939_v0  ;;  %v3310_v52 = vadd.f32 %v12818_v33, %v3309_v11 }
 0x487   :  { %v4219_v46 = vmax.f32 %v3900_v35, 0.0  ;;  %v9202_v19 = vpop.f32.mrf.mxu0 }
 0x488   :  { %v3904_v12 = vpop.f32.mrf.mxu1  ;;  %9465 = vmatmul.mubr.bf16.gmra.mxu1 %v3560_v22  ;;  %v3475_v58 = vmax.f32 %v3310_v52, 0.0 }
 0x489   :  { %v12847_v41 = vpack.c.bf16 %v4219_v46, %v4218_v40  ;;  %v3312_v38 = vpop.f32.mrf.mxu0  ;;  %9468 = vmatprep.mubr.msk.bf16.mxu1 %vm10940_vm2, %v10939_v0  ;;  %v3905_v37 = vadd.f32 %v12741_v1, %v3904_v12 }
 0x48a   :  { %v3313_v26 = vadd.f32 %v12818_v33, %v3312_v38  ;;  %v9370_v32 = vpop.f32.mrf.mxu1 }
 0x48b   :  { %v9203_v34 = vpop.f32.mrf.mxu0  ;;  %v4220_v49 = vmax.f32 %v3905_v37, 0.0 }
 0x48c   :  { %v3476_v48 = vmax.f32 %v3313_v26, 0.0  ;;  %v3907_v55 = vpop.f32.mrf.mxu1 }
 0x48d   :  { %v3908_v7 = vadd.f32 %v12741_v1, %v3907_v55  ;;  %v3317_v50 = vpop.f32.mrf.mxu0  ;;  %9585 = vmatmul.mubr.bf16.gmra.mxu0 %v12697_v23 }
 0x48e   :  { %v3561_v57 = vpack.c.bf16 %v3476_v48, %v3475_v58  ;;  %v9371_v31 = vpop.f32.mrf.mxu1  ;;  %9588 = vmatprep.mubr.msk.bf16.mxu0 %vm10940_vm2, %v10939_v0  ;;  %v3318_v21 = vadd.f32 %v12818_v33, %v3317_v50 }
 0x48f   :  { %v4221_v27 = vmax.f32 %v3908_v7, 0.0  ;;  %v9206_v51 = vpop.f32.mrf.mxu0 }
 0x490   :  { %v3912_v24 = vpop.f32.mrf.mxu1  ;;  %9469 = vmatmul.mubr.bf16.gmra.mxu1 %v3561_v57  ;;  %v3477_v15 = vmax.f32 %v3318_v21, 0.0 }
 0x491   :  { %v12858_v18 = vpack.c.bf16 %v4221_v27, %v4220_v49  ;;  %v3320_v5 = vpop.f32.mrf.mxu0  ;;  %9472 = vmatprep.mubr.msk.bf16.mxu1 %vm10940_vm2, %v10939_v0  ;;  %v3913_v16 = vadd.f32 %v12741_v1, %v3912_v24 }
 0x492   :  { %v3321_v23 = vadd.f32 %v12818_v33, %v3320_v5  ;;  %v9374_v29 = vpop.f32.mrf.mxu1 }
 0x493   :  { %v9207_v42 = vpop.f32.mrf.mxu0  ;;  %v4222_v28 = vmax.f32 %v3913_v16, 0.0 }
 0x494   :  { %v3478_v47 = vmax.f32 %v3321_v23, 0.0  ;;  %v3915_v9 = vpop.f32.mrf.mxu1 }
 0x495   :  { %v3916_v62 = vadd.f32 %v12741_v1, %v3915_v9  ;;  %v3325_v54 = vpop.f32.mrf.mxu0  ;;  %9589 = vmatmul.mubr.bf16.gmra.mxu0 %v12708_v53 }
 0x496   :  { %v3562_v60 = vpack.c.bf16 %v3478_v47, %v3477_v15  ;;  %v9375_v25 = vpop.f32.mrf.mxu1  ;;  %9592 = vmatprep.mubr.msk.bf16.mxu0 %vm10940_vm2, %v10939_v0  ;;  %v3326_v30 = vadd.f32 %v12818_v33, %v3325_v54 }
 0x497   :  { %v4223_v10 = vmax.f32 %v3916_v62, 0.0  ;;  %v9210_v39 = vpop.f32.mrf.mxu0 }
 0x498   :  { %v3920_v43 = vpop.f32.mrf.mxu1  ;;  %9473 = vmatmul.mubr.bf16.gmra.mxu1 %v3562_v60  ;;  %v3479_v35 = vmax.f32 %v3326_v30, 0.0 }
 0x499   :  { %v12869_v3 = vpack.c.bf16 %v4223_v10, %v4222_v28  ;;  %v3328_v2 = vpop.f32.mrf.mxu0  ;;  %9476 = vmatprep.mubr.msk.bf16.mxu1 %vm10940_vm2, %v10939_v0  ;;  %v3921_v17 = vadd.f32 %v12741_v1, %v3920_v43 }
 0x49a   :  { %v3329_v53 = vadd.f32 %v12818_v33, %v3328_v2  ;;  %v9378_v63 = vpop.f32.mrf.mxu1 }
 0x49b   :  { %v9211_v56 = vpop.f32.mrf.mxu0  ;;  %v4224_v52 = vmax.f32 %v3921_v17, 0.0 }
 0x49c   :  { %v3480_v11 = vmax.f32 %v3329_v53, 0.0  ;;  %v3923_v22 = vpop.f32.mrf.mxu1 }
 0x49d   :  { %v3924_v14 = vadd.f32 %v12741_v1, %v3923_v22  ;;  %v3333_v40 = vpop.f32.mrf.mxu0  ;;  %9593 = vmatmul.mubr.bf16.gmra.mxu0 %v12719_v44 }
 0x49e   :  { %v3563_v46 = vpack.c.bf16 %v3480_v11, %v3479_v35  ;;  %v9379_v19 = vpop.f32.mrf.mxu1  ;;  %9596 = vmatprep.mubr.msk.bf16.mxu0 %vm10940_vm2, %v10939_v0  ;;  %v3334_v26 = vadd.f32 %v12818_v33, %v3333_v40 }
 0x49f   :  { %v4225_v12 = vmax.f32 %v3924_v14, 0.0  ;;  %v9214_v38 = vpop.f32.mrf.mxu0 }
 0x4a0   :  { %v3928_v32 = vpop.f32.mrf.mxu1  ;;  %9477 = vmatmul.mubr.bf16.gmra.mxu1 %v3563_v46  ;;  %v3481_v7 = vmax.f32 %v3334_v26, 0.0 }
 0x4a1   :  { %v12880_v37 = vpack.c.bf16 %v4225_v12, %v4224_v52  ;;  %v3336_v34 = vpop.f32.mrf.mxu0  ;;  %9480 = vmatprep.mubr.msk.bf16.mxu1 %vm10940_vm2, %v10939_v0  ;;  %v3929_v48 = vadd.f32 %v12741_v1, %v3928_v32 }
 0x4a2   :  { %v3337_v44 = vadd.f32 %v12818_v33, %v3336_v34  ;;  %v9382_v58 = vpop.f32.mrf.mxu1 }
 0x4a3   :  { %v9215_v55 = vpop.f32.mrf.mxu0  ;;  %v4226_v21 = vmax.f32 %v3929_v48, 0.0 }
 0x4a4   :  { %v3482_v50 = vmax.f32 %v3337_v44, 0.0  ;;  %v3931_v57 = vpop.f32.mrf.mxu1 }
 0x4a5   :  { %v3932_v31 = vadd.f32 %v12741_v1, %v3931_v57  ;;  %v3341_v49 = vpop.f32.mrf.mxu0  ;;  %9597 = vmatmul.mubr.bf16.gmra.mxu0 %v12730_v45 }
 0x4a6   :  { %v3564_v27 = vpack.c.bf16 %v3482_v50, %v3481_v7  ;;  %v9383_v51 = vpop.f32.mrf.mxu1  ;;  %9600 = vmatprep.mubr.msk.bf16.mxu0 %vm10940_vm2, %v10939_v0  ;;  %v3342_v23 = vadd.f32 %v12818_v33, %v3341_v49  ;;  %v12922_v49 = vld [vmem:[%s15042_s10] ss:$0 sm:$0xff] }
 0x4a7   :  { %v4227_v24 = vmax.f32 %v3932_v31, 0.0  ;;  %v9218_v5 = vpop.f32.mrf.mxu0 }
 0x4a8   :  { %v3936_v29 = vpop.f32.mrf.mxu1  ;;  %9481 = vmatmul.mubr.bf16.gmra.mxu1 %v3564_v27  ;;  %v3483_v62 = vmax.f32 %v3342_v23, 0.0 }
 0x4a9   :  { %v12891_v16 = vpack.c.bf16 %v4227_v24, %v4226_v21  ;;  %v3344_v42 = vpop.f32.mrf.mxu0  ;;  %9484 = vmatprep.mubr.msk.bf16.mxu1 %vm10940_vm2, %v10939_v0  ;;  %v3937_v47 = vadd.f32 %v12741_v1, %v3936_v29  ;;  %v10911_v24 = vld [vmem:[%s15040_s13 + $0x10] sm:$0xff]  }
 0x4aa   :  { %v3345_v45 = vadd.f32 %v12818_v33, %v3344_v42  ;;  %v9386_v15 = vpop.f32.mrf.mxu1  ;;  %10043 = vmatpush3.bf16.msra.mxu0 %v10911_v24 }
 0x4ab   :  { %v9219_v9 = vpop.f32.mrf.mxu0  ;;  %v4228_v30 = vmax.f32 %v3937_v47, 0.0  ;;  %10044 = vmatprep.subr.bf16.mxu0 %v10939_v0 }
 0x4ac   :  { %v3484_v54 = vmax.f32 %v3345_v45, 0.0  ;;  %v3939_v60 = vpop.f32.mrf.mxu1 }
 0x4ad   :  { %v3940_v25 = vadd.f32 %v12741_v1, %v3939_v60  ;;  %v3349_v28 = vpop.f32.mrf.mxu0  ;;  %9601 = vmatmul.mubr.bf16.gmra.mxu0 %v12750_v6 }
 0x4ae   :  { %v3565_v10 = vpack.c.bf16 %v3484_v54, %v3483_v62  ;;  %v9387_v39 = vpop.f32.mrf.mxu1  ;;  %9604 = vmatprep.mubr.msk.bf16.mxu0 %vm10940_vm2, %v10939_v0  ;;  %v3350_v53 = vadd.f32 %v12818_v33, %v3349_v28 }
 0x4af   :  { %v4229_v43 = vmax.f32 %v3940_v25, 0.0  ;;  %v9222_v2 = vpop.f32.mrf.mxu0 }
 0x4b0   :  { %v3944_v63 = vpop.f32.mrf.mxu1  ;;  %9485 = vmatmul.mubr.bf16.gmra.mxu1 %v3565_v10  ;;  %v3485_v14 = vmax.f32 %v3350_v53, 0.0  ;;  %v6683_v2 = vld [vmem:[%s15043_s15 + $0x78] sm:$0xff] }
 0x4b1   :  { %v12902_v17 = vpack.c.bf16 %v4229_v43, %v4228_v30  ;;  %v3352_v56 = vpop.f32.mrf.mxu0  ;;  %9488 = vmatprep.mubr.msk.bf16.mxu1 %vm10940_vm2, %v10939_v0  ;;  %v3945_v11 = vadd.f32 %v12741_v1, %v3944_v63 }
 0x4b2   :  { %v3353_v6 = vadd.f32 %v12818_v33, %v3352_v56  ;;  %v9390_v35 = vpop.f32.mrf.mxu1 }
 0x4b3   :  { %v9223_v22 = vpop.f32.mrf.mxu0  ;;  %v4230_v32 = vmax.f32 %v3945_v11, 0.0 }
 0x4b4   :  { %v3486_v40 = vmax.f32 %v3353_v6, 0.0  ;;  %v3947_v46 = vpop.f32.mrf.mxu1 }
 0x4b5   :  { %v3948_v19 = vadd.f32 %v12741_v1, %v3947_v46  ;;  %v3357_v52 = vpop.f32.mrf.mxu0  ;;  %9605 = vmatmul.mubr.bf16.gmra.mxu0 %v12761_v8  ;;  %v6681_v46 = vld [vmem:[%s15043_s15 + $0x68] sm:$0xff] }
 0x4b6   :  { %v3566_v12 = vpack.c.bf16 %v3486_v40, %v3485_v14  ;;  %v3358_v38 = vadd.f32 %v12818_v33, %v3357_v52  ;;  %v9391_v26 = vpop.f32.mrf.mxu1  ;;  %9608 = vmatprep.mubr.msk.bf16.mxu0 %vm10940_vm2, %v10939_v0 }
 0x4b7   :  { %v4231_v34 = vmax.f32 %v3948_v19, 0.0  ;;  %v9226_v44 = vpop.f32.mrf.mxu0 }
 0x4b8   :  { %v3952_v58 = vpop.f32.mrf.mxu1  ;;  %9489 = vmatmul.mubr.bf16.gmra.mxu1 %v3566_v12  ;;  %v3487_v7 = vmax.f32 %v3358_v38, 0.0 }
 0x4b9   :  { %v12913_v48 = vpack.c.bf16 %v4231_v34, %v4230_v32  ;;  %v3360_v55 = vpop.f32.mrf.mxu0  ;;  %9492 = vmatprep.mubr.msk.bf16.mxu1 %vm10940_vm2, %v10939_v0  ;;  %v3953_v50 = vadd.f32 %v12741_v1, %v3952_v58  ;;  %v6680_v32 = vld [vmem:[%s15043_s15 + $0x60] sm:$0xff] }
 0x4ba   :  { %v9394_v8 = vpop.f32.mrf.mxu1  ;;  %v3567_v51 = vpack.c.bf16 %v3487_v7, %v3487_v7  ;;  %v6679_v7 = vld [vmem:[%s15043_s15 + $0x58] sm:$0xff] }
 0x4bb   :  { %v9227_v33 = vpop.f32.mrf.mxu0  ;;  %v4232_v5 = vmax.f32 %v3953_v50, 0.0 }
 0x4bc   :  { %v3955_v57 = vpop.f32.mrf.mxu1 }
 0x4bd   :  { %v3956_v31 = vadd.f32 %v12741_v1, %v3955_v57  ;;  %v4451_v27 = vpop.f32.mrf.mxu0  ;;  %9609 = vmatmul.mubr.bf16.gmra.mxu0 %v12772_v36 }
 0x4be   :  { %v9395_v21 = vpop.f32.mrf.mxu1  ;;  %9612 = vmatprep.mubr.msk.bf16.mxu0 %vm10940_vm2, %v10939_v0  ;;  %v4452_v42 = vadd.f32 %v12922_v49, %v4451_v27 }
 0x4bf   :  { %v4233_v23 = vmax.f32 %v3956_v31, 0.0  ;;  %v9514_v29 = vpop.f32.mrf.mxu0 }
 0x4c0   :  { %v3960_v45 = vpop.f32.mrf.mxu1  ;;  %9493 = vmatmul.mubr.bf16.gmra.mxu1 %v3567_v51  ;;  %v4953_v60 = vmax.f32 %v4452_v42, 0.0 }
 0x4c1   :  { %v12931_v15 = vpack.c.bf16 %v4233_v23, %v4232_v5  ;;  %v4454_v36 = vpop.f32.mrf.mxu0  ;;  %9780 = vmatprep.mubr.msk.bf16.mxu1 %vm10940_vm2, %v10939_v0  ;;  %v3961_v62 = vadd.f32 %v12741_v1, %v3960_v45 }
 0x4c2   :  { %v4455_v47 = vadd.f32 %v12922_v49, %v4454_v36  ;;  %v9398_v9 = vpop.f32.mrf.mxu1 }
 0x4c3   :  { %v9515_v54 = vpop.f32.mrf.mxu0  ;;  %v4234_v53 = vmax.f32 %v3961_v62, 0.0 }
 0x4c4   :  { %v4954_v25 = vmax.f32 %v4455_v47, 0.0  ;;  %v3963_v28 = vpop.f32.mrf.mxu1 }
 0x4c5   :  { %v3964_v10 = vadd.f32 %v12741_v1, %v3963_v28  ;;  %v4459_v39 = vpop.f32.mrf.mxu0  ;;  %9613 = vmatmul.mubr.bf16.gmra.mxu0 %v12783_v4  ;;  %v6682_v4 = vld [vmem:[%s15043_s15 + $0x70] sm:$0xff] }
 0x4c6   :  { %v5095_v30 = vpack.c.bf16 %v4954_v25, %v4953_v60  ;;  %v9399_v43 = vpop.f32.mrf.mxu1  ;;  %9616 = vmatprep.mubr.msk.bf16.mxu0 %vm10940_vm2, %v10939_v0  ;;  %v4460_v6 = vadd.f32 %v12922_v49, %v4459_v39 }
 0x4c7   :  { %v4235_v63 = vmax.f32 %v3964_v10, 0.0  ;;  %v9518_v56 = vpop.f32.mrf.mxu0 }
 0x4c8   :  { %v3968_v35 = vpop.f32.mrf.mxu1  ;;  %9781 = vmatmul.mubr.bf16.vlgmr.msra.gmra.mxu1 %v5095_v30  ;;  %v4955_v12 = vmax.f32 %v4460_v6, 0.0 }
 0x4c9   :  { %v12949_v11 = vpack.c.bf16 %v4235_v63, %v4234_v53  ;;  %v4462_v22 = vpop.f32.mrf.mxu0  ;;  %10723 = vmatpush3.msra.mxu1 %v6683_v2  ;;  %9784 = vmatprep.mubr.msk.bf16.mxu1 %vm10940_vm2, %v10939_v0  ;;  %v3969_v19 = vadd.f32 %v12741_v1, %v3968_v35 }
 0x4ca   :  { %v4463_v14 = vadd.f32 %v12922_v49, %v4462_v22  ;;  %v9402_v40 = vpop.f32.mrf.mxu1  ;;  %10708 = vmatprep.subr.mxu1 %v10939_v0 }
 0x4cb   :  { %v9519_v52 = vpop.f32.mrf.mxu0  ;;  %10724 = vmatpush3.msra.mxu1 %v6682_v4  ;;  %v4236_v8 = vmax.f32 %v3969_v19, 0.0 }
 0x4cc   :  { %v4956_v38 = vmax.f32 %v4463_v14, 0.0  ;;  %v3971_v26 = vpop.f32.mrf.mxu1  ;;  %10709 = vmatprep.subr.mxu1 %v10939_v0 }
 0x4cd   :  { %v3972_v34 = vadd.f32 %v12741_v1, %v3971_v26  ;;  %v4467_v44 = vpop.f32.mrf.mxu0  ;;  %9617 = vmatmul.mubr.bf16.gmra.mxu0 %v12794_v59  ;;  %10725 = vmatpush3.msra.mxu1 %v6681_v46 }
 0x4ce   :  { %v5096_v58 = vpack.c.bf16 %v4956_v38, %v4955_v12  ;;  %v9403_v55 = vpop.f32.mrf.mxu1  ;;  %9620 = vmatprep.mubr.msk.bf16.mxu0 %vm10940_vm2, %v10939_v0  ;;  %10710 = vmatprep.subr.mxu1 %v10939_v0  ;;  %v4468_v57 = vadd.f32 %v12922_v49, %v4467_v44 }
 0x4cf   :  { %v4237_v50 = vmax.f32 %v3972_v34, 0.0  ;;  %v9522_v33 = vpop.f32.mrf.mxu0  ;;  %10726 = vmatpush3.msra.mxu1 %v6680_v32 }
 0x4d0   :  { %v3976_v31 = vpop.f32.mrf.mxu1  ;;  %9785 = vmatmul.mubr.bf16.gmra.mxu1 %v5096_v58  ;;  %10711 = vmatprep.subr.mxu1 %v10939_v0  ;;  %v4957_v23 = vmax.f32 %v4468_v57, 0.0 }
 0x4d1   :  { %v12973_v59 = vpack.c.bf16 %v4237_v50, %v4236_v8  ;;  %v4470_v27 = vpop.f32.mrf.mxu0  ;;  %9788 = vmatprep.mubr.msk.bf16.mxu1 %vm10940_vm2, %v10939_v0  ;;  %10727 = vmatpush3.msra.mxu1 %v6679_v7  ;;  %v3977_v24 = vadd.f32 %v12741_v1, %v3976_v31 }
 0x4d2   :  { %v4471_v51 = vadd.f32 %v12922_v49, %v4470_v27  ;;  %v9406_v21 = vpop.f32.mrf.mxu1  ;;  %10712 = vmatprep.subr.mxu1 %v10939_v0 }
 0x4d3   :  { %v9523_v5 = vpop.f32.mrf.mxu0  ;;  %v4238_v62 = vmax.f32 %v3977_v24, 0.0 }
 0x4d4   :  { %v4958_v29 = vmax.f32 %v4471_v51, 0.0  ;;  %v3979_v42 = vpop.f32.mrf.mxu1 }
 0x4d5   :  { %v3980_v45 = vadd.f32 %v12741_v1, %v3979_v42  ;;  %v4475_v36 = vpop.f32.mrf.mxu0  ;;  %9621 = vmatmul.mubr.bf16.gmra.mxu0 %v12805_v61 }
 0x4d6   :  { %v5097_v47 = vpack.c.bf16 %v4958_v29, %v4957_v23  ;;  %v9407_v9 = vpop.f32.mrf.mxu1  ;;  %9624 = vmatprep.mubr.msk.bf16.mxu0 %vm10940_vm2, %v10939_v0  ;;  %v4476_v25 = vadd.f32 %v12922_v49, %v4475_v36 }
 0x4d7   :  { %v4239_v54 = vmax.f32 %v3980_v45, 0.0  ;;  %v9526_v60 = vpop.f32.mrf.mxu0 }
 0x4d8   :  { %v3984_v28 = vpop.f32.mrf.mxu1  ;;  %9789 = vmatmul.mubr.bf16.gmra.mxu1 %v5097_v47  ;;  %v4959_v53 = vmax.f32 %v4476_v25, 0.0 }
 0x4d9   :  { %v12985_v10 = vpack.c.bf16 %v4239_v54, %v4238_v62  ;;  %v4478_v39 = vpop.f32.mrf.mxu0  ;;  %9792 = vmatprep.mubr.msk.bf16.mxu1 %vm10940_vm2, %v10939_v0  ;;  %v3985_v43 = vadd.f32 %v12741_v1, %v3984_v28 }
 0x4da   :  { %v4479_v61 = vadd.f32 %v12922_v49, %v4478_v39  ;;  %v9410_v30 = vpop.f32.mrf.mxu1 }
 0x4db   :  { %v9527_v2 = vpop.f32.mrf.mxu0  ;;  %v4240_v14 = vmax.f32 %v3985_v43, 0.0 }
 0x4dc   :  { %v4960_v63 = vmax.f32 %v4479_v61, 0.0  ;;  %v3987_v56 = vpop.f32.mrf.mxu1 }
 0x4dd   :  { %v3988_v6 = vadd.f32 %v12741_v1, %v3987_v56  ;;  %v4483_v35 = vpop.f32.mrf.mxu0  ;;  %9625 = vmatmul.mubr.bf16.gmra.mxu0 %v12821_v13 }
 0x4de   :  { %v5098_v4 = vpack.c.bf16 %v4960_v63, %v4959_v53  ;;  %v9411_v22 = vpop.f32.mrf.mxu1  ;;  %9628 = vmatprep.mubr.msk.bf16.mxu0 %vm10940_vm2, %v10939_v0  ;;  %v4484_v19 = vadd.f32 %v12922_v49, %v4483_v35 }
 0x4df   :  { %v4241_v40 = vmax.f32 %v3988_v6, 0.0  ;;  %v9530_v46 = vpop.f32.mrf.mxu0 }
 0x4e0   :  { %v3992_v52 = vpop.f32.mrf.mxu1  ;;  %9793 = vmatmul.mubr.bf16.gmra.mxu1 %v5098_v4  ;;  %v4961_v44 = vmax.f32 %v4484_v19, 0.0 }
 0x4e1   :  { %v12996_v12 = vpack.c.bf16 %v4241_v40, %v4240_v14  ;;  %v4486_v38 = vpop.f32.mrf.mxu0  ;;  %9796 = vmatprep.mubr.msk.bf16.mxu1 %vm10940_vm2, %v10939_v0  ;;  %v3993_v32 = vadd.f32 %v12741_v1, %v3992_v52  ;;  %v13031_v14 = vld [vmem:[%s15041_s8] ss:$0 sm:$0xff] }
 0x4e2   :  { %v4487_v13 = vadd.f32 %v12922_v49, %v4486_v38  ;;  %v9414_v26 = vpop.f32.mrf.mxu1 }
 0x4e3   :  { %v9531_v34 = vpop.f32.mrf.mxu0  ;;  %v4242_v57 = vmax.f32 %v3993_v32, 0.0 }
 0x4e4   :  { %v4962_v58 = vmax.f32 %v4487_v13, 0.0  ;;  %v3995_v55 = vpop.f32.mrf.mxu1 }
 0x4e5   :  { %v3996_v7 = vadd.f32 %v12741_v1, %v3995_v55  ;;  %v4491_v8 = vpop.f32.mrf.mxu0  ;;  %9629 = vmatmul.mubr.bf16.gmra.mxu0 %v12832_v20  ;;  %v6678_v20 = vld [vmem:[%s15043_s15 + $0x50] sm:$0xff] }
 0x4e6   :  { %v5099_v50 = vpack.c.bf16 %v4962_v58, %v4961_v44  ;;  %v9415_v33 = vpop.f32.mrf.mxu1  ;;  %9632 = vmatprep.mubr.msk.bf16.mxu0 %vm10940_vm2, %v10939_v0  ;;  %v4492_v51 = vadd.f32 %v12922_v49, %v4491_v8  ;;  %10728 = vmatpush3.msra.mxu1 %v6678_v20 }
 0x4e7   :  { %v4243_v31 = vmax.f32 %v3996_v7, 0.0  ;;  %v9534_v27 = vpop.f32.mrf.mxu0  ;;  %10713 = vmatprep.subr.mxu1 %v10939_v0 }
 0x4e8   :  { %v4000_v21 = vpop.f32.mrf.mxu1  ;;  %9797 = vmatmul.mubr.bf16.gmra.mxu1 %v5099_v50  ;;  %v4963_v36 = vmax.f32 %v4492_v51, 0.0 }
 0x4e9   :  { %v13007_v24 = vpack.c.bf16 %v4243_v31, %v4242_v57  ;;  %v4494_v5 = vpop.f32.mrf.mxu0  ;;  %9800 = vmatprep.mubr.msk.bf16.mxu1 %vm10940_vm2, %v10939_v0  ;;  %v4001_v42 = vadd.f32 %v12741_v1, %v4000_v21  ;;  %v10912_v21 = vld [vmem:[%s15040_s13 + $0x8] sm:$0xff]  }
 0x4ea   :  { %v4495_v23 = vadd.f32 %v12922_v49, %v4494_v5  ;;  %v9418_v29 = vpop.f32.mrf.mxu1  ;;  %10045 = vmatpush3.bf16.msra.mxu0 %v10912_v21 }
 0x4eb   :  { %v9535_v45 = vpop.f32.mrf.mxu0  ;;  %v4244_v28 = vmax.f32 %v4001_v42, 0.0  ;;  %10046 = vmatprep.subr.bf16.mxu0 %v10939_v0 }
 0x4ec   :  { %v4964_v47 = vmax.f32 %v4495_v23, 0.0  ;;  %v4003_v9 = vpop.f32.mrf.mxu1 }
 0x4ed   :  { %v4004_v62 = vadd.f32 %v12741_v1, %v4003_v9  ;;  %v4499_v54 = vpop.f32.mrf.mxu0  ;;  %9633 = vmatmul.mubr.bf16.gmra.mxu0 %v12847_v41 }
 0x4ee   :  { %v5100_v60 = vpack.c.bf16 %v4964_v47, %v4963_v36  ;;  %v9419_v25 = vpop.f32.mrf.mxu1  ;;  %9636 = vmatprep.mubr.msk.bf16.mxu0 %vm10940_vm2, %v10939_v0  ;;  %v4500_v30 = vadd.f32 %v12922_v49, %v4499_v54 }
 0x4ef   :  { %v4245_v39 = vmax.f32 %v4004_v62, 0.0  ;;  %v9538_v61 = vpop.f32.mrf.mxu0 }
 0x4f0   :  { %v4008_v43 = vpop.f32.mrf.mxu1  ;;  %9801 = vmatmul.mubr.bf16.gmra.mxu1 %v5100_v60  ;;  %v4965_v35 = vmax.f32 %v4500_v30, 0.0 }
 0x4f1   :  { %v13022_v2 = vpack.c.bf16 %v4245_v39, %v4244_v28  ;;  %v4502_v53 = vpop.f32.mrf.mxu0  ;;  %9804 = vmatprep.mubr.msk.bf16.mxu1 %vm10940_vm2, %v10939_v0  ;;  %v4009_v56 = vadd.f32 %v12741_v1, %v4008_v43 }
 0x4f2   :  { %v4503_v41 = vadd.f32 %v12922_v49, %v4502_v53  ;;  %v9422_v63 = vpop.f32.mrf.mxu1 }
 0x4f3   :  { %v9539_v6 = vpop.f32.mrf.mxu0  ;;  %v4246_v1 = vmax.f32 %v4009_v56, 0.0 }
 0x4f4   :  { %v4966_v4 = vmax.f32 %v4503_v41, 0.0  ;;  %v4011_v22 = vpop.f32.mrf.mxu1  ;;  %v6677_v6 = vld [vmem:[%s15043_s15 + $0x48] sm:$0xff] }
 0x4f5   :  { %v4012_v40 = vadd.f32 %v13031_v14, %v4011_v22  ;;  %v4507_v46 = vpop.f32.mrf.mxu0  ;;  %9637 = vmatmul.mubr.bf16.gmra.mxu0 %v12858_v18  ;;  %10729 = vmatpush3.msra.mxu1 %v6677_v6 }
 0x4f6   :  { %v5101_v19 = vpack.c.bf16 %v4966_v4, %v4965_v35  ;;  %v9423_v52 = vpop.f32.mrf.mxu1  ;;  %9640 = vmatprep.mubr.msk.bf16.mxu0 %vm10940_vm2, %v10939_v0  ;;  %v4508_v26 = vadd.f32 %v12922_v49, %v4507_v46  ;;  %10714 = vmatprep.subr.mxu1 %v10939_v0 }
 0x4f7   :  { %v4247_v38 = vmax.f32 %v4012_v40, 0.0  ;;  %v9542_v13 = vpop.f32.mrf.mxu0 }
 0x4f8   :  { %v4016_v32 = vpop.f32.mrf.mxu1  ;;  %9805 = vmatmul.mubr.bf16.gmra.mxu1 %v5101_v19  ;;  %v4967_v8 = vmax.f32 %v4508_v26, 0.0 }
 0x4f9   :  { %v13038_v34 = vpack.c.bf16 %v4247_v38, %v4246_v1  ;;  %v4510_v44 = vpop.f32.mrf.mxu0  ;;  %9808 = vmatprep.mubr.msk.bf16.mxu1 %vm10940_vm2, %v10939_v0  ;;  %v4017_v55 = vadd.f32 %v13031_v14, %v4016_v32 }
 0x4fa   :  { %v4511_v18 = vadd.f32 %v12922_v49, %v4510_v44  ;;  %v9426_v58 = vpop.f32.mrf.mxu1 }
 0x4fb   :  { %v9543_v7 = vpop.f32.mrf.mxu0  ;;  %v4248_v5 = vmax.f32 %v4017_v55, 0.0 }
 0x4fc   :  { %v4968_v50 = vmax.f32 %v4511_v18, 0.0  ;;  %v4019_v33 = vpop.f32.mrf.mxu1 }
 0x4fd   :  { %v4020_v57 = vadd.f32 %v13031_v14, %v4019_v33  ;;  %v4515_v31 = vpop.f32.mrf.mxu0  ;;  %9641 = vmatmul.mubr.bf16.gmra.mxu0 %v12869_v3 }
 0x4fe   :  { %v5102_v27 = vpack.c.bf16 %v4968_v50, %v4967_v8  ;;  %v9427_v51 = vpop.f32.mrf.mxu1  ;;  %9644 = vmatprep.mubr.msk.bf16.mxu0 %vm10940_vm2, %v10939_v0  ;;  %v4516_v29 = vadd.f32 %v12922_v49, %v4515_v31 }
 0x4ff   :  { %v4249_v20 = vmax.f32 %v4020_v57, 0.0  ;;  %v9546_v23 = vpop.f32.mrf.mxu0 }
 0x500   :  { %v4024_v42 = vpop.f32.mrf.mxu1  ;;  %9809 = vmatmul.mubr.bf16.gmra.mxu1 %v5102_v27  ;;  %v4969_v54 = vmax.f32 %v4516_v29, 0.0 }
 0x501   :  { %v13052_v45 = vpack.c.bf16 %v4249_v20, %v4248_v5  ;;  %v4518_v3 = vpop.f32.mrf.mxu0  ;;  %9812 = vmatprep.mubr.msk.bf16.mxu1 %vm10940_vm2, %v10939_v0  ;;  %v4025_v9 = vadd.f32 %v13031_v14, %v4024_v42 }
 0x502   :  { %v4519_v36 = vadd.f32 %v12922_v49, %v4518_v3  ;;  %v9430_v47 = vpop.f32.mrf.mxu1 }
 0x503   :  { %v9547_v62 = vpop.f32.mrf.mxu0  ;;  %v4250_v43 = vmax.f32 %v4025_v9, 0.0 }
 0x504   :  { %v4970_v60 = vmax.f32 %v4519_v36, 0.0  ;;  %v4027_v25 = vpop.f32.mrf.mxu1 }
 0x505   :  { %v4028_v28 = vadd.f32 %v13031_v14, %v4027_v25  ;;  %v4523_v39 = vpop.f32.mrf.mxu0  ;;  %9645 = vmatmul.mubr.bf16.gmra.mxu0 %v12880_v37 }
 0x506   :  { %v5103_v61 = vpack.c.bf16 %v4970_v60, %v4969_v54  ;;  %v9431_v30 = vpop.f32.mrf.mxu1  ;;  %9648 = vmatprep.mubr.msk.bf16.mxu0 %vm10940_vm2, %v10939_v0  ;;  %v4524_v63 = vadd.f32 %v12922_v49, %v4523_v39 }
 0x507   :  { %v4251_v53 = vmax.f32 %v4028_v28, 0.0  ;;  %v9550_v41 = vpop.f32.mrf.mxu0 }
 0x508   :  { %v4032_v56 = vpop.f32.mrf.mxu1  ;;  %9813 = vmatmul.mubr.bf16.gmra.mxu1 %v5103_v61  ;;  %v4971_v19 = vmax.f32 %v4524_v63, 0.0 }
 0x509   :  { %v13067_v35 = vpack.c.bf16 %v4251_v53, %v4250_v43  ;;  %v4526_v4 = vpop.f32.mrf.mxu0  ;;  %9816 = vmatprep.mubr.msk.bf16.mxu1 %vm10940_vm2, %v10939_v0  ;;  %v4033_v40 = vadd.f32 %v13031_v14, %v4032_v56 }
 0x50a   :  { %v4527_v37 = vadd.f32 %v12922_v49, %v4526_v4  ;;  %v9434_v22 = vpop.f32.mrf.mxu1 }
 0x50b   :  { %v9551_v46 = vpop.f32.mrf.mxu0  ;;  %v4252_v44 = vmax.f32 %v4033_v40, 0.0 }
 0x50c   :  { %v4972_v52 = vmax.f32 %v4527_v37, 0.0  ;;  %v4035_v1 = vpop.f32.mrf.mxu1 }
 0x50d   :  { %v4036_v38 = vadd.f32 %v13031_v14, %v4035_v1  ;;  %v4531_v13 = vpop.f32.mrf.mxu0  ;;  %9649 = vmatmul.mubr.bf16.gmra.mxu0 %v12891_v16 }
 0x50e   :  { %v5104_v26 = vpack.c.bf16 %v4972_v52, %v4971_v19  ;;  %v9435_v32 = vpop.f32.mrf.mxu1  ;;  %9652 = vmatprep.mubr.msk.bf16.mxu0 %vm10940_vm2, %v10939_v0  ;;  %v4532_v55 = vadd.f32 %v12922_v49, %v4531_v13 }
 0x50f   :  { %v4253_v18 = vmax.f32 %v4036_v38, 0.0  ;;  %v9554_v58 = vpop.f32.mrf.mxu0 }
 0x510   :  { %v4040_v7 = vpop.f32.mrf.mxu1  ;;  %9817 = vmatmul.mubr.bf16.gmra.mxu1 %v5104_v26  ;;  %v4973_v27 = vmax.f32 %v4532_v55, 0.0 }
 0x511   :  { %v13079_v8 = vpack.c.bf16 %v4253_v18, %v4252_v44  ;;  %v4534_v50 = vpop.f32.mrf.mxu0  ;;  %9820 = vmatprep.mubr.msk.bf16.mxu1 %vm10940_vm2, %v10939_v0  ;;  %v4041_v57 = vadd.f32 %v13031_v14, %v4040_v7 }
 0x512   :  { %v4535_v16 = vadd.f32 %v12922_v49, %v4534_v50  ;;  %v9438_v33 = vpop.f32.mrf.mxu1 }
 0x513   :  { %v9555_v31 = vpop.f32.mrf.mxu0  ;;  %v4254_v42 = vmax.f32 %v4041_v57, 0.0 }
 0x514   :  { %v4974_v51 = vmax.f32 %v4535_v16, 0.0  ;;  %v4043_v21 = vpop.f32.mrf.mxu1 }
 0x515   :  { %v4044_v5 = vadd.f32 %v13031_v14, %v4043_v21  ;;  %v4539_v20 = vpop.f32.mrf.mxu0  ;;  %9653 = vmatmul.mubr.bf16.gmra.mxu0 %v12902_v17 }
 0x516   :  { %v5105_v23 = vpack.c.bf16 %v4974_v51, %v4973_v27  ;;  %v9439_v29 = vpop.f32.mrf.mxu1  ;;  %9656 = vmatprep.mubr.msk.bf16.mxu0 %vm10940_vm2, %v10939_v0  ;;  %v4540_v47 = vadd.f32 %v12922_v49, %v4539_v20 }
 0x517   :  { %v4255_v3 = vmax.f32 %v4044_v5, 0.0  ;;  %v9558_v36 = vpop.f32.mrf.mxu0 }
 0x518   :  { %v4048_v9 = vpop.f32.mrf.mxu1  ;;  %9821 = vmatmul.mubr.bf16.gmra.mxu1 %v5105_v23  ;;  %v4975_v39 = vmax.f32 %v4540_v47, 0.0 }
 0x519   :  { %v13090_v62 = vpack.c.bf16 %v4255_v3, %v4254_v42  ;;  %v4542_v54 = vpop.f32.mrf.mxu0  ;;  %9824 = vmatprep.mubr.msk.bf16.mxu1 %vm10940_vm2, %v10939_v0  ;;  %v4049_v25 = vadd.f32 %v13031_v14, %v4048_v9 }
 0x51a   :  { %v4543_v17 = vadd.f32 %v12922_v49, %v4542_v54  ;;  %v9442_v60 = vpop.f32.mrf.mxu1 }
 0x51b   :  { %v9559_v28 = vpop.f32.mrf.mxu0  ;;  %v4256_v56 = vmax.f32 %v4049_v25, 0.0 }
 0x51c   :  { %v4976_v61 = vmax.f32 %v4543_v17, 0.0  ;;  %v4051_v30 = vpop.f32.mrf.mxu1 }
 0x51d   :  { %v4052_v43 = vadd.f32 %v13031_v14, %v4051_v30  ;;  %v4547_v53 = vpop.f32.mrf.mxu0  ;;  %9657 = vmatmul.mubr.bf16.gmra.mxu0 %v12913_v48 }
 0x51e   :  { %v5106_v41 = vpack.c.bf16 %v4976_v61, %v4975_v39  ;;  %v9443_v63 = vpop.f32.mrf.mxu1  ;;  %9660 = vmatprep.mubr.msk.bf16.mxu0 %vm10940_vm2, %v10939_v0  ;;  %v4548_v37 = vadd.f32 %v12922_v49, %v4547_v53 }
 0x51f   :  { %v4257_v6 = vmax.f32 %v4052_v43, 0.0  ;;  %v9562_v4 = vpop.f32.mrf.mxu0 }
 0x520   :  { %v4056_v22 = vpop.f32.mrf.mxu1  ;;  %9825 = vmatmul.mubr.bf16.gmra.mxu1 %v5106_v41  ;;  %v4977_v38 = vmax.f32 %v4548_v37, 0.0 }
 0x521   :  { %v13101_v40 = vpack.c.bf16 %v4257_v6, %v4256_v56  ;;  %v4550_v46 = vpop.f32.mrf.mxu0  ;;  %9828 = vmatprep.mubr.msk.bf16.mxu1 %vm10940_vm2, %v10939_v0  ;;  %v4057_v52 = vadd.f32 %v13031_v14, %v4056_v22 }
 0x522   :  { %v4551_v48 = vadd.f32 %v12922_v49, %v4550_v46  ;;  %v9446_v19 = vpop.f32.mrf.mxu1 }
 0x523   :  { %v9563_v1 = vpop.f32.mrf.mxu0  ;;  %v4258_v55 = vmax.f32 %v4057_v52, 0.0 }
 0x524   :  { %v4978_v13 = vmax.f32 %v4551_v48, 0.0  ;;  %v4059_v26 = vpop.f32.mrf.mxu1 }
 0x525   :  { %v4060_v32 = vadd.f32 %v13031_v14, %v4059_v26  ;;  %v4555_v44 = vpop.f32.mrf.mxu0  ;;  %9661 = vmatmul.mubr.bf16.gmra.mxu0 %v12931_v15  ;;  %v6676_v15 = vld [vmem:[%s15043_s15 + $0x40] sm:$0xff] }
 0x526   :  { %v5107_v18 = vpack.c.bf16 %v4978_v13, %v4977_v38  ;;  %v9447_v58 = vpop.f32.mrf.mxu1  ;;  %9664 = vmatprep.mubr.msk.bf16.mxu0 %vm10940_vm2, %v10939_v0  ;;  %v4556_v16 = vadd.f32 %v12922_v49, %v4555_v44  ;;  %10730 = vmatpush3.msra.mxu1 %v6676_v15 }
 0x527   :  { %v4259_v7 = vmax.f32 %v4060_v32, 0.0  ;;  %v9566_v50 = vpop.f32.mrf.mxu0  ;;  %10715 = vmatprep.subr.mxu1 %v10939_v0 }
 0x528   :  { %v4064_v33 = vpop.f32.mrf.mxu1  ;;  %9829 = vmatmul.mubr.bf16.gmra.mxu1 %v5107_v18  ;;  %v4979_v20 = vmax.f32 %v4556_v16, 0.0 }
 0x529   :  { %v13112_v57 = vpack.c.bf16 %v4259_v7, %v4258_v55  ;;  %v4558_v31 = vpop.f32.mrf.mxu0  ;;  %9832 = vmatprep.mubr.msk.bf16.mxu1 %vm10940_vm2, %v10939_v0  ;;  %v4065_v21 = vadd.f32 %v13031_v14, %v4064_v33  ;;  %v10913_v33 = vld [vmem:[%s15040_s13] sm:$0xff]  }
 0x52a   :  { %v4559_v27 = vadd.f32 %v12922_v49, %v4558_v31  ;;  %v9450_v51 = vpop.f32.mrf.mxu1  ;;  %10047 = vmatpush3.bf16.msra.mxu0 %v10913_v33 }
 0x52b   :  { %v9567_v5 = vpop.f32.mrf.mxu0  ;;  %v4260_v9 = vmax.f32 %v4065_v21, 0.0  ;;  %10300 = vmatprep.subr.mxu0 %v10939_v0 }
 0x52c   :  { %v4980_v23 = vmax.f32 %v4559_v27, 0.0  ;;  %v4067_v29 = vpop.f32.mrf.mxu1 }
 0x52d   :  { %v4068_v42 = vadd.f32 %v13031_v14, %v4067_v29  ;;  %v4563_v3 = vpop.f32.mrf.mxu0  ;;  %9665 = vmatmul.mubr.bf16.gmra.mxu0 %v12949_v11 }
 0x52e   :  { %v5108_v36 = vpack.c.bf16 %v4980_v23, %v4979_v20  ;;  %v9451_v47 = vpop.f32.mrf.mxu1  ;;  %9668 = vmatprep.mubr.msk.bf16.mxu0 %vm10940_vm2, %v10939_v0  ;;  %v4564_v60 = vadd.f32 %v12922_v49, %v4563_v3 }
 0x52f   :  { %v4261_v54 = vmax.f32 %v4068_v42, 0.0  ;;  %v9570_v17 = vpop.f32.mrf.mxu0 }
 0x530   :  { %v4072_v25 = vpop.f32.mrf.mxu1  ;;  %9833 = vmatmul.mubr.bf16.gmra.mxu1 %v5108_v36  ;;  %v4981_v53 = vmax.f32 %v4564_v60, 0.0 }
 0x531   :  { %v13127_v28 = vpack.c.bf16 %v4261_v54, %v4260_v9  ;;  %v4566_v39 = vpop.f32.mrf.mxu0  ;;  %9836 = vmatprep.mubr.msk.bf16.mxu1 %vm10940_vm2, %v10939_v0  ;;  %v4073_v30 = vadd.f32 %v13031_v14, %v4072_v25 }
 0x532   :  { %v4567_v11 = vadd.f32 %v12922_v49, %v4566_v39  ;;  %v9454_v61 = vpop.f32.mrf.mxu1 }
 0x533   :  { %v9571_v43 = vpop.f32.mrf.mxu0  ;;  %v4262_v22 = vmax.f32 %v4073_v30, 0.0 }
 0x534   :  { %v4982_v41 = vmax.f32 %v4567_v11, 0.0  ;;  %v4075_v63 = vpop.f32.mrf.mxu1 }
 0x535   :  { %v4076_v56 = vadd.f32 %v13031_v14, %v4075_v63  ;;  %v4571_v6 = vpop.f32.mrf.mxu0  ;;  %9669 = vmatmul.mubr.bf16.gmra.mxu0 %v12973_v59 }
 0x536   :  { %v5109_v4 = vpack.c.bf16 %v4982_v41, %v4981_v53  ;;  %v9455_v37 = vpop.f32.mrf.mxu1  ;;  %9672 = vmatprep.mubr.msk.bf16.mxu0 %vm10940_vm2, %v10939_v0  ;;  %v4572_v19 = vadd.f32 %v12922_v49, %v4571_v6 }
 0x537   :  { %v4263_v46 = vmax.f32 %v4076_v56, 0.0  ;;  %v9574_v48 = vpop.f32.mrf.mxu0 }
 0x538   :  { %v4080_v52 = vpop.f32.mrf.mxu1  ;;  %9837 = vmatmul.mubr.bf16.gmra.mxu1 %v5109_v4  ;;  %v4983_v44 = vmax.f32 %v4572_v19, 0.0 }
 0x539   :  { %v13138_v1 = vpack.c.bf16 %v4263_v46, %v4262_v22  ;;  %v4574_v38 = vpop.f32.mrf.mxu0  ;;  %9840 = vmatprep.mubr.msk.bf16.mxu1 %vm10940_vm2, %v10939_v0  ;;  %v4081_v26 = vadd.f32 %v13031_v14, %v4080_v52 }
 0x53a   :  { %v4575_v59 = vadd.f32 %v12922_v49, %v4574_v38  ;;  %v9458_v13 = vpop.f32.mrf.mxu1 }
 0x53b   :  { %v9575_v32 = vpop.f32.mrf.mxu0  ;;  %v4264_v31 = vmax.f32 %v4081_v26, 0.0 }
 0x53c   :  { %v4984_v18 = vmax.f32 %v4575_v59, 0.0  ;;  %v4083_v58 = vpop.f32.mrf.mxu1 }
 0x53d   :  { %v4084_v55 = vadd.f32 %v13031_v14, %v4083_v58  ;;  %v4579_v7 = vpop.f32.mrf.mxu0  ;;  %9673 = vmatmul.mubr.bf16.gmra.mxu0 %v12985_v10 }
 0x53e   :  { %v5110_v50 = vpack.c.bf16 %v4984_v18, %v4983_v44  ;;  %v9459_v16 = vpop.f32.mrf.mxu1  ;;  %9676 = vmatprep.mubr.msk.bf16.mxu0 %vm10940_vm2, %v10939_v0  ;;  %v4580_v51 = vadd.f32 %v12922_v49, %v4579_v7 }
 0x53f   :  { %v4265_v15 = vmax.f32 %v4084_v55, 0.0  ;;  %v9578_v27 = vpop.f32.mrf.mxu0 }
 0x540   :  { %v4088_v21 = vpop.f32.mrf.mxu1  ;;  %9841 = vmatmul.mubr.bf16.gmra.mxu1 %v5110_v50  ;;  %v4985_v3 = vmax.f32 %v4580_v51, 0.0 }
 0x541   :  { %v13152_v5 = vpack.c.bf16 %v4265_v15, %v4264_v31  ;;  %v4582_v10 = vpop.f32.mrf.mxu0  ;;  %9844 = vmatprep.mubr.msk.bf16.mxu1 %vm10940_vm2, %v10939_v0  ;;  %v4089_v29 = vadd.f32 %v13031_v14, %v4088_v21 }
 0x542   :  { %v4583_v20 = vadd.f32 %v12922_v49, %v4582_v10  ;;  %v9462_v23 = vpop.f32.mrf.mxu1 }
 0x543   :  { %v9579_v42 = vpop.f32.mrf.mxu0  ;;  %v4266_v25 = vmax.f32 %v4089_v29, 0.0 }
 0x544   :  { %v4986_v36 = vmax.f32 %v4583_v20, 0.0  ;;  %v4091_v47 = vpop.f32.mrf.mxu1 }
 0x545   :  { %v4092_v9 = vadd.f32 %v13031_v14, %v4091_v47  ;;  %v4587_v54 = vpop.f32.mrf.mxu0  ;;  %9677 = vmatmul.mubr.bf16.gmra.mxu0 %v12996_v12  ;;  %v6675_v12 = vld [vmem:[%s15043_s15 + $0x38] sm:$0xff] }
 0x546   :  { %v5111_v17 = vpack.c.bf16 %v4986_v36, %v4985_v3  ;;  %v9463_v60 = vpop.f32.mrf.mxu1  ;;  %9680 = vmatprep.mubr.msk.bf16.mxu0 %vm10940_vm2, %v10939_v0  ;;  %v4588_v61 = vadd.f32 %v12922_v49, %v4587_v54  ;;  %10731 = vmatpush3.msra.mxu1 %v6675_v12 }
 0x547   :  { %v4267_v39 = vmax.f32 %v4092_v9, 0.0  ;;  %v9582_v11 = vpop.f32.mrf.mxu0  ;;  %10716 = vmatprep.subr.mxu1 %v10939_v0 }
 0x548   :  { %v4096_v30 = vpop.f32.mrf.mxu1  ;;  %9845 = vmatmul.mubr.bf16.gmra.mxu1 %v5111_v17  ;;  %v4987_v4 = vmax.f32 %v4588_v61, 0.0 }
 0x549   :  { %v13164_v43 = vpack.c.bf16 %v4267_v39, %v4266_v25  ;;  %v4590_v53 = vpop.f32.mrf.mxu0  ;;  %9848 = vmatprep.mubr.msk.bf16.mxu1 %vm10940_vm2, %v10939_v0  ;;  %v4097_v56 = vadd.f32 %v13031_v14, %v4096_v30 }
 0x54a   :  { %v4591_v41 = vadd.f32 %v12922_v49, %v4590_v53  ;;  %v9466_v63 = vpop.f32.mrf.mxu1 }
 0x54b   :  { %v9583_v6 = vpop.f32.mrf.mxu0  ;;  %v4268_v38 = vmax.f32 %v4097_v56, 0.0 }
 0x54c   :  { %v4988_v37 = vmax.f32 %v4591_v41, 0.0  ;;  %v4099_v22 = vpop.f32.mrf.mxu1 }
 0x54d   :  { %v4100_v46 = vadd.f32 %v13031_v14, %v4099_v22  ;;  %v4595_v48 = vpop.f32.mrf.mxu0  ;;  %9681 = vmatmul.mubr.bf16.gmra.mxu0 %v13007_v24 }
 0x54e   :  { %v5112_v19 = vpack.c.bf16 %v4988_v37, %v4987_v4  ;;  %v9467_v52 = vpop.f32.mrf.mxu1  ;;  %9684 = vmatprep.mubr.msk.bf16.mxu0 %vm10940_vm2, %v10939_v0  ;;  %v4596_v26 = vadd.f32 %v12922_v49, %v4595_v48 }
 0x54f   :  { %v4269_v59 = vmax.f32 %v4100_v46, 0.0  ;;  %v9586_v13 = vpop.f32.mrf.mxu0 }
 0x550   :  { %v4104_v32 = vpop.f32.mrf.mxu1  ;;  %9849 = vmatmul.mubr.bf16.gmra.mxu1 %v5112_v19  ;;  %v4989_v50 = vmax.f32 %v4596_v26, 0.0 }
 0x551   :  { %v13179_v44 = vpack.c.bf16 %v4269_v59, %v4268_v38  ;;  %v4598_v18 = vpop.f32.mrf.mxu0  ;;  %9852 = vmatprep.mubr.msk.bf16.mxu1 %vm10940_vm2, %v10939_v0  ;;  %v4105_v55 = vadd.f32 %v13031_v14, %v4104_v32 }
 0x552   :  { %v4599_v24 = vadd.f32 %v12922_v49, %v4598_v18  ;;  %v9470_v58 = vpop.f32.mrf.mxu1 }
 0x553   :  { %v9587_v7 = vpop.f32.mrf.mxu0  ;;  %v4270_v21 = vmax.f32 %v4105_v55, 0.0 }
 0x554   :  { %v4990_v16 = vmax.f32 %v4599_v24, 0.0  ;;  %v4107_v33 = vpop.f32.mrf.mxu1 }
 0x555   :  { %v4108_v31 = vadd.f32 %v13031_v14, %v4107_v33  ;;  %v4603_v15 = vpop.f32.mrf.mxu0  ;;  %9685 = vmatmul.mubr.bf16.gmra.mxu0 %v13022_v2 }
 0x556   :  { %v5113_v27 = vpack.c.bf16 %v4990_v16, %v4989_v50  ;;  %v9471_v51 = vpop.f32.mrf.mxu1  ;;  %9688 = vmatprep.mubr.msk.bf16.mxu0 %vm10940_vm2, %v10939_v0  ;;  %v4604_v23 = vadd.f32 %v12922_v49, %v4603_v15  ;;  %v13224_v50 = vld [vmem:[%s15042_s10] ss:$0 sm:$0xff] }
 0x557   :  { %v4271_v10 = vmax.f32 %v4108_v31, 0.0  ;;  %v9590_v20 = vpop.f32.mrf.mxu0 }
 0x558   :  { %v4112_v29 = vpop.f32.mrf.mxu1  ;;  %9853 = vmatmul.mubr.bf16.gmra.mxu1 %v5113_v27  ;;  %v4991_v54 = vmax.f32 %v4604_v23, 0.0 }
 0x559   :  { %v13190_v42 = vpack.c.bf16 %v4271_v10, %v4270_v21  ;;  %v4606_v3 = vpop.f32.mrf.mxu0  ;;  %9856 = vmatprep.mubr.msk.bf16.mxu1 %vm10940_vm2, %v10939_v0  ;;  %v4113_v47 = vadd.f32 %v13031_v14, %v4112_v29 }
 0x55a   :  { %v4607_v2 = vadd.f32 %v12922_v49, %v4606_v3  ;;  %v9474_v36 = vpop.f32.mrf.mxu1 }
 0x55b   :  { %v9591_v9 = vpop.f32.mrf.mxu0  ;;  %v4272_v30 = vmax.f32 %v4113_v47, 0.0 }
 0x55c   :  { %v4992_v17 = vmax.f32 %v4607_v2, 0.0  ;;  %v4115_v60 = vpop.f32.mrf.mxu1 }
 0x55d   :  { %v4116_v25 = vadd.f32 %v13031_v14, %v4115_v60  ;;  %v4611_v39 = vpop.f32.mrf.mxu0  ;;  %9689 = vmatmul.mubr.bf16.gmra.mxu0 %v13038_v34 }
 0x55e   :  { %v5114_v11 = vpack.c.bf16 %v4992_v17, %v4991_v54  ;;  %v9475_v61 = vpop.f32.mrf.mxu1  ;;  %9692 = vmatprep.mubr.msk.bf16.mxu0 %vm10940_vm2, %v10939_v0  ;;  %v4612_v41 = vadd.f32 %v12922_v49, %v4611_v39 }
 0x55f   :  { %v4273_v53 = vmax.f32 %v4116_v25, 0.0  ;;  %v9594_v12 = vpop.f32.mrf.mxu0 }
 0x560   :  { %v4120_v63 = vpop.f32.mrf.mxu1  ;;  %9857 = vmatmul.mubr.bf16.gmra.mxu1 %v5114_v11  ;;  %v4993_v46 = vmax.f32 %v4612_v41, 0.0 }
 0x561   :  { %v13201_v56 = vpack.c.bf16 %v4273_v53, %v4272_v30  ;;  %v4614_v6 = vpop.f32.mrf.mxu0  ;;  %9860 = vmatprep.mubr.msk.bf16.mxu1 %vm10940_vm2, %v10939_v0  ;;  %v4121_v37 = vadd.f32 %v13031_v14, %v4120_v63 }
 0x562   :  { %v4615_v34 = vadd.f32 %v12922_v49, %v4614_v6  ;;  %v9478_v4 = vpop.f32.mrf.mxu1 }
 0x563   :  { %v9595_v22 = vpop.f32.mrf.mxu0  ;;  %v4274_v26 = vmax.f32 %v4121_v37, 0.0 }
 0x564   :  { %v4994_v48 = vmax.f32 %v4615_v34, 0.0  ;;  %v4123_v19 = vpop.f32.mrf.mxu1 }
 0x565   :  { %v4124_v52 = vadd.f32 %v13031_v14, %v4123_v19  ;;  %v4619_v38 = vpop.f32.mrf.mxu0  ;;  %9693 = vmatmul.mubr.bf16.gmra.mxu0 %v13052_v45  ;;  %v13219_v45 = vld [vmem:[%s15043_s15 + $0x30] sm:$0xff] }
 0x566   :  { %v5115_v59 = vpack.c.bf16 %v4994_v48, %v4993_v46  ;;  %v9479_v13 = vpop.f32.mrf.mxu1  ;;  %9696 = vmatprep.mubr.msk.bf16.mxu0 %vm10940_vm2, %v10939_v0  ;;  %v4620_v24 = vadd.f32 %v12922_v49, %v4619_v38  ;;  %10732 = vmatpush3.msra.mxu1 %v13219_v45 }
 0x567   :  { %v4275_v32 = vmax.f32 %v4124_v52, 0.0  ;;  %v9598_v18 = vpop.f32.mrf.mxu0  ;;  %10717 = vmatprep.subr.mxu1 %v10939_v0 }
 0x568   :  { %v4128_v58 = vpop.f32.mrf.mxu1  ;;  %9861 = vmatmul.mubr.bf16.gmra.mxu1 %v5115_v59  ;;  %v4995_v15 = vmax.f32 %v4620_v24, 0.0 }
 0x569   :  { %v13212_v55 = vpack.c.bf16 %v4275_v32, %v4274_v26  ;;  %v4622_v7 = vpop.f32.mrf.mxu0  ;;  %9864 = vmatprep.mubr.msk.bf16.mxu1 %vm10940_vm2, %v10939_v0  ;;  %v4129_v33 = vadd.f32 %v13031_v14, %v4128_v58 }
 0x56a   :  { %v4623_v49 = vadd.f32 %v13224_v50, %v4622_v7  ;;  %v9482_v16 = vpop.f32.mrf.mxu1 }
 0x56b   :  { %v9599_v31 = vpop.f32.mrf.mxu0  ;;  %v4276_v29 = vmax.f32 %v4129_v33, 0.0 }
 0x56c   :  { %v4996_v27 = vmax.f32 %v4623_v49, 0.0  ;;  %v4131_v51 = vpop.f32.mrf.mxu1 }
 0x56d   :  { %v4132_v21 = vadd.f32 %v13031_v14, %v4131_v51  ;;  %v4627_v10 = vpop.f32.mrf.mxu0  ;;  %9697 = vmatmul.mubr.bf16.gmra.mxu0 %v13067_v35 }
 0x56e   :  { %v5116_v20 = vpack.c.bf16 %v4996_v27, %v4995_v15  ;;  %v9483_v23 = vpop.f32.mrf.mxu1  ;;  %9700 = vmatprep.mubr.msk.bf16.mxu0 %vm10940_vm2, %v10939_v0  ;;  %v4628_v36 = vadd.f32 %v13224_v50, %v4627_v10 }
 0x56f   :  { %v4277_v3 = vmax.f32 %v4132_v21, 0.0  ;;  %v9602_v2 = vpop.f32.mrf.mxu0 }
 0x570   :  { %v4136_v47 = vpop.f32.mrf.mxu1  ;;  %9865 = vmatmul.mubr.bf16.gmra.mxu1 %v5116_v20  ;;  %v4997_v39 = vmax.f32 %v4628_v36, 0.0  ;;  %v13271_v36 = vld [vmem:[%s15044_s12] ss:$0 sm:$0xff] }
 0x571   :  { %v13235_v9 = vpack.c.bf16 %v4277_v3, %v4276_v29  ;;  %v4630_v54 = vpop.f32.mrf.mxu0  ;;  %9868 = vmatprep.mubr.msk.bf16.mxu1 %vm10940_vm2, %v10939_v0  ;;  %v4137_v60 = vadd.f32 %v13031_v14, %v4136_v47 }
 0x572   :  { %v4631_v35 = vadd.f32 %v13224_v50, %v4630_v54  ;;  %v9486_v17 = vpop.f32.mrf.mxu1 }
 0x573   :  { %v9603_v25 = vpop.f32.mrf.mxu0  ;;  %v4278_v63 = vmax.f32 %v4137_v60, 0.0 }
 0x574   :  { %v4998_v11 = vmax.f32 %v4631_v35, 0.0  ;;  %v4139_v61 = vpop.f32.mrf.mxu1 }
 0x575   :  { %v4140_v30 = vadd.f32 %v13031_v14, %v4139_v61  ;;  %v4635_v53 = vpop.f32.mrf.mxu0  ;;  %9701 = vmatmul.mubr.bf16.gmra.mxu0 %v13079_v8 }
 0x576   :  { %v5117_v12 = vpack.c.bf16 %v4998_v11, %v4997_v39  ;;  %v9487_v41 = vpop.f32.mrf.mxu1  ;;  %9704 = vmatprep.mubr.msk.bf16.mxu0 %vm10940_vm2, %v10939_v0  ;;  %v4636_v4 = vadd.f32 %v13224_v50, %v4635_v53 }
 0x577   :  { %v4279_v6 = vmax.f32 %v4140_v30, 0.0  ;;  %v9606_v34 = vpop.f32.mrf.mxu0 }
 0x578   :  { %v4144_v37 = vpop.f32.mrf.mxu1  ;;  %9869 = vmatmul.mubr.bf16.gmra.mxu1 %v5117_v12  ;;  %v4999_v38 = vmax.f32 %v4636_v4, 0.0 }
 0x579   :  { %v13246_v22 = vpack.c.bf16 %v4279_v6, %v4278_v63  ;;  %v4638_v46 = vpop.f32.mrf.mxu0  ;;  %9872 = vmatprep.mubr.msk.bf16.mxu1 %vm10940_vm2, %v10939_v0  ;;  %v4145_v19 = vadd.f32 %v13031_v14, %v4144_v37 }
 0x57a   :  { %v4639_v8 = vadd.f32 %v13224_v50, %v4638_v46  ;;  %v9490_v48 = vpop.f32.mrf.mxu1 }
 0x57b   :  { %v9607_v52 = vpop.f32.mrf.mxu0  ;;  %v4280_v58 = vmax.f32 %v4145_v19, 0.0 }
 0x57c   :  { %v5000_v59 = vmax.f32 %v4639_v8, 0.0  ;;  %v4147_v13 = vpop.f32.mrf.mxu1 }
 0x57d   :  { %v4148_v26 = vadd.f32 %v13031_v14, %v4147_v13  ;;  %v4643_v32 = vpop.f32.mrf.mxu0  ;;  %9705 = vmatmul.mubr.bf16.gmra.mxu0 %v13090_v62 }
 0x57e   :  { %v5118_v18 = vpack.c.bf16 %v5000_v59, %v4999_v38  ;;  %v9491_v24 = vpop.f32.mrf.mxu1  ;;  %9708 = vmatprep.mubr.msk.bf16.mxu0 %vm10940_vm2, %v10939_v0  ;;  %v4644_v16 = vadd.f32 %v13224_v50, %v4643_v32 }
 0x57f   :  { %v4281_v7 = vmax.f32 %v4148_v26, 0.0  ;;  %v9610_v49 = vpop.f32.mrf.mxu0 }
 0x580   :  { %v13257_v33 = vpop.f32.mrf.mxu1  ;;  %9873 = vmatmul.mubr.bf16.gmra.mxu1 %v5118_v18  ;;  %v5001_v51 = vmax.f32 %v4644_v16, 0.0 }
 0x581   :  { %v13259_v31 = vpack.c.bf16 %v4281_v7, %v4280_v58  ;;  %v4646_v15 = vpop.f32.mrf.mxu0  ;;  %9876 = vmatprep.mubr.msk.bf16.mxu1 %vm10940_vm2, %v10939_v0 }
 0x582   :  { %v4647_v14 = vadd.f32 %v13224_v50, %v4646_v15  ;;  %v9494_v62 = vpop.f32.mrf.mxu1 }
 0x583   :  { %v9611_v27 = vpop.f32.mrf.mxu0 }
 0x584   :  { %v5002_v21 = vmax.f32 %v4647_v14, 0.0  ;;  %v4155_v10 = vpop.f32.mrf.mxu1 }
 0x585   :  { %v4651_v20 = vpop.f32.mrf.mxu0  ;;  %9709 = vmatmul.mubr.bf16.gmra.mxu0 %v13101_v40  ;;  %v13278_v40 = vld [vmem:[%s15043_s15 + $0x28] sm:$0xff] }
 0x586   :  { %v5119_v23 = vpack.c.bf16 %v5002_v21, %v5001_v51  ;;  %v9495_v29 = vpop.f32.mrf.mxu1  ;;  %9712 = vmatprep.mubr.msk.bf16.mxu0 %vm10940_vm2, %v10939_v0  ;;  %v4652_v2 = vadd.f32 %v13224_v50, %v4651_v20  ;;  %10733 = vmatpush3.msra.mxu1 %v13278_v40 }
 0x587   :  { %v9614_v3 = vpop.f32.mrf.mxu0  ;;  %10718 = vmatprep.subr.mxu1 %v10939_v0 }
 0x588   :  { %v5246_v47 = vpop.f32.mrf.mxu1  ;;  %9877 = vmatmul.mubr.bf16.gmra.mxu1 %v5119_v23  ;;  %v5003_v39 = vmax.f32 %v4652_v2, 0.0 }
 0x589   :  { %v4654_v54 = vpop.f32.mrf.mxu0  ;;  %9880 = vmatprep.mubr.msk.bf16.mxu1 %vm10940_vm2, %v10939_v0  ;;  %v5247_v60 = vadd.f32 %v13271_v36, %v5246_v47 }
 0x58a   :  { %v4655_v35 = vadd.f32 %v13224_v50, %v4654_v54  ;;  %v9782_v17 = vpop.f32.mrf.mxu1 }
 0x58b   :  { %v9615_v25 = vpop.f32.mrf.mxu0  ;;  %v5748_v63 = vmax.f32 %v5247_v60, 0.0 }
 0x58c   :  { %v5004_v11 = vmax.f32 %v4655_v35, 0.0  ;;  %v5249_v61 = vpop.f32.mrf.mxu1 }
 0x58d   :  { %v5250_v30 = vadd.f32 %v13271_v36, %v5249_v61  ;;  %v4659_v53 = vpop.f32.mrf.mxu0  ;;  %9713 = vmatmul.mubr.bf16.gmra.mxu0 %v13112_v57 }
 0x58e   :  { %v5120_v12 = vpack.c.bf16 %v5004_v11, %v5003_v39  ;;  %v9783_v41 = vpop.f32.mrf.mxu1  ;;  %9716 = vmatprep.mubr.msk.bf16.mxu0 %vm10940_vm2, %v10939_v0  ;;  %v4660_v4 = vadd.f32 %v13224_v50, %v4659_v53 }
 0x58f   :  { %v5749_v6 = vmax.f32 %v5250_v30, 0.0  ;;  %v9618_v34 = vpop.f32.mrf.mxu0 }
 0x590   :  { %v5254_v37 = vpop.f32.mrf.mxu1  ;;  %9881 = vmatmul.mubr.bf16.gmra.mxu1 %v5120_v12  ;;  %v5005_v38 = vmax.f32 %v4660_v4, 0.0 }
 0x591   :  { %v13289_v46 = vpack.c.bf16 %v5749_v6, %v5748_v63  ;;  %v4662_v8 = vpop.f32.mrf.mxu0  ;;  %9884 = vmatprep.mubr.msk.bf16.mxu1 %vm10940_vm2, %v10939_v0  ;;  %v5255_v19 = vadd.f32 %v13271_v36, %v5254_v37 }
 0x592   :  { %v4663_v57 = vadd.f32 %v13224_v50, %v4662_v8  ;;  %v9786_v48 = vpop.f32.mrf.mxu1 }
 0x593   :  { %v9619_v52 = vpop.f32.mrf.mxu0  ;;  %v5750_v58 = vmax.f32 %v5255_v19, 0.0 }
 0x594   :  { %v5006_v59 = vmax.f32 %v4663_v57, 0.0  ;;  %v5257_v13 = vpop.f32.mrf.mxu1 }
 0x595   :  { %v5258_v26 = vadd.f32 %v13271_v36, %v5257_v13  ;;  %v4667_v32 = vpop.f32.mrf.mxu0  ;;  %9717 = vmatmul.mubr.bf16.gmra.mxu0 %v13127_v28 }
 0x596   :  { %v5121_v18 = vpack.c.bf16 %v5006_v59, %v5005_v38  ;;  %v9787_v24 = vpop.f32.mrf.mxu1  ;;  %9720 = vmatprep.mubr.msk.bf16.mxu0 %vm10940_vm2, %v10939_v0  ;;  %v4668_v16 = vadd.f32 %v13224_v50, %v4667_v32 }
 0x597   :  { %v5751_v7 = vmax.f32 %v5258_v26, 0.0  ;;  %v9622_v49 = vpop.f32.mrf.mxu0 }
 0x598   :  { %v5262_v15 = vpop.f32.mrf.mxu1  ;;  %9885 = vmatmul.mubr.bf16.gmra.mxu1 %v5121_v18  ;;  %v5007_v10 = vmax.f32 %v4668_v16, 0.0 }
 0x599   :  { %v13300_v14 = vpack.c.bf16 %v5751_v7, %v5750_v58  ;;  %v4670_v62 = vpop.f32.mrf.mxu0  ;;  %9888 = vmatprep.mubr.msk.bf16.mxu1 %vm10940_vm2, %v10939_v0  ;;  %v5263_v51 = vadd.f32 %v13271_v36, %v5262_v15 }
 0x59a   :  { %v4671_v28 = vadd.f32 %v13224_v50, %v4670_v62  ;;  %v9790_v27 = vpop.f32.mrf.mxu1 }
 0x59b   :  { %v9623_v21 = vpop.f32.mrf.mxu0  ;;  %v5752_v54 = vmax.f32 %v5263_v51, 0.0 }
 0x59c   :  { %v5008_v20 = vmax.f32 %v4671_v28, 0.0  ;;  %v5265_v23 = vpop.f32.mrf.mxu1 }
 0x59d   :  { %v5266_v29 = vadd.f32 %v13271_v36, %v5265_v23  ;;  %v4675_v3 = vpop.f32.mrf.mxu0  ;;  %9721 = vmatmul.mubr.bf16.gmra.mxu0 %v13138_v1 }
 0x59e   :  { %v5122_v2 = vpack.c.bf16 %v5008_v20, %v5007_v10  ;;  %v9791_v47 = vpop.f32.mrf.mxu1  ;;  %9724 = vmatprep.mubr.msk.bf16.mxu0 %vm10940_vm2, %v10939_v0  ;;  %v4676_v60 = vadd.f32 %v13224_v50, %v4675_v3 }
 0x59f   :  { %v5753_v35 = vmax.f32 %v5266_v29, 0.0  ;;  %v9626_v17 = vpop.f32.mrf.mxu0 }
 0x5a0   :  { %v5270_v25 = vpop.f32.mrf.mxu1  ;;  %9889 = vmatmul.mubr.bf16.gmra.mxu1 %v5122_v2  ;;  %v5009_v12 = vmax.f32 %v4676_v60, 0.0 }
 0x5a1   :  { %v13311_v39 = vpack.c.bf16 %v5753_v35, %v5752_v54  ;;  %v4678_v11 = vpop.f32.mrf.mxu0  ;;  %9892 = vmatprep.mubr.msk.bf16.mxu1 %vm10940_vm2, %v10939_v0  ;;  %v5271_v30 = vadd.f32 %v13271_v36, %v5270_v25 }
 0x5a2   :  { %v4679_v1 = vadd.f32 %v13224_v50, %v4678_v11  ;;  %v9794_v61 = vpop.f32.mrf.mxu1 }
 0x5a3   :  { %v9627_v53 = vpop.f32.mrf.mxu0  ;;  %v5754_v8 = vmax.f32 %v5271_v30, 0.0 }
 0x5a4   :  { %v5010_v41 = vmax.f32 %v4679_v1, 0.0  ;;  %v5273_v63 = vpop.f32.mrf.mxu1 }
 0x5a5   :  { %v5274_v6 = vadd.f32 %v13271_v36, %v5273_v63  ;;  %v4683_v34 = vpop.f32.mrf.mxu0  ;;  %9725 = vmatmul.mubr.bf16.gmra.mxu0 %v13152_v5  ;;  %v13329_v5 = vld [vmem:[%s15043_s15 + $0x20] sm:$0xff] }
 0x5a6   :  { %v5123_v4 = vpack.c.bf16 %v5010_v41, %v5009_v12  ;;  %v9795_v37 = vpop.f32.mrf.mxu1  ;;  %9728 = vmatprep.mubr.msk.bf16.mxu0 %vm10940_vm2, %v10939_v0  ;;  %v4684_v19 = vadd.f32 %v13224_v50, %v4683_v34  ;;  %10734 = vmatpush3.msra.mxu1 %v13329_v5 }
 0x5a7   :  { %v5755_v57 = vmax.f32 %v5274_v6, 0.0  ;;  %v9630_v48 = vpop.f32.mrf.mxu0  ;;  %10719 = vmatprep.subr.mxu1 %v10939_v0 }
 0x5a8   :  { %v5278_v52 = vpop.f32.mrf.mxu1  ;;  %9893 = vmatmul.mubr.bf16.gmra.mxu1 %v5123_v4  ;;  %v5011_v24 = vmax.f32 %v4684_v19, 0.0 }
 0x5a9   :  { %v13322_v38 = vpack.c.bf16 %v5755_v57, %v5754_v8  ;;  %v4686_v59 = vpop.f32.mrf.mxu0  ;;  %9896 = vmatprep.mubr.msk.bf16.mxu1 %vm10940_vm2, %v10939_v0  ;;  %v5279_v32 = vadd.f32 %v13271_v36, %v5278_v52 }
 0x5aa   :  { %v4687_v13 = vadd.f32 %v13224_v50, %v4686_v59  ;;  %v9798_v26 = vpop.f32.mrf.mxu1 }
 0x5ab   :  { %v9631_v18 = vpop.f32.mrf.mxu0  ;;  %v5756_v28 = vmax.f32 %v5279_v32, 0.0 }
 0x5ac   :  { %v5012_v58 = vmax.f32 %v4687_v13, 0.0  ;;  %v5281_v7 = vpop.f32.mrf.mxu1 }
 0x5ad   :  { %v5282_v49 = vadd.f32 %v13271_v36, %v5281_v7  ;;  %v4691_v16 = vpop.f32.mrf.mxu0  ;;  %9729 = vmatmul.mubr.bf16.gmra.mxu0 %v13164_v43 }
 0x5ae   :  { %v5124_v15 = vpack.c.bf16 %v5012_v58, %v5011_v24  ;;  %v9799_v62 = vpop.f32.mrf.mxu1  ;;  %9732 = vmatprep.mubr.msk.bf16.mxu0 %vm10940_vm2, %v10939_v0  ;;  %v4692_v21 = vadd.f32 %v13224_v50, %v4691_v16 }
 0x5af   :  { %v5757_v27 = vmax.f32 %v5282_v49, 0.0  ;;  %v9634_v51 = vpop.f32.mrf.mxu0 }
 0x5b0   :  { %v5286_v10 = vpop.f32.mrf.mxu1  ;;  %9897 = vmatmul.mubr.bf16.gmra.mxu1 %v5124_v15  ;;  %v5013_v47 = vmax.f32 %v4692_v21, 0.0 }
 0x5b1   :  { %v13340_v20 = vpack.c.bf16 %v5757_v27, %v5756_v28  ;;  %v4694_v23 = vpop.f32.mrf.mxu0  ;;  %9900 = vmatprep.mubr.msk.bf16.mxu1 %vm10940_vm2, %v10939_v0  ;;  %v5287_v3 = vadd.f32 %v13271_v36, %v5286_v10 }
 0x5b2   :  { %v4695_v43 = vadd.f32 %v13224_v50, %v4694_v23  ;;  %v9802_v29 = vpop.f32.mrf.mxu1 }
 0x5b3   :  { %v9635_v2 = vpop.f32.mrf.mxu0  ;;  %v5758_v1 = vmax.f32 %v5287_v3, 0.0 }
 0x5b4   :  { %v5014_v54 = vmax.f32 %v4695_v43, 0.0  ;;  %v5289_v35 = vpop.f32.mrf.mxu1  ;;  %v13375_v43 = vld [vmem:[%s15043_s15 + $0x18] sm:$0xff] }
 0x5b5   :  { %v5290_v17 = vadd.f32 %v13271_v36, %v5289_v35  ;;  %v4699_v60 = vpop.f32.mrf.mxu0  ;;  %9733 = vmatmul.mubr.bf16.gmra.mxu0 %v13179_v44  ;;  %10735 = vmatpush3.msra.mxu1 %v13375_v43 }
 0x5b6   :  { %v5125_v25 = vpack.c.bf16 %v5014_v54, %v5013_v47  ;;  %v9803_v11 = vpop.f32.mrf.mxu1  ;;  %9736 = vmatprep.mubr.msk.bf16.mxu0 %vm10940_vm2, %v10939_v0  ;;  %v4700_v53 = vadd.f32 %v13224_v50, %v4699_v60  ;;  %10720 = vmatprep.subr.mxu1 %v10939_v0 }
 0x5b7   :  { %v5759_v61 = vmax.f32 %v5290_v17, 0.0  ;;  %v9638_v30 = vpop.f32.mrf.mxu0 }
 0x5b8   :  { %v5294_v12 = vpop.f32.mrf.mxu1  ;;  %9901 = vmatmul.mubr.bf16.gmra.mxu1 %v5125_v25  ;;  %v5015_v37 = vmax.f32 %v4700_v53, 0.0 }
 0x5b9   :  { %v13351_v41 = vpack.c.bf16 %v5759_v61, %v5758_v1  ;;  %v4702_v63 = vpop.f32.mrf.mxu0  ;;  %9904 = vmatprep.mubr.msk.bf16.mxu1 %vm10940_vm2, %v10939_v0  ;;  %v5295_v34 = vadd.f32 %v13271_v36, %v5294_v12 }
 0x5ba   :  { %v4703_v44 = vadd.f32 %v13224_v50, %v4702_v63  ;;  %v9806_v6 = vpop.f32.mrf.mxu1 }
 0x5bb   :  { %v9639_v4 = vpop.f32.mrf.mxu0  ;;  %v5760_v13 = vmax.f32 %v5295_v34, 0.0 }
 0x5bc   :  { %v5016_v8 = vmax.f32 %v4703_v44, 0.0  ;;  %v5297_v57 = vpop.f32.mrf.mxu1 }
 0x5bd   :  { %v5298_v48 = vadd.f32 %v13271_v36, %v5297_v57  ;;  %v4707_v19 = vpop.f32.mrf.mxu0  ;;  %9737 = vmatmul.mubr.bf16.gmra.mxu0 %v13190_v42 }
 0x5be   :  { %v5126_v52 = vpack.c.bf16 %v5016_v8, %v5015_v37  ;;  %v9807_v59 = vpop.f32.mrf.mxu1  ;;  %9740 = vmatprep.mubr.msk.bf16.mxu0 %vm10940_vm2, %v10939_v0  ;;  %v4708_v18 = vadd.f32 %v13224_v50, %v4707_v19 }
 0x5bf   :  { %v5761_v26 = vmax.f32 %v5298_v48, 0.0  ;;  %v9642_v32 = vpop.f32.mrf.mxu0 }
 0x5c0   :  { %v5302_v24 = vpop.f32.mrf.mxu1  ;;  %9905 = vmatmul.mubr.bf16.gmra.mxu1 %v5126_v52  ;;  %v5017_v62 = vmax.f32 %v4708_v18, 0.0 }
 0x5c1   :  { %v13362_v58 = vpack.c.bf16 %v5761_v26, %v5760_v13  ;;  %v4710_v7 = vpop.f32.mrf.mxu0  ;;  %9908 = vmatprep.mubr.msk.bf16.mxu1 %vm10940_vm2, %v10939_v0  ;;  %v5303_v16 = vadd.f32 %v13271_v36, %v5302_v24 }
 0x5c2   :  { %v4711_v42 = vadd.f32 %v13224_v50, %v4710_v7  ;;  %v9810_v49 = vpop.f32.mrf.mxu1 }
 0x5c3   :  { %v9643_v15 = vpop.f32.mrf.mxu0  ;;  %v5762_v29 = vmax.f32 %v5303_v16, 0.0 }
 0x5c4   :  { %v5018_v28 = vmax.f32 %v4711_v42, 0.0  ;;  %v5305_v27 = vpop.f32.mrf.mxu1 }
 0x5c5   :  { %v5306_v51 = vadd.f32 %v13271_v36, %v5305_v27  ;;  %v4715_v21 = vpop.f32.mrf.mxu0  ;;  %9741 = vmatmul.mubr.bf16.gmra.mxu0 %v13201_v56 }
 0x5c6   :  { %v5127_v10 = vpack.c.bf16 %v5018_v28, %v5017_v62  ;;  %v9811_v23 = vpop.f32.mrf.mxu1  ;;  %9744 = vmatprep.mubr.msk.bf16.mxu0 %vm10940_vm2, %v10939_v0  ;;  %v4716_v47 = vadd.f32 %v13224_v50, %v4715_v21 }
 0x5c7   :  { %v5763_v3 = vmax.f32 %v5306_v51, 0.0  ;;  %v9646_v2 = vpop.f32.mrf.mxu0 }
 0x5c8   :  { %v5310_v54 = vpop.f32.mrf.mxu1  ;;  %9909 = vmatmul.mubr.bf16.gmra.mxu1 %v5127_v10  ;;  %v5019_v1 = vmax.f32 %v4716_v47, 0.0 }
 0x5c9   :  { %v13380_v56 = vpack.c.bf16 %v5763_v3, %v5762_v29  ;;  %v4718_v35 = vpop.f32.mrf.mxu0  ;;  %9912 = vmatprep.mubr.msk.bf16.mxu1 %vm10940_vm2, %v10939_v0  ;;  %v5311_v25 = vadd.f32 %v13271_v36, %v5310_v54 }
 0x5ca   :  { %v4719_v17 = vadd.f32 %v13224_v50, %v4718_v35  ;;  %v9814_v60 = vpop.f32.mrf.mxu1 }
 0x5cb   :  { %v9647_v11 = vpop.f32.mrf.mxu0  ;;  %v5764_v6 = vmax.f32 %v5311_v25, 0.0 }
 0x5cc   :  { %v5020_v61 = vmax.f32 %v4719_v17, 0.0  ;;  %v5313_v30 = vpop.f32.mrf.mxu1 }
 0x5cd   :  { %v5314_v53 = vadd.f32 %v13271_v36, %v5313_v30  ;;  %v4723_v12 = vpop.f32.mrf.mxu0  ;;  %9745 = vmatmul.mubr.bf16.gmra.mxu0 %v13212_v55 }
 0x5ce   :  { %v5128_v63 = vpack.c.bf16 %v5020_v61, %v5019_v1  ;;  %v9815_v44 = vpop.f32.mrf.mxu1  ;;  %9748 = vmatprep.mubr.msk.bf16.mxu0 %vm10940_vm2, %v10939_v0  ;;  %v4724_v37 = vadd.f32 %v13224_v50, %v4723_v12 }
 0x5cf   :  { %v5765_v34 = vmax.f32 %v5314_v53, 0.0  ;;  %v9650_v4 = vpop.f32.mrf.mxu0 }
 0x5d0   :  { %v5318_v8 = vpop.f32.mrf.mxu1  ;;  %9913 = vmatmul.mubr.bf16.gmra.mxu1 %v5128_v63  ;;  %v5021_v13 = vmax.f32 %v4724_v37, 0.0  ;;  %v10922_v63 = vld [vmem:[%s15041_s8] ss:$0 sm:$0xff] }
 0x5d1   :  { %v13391_v57 = vpack.c.bf16 %v5765_v34, %v5764_v6  ;;  %v4726_v48 = vpop.f32.mrf.mxu0  ;;  %9916 = vmatprep.mubr.msk.bf16.mxu1 %vm10940_vm2, %v10939_v0  ;;  %v5319_v52 = vadd.f32 %v13271_v36, %v5318_v8  ;;  %v4153_v44 = vadd.f32 %v10922_v63, %v13257_v33  ;;  %v13430_v33 = vld [vmem:[%s15043_s15 + $0x10] sm:$0xff] }
 0x5d2   :  { %v4727_v55 = vadd.f32 %v13224_v50, %v4726_v48  ;;  %v9818_v19 = vpop.f32.mrf.mxu1  ;;  %10736 = vmatpush3.msra.mxu1 %v13430_v33 }
 0x5d3   :  { %v9651_v59 = vpop.f32.mrf.mxu0  ;;  %v5766_v49 = vmax.f32 %v5319_v52, 0.0  ;;  %10721 = vmatprep.subr.mxu1 %v10939_v0 }
 0x5d4   :  { %v5022_v26 = vmax.f32 %v4727_v55, 0.0  ;;  %v5321_v32 = vpop.f32.mrf.mxu1  ;;  %v4282_v59 = vmax.f32 %v4153_v44, 0.0 }
 0x5d5   :  { %v5322_v18 = vadd.f32 %v13271_v36, %v5321_v32  ;;  %v4731_v24 = vpop.f32.mrf.mxu0  ;;  %9749 = vmatmul.mubr.bf16.gmra.mxu0 %v13235_v9 }
 0x5d6   :  { %v5129_v7 = vpack.c.bf16 %v5022_v26, %v5021_v13  ;;  %v9819_v42 = vpop.f32.mrf.mxu1  ;;  %9752 = vmatprep.mubr.msk.bf16.mxu0 %vm10940_vm2, %v10939_v0  ;;  %v4732_v62 = vadd.f32 %v13224_v50, %v4731_v24 }
 0x5d7   :  { %v5767_v16 = vmax.f32 %v5322_v18, 0.0  ;;  %v9654_v15 = vpop.f32.mrf.mxu0 }
 0x5d8   :  { %v5326_v28 = vpop.f32.mrf.mxu1  ;;  %9917 = vmatmul.mubr.bf16.gmra.mxu1 %v5129_v7  ;;  %v5023_v29 = vmax.f32 %v4732_v62, 0.0 }
 0x5d9   :  { %v13402_v27 = vpack.c.bf16 %v5767_v16, %v5766_v49  ;;  %v4734_v51 = vpop.f32.mrf.mxu0  ;;  %9920 = vmatprep.mubr.msk.bf16.mxu1 %vm10940_vm2, %v10939_v0  ;;  %v5327_v10 = vadd.f32 %v13271_v36, %v5326_v28  ;;  %v4362_v16 = vpack.c.bf16 %v4282_v59, %v4282_v59 }
 0x5da   :  { %v4735_v9 = vadd.f32 %v13224_v50, %v4734_v51  ;;  %v9822_v21 = vpop.f32.mrf.mxu1 }
 0x5db   :  { %v9655_v23 = vpop.f32.mrf.mxu0  ;;  %v5768_v60 = vmax.f32 %v5327_v10, 0.0 }
 0x5dc   :  { %v5024_v3 = vmax.f32 %v4735_v9, 0.0  ;;  %v5329_v2 = vpop.f32.mrf.mxu1 }
 0x5dd   :  { %v5330_v47 = vadd.f32 %v13271_v36, %v5329_v2  ;;  %v4739_v54 = vpop.f32.mrf.mxu0  ;;  %9753 = vmatmul.mubr.bf16.gmra.mxu0 %v13246_v22 }
 0x5de   :  { %v5130_v35 = vpack.c.bf16 %v5024_v3, %v5023_v29  ;;  %v9823_v17 = vpop.f32.mrf.mxu1  ;;  %9756 = vmatprep.mubr.msk.bf16.mxu0 %vm10940_vm2, %v10939_v0  ;;  %v4740_v1 = vadd.f32 %v13224_v50, %v4739_v54 }
 0x5df   :  { %v5769_v25 = vmax.f32 %v5330_v47, 0.0  ;;  %v9658_v11 = vpop.f32.mrf.mxu0 }
 0x5e0   :  { %v5334_v61 = vpop.f32.mrf.mxu1  ;;  %9921 = vmatmul.mubr.bf16.gmra.mxu1 %v5130_v35  ;;  %v5025_v4 = vmax.f32 %v4740_v1, 0.0 }
 0x5e1   :  { %v13413_v30 = vpack.c.bf16 %v5769_v25, %v5768_v60  ;;  %v4742_v53 = vpop.f32.mrf.mxu0  ;;  %9924 = vmatprep.mubr.msk.bf16.mxu1 %vm10940_vm2, %v10939_v0  ;;  %v5335_v6 = vadd.f32 %v13271_v36, %v5334_v61 }
 0x5e2   :  { %v4743_v22 = vadd.f32 %v13224_v50, %v4742_v53  ;;  %v9826_v12 = vpop.f32.mrf.mxu1 }
 0x5e3   :  { %v9659_v34 = vpop.f32.mrf.mxu0  ;;  %v5770_v13 = vmax.f32 %v5335_v6, 0.0 }
 0x5e4   :  { %v5026_v37 = vmax.f32 %v4743_v22, 0.0  ;;  %v5337_v8 = vpop.f32.mrf.mxu1 }
 0x5e5   :  { %v5338_v48 = vadd.f32 %v13271_v36, %v5337_v8  ;;  %v4747_v55 = vpop.f32.mrf.mxu0  ;;  %9757 = vmatmul.mubr.bf16.gmra.mxu0 %v13259_v31 }
 0x5e6   :  { %v5131_v19 = vpack.c.bf16 %v5026_v37, %v5025_v4  ;;  %v9827_v52 = vpop.f32.mrf.mxu1  ;;  %9760 = vmatprep.mubr.msk.bf16.mxu0 %vm10940_vm2, %v10939_v0  ;;  %v4748_v18 = vadd.f32 %v13224_v50, %v4747_v55  ;;  %v10923_v4 = vld [vmem:[%s15043_s15 + $0x78] sm:$0xff] }
 0x5e7   :  { %v5771_v26 = vmax.f32 %v5338_v48, 0.0  ;;  %v9662_v32 = vpop.f32.mrf.mxu0 }
 0x5e8   :  { %v5342_v24 = vpop.f32.mrf.mxu1  ;;  %9925 = vmatmul.mubr.bf16.gmra.mxu1 %v5131_v19  ;;  %v5027_v28 = vmax.f32 %v4748_v18, 0.0  ;;  %v10925_v32 = vld [vmem:[%s15043_s15 + $0x68] sm:$0xff] }
 0x5e9   :  { %v13435_v31 = vpack.c.bf16 %v5771_v26, %v5770_v13  ;;  %v4750_v7 = vpop.f32.mrf.mxu0  ;;  %9928 = vmatprep.mubr.msk.bf16.mxu1 %vm10940_vm2, %v10939_v0  ;;  %v5343_v15 = vadd.f32 %v13271_v36, %v5342_v24 }
 0x5ea   :  { %v4751_v42 = vadd.f32 %v13224_v50, %v4750_v7  ;;  %v9830_v49 = vpop.f32.mrf.mxu1 }
 0x5eb   :  { %v9663_v62 = vpop.f32.mrf.mxu0  ;;  %v5772_v3 = vmax.f32 %v5343_v15, 0.0 }
 0x5ec   :  { %v5028_v51 = vmax.f32 %v4751_v42, 0.0  ;;  %v5345_v9 = vpop.f32.mrf.mxu1 }
 0x5ed   :  { %v5346_v21 = vadd.f32 %v13271_v36, %v5345_v9  ;;  %v4755_v10 = vpop.f32.mrf.mxu0  ;;  %9761 = vmatmul.mubr.bf16.gmra.mxu0 %v4362_v16  ;;  %v10926_v16 = vld [vmem:[%s15043_s15 + $0x60] sm:$0xff]  ;;  %v10927_v9 = vld [vmem:[%s15043_s15 + $0x58] sm:$0xff] }
 0x5ee   :  { %v5132_v23 = vpack.c.bf16 %v5028_v51, %v5027_v28  ;;  %v9831_v29 = vpop.f32.mrf.mxu1  ;;  %10048 = vmatprep.mubr.msk.bf16.mxu0 %vm10940_vm2, %v10939_v0  ;;  %v4756_v54 = vadd.f32 %v13224_v50, %v4755_v10 }
 0x5ef   :  { %v5773_v2 = vmax.f32 %v5346_v21, 0.0  ;;  %v9666_v47 = vpop.f32.mrf.mxu0 }
 0x5f0   :  { %v5350_v35 = vpop.f32.mrf.mxu1  ;;  %9929 = vmatmul.mubr.bf16.gmra.mxu1 %v5132_v23  ;;  %v5029_v53 = vmax.f32 %v4756_v54, 0.0 }
 0x5f1   :  { %v13445_v17 = vpack.c.bf16 %v5773_v2, %v5772_v3  ;;  %v4758_v60 = vpop.f32.mrf.mxu0  ;;  %9932 = vmatprep.mubr.msk.bf16.mxu1 %vm10940_vm2, %v10939_v0  ;;  %v5351_v1 = vadd.f32 %v13271_v36, %v5350_v35  ;;  %v10928_v3 = vld [vmem:[%s15043_s15 + $0x50] sm:$0xff] }
 0x5f2   :  { %v4759_v25 = vadd.f32 %v13224_v50, %v4758_v60  ;;  %v9834_v11 = vpop.f32.mrf.mxu1  ;;  %v10929_v60 = vld [vmem:[%s15043_s15 + $0x48] sm:$0xff] }
 0x5f3   :  { %v9667_v61 = vpop.f32.mrf.mxu0  ;;  %v5774_v37 = vmax.f32 %v5351_v1, 0.0 }
 0x5f4   :  { %v5030_v22 = vmax.f32 %v4759_v25, 0.0  ;;  %v5353_v12 = vpop.f32.mrf.mxu1 }
 0x5f5   :  { %v5354_v63 = vadd.f32 %v13271_v36, %v5353_v12  ;;  %v4763_v44 = vpop.f32.mrf.mxu0  ;;  %10049 = vmatmul.mubr.bf16.vlgmr.msra.gmra.mxu0 %v13289_v46  ;;  %v10924_v46 = vld [vmem:[%s15043_s15 + $0x70] sm:$0xff] }
 0x5f6   :  { %v5133_v6 = vpack.c.bf16 %v5030_v22, %v5029_v53  ;;  %v9835_v34 = vpop.f32.mrf.mxu1  ;;  %10052 = vmatprep.mubr.msk.bf16.mxu0 %vm10940_vm2, %v10939_v0  ;;  %10301 = vmatpush3.msra.mxu0 %v10923_v4  ;;  %v4764_v55 = vadd.f32 %v13224_v50, %v4763_v44  ;;  %v10930_v22 = vld [vmem:[%s15043_s15 + $0x40] sm:$0xff]  ;;  %v10931_v4 = vld [vmem:[%s15043_s15 + $0x38] sm:$0xff] }
 0x5f7   :  { %v5775_v8 = vmax.f32 %v5354_v63, 0.0  ;;  %v9670_v48 = vpop.f32.mrf.mxu0  ;;  %10302 = vmatprep.subr.mxu0 %v10939_v0  ;;  %v6669_v34 = vld [vmem:[%s15043_s15 + $0x8] sm:$0xff] }
 0x5f8   :  { %v5358_v19 = vpop.f32.mrf.mxu1  ;;  %9933 = vmatmul.mubr.bf16.gmra.mxu1 %v5133_v6  ;;  %10303 = vmatpush3.msra.mxu0 %v10924_v46  ;;  %v5031_v7 = vmax.f32 %v4764_v55, 0.0 }
 0x5f9   :  { %v13463_v52 = vpack.c.bf16 %v5775_v8, %v5774_v37  ;;  %v4766_v59 = vpop.f32.mrf.mxu0  ;;  %9936 = vmatprep.mubr.msk.bf16.mxu1 %vm10940_vm2, %v10939_v0  ;;  %10304 = vmatprep.subr.mxu0 %v10939_v0  ;;  %v5359_v18 = vadd.f32 %v13271_v36, %v5358_v19 }
 0x5fa   :  { %v4767_v13 = vadd.f32 %v13224_v50, %v4766_v59  ;;  %v9838_v26 = vpop.f32.mrf.mxu1  ;;  %10305 = vmatpush3.msra.mxu0 %v10925_v32  ;;  %10737 = vmatpush3.msra.mxu1 %v6669_v34 }
 0x5fb   :  { %v9671_v24 = vpop.f32.mrf.mxu0  ;;  %10306 = vmatprep.subr.mxu0 %v10939_v0  ;;  %v5776_v21 = vmax.f32 %v5359_v18, 0.0  ;;  %10722 = vmatprep.subr.mxu1 %v10939_v0 }
 0x5fc   :  { %v5032_v42 = vmax.f32 %v4767_v13, 0.0  ;;  %v5361_v49 = vpop.f32.mrf.mxu1  ;;  %10307 = vmatpush3.msra.mxu0 %v10926_v16 }
 0x5fd   :  { %v5362_v15 = vadd.f32 %v13271_v36, %v5361_v49  ;;  %v4771_v62 = vpop.f32.mrf.mxu0  ;;  %10053 = vmatmul.mubr.bf16.gmra.mxu0 %v13300_v14  ;;  %10308 = vmatprep.subr.mxu0 %v10939_v0 }
 0x5fe   :  { %v5134_v28 = vpack.c.bf16 %v5032_v42, %v5031_v7  ;;  %v9839_v51 = vpop.f32.mrf.mxu1  ;;  %10056 = vmatprep.mubr.msk.bf16.mxu0 %vm10940_vm2, %v10939_v0  ;;  %10309 = vmatpush3.msra.mxu0 %v10927_v9  ;;  %v4772_v29 = vadd.f32 %v13224_v50, %v4771_v62 }
 0x5ff   :  { %v5777_v10 = vmax.f32 %v5362_v15, 0.0  ;;  %v9674_v23 = vpop.f32.mrf.mxu0  ;;  %10310 = vmatprep.subr.mxu0 %v10939_v0 }
 0x600   :  { %v5366_v14 = vpop.f32.mrf.mxu1  ;;  %9937 = vmatmul.mubr.bf16.gmra.mxu1 %v5134_v28  ;;  %10311 = vmatpush3.msra.mxu0 %v10928_v3  ;;  %v5033_v1 = vmax.f32 %v4772_v29, 0.0 }
 0x601   :  { %v13490_v2 = vpack.c.bf16 %v5777_v10, %v5776_v21  ;;  %v4774_v47 = vpop.f32.mrf.mxu0  ;;  %9940 = vmatprep.mubr.msk.bf16.mxu1 %vm10940_vm2, %v10939_v0  ;;  %10312 = vmatprep.subr.mxu0 %v10939_v0  ;;  %v5367_v25 = vadd.f32 %v13271_v36, %v5366_v14 }
 0x602   :  { %v4775_v54 = vadd.f32 %v13224_v50, %v4774_v47  ;;  %v9842_v35 = vpop.f32.mrf.mxu1  ;;  %10313 = vmatpush3.msra.mxu0 %v10929_v60 }
 0x603   :  { %v9675_v11 = vpop.f32.mrf.mxu0  ;;  %10314 = vmatprep.subr.mxu0 %v10939_v0  ;;  %v5778_v37 = vmax.f32 %v5367_v25, 0.0  ;;  %v13553_v25 = vld [vmem:[%s15042_s10] ss:$0 sm:$0xff] }
 0x604   :  { %v5034_v61 = vmax.f32 %v4775_v54, 0.0  ;;  %v5369_v53 = vpop.f32.mrf.mxu1  ;;  %10315 = vmatpush3.msra.mxu0 %v10930_v22 }
 0x605   :  { %v5370_v12 = vadd.f32 %v13271_v36, %v5369_v53  ;;  %v4779_v63 = vpop.f32.mrf.mxu0  ;;  %10057 = vmatmul.mubr.bf16.gmra.mxu0 %v13311_v39  ;;  %10316 = vmatprep.subr.mxu0 %v10939_v0 }
 0x606   :  { %v5135_v44 = vpack.c.bf16 %v5034_v61, %v5033_v1  ;;  %v9843_v6 = vpop.f32.mrf.mxu1  ;;  %10060 = vmatprep.mubr.msk.bf16.mxu0 %vm10940_vm2, %v10939_v0  ;;  %10317 = vmatpush3.msra.mxu0 %v10931_v4  ;;  %v4780_v39 = vadd.f32 %v13224_v50, %v4779_v63 }
 0x607   :  { %v5779_v8 = vmax.f32 %v5370_v12, 0.0  ;;  %v9678_v48 = vpop.f32.mrf.mxu0  ;;  %10318 = vmatprep.subr.mxu0 %v10939_v0 }
 0x608   :  { %v5374_v55 = vpop.f32.mrf.mxu1  ;;  %9941 = vmatmul.mubr.bf16.gmra.mxu1 %v5135_v44  ;;  %10319 = vmatpush3.msra.mxu0 %v13219_v45  ;;  %v5035_v18 = vmax.f32 %v4780_v39, 0.0 }
 0x609   :  { %v13518_v19 = vpack.c.bf16 %v5779_v8, %v5778_v37  ;;  %v4782_v46 = vpop.f32.mrf.mxu0  ;;  %9944 = vmatprep.mubr.msk.bf16.mxu1 %vm10940_vm2, %v10939_v0  ;;  %10320 = vmatprep.subr.mxu0 %v10939_v0  ;;  %v5375_v26 = vadd.f32 %v13271_v36, %v5374_v55 }
 0x60a   :  { %v4783_v59 = vadd.f32 %v13224_v50, %v4782_v46  ;;  %v9846_v13 = vpop.f32.mrf.mxu1  ;;  %10321 = vmatpush3.msra.mxu0 %v13278_v40 }
 0x60b   :  { %v9679_v32 = vpop.f32.mrf.mxu0  ;;  %10322 = vmatprep.subr.mxu0 %v10939_v0  ;;  %v5780_v15 = vmax.f32 %v5375_v26, 0.0 }
 0x60c   :  { %v5036_v24 = vmax.f32 %v4783_v59, 0.0  ;;  %v5377_v7 = vpop.f32.mrf.mxu1  ;;  %10323 = vmatpush3.msra.mxu0 %v13329_v5 }
 0x60d   :  { %v5378_v42 = vadd.f32 %v13271_v36, %v5377_v7  ;;  %v4787_v49 = vpop.f32.mrf.mxu0  ;;  %10061 = vmatmul.mubr.bf16.gmra.mxu0 %v13322_v38  ;;  %10324 = vmatprep.subr.mxu0 %v10939_v0 }
 0x60e   :  { %v5136_v45 = vpack.c.bf16 %v5036_v24, %v5035_v18  ;;  %v9847_v16 = vpop.f32.mrf.mxu1  ;;  %10064 = vmatprep.mubr.msk.bf16.mxu0 %vm10940_vm2, %v10939_v0  ;;  %v4788_v28 = vadd.f32 %v13224_v50, %v4787_v49  ;;  %10325 = vmatpush3.msra.mxu0 %v13375_v43 }
 0x60f   :  { %v5781_v62 = vmax.f32 %v5378_v42, 0.0  ;;  %v9682_v40 = vpop.f32.mrf.mxu0  ;;  %10326 = vmatprep.subr.mxu0 %v10939_v0 }
 0x610   :  { %v5382_v51 = vpop.f32.mrf.mxu1  ;;  %9945 = vmatmul.mubr.bf16.gmra.mxu1 %v5136_v45  ;;  %10327 = vmatpush3.msra.mxu0 %v13430_v33  ;;  %v5037_v29 = vmax.f32 %v4788_v28, 0.0  ;;  %v6668_v28 = vld [vmem:[%s15043_s15] sm:$0xff] }
 0x611   :  { %v13536_v9 = vpack.c.bf16 %v5781_v62, %v5780_v15  ;;  %v4790_v38 = vpop.f32.mrf.mxu0  ;;  %9948 = vmatprep.mubr.msk.bf16.mxu1 %vm10940_vm2, %v10939_v0  ;;  %v5383_v10 = vadd.f32 %v13271_v36, %v5382_v51  ;;  %10328 = vmatprep.subr.mxu0 %v10939_v0 }
 0x612   :  { %v4791_v5 = vadd.f32 %v13224_v50, %v4790_v38  ;;  %v9850_v21 = vpop.f32.mrf.mxu1  ;;  %10329 = vmatpush3.msra.mxu0 %v6669_v34  ;;  %10738 = vmatpush3.msra.mxu1 %v6668_v28 }
 0x613   :  { %v9683_v23 = vpop.f32.mrf.mxu0  ;;  %10330 = vmatprep.subr.mxu0 %v10939_v0  ;;  %v5782_v33 = vmax.f32 %v5383_v10, 0.0 }
 0x614   :  { %v5038_v43 = vmax.f32 %v4791_v5, 0.0  ;;  %v5385_v14 = vpop.f32.mrf.mxu1  ;;  %10331 = vmatpush3.msra.mxu0 %v6668_v28 }
 0x615   :  { %v5386_v3 = vadd.f32 %v13271_v36, %v5385_v14  ;;  %v4795_v47 = vpop.f32.mrf.mxu0  ;;  %10065 = vmatmul.mubr.bf16.gmra.mxu0 %v13340_v20 }
 0x616   :  { %v5137_v50 = vpack.c.bf16 %v5038_v43, %v5037_v29  ;;  %v9851_v54 = vpop.f32.mrf.mxu1  ;;  %10068 = vmatprep.mubr.msk.bf16.mxu0 %vm10940_vm2, %v10939_v0  ;;  %v4796_v11 = vadd.f32 %v13553_v25, %v4795_v47 }
 0x617   :  { %v5783_v35 = vmax.f32 %v5386_v3, 0.0  ;;  %v9686_v60 = vpop.f32.mrf.mxu0 }
 0x618   :  { %v5390_v1 = vpop.f32.mrf.mxu1  ;;  %9949 = vmatmul.mubr.bf16.gmra.mxu1 %v5137_v50  ;;  %v5039_v44 = vmax.f32 %v4796_v11, 0.0 }
 0x619   :  { %v13556_v20 = vpack.c.bf16 %v5783_v35, %v5782_v33  ;;  %v4798_v61 = vpop.f32.mrf.mxu0  ;;  %9952 = vmatprep.mubr.msk.bf16.mxu1 %vm10940_vm2, %v10939_v0  ;;  %v5391_v12 = vadd.f32 %v13271_v36, %v5390_v1 }
 0x61a   :  { %v4799_v53 = vadd.f32 %v13553_v25, %v4798_v61  ;;  %v9854_v22 = vpop.f32.mrf.mxu1 }
 0x61b   :  { %v9687_v63 = vpop.f32.mrf.mxu0  ;;  %v5784_v39 = vmax.f32 %v5391_v12, 0.0 }
 0x61c   :  { %v5040_v6 = vmax.f32 %v4799_v53, 0.0  ;;  %v5393_v34 = vpop.f32.mrf.mxu1 }
 0x61d   :  { %v5394_v4 = vadd.f32 %v13271_v36, %v5393_v34  ;;  %v4803_v37 = vpop.f32.mrf.mxu0  ;;  %10069 = vmatmul.mubr.bf16.gmra.mxu0 %v13351_v41 }
 0x61e   :  { %v5138_v8 = vpack.c.bf16 %v5040_v6, %v5039_v44  ;;  %v9855_v48 = vpop.f32.mrf.mxu1  ;;  %10072 = vmatprep.mubr.msk.bf16.mxu0 %vm10940_vm2, %v10939_v0  ;;  %v4804_v59 = vadd.f32 %v13553_v25, %v4803_v37  ;;  %v13600_v6 = vld [vmem:[%s15044_s12] ss:$0 sm:$0xff] }
 0x61f   :  { %v5785_v55 = vmax.f32 %v5394_v4, 0.0  ;;  %v9690_v46 = vpop.f32.mrf.mxu0 }
 0x620   :  { %v5398_v13 = vpop.f32.mrf.mxu1  ;;  %9953 = vmatmul.mubr.bf16.gmra.mxu1 %v5138_v8  ;;  %v5041_v42 = vmax.f32 %v4804_v59, 0.0 }
 0x621   :  { %v13567_v26 = vpack.c.bf16 %v5785_v55, %v5784_v39  ;;  %v4806_v32 = vpop.f32.mrf.mxu0  ;;  %9956 = vmatprep.mubr.msk.bf16.mxu1 %vm10940_vm2, %v10939_v0  ;;  %v5399_v24 = vadd.f32 %v13271_v36, %v5398_v13 }
 0x622   :  { %v4807_v41 = vadd.f32 %v13553_v25, %v4806_v32  ;;  %v9858_v18 = vpop.f32.mrf.mxu1 }
 0x623   :  { %v9691_v7 = vpop.f32.mrf.mxu0  ;;  %v5786_v51 = vmax.f32 %v5399_v24, 0.0 }
 0x624   :  { %v5042_v49 = vmax.f32 %v4807_v41, 0.0  ;;  %v5401_v45 = vpop.f32.mrf.mxu1 }
 0x625   :  { %v5402_v16 = vadd.f32 %v13271_v36, %v5401_v45  ;;  %v4811_v15 = vpop.f32.mrf.mxu0  ;;  %10073 = vmatmul.mubr.bf16.gmra.mxu0 %v13362_v58 }
 0x626   :  { %v5139_v62 = vpack.c.bf16 %v5042_v49, %v5041_v42  ;;  %v9859_v40 = vpop.f32.mrf.mxu1  ;;  %10076 = vmatprep.mubr.msk.bf16.mxu0 %vm10940_vm2, %v10939_v0  ;;  %v4812_v21 = vadd.f32 %v13553_v25, %v4811_v15 }
 0x627   :  { %v5787_v38 = vmax.f32 %v5402_v16, 0.0  ;;  %v9694_v5 = vpop.f32.mrf.mxu0 }
 0x628   :  { %v5406_v10 = vpop.f32.mrf.mxu1  ;;  %9957 = vmatmul.mubr.bf16.gmra.mxu1 %v5139_v62  ;;  %v5043_v47 = vmax.f32 %v4812_v21, 0.0 }
 0x629   :  { %v13581_v23 = vpack.c.bf16 %v5787_v38, %v5786_v51  ;;  %v4814_v58 = vpop.f32.mrf.mxu0  ;;  %9960 = vmatprep.mubr.msk.bf16.mxu1 %vm10940_vm2, %v10939_v0  ;;  %v5407_v14 = vadd.f32 %v13271_v36, %v5406_v10 }
 0x62a   :  { %v4815_v29 = vadd.f32 %v13553_v25, %v4814_v58  ;;  %v9862_v43 = vpop.f32.mrf.mxu1 }
 0x62b   :  { %v9695_v3 = vpop.f32.mrf.mxu0  ;;  %v5788_v1 = vmax.f32 %v5407_v14, 0.0 }
 0x62c   :  { %v5044_v50 = vmax.f32 %v4815_v29, 0.0  ;;  %v5409_v54 = vpop.f32.mrf.mxu1 }
 0x62d   :  { %v5410_v33 = vadd.f32 %v13271_v36, %v5409_v54  ;;  %v4819_v35 = vpop.f32.mrf.mxu0  ;;  %10077 = vmatmul.mubr.bf16.gmra.mxu0 %v13380_v56 }
 0x62e   :  { %v5140_v60 = vpack.c.bf16 %v5044_v50, %v5043_v47  ;;  %v9863_v11 = vpop.f32.mrf.mxu1  ;;  %10080 = vmatprep.mubr.msk.bf16.mxu0 %vm10940_vm2, %v10939_v0  ;;  %v4820_v22 = vadd.f32 %v13553_v25, %v4819_v35 }
 0x62f   :  { %v5789_v61 = vmax.f32 %v5410_v33, 0.0  ;;  %v9698_v53 = vpop.f32.mrf.mxu0 }
 0x630   :  { %v5414_v12 = vpop.f32.mrf.mxu1  ;;  %9961 = vmatmul.mubr.bf16.gmra.mxu1 %v5140_v60  ;;  %v5045_v37 = vmax.f32 %v4820_v22, 0.0 }
 0x631   :  { %v13592_v63 = vpack.c.bf16 %v5789_v61, %v5788_v1  ;;  %v4822_v44 = vpop.f32.mrf.mxu0  ;;  %9964 = vmatprep.mubr.msk.bf16.mxu1 %vm10940_vm2, %v10939_v0  ;;  %v5415_v34 = vadd.f32 %v13600_v6, %v5414_v12 }
 0x632   :  { %v4823_v36 = vadd.f32 %v13553_v25, %v4822_v44  ;;  %v9866_v56 = vpop.f32.mrf.mxu1 }
 0x633   :  { %v9699_v4 = vpop.f32.mrf.mxu0  ;;  %v5790_v13 = vmax.f32 %v5415_v34, 0.0 }
 0x634   :  { %v5046_v8 = vmax.f32 %v4823_v36, 0.0  ;;  %v5417_v48 = vpop.f32.mrf.mxu1 }
 0x635   :  { %v5418_v39 = vadd.f32 %v13600_v6, %v5417_v48  ;;  %v4827_v55 = vpop.f32.mrf.mxu0  ;;  %10081 = vmatmul.mubr.bf16.gmra.mxu0 %v13391_v57 }
 0x636   :  { %v5141_v46 = vpack.c.bf16 %v5046_v8, %v5045_v37  ;;  %v9867_v59 = vpop.f32.mrf.mxu1  ;;  %10084 = vmatprep.mubr.msk.bf16.mxu0 %vm10940_vm2, %v10939_v0  ;;  %v4828_v18 = vadd.f32 %v13553_v25, %v4827_v55 }
 0x637   :  { %v5791_v32 = vmax.f32 %v5418_v39, 0.0  ;;  %v9702_v41 = vpop.f32.mrf.mxu0 }
 0x638   :  { %v5422_v24 = vpop.f32.mrf.mxu1  ;;  %9965 = vmatmul.mubr.bf16.gmra.mxu1 %v5141_v46  ;;  %v5047_v15 = vmax.f32 %v4828_v18, 0.0 }
 0x639   :  { %v13608_v7 = vpack.c.bf16 %v5791_v32, %v5790_v13  ;;  %v4830_v42 = vpop.f32.mrf.mxu0  ;;  %9968 = vmatprep.mubr.msk.bf16.mxu1 %vm10940_vm2, %v10939_v0  ;;  %v5423_v45 = vadd.f32 %v13600_v6, %v5422_v24 }
 0x63a   :  { %v4831_v57 = vadd.f32 %v13553_v25, %v4830_v42  ;;  %v9870_v49 = vpop.f32.mrf.mxu1 }
 0x63b   :  { %v9703_v16 = vpop.f32.mrf.mxu0  ;;  %v5792_v21 = vmax.f32 %v5423_v45, 0.0 }
 0x63c   :  { %v5048_v62 = vmax.f32 %v4831_v57, 0.0  ;;  %v5425_v40 = vpop.f32.mrf.mxu1 }
 0x63d   :  { %v5426_v28 = vadd.f32 %v13600_v6, %v5425_v40  ;;  %v4835_v51 = vpop.f32.mrf.mxu0  ;;  %10085 = vmatmul.mubr.bf16.gmra.mxu0 %v13402_v27 }
 0x63e   :  { %v5142_v38 = vpack.c.bf16 %v5048_v62, %v5047_v15  ;;  %v9871_v5 = vpop.f32.mrf.mxu1  ;;  %10088 = vmatprep.mubr.msk.bf16.mxu0 %vm10940_vm2, %v10939_v0  ;;  %v4836_v29 = vadd.f32 %v13553_v25, %v4835_v51 }
 0x63f   :  { %v5793_v10 = vmax.f32 %v5426_v28, 0.0  ;;  %v9706_v58 = vpop.f32.mrf.mxu0 }
 0x640   :  { %v5430_v43 = vpop.f32.mrf.mxu1  ;;  %9969 = vmatmul.mubr.bf16.gmra.mxu1 %v5142_v38  ;;  %v5049_v33 = vmax.f32 %v4836_v29, 0.0 }
 0x641   :  { %v13619_v14 = vpack.c.bf16 %v5793_v10, %v5792_v21  ;;  %v4838_v3 = vpop.f32.mrf.mxu0  ;;  %9972 = vmatprep.mubr.msk.bf16.mxu1 %vm10940_vm2, %v10939_v0  ;;  %v5431_v50 = vadd.f32 %v13600_v6, %v5430_v43 }
 0x642   :  { %v4839_v27 = vadd.f32 %v13553_v25, %v4838_v3  ;;  %v9874_v47 = vpop.f32.mrf.mxu1 }
 0x643   :  { %v9707_v54 = vpop.f32.mrf.mxu0  ;;  %v5794_v22 = vmax.f32 %v5431_v50, 0.0 }
 0x644   :  { %v5050_v35 = vmax.f32 %v4839_v27, 0.0  ;;  %v5433_v60 = vpop.f32.mrf.mxu1 }
 0x645   :  { %v5434_v11 = vadd.f32 %v13600_v6, %v5433_v60  ;;  %v4843_v1 = vpop.f32.mrf.mxu0  ;;  %10089 = vmatmul.mubr.bf16.gmra.mxu0 %v13413_v30 }
 0x646   :  { %v5143_v61 = vpack.c.bf16 %v5050_v35, %v5049_v33  ;;  %v9875_v53 = vpop.f32.mrf.mxu1  ;;  %10092 = vmatprep.mubr.msk.bf16.mxu0 %vm10940_vm2, %v10939_v0  ;;  %v4844_v36 = vadd.f32 %v13553_v25, %v4843_v1 }
 0x647   :  { %v5795_v12 = vmax.f32 %v5434_v11, 0.0  ;;  %v9710_v44 = vpop.f32.mrf.mxu0 }
 0x648   :  { %v5438_v56 = vpop.f32.mrf.mxu1  ;;  %9973 = vmatmul.mubr.bf16.gmra.mxu1 %v5143_v61  ;;  %v5051_v39 = vmax.f32 %v4844_v36, 0.0 }
 0x649   :  { %v13630_v34 = vpack.c.bf16 %v5795_v12, %v5794_v22  ;;  %v4846_v4 = vpop.f32.mrf.mxu0  ;;  %9976 = vmatprep.mubr.msk.bf16.mxu1 %vm10940_vm2, %v10939_v0  ;;  %v5439_v8 = vadd.f32 %v13600_v6, %v5438_v56 }
 0x64a   :  { %v4847_v30 = vadd.f32 %v13553_v25, %v4846_v4  ;;  %v9878_v37 = vpop.f32.mrf.mxu1 }
 0x64b   :  { %v9711_v48 = vpop.f32.mrf.mxu0  ;;  %v5796_v18 = vmax.f32 %v5439_v8, 0.0 }
 0x64c   :  { %v5052_v55 = vmax.f32 %v4847_v30, 0.0  ;;  %v5441_v46 = vpop.f32.mrf.mxu1 }
 0x64d   :  { %v5442_v59 = vadd.f32 %v13600_v6, %v5441_v46  ;;  %v4851_v13 = vpop.f32.mrf.mxu0  ;;  %10093 = vmatmul.mubr.bf16.gmra.mxu0 %v13435_v31 }
 0x64e   :  { %v5144_v32 = vpack.c.bf16 %v5052_v55, %v5051_v39  ;;  %v9879_v41 = vpop.f32.mrf.mxu1  ;;  %10096 = vmatprep.mubr.msk.bf16.mxu0 %vm10940_vm2, %v10939_v0  ;;  %v4852_v57 = vadd.f32 %v13553_v25, %v4851_v13 }
 0x64f   :  { %v5797_v24 = vmax.f32 %v5442_v59, 0.0  ;;  %v9714_v42 = vpop.f32.mrf.mxu0 }
 0x650   :  { %v5446_v49 = vpop.f32.mrf.mxu1  ;;  %9977 = vmatmul.mubr.bf16.gmra.mxu1 %v5144_v32  ;;  %v5053_v28 = vmax.f32 %v4852_v57, 0.0 }
 0x651   :  { %v13641_v45 = vpack.c.bf16 %v5797_v24, %v5796_v18  ;;  %v4854_v16 = vpop.f32.mrf.mxu0  ;;  %9980 = vmatprep.mubr.msk.bf16.mxu1 %vm10940_vm2, %v10939_v0  ;;  %v5447_v62 = vadd.f32 %v13600_v6, %v5446_v49 }
 0x652   :  { %v4855_v31 = vadd.f32 %v13553_v25, %v4854_v16  ;;  %v9882_v15 = vpop.f32.mrf.mxu1 }
 0x653   :  { %v9715_v40 = vpop.f32.mrf.mxu0  ;;  %v5798_v29 = vmax.f32 %v5447_v62, 0.0 }
 0x654   :  { %v5054_v51 = vmax.f32 %v4855_v31, 0.0  ;;  %v5449_v38 = vpop.f32.mrf.mxu1 }
 0x655   :  { %v5450_v5 = vadd.f32 %v13600_v6, %v5449_v38  ;;  %v4859_v21 = vpop.f32.mrf.mxu0  ;;  %10097 = vmatmul.mubr.bf16.gmra.mxu0 %v13445_v17 }
 0x656   :  { %v5145_v10 = vpack.c.bf16 %v5054_v51, %v5053_v28  ;;  %v9883_v58 = vpop.f32.mrf.mxu1  ;;  %10100 = vmatprep.mubr.msk.bf16.mxu0 %vm10940_vm2, %v10939_v0  ;;  %v4860_v27 = vadd.f32 %v13553_v25, %v4859_v21 }
 0x657   :  { %v5799_v43 = vmax.f32 %v5450_v5, 0.0  ;;  %v9718_v3 = vpop.f32.mrf.mxu0 }
 0x658   :  { %v5454_v47 = vpop.f32.mrf.mxu1  ;;  %9981 = vmatmul.mubr.bf16.gmra.mxu1 %v5145_v10  ;;  %v5055_v11 = vmax.f32 %v4860_v27, 0.0 }
 0x659   :  { %v13652_v50 = vpack.c.bf16 %v5799_v43, %v5798_v29  ;;  %v4862_v54 = vpop.f32.mrf.mxu0  ;;  %9984 = vmatprep.mubr.msk.bf16.mxu1 %vm10940_vm2, %v10939_v0  ;;  %v5455_v35 = vadd.f32 %v13600_v6, %v5454_v47 }
 0x65a   :  { %v4863_v17 = vadd.f32 %v13553_v25, %v4862_v54  ;;  %v9886_v33 = vpop.f32.mrf.mxu1 }
 0x65b   :  { %v9719_v60 = vpop.f32.mrf.mxu0  ;;  %v5800_v36 = vmax.f32 %v5455_v35, 0.0 }
 0x65c   :  { %v5056_v1 = vmax.f32 %v4863_v17, 0.0  ;;  %v5457_v61 = vpop.f32.mrf.mxu1 }
 0x65d   :  { %v5458_v53 = vadd.f32 %v13600_v6, %v5457_v61  ;;  %v4867_v22 = vpop.f32.mrf.mxu0  ;;  %10101 = vmatmul.mubr.bf16.gmra.mxu0 %v13463_v52 }
 0x65e   :  { %v5146_v12 = vpack.c.bf16 %v5056_v1, %v5055_v11  ;;  %v9887_v44 = vpop.f32.mrf.mxu1  ;;  %10104 = vmatprep.mubr.msk.bf16.mxu0 %vm10940_vm2, %v10939_v0  ;;  %v4868_v30 = vadd.f32 %v13553_v25, %v4867_v22 }
 0x65f   :  { %v5801_v56 = vmax.f32 %v5458_v53, 0.0  ;;  %v9722_v4 = vpop.f32.mrf.mxu0 }
 0x660   :  { %v5462_v37 = vpop.f32.mrf.mxu1  ;;  %9985 = vmatmul.mubr.bf16.gmra.mxu1 %v5146_v12  ;;  %v5057_v59 = vmax.f32 %v4868_v30, 0.0 }
 0x661   :  { %v13663_v8 = vpack.c.bf16 %v5801_v56, %v5800_v36  ;;  %v4870_v48 = vpop.f32.mrf.mxu0  ;;  %9988 = vmatprep.mubr.msk.bf16.mxu1 %vm10940_vm2, %v10939_v0  ;;  %v5463_v55 = vadd.f32 %v13600_v6, %v5462_v37 }
 0x662   :  { %v4871_v52 = vadd.f32 %v13553_v25, %v4870_v48  ;;  %v9890_v39 = vpop.f32.mrf.mxu1 }
 0x663   :  { %v9723_v46 = vpop.f32.mrf.mxu0  ;;  %v5802_v57 = vmax.f32 %v5463_v55, 0.0 }
 0x664   :  { %v5058_v13 = vmax.f32 %v4871_v52, 0.0  ;;  %v5465_v32 = vpop.f32.mrf.mxu1 }
 0x665   :  { %v5466_v41 = vadd.f32 %v13600_v6, %v5465_v32  ;;  %v4875_v18 = vpop.f32.mrf.mxu0  ;;  %10105 = vmatmul.mubr.bf16.gmra.mxu0 %v13490_v2 }
 0x666   :  { %v5147_v24 = vpack.c.bf16 %v5058_v13, %v5057_v59  ;;  %v9891_v42 = vpop.f32.mrf.mxu1  ;;  %10108 = vmatprep.mubr.msk.bf16.mxu0 %vm10940_vm2, %v10939_v0  ;;  %v4876_v31 = vadd.f32 %v13553_v25, %v4875_v18 }
 0x667   :  { %v5803_v49 = vmax.f32 %v5466_v41, 0.0  ;;  %v9726_v16 = vpop.f32.mrf.mxu0 }
 0x668   :  { %v5470_v15 = vpop.f32.mrf.mxu1  ;;  %9989 = vmatmul.mubr.bf16.gmra.mxu1 %v5147_v24  ;;  %v5059_v5 = vmax.f32 %v4876_v31, 0.0 }
 0x669   :  { %v13674_v62 = vpack.c.bf16 %v5803_v49, %v5802_v57  ;;  %v4878_v40 = vpop.f32.mrf.mxu0  ;;  %9992 = vmatprep.mubr.msk.bf16.mxu1 %vm10940_vm2, %v10939_v0  ;;  %v5471_v51 = vadd.f32 %v13600_v6, %v5470_v15 }
 0x66a   :  { %v4879_v2 = vadd.f32 %v13553_v25, %v4878_v40  ;;  %v9894_v28 = vpop.f32.mrf.mxu1 }
 0x66b   :  { %v9727_v38 = vpop.f32.mrf.mxu0  ;;  %v5804_v27 = vmax.f32 %v5471_v51, 0.0 }
 0x66c   :  { %v5060_v21 = vmax.f32 %v4879_v2, 0.0  ;;  %v5473_v10 = vpop.f32.mrf.mxu1 }
 0x66d   :  { %v5474_v58 = vadd.f32 %v13600_v6, %v5473_v10  ;;  %v4883_v29 = vpop.f32.mrf.mxu0  ;;  %10109 = vmatmul.mubr.bf16.gmra.mxu0 %v13518_v19 }
 0x66e   :  { %v5148_v43 = vpack.c.bf16 %v5060_v21, %v5059_v5  ;;  %v9895_v3 = vpop.f32.mrf.mxu1  ;;  %10112 = vmatprep.mubr.msk.bf16.mxu0 %vm10940_vm2, %v10939_v0  ;;  %v4884_v17 = vadd.f32 %v13553_v25, %v4883_v29 }
 0x66f   :  { %v5805_v47 = vmax.f32 %v5474_v58, 0.0  ;;  %v9730_v54 = vpop.f32.mrf.mxu0 }
 0x670   :  { %v5478_v33 = vpop.f32.mrf.mxu1  ;;  %9993 = vmatmul.mubr.bf16.gmra.mxu1 %v5148_v43  ;;  %v5061_v53 = vmax.f32 %v4884_v17, 0.0 }
 0x671   :  { %v13685_v35 = vpack.c.bf16 %v5805_v47, %v5804_v27  ;;  %v4886_v60 = vpop.f32.mrf.mxu0  ;;  %9996 = vmatprep.mubr.msk.bf16.mxu1 %vm10940_vm2, %v10939_v0  ;;  %v5479_v1 = vadd.f32 %v13600_v6, %v5478_v33 }
 0x672   :  { %v4887_v19 = vadd.f32 %v13553_v25, %v4886_v60  ;;  %v9898_v11 = vpop.f32.mrf.mxu1 }
 0x673   :  { %v9731_v61 = vpop.f32.mrf.mxu0  ;;  %v5806_v30 = vmax.f32 %v5479_v1, 0.0 }
 0x674   :  { %v5062_v22 = vmax.f32 %v4887_v19, 0.0  ;;  %v5481_v12 = vpop.f32.mrf.mxu1 }
 0x675   :  { %v5482_v44 = vadd.f32 %v13600_v6, %v5481_v12  ;;  %v4891_v36 = vpop.f32.mrf.mxu0  ;;  %10113 = vmatmul.mubr.bf16.gmra.mxu0 %v13536_v9 }
 0x676   :  { %v5149_v56 = vpack.c.bf16 %v5062_v22, %v5061_v53  ;;  %v9899_v4 = vpop.f32.mrf.mxu1  ;;  %10116 = vmatprep.mubr.msk.bf16.mxu0 %vm10940_vm2, %v10939_v0  ;;  %v4892_v52 = vadd.f32 %v13553_v25, %v4891_v36 }
 0x677   :  { %v5807_v37 = vmax.f32 %v5482_v44, 0.0  ;;  %v9734_v48 = vpop.f32.mrf.mxu0 }
 0x678   :  { %v5486_v39 = vpop.f32.mrf.mxu1  ;;  %9997 = vmatmul.mubr.bf16.gmra.mxu1 %v5149_v56  ;;  %v5063_v41 = vmax.f32 %v4892_v52, 0.0 }
 0x679   :  { %v13696_v55 = vpack.c.bf16 %v5807_v37, %v5806_v30  ;;  %v4894_v46 = vpop.f32.mrf.mxu0  ;;  %10000 = vmatprep.mubr.msk.bf16.mxu1 %vm10940_vm2, %v10939_v0  ;;  %v5487_v13 = vadd.f32 %v13600_v6, %v5486_v39 }
 0x67a   :  { %v4895_v9 = vadd.f32 %v13553_v25, %v4894_v46  ;;  %v9902_v59 = vpop.f32.mrf.mxu1 }
 0x67b   :  { %v9735_v32 = vpop.f32.mrf.mxu0  ;;  %v5808_v31 = vmax.f32 %v5487_v13, 0.0 }
 0x67c   :  { %v5064_v18 = vmax.f32 %v4895_v9, 0.0  ;;  %v5489_v24 = vpop.f32.mrf.mxu1 }
 0x67d   :  { %v5490_v42 = vadd.f32 %v13600_v6, %v5489_v24  ;;  %v4899_v57 = vpop.f32.mrf.mxu0  ;;  %10117 = vmatmul.mubr.bf16.gmra.mxu0 %v13556_v20 }
 0x67e   :  { %v5150_v49 = vpack.c.bf16 %v5064_v18, %v5063_v41  ;;  %v9903_v16 = vpop.f32.mrf.mxu1  ;;  %10120 = vmatprep.mubr.msk.bf16.mxu0 %vm10940_vm2, %v10939_v0  ;;  %v4900_v2 = vadd.f32 %v13553_v25, %v4899_v57 }
 0x67f   :  { %v5809_v15 = vmax.f32 %v5490_v42, 0.0  ;;  %v9738_v40 = vpop.f32.mrf.mxu0 }
 0x680   :  { %v5494_v28 = vpop.f32.mrf.mxu1  ;;  %10001 = vmatmul.mubr.bf16.gmra.mxu1 %v5150_v49  ;;  %v5065_v58 = vmax.f32 %v4900_v2, 0.0 }
 0x681   :  { %v13707_v51 = vpack.c.bf16 %v5809_v15, %v5808_v31  ;;  %v4902_v38 = vpop.f32.mrf.mxu0  ;;  %10004 = vmatprep.mubr.msk.bf16.mxu1 %vm10940_vm2, %v10939_v0  ;;  %v5495_v21 = vadd.f32 %v13600_v6, %v5494_v28 }
 0x682   :  { %v4903_v20 = vadd.f32 %v13553_v25, %v4902_v38  ;;  %v9906_v5 = vpop.f32.mrf.mxu1 }
 0x683   :  { %v9739_v10 = vpop.f32.mrf.mxu0  ;;  %v5810_v17 = vmax.f32 %v5495_v21, 0.0 }
 0x684   :  { %v5066_v29 = vmax.f32 %v4903_v20, 0.0  ;;  %v5497_v43 = vpop.f32.mrf.mxu1 }
 0x685   :  { %v5498_v3 = vadd.f32 %v13600_v6, %v5497_v43  ;;  %v4907_v27 = vpop.f32.mrf.mxu0  ;;  %10121 = vmatmul.mubr.bf16.gmra.mxu0 %v13567_v26 }
 0x686   :  { %v5151_v47 = vpack.c.bf16 %v5066_v29, %v5065_v58  ;;  %v9907_v54 = vpop.f32.mrf.mxu1  ;;  %10124 = vmatprep.mubr.msk.bf16.mxu0 %vm10940_vm2, %v10939_v0  ;;  %v4908_v19 = vadd.f32 %v13553_v25, %v4907_v27 }
 0x687   :  { %v5811_v33 = vmax.f32 %v5498_v3, 0.0  ;;  %v9742_v60 = vpop.f32.mrf.mxu0 }
 0x688   :  { %v5502_v11 = vpop.f32.mrf.mxu1  ;;  %10005 = vmatmul.mubr.bf16.gmra.mxu1 %v5151_v47  ;;  %v5067_v44 = vmax.f32 %v4908_v19, 0.0 }
 0x689   :  { %v13718_v1 = vpack.c.bf16 %v5811_v33, %v5810_v17  ;;  %v4910_v61 = vpop.f32.mrf.mxu0  ;;  %10008 = vmatprep.mubr.msk.bf16.mxu1 %vm10940_vm2, %v10939_v0  ;;  %v5503_v22 = vadd.f32 %v13600_v6, %v5502_v11 }
 0x68a   :  { %v4911_v26 = vadd.f32 %v13553_v25, %v4910_v61  ;;  %v9910_v53 = vpop.f32.mrf.mxu1 }
 0x68b   :  { %v9743_v12 = vpop.f32.mrf.mxu0  ;;  %v5812_v52 = vmax.f32 %v5503_v22, 0.0 }
 0x68c   :  { %v5068_v36 = vmax.f32 %v4911_v26, 0.0  ;;  %v5505_v56 = vpop.f32.mrf.mxu1 }
 0x68d   :  { %v5506_v4 = vadd.f32 %v13600_v6, %v5505_v56  ;;  %v4915_v30 = vpop.f32.mrf.mxu0  ;;  %10125 = vmatmul.mubr.bf16.gmra.mxu0 %v13581_v23 }
 0x68e   :  { %v5152_v37 = vpack.c.bf16 %v5068_v36, %v5067_v44  ;;  %v9911_v48 = vpop.f32.mrf.mxu1  ;;  %10128 = vmatprep.mubr.msk.bf16.mxu0 %vm10940_vm2, %v10939_v0  ;;  %v4916_v9 = vadd.f32 %v13553_v25, %v4915_v30 }
 0x68f   :  { %v5813_v39 = vmax.f32 %v5506_v4, 0.0  ;;  %v9746_v46 = vpop.f32.mrf.mxu0 }
 0x690   :  { %v5510_v59 = vpop.f32.mrf.mxu1  ;;  %10009 = vmatmul.mubr.bf16.gmra.mxu1 %v5152_v37  ;;  %v5069_v42 = vmax.f32 %v4916_v9, 0.0 }
 0x691   :  { %v13729_v13 = vpack.c.bf16 %v5813_v39, %v5812_v52  ;;  %v4918_v32 = vpop.f32.mrf.mxu0  ;;  %10012 = vmatprep.mubr.msk.bf16.mxu1 %vm10940_vm2, %v10939_v0  ;;  %v5511_v18 = vadd.f32 %v13600_v6, %v5510_v59 }
 0x692   :  { %v4919_v23 = vadd.f32 %v13553_v25, %v4918_v32  ;;  %v9914_v41 = vpop.f32.mrf.mxu1 }
 0x693   :  { %v9747_v24 = vpop.f32.mrf.mxu0  ;;  %v5814_v2 = vmax.f32 %v5511_v18, 0.0 }
 0x694   :  { %v5070_v57 = vmax.f32 %v4919_v23, 0.0  ;;  %v5513_v49 = vpop.f32.mrf.mxu1 }
 0x695   :  { %v5514_v16 = vadd.f32 %v13600_v6, %v5513_v49  ;;  %v4923_v31 = vpop.f32.mrf.mxu0  ;;  %10129 = vmatmul.mubr.bf16.gmra.mxu0 %v13592_v63 }
 0x696   :  { %v5153_v15 = vpack.c.bf16 %v5070_v57, %v5069_v42  ;;  %v9915_v40 = vpop.f32.mrf.mxu1  ;;  %10132 = vmatprep.mubr.msk.bf16.mxu0 %vm10940_vm2, %v10939_v0  ;;  %v4924_v20 = vadd.f32 %v13553_v25, %v4923_v31 }
 0x697   :  { %v5815_v28 = vmax.f32 %v5514_v16, 0.0  ;;  %v9750_v38 = vpop.f32.mrf.mxu0 }
 0x698   :  { %v5518_v5 = vpop.f32.mrf.mxu1  ;;  %10013 = vmatmul.mubr.bf16.gmra.mxu1 %v5153_v15  ;;  %v5071_v3 = vmax.f32 %v4924_v20, 0.0 }
 0x699   :  { %v13740_v21 = vpack.c.bf16 %v5815_v28, %v5814_v2  ;;  %v4926_v10 = vpop.f32.mrf.mxu0  ;;  %10016 = vmatprep.mubr.msk.bf16.mxu1 %vm10940_vm2, %v10939_v0  ;;  %v5519_v29 = vadd.f32 %v13600_v6, %v5518_v5 }
 0x69a   :  { %v4927_v63 = vadd.f32 %v13553_v25, %v4926_v10  ;;  %v9918_v58 = vpop.f32.mrf.mxu1 }
 0x69b   :  { %v9751_v43 = vpop.f32.mrf.mxu0  ;;  %v5816_v19 = vmax.f32 %v5519_v29, 0.0 }
 0x69c   :  { %v5072_v27 = vmax.f32 %v4927_v63, 0.0  ;;  %v5521_v47 = vpop.f32.mrf.mxu1 }
 0x69d   :  { %v5522_v54 = vadd.f32 %v13600_v6, %v5521_v47  ;;  %v4931_v17 = vpop.f32.mrf.mxu0  ;;  %10133 = vmatmul.mubr.bf16.gmra.mxu0 %v13608_v7 }
 0x69e   :  { %v5154_v33 = vpack.c.bf16 %v5072_v27, %v5071_v3  ;;  %v9919_v60 = vpop.f32.mrf.mxu1  ;;  %10136 = vmatprep.mubr.msk.bf16.mxu0 %vm10940_vm2, %v10939_v0  ;;  %v4932_v26 = vadd.f32 %v13553_v25, %v4931_v17 }
 0x69f   :  { %v5817_v11 = vmax.f32 %v5522_v54, 0.0  ;;  %v9754_v61 = vpop.f32.mrf.mxu0 }
 0x6a0   :  { %v5526_v53 = vpop.f32.mrf.mxu1  ;;  %10017 = vmatmul.mubr.bf16.gmra.mxu1 %v5154_v33  ;;  %v5073_v4 = vmax.f32 %v4932_v26, 0.0 }
 0x6a1   :  { %v13751_v22 = vpack.c.bf16 %v5817_v11, %v5816_v19  ;;  %v4934_v12 = vpop.f32.mrf.mxu0  ;;  %10020 = vmatprep.mubr.msk.bf16.mxu1 %vm10940_vm2, %v10939_v0  ;;  %v5527_v36 = vadd.f32 %v13600_v6, %v5526_v53 }
 0x6a2   :  { %v4935_v7 = vadd.f32 %v13553_v25, %v4934_v12  ;;  %v9922_v44 = vpop.f32.mrf.mxu1  ;;  %v13789_v12 = vld [vmem:[%s15045_s14] ss:$0 sm:$0xff] }
 0x6a3   :  { %v9755_v56 = vpop.f32.mrf.mxu0  ;;  %v5818_v9 = vmax.f32 %v5527_v36, 0.0 }
 0x6a4   :  { %v5074_v30 = vmax.f32 %v4935_v7, 0.0  ;;  %v5529_v37 = vpop.f32.mrf.mxu1 }
 0x6a5   :  { %v5530_v48 = vadd.f32 %v13600_v6, %v5529_v37  ;;  %v4939_v52 = vpop.f32.mrf.mxu0  ;;  %10137 = vmatmul.mubr.bf16.gmra.mxu0 %v13619_v14 }
 0x6a6   :  { %v5155_v39 = vpack.c.bf16 %v5074_v30, %v5073_v4  ;;  %v9923_v46 = vpop.f32.mrf.mxu1  ;;  %10140 = vmatprep.mubr.msk.bf16.mxu0 %vm10940_vm2, %v10939_v0  ;;  %v4940_v23 = vadd.f32 %v13553_v25, %v4939_v52 }
 0x6a7   :  { %v5819_v59 = vmax.f32 %v5530_v48, 0.0  ;;  %v9758_v32 = vpop.f32.mrf.mxu0 }
 0x6a8   :  { %v5534_v41 = vpop.f32.mrf.mxu1  ;;  %10021 = vmatmul.mubr.bf16.gmra.mxu1 %v5155_v39  ;;  %v5075_v16 = vmax.f32 %v4940_v23, 0.0 }
 0x6a9   :  { %v13762_v18 = vpack.c.bf16 %v5819_v59, %v5818_v9  ;;  %v4942_v24 = vpop.f32.mrf.mxu0  ;;  %10024 = vmatprep.mubr.msk.bf16.mxu1 %vm10940_vm2, %v10939_v0  ;;  %v5535_v57 = vadd.f32 %v13600_v6, %v5534_v41 }
 0x6aa   :  { %v4943_v14 = vadd.f32 %v13553_v25, %v4942_v24  ;;  %v9926_v42 = vpop.f32.mrf.mxu1 }
 0x6ab   :  { %v9759_v49 = vpop.f32.mrf.mxu0  ;;  %v5820_v5 = vmax.f32 %v5535_v57, 0.0 }
 0x6ac   :  { %v5076_v31 = vmax.f32 %v4943_v14, 0.0  ;;  %v5537_v15 = vpop.f32.mrf.mxu1 }
 0x6ad   :  { %v5538_v40 = vadd.f32 %v13600_v6, %v5537_v15  ;;  %v4947_v2 = vpop.f32.mrf.mxu0  ;;  %10141 = vmatmul.mubr.bf16.gmra.mxu0 %v13630_v34 }
 0x6ae   :  { %v5156_v28 = vpack.c.bf16 %v5076_v31, %v5075_v16  ;;  %v4948_v38 = vadd.f32 %v13553_v25, %v4947_v2  ;;  %v9927_v20 = vpop.f32.mrf.mxu1  ;;  %10144 = vmatprep.mubr.msk.bf16.mxu0 %vm10940_vm2, %v10939_v0 }
 0x6af   :  { %v5821_v10 = vmax.f32 %v5538_v40, 0.0  ;;  %v9762_v63 = vpop.f32.mrf.mxu0 }
 0x6b0   :  { %v5542_v58 = vpop.f32.mrf.mxu1  ;;  %10025 = vmatmul.mubr.bf16.gmra.mxu1 %v5156_v28  ;;  %v5077_v3 = vmax.f32 %v4948_v38, 0.0 }
 0x6b1   :  { %v13773_v29 = vpack.c.bf16 %v5821_v10, %v5820_v5  ;;  %v4950_v43 = vpop.f32.mrf.mxu0  ;;  %10028 = vmatprep.mubr.msk.bf16.mxu1 %vm10940_vm2, %v10939_v0  ;;  %v5543_v27 = vadd.f32 %v13600_v6, %v5542_v58 }
 0x6b2   :  { %v9930_v34 = vpop.f32.mrf.mxu1  ;;  %v5157_v33 = vpack.c.bf16 %v5077_v3, %v5077_v3 }
 0x6b3   :  { %v9763_v25 = vpop.f32.mrf.mxu0  ;;  %v5822_v19 = vmax.f32 %v5543_v27, 0.0 }
 0x6b4   :  { %v5545_v47 = vpop.f32.mrf.mxu1 }
 0x6b5   :  { %v5546_v54 = vadd.f32 %v13600_v6, %v5545_v47  ;;  %v13779_v17 = vpop.f32.mrf.mxu0  ;;  %10145 = vmatmul.mubr.bf16.gmra.mxu0 %v13641_v45 }
 0x6b6   :  { %v9931_v60 = vpop.f32.mrf.mxu1  ;;  %10148 = vmatprep.mubr.msk.bf16.mxu0 %vm10940_vm2, %v10939_v0 }
 0x6b7   :  { %v5823_v11 = vmax.f32 %v5546_v54, 0.0  ;;  %v10050_v61 = vpop.f32.mrf.mxu0 }
 0x6b8   :  { %v5550_v26 = vpop.f32.mrf.mxu1  ;;  %10029 = vmatmul.mubr.bf16.gmra.mxu1 %v5157_v33 }
 0x6b9   :  { %v13784_v53 = vpack.c.bf16 %v5823_v11, %v5822_v19  ;;  %v6044_v7 = vpop.f32.mrf.mxu0  ;;  %10335 = vmatprep.mubr.msk.f32.mxu1 %vm10940_vm2, %v10939_v0  ;;  %v5551_v36 = vadd.f32 %v13600_v6, %v5550_v26 }
 0x6ba   :  { %v6045_v45 = vadd.f32 %v13789_v12, %v6044_v7  ;;  %v9934_v44 = vpop.f32.mrf.mxu1 }
 0x6bb   :  { %v10051_v56 = vpop.f32.mrf.mxu0  ;;  %v5824_v46 = vmax.f32 %v5551_v36, 0.0 }
 0x6bc   :  { %v5553_v4 = vpop.f32.mrf.mxu1  ;;  %v6544_v48 = vmax.f32 %v6045_v45, 0.0 }
 0x6bd   :  { %v5554_v30 = vadd.f32 %v13600_v6, %v5553_v4  ;;  %v6049_v37 = vpop.f32.mrf.mxu0  ;;  %10149 = vmatmul.mubr.bf16.gmra.mxu0 %v13652_v50 }
 0x6be   :  { %v6050_v52 = vadd.f32 %v13789_v12, %v6049_v37  ;;  %v9935_v39 = vpop.f32.mrf.mxu1  ;;  %10152 = vmatprep.mubr.msk.bf16.mxu0 %vm10940_vm2, %v10939_v0 }
 0x6bf   :  { %v5825_v9 = vmax.f32 %v5554_v30, 0.0  ;;  %v10054_v59 = vpop.f32.mrf.mxu0 }
 0x6c0   :  { %v5558_v32 = vpop.f32.mrf.mxu1  ;;  %10336 = vmatmul.mubr.f32.vlgmr.msra.gmra.mxu1 %v6544_v48  ;;  %v6545_v24 = vmax.f32 %v6050_v52, 0.0 }
 0x6c1   :  { %v13800_v23 = vpack.c.bf16 %v5825_v9, %v5824_v46  ;;  %v6052_v41 = vpop.f32.mrf.mxu0  ;;  %10338 = vmatprep.mubr.msk.f32.mxu1 %vm10940_vm2, %v10939_v0  ;;  %v5559_v42 = vadd.f32 %v13600_v6, %v5558_v32 }
 0x6c2   :  { %v6053_v50 = vadd.f32 %v13789_v12, %v6052_v41  ;;  %v9938_v14 = vpop.f32.mrf.mxu1 }
 0x6c3   :  { %v10055_v57 = vpop.f32.mrf.mxu0  ;;  %v5826_v28 = vmax.f32 %v5559_v42, 0.0 }
 0x6c4   :  { %v5561_v49 = vpop.f32.mrf.mxu1  ;;  %10339 = vmatmul.mubr.f32.gmra.mxu1 %v6545_v24  ;;  %v6546_v15 = vmax.f32 %v6053_v50, 0.0 }
 0x6c5   :  { %v5562_v16 = vadd.f32 %v13600_v6, %v5561_v49  ;;  %v6057_v31 = vpop.f32.mrf.mxu0  ;;  %10153 = vmatmul.mubr.bf16.gmra.mxu0 %v13663_v8  ;;  %10341 = vmatprep.mubr.msk.f32.mxu1 %vm10940_vm2, %v10939_v0 }
 0x6c6   :  { %v6058_v40 = vadd.f32 %v13789_v12, %v6057_v31  ;;  %v9939_v2 = vpop.f32.mrf.mxu1  ;;  %10156 = vmatprep.mubr.msk.bf16.mxu0 %vm10940_vm2, %v10939_v0 }
 0x6c7   :  { %v5827_v38 = vmax.f32 %v5562_v16, 0.0  ;;  %v10058_v20 = vpop.f32.mrf.mxu0 }
 0x6c8   :  { %v5566_v5 = vpop.f32.mrf.mxu1  ;;  %10342 = vmatmul.mubr.f32.gmra.mxu1 %v6546_v15  ;;  %v6547_v8 = vmax.f32 %v6058_v40, 0.0 }
 0x6c9   :  { %v13813_v10 = vpack.c.bf16 %v5827_v38, %v5826_v28  ;;  %v6060_v63 = vpop.f32.mrf.mxu0  ;;  %10344 = vmatprep.mubr.msk.f32.mxu1 %vm10940_vm2, %v10939_v0  ;;  %v5567_v3 = vadd.f32 %v13600_v6, %v5566_v5 }
 0x6ca   :  { %v6061_v58 = vadd.f32 %v13789_v12, %v6060_v63  ;;  %v9942_v43 = vpop.f32.mrf.mxu1 }
 0x6cb   :  { %v10059_v34 = vpop.f32.mrf.mxu0  ;;  %v5828_v19 = vmax.f32 %v5567_v3, 0.0 }
 0x6cc   :  { %v5569_v27 = vpop.f32.mrf.mxu1  ;;  %10345 = vmatmul.mubr.f32.gmra.mxu1 %v6547_v8  ;;  %v6548_v54 = vmax.f32 %v6061_v58, 0.0 }
 0x6cd   :  { %v5570_v25 = vadd.f32 %v13600_v6, %v5569_v27  ;;  %v6065_v47 = vpop.f32.mrf.mxu0  ;;  %10157 = vmatmul.mubr.bf16.gmra.mxu0 %v13674_v62  ;;  %10347 = vmatprep.mubr.msk.f32.mxu1 %vm10940_vm2, %v10939_v0 }
 0x6ce   :  { %v6066_v33 = vadd.f32 %v13789_v12, %v6065_v47  ;;  %v9943_v60 = vpop.f32.mrf.mxu1  ;;  %10160 = vmatprep.mubr.msk.bf16.mxu0 %vm10940_vm2, %v10939_v0 }
 0x6cf   :  { %v5829_v11 = vmax.f32 %v5570_v25, 0.0  ;;  %v10062_v61 = vpop.f32.mrf.mxu0 }
 0x6d0   :  { %v5574_v26 = vpop.f32.mrf.mxu1  ;;  %10348 = vmatmul.mubr.f32.gmra.mxu1 %v6548_v54  ;;  %v6549_v62 = vmax.f32 %v6066_v33, 0.0 }
 0x6d1   :  { %v13826_v7 = vpack.c.bf16 %v5829_v11, %v5828_v19  ;;  %v6068_v45 = vpop.f32.mrf.mxu0  ;;  %10350 = vmatprep.mubr.msk.f32.mxu1 %vm10940_vm2, %v10939_v0  ;;  %v5575_v56 = vadd.f32 %v13600_v6, %v5574_v26 }
 0x6d2   :  { %v6069_v44 = vadd.f32 %v13789_v12, %v6068_v45  ;;  %v9946_v36 = vpop.f32.mrf.mxu1 }
 0x6d3   :  { %v10063_v4 = vpop.f32.mrf.mxu0  ;;  %v5830_v9 = vmax.f32 %v5575_v56, 0.0 }
 0x6d4   :  { %v5577_v30 = vpop.f32.mrf.mxu1  ;;  %10351 = vmatmul.mubr.f32.gmra.mxu1 %v6549_v62  ;;  %v6550_v52 = vmax.f32 %v6069_v44, 0.0 }
 0x6d5   :  { %v5578_v37 = vadd.f32 %v13600_v6, %v5577_v30  ;;  %v6073_v48 = vpop.f32.mrf.mxu0  ;;  %10161 = vmatmul.mubr.bf16.gmra.mxu0 %v13685_v35  ;;  %10353 = vmatprep.mubr.msk.f32.mxu1 %vm10940_vm2, %v10939_v0 }
 0x6d6   :  { %v6074_v39 = vadd.f32 %v13789_v12, %v6073_v48  ;;  %v9947_v46 = vpop.f32.mrf.mxu1  ;;  %10164 = vmatprep.mubr.msk.bf16.mxu0 %vm10940_vm2, %v10939_v0  ;;  %v13874_v48 = vld [vmem:[%s15044_s12] ss:$0 sm:$0xff] }
 0x6d7   :  { %v5831_v59 = vmax.f32 %v5578_v37, 0.0  ;;  %v10066_v32 = vpop.f32.mrf.mxu0 }
 0x6d8   :  { %v5582_v41 = vpop.f32.mrf.mxu1  ;;  %10354 = vmatmul.mubr.f32.gmra.mxu1 %v6550_v52  ;;  %v6551_v35 = vmax.f32 %v6074_v39, 0.0 }
 0x6d9   :  { %v13839_v24 = vpack.c.bf16 %v5831_v59, %v5830_v9  ;;  %v6076_v50 = vpop.f32.mrf.mxu0  ;;  %10356 = vmatprep.mubr.msk.f32.mxu1 %vm10940_vm2, %v10939_v0  ;;  %v5583_v57 = vadd.f32 %v13600_v6, %v5582_v41 }
 0x6da   :  { %v6077_v14 = vadd.f32 %v13789_v12, %v6076_v50  ;;  %v9950_v42 = vpop.f32.mrf.mxu1 }
 0x6db   :  { %v10067_v49 = vpop.f32.mrf.mxu0  ;;  %v5832_v38 = vmax.f32 %v5583_v57, 0.0 }
 0x6dc   :  { %v5585_v16 = vpop.f32.mrf.mxu1  ;;  %10357 = vmatmul.mubr.f32.gmra.mxu1 %v6551_v35  ;;  %v6552_v40 = vmax.f32 %v6077_v14, 0.0 }
 0x6dd   :  { %v5586_v31 = vadd.f32 %v13600_v6, %v5585_v16  ;;  %v6081_v15 = vpop.f32.mrf.mxu0  ;;  %10165 = vmatmul.mubr.bf16.gmra.mxu0 %v13696_v55  ;;  %10359 = vmatprep.mubr.msk.f32.mxu1 %vm10940_vm2, %v10939_v0 }
 0x6de   :  { %v6082_v2 = vadd.f32 %v13789_v12, %v6081_v15  ;;  %v9951_v28 = vpop.f32.mrf.mxu1  ;;  %10168 = vmatprep.mubr.msk.bf16.mxu0 %vm10940_vm2, %v10939_v0 }
 0x6df   :  { %v5833_v20 = vmax.f32 %v5586_v31, 0.0  ;;  %v10070_v5 = vpop.f32.mrf.mxu0 }
 0x6e0   :  { %v5590_v63 = vpop.f32.mrf.mxu1  ;;  %10360 = vmatmul.mubr.f32.gmra.mxu1 %v6552_v40  ;;  %v6553_v55 = vmax.f32 %v6082_v2, 0.0 }
 0x6e1   :  { %v13852_v8 = vpack.c.bf16 %v5833_v20, %v5832_v38  ;;  %v6084_v58 = vpop.f32.mrf.mxu0  ;;  %10362 = vmatprep.mubr.msk.f32.mxu1 %vm10940_vm2, %v10939_v0  ;;  %v5591_v34 = vadd.f32 %v13600_v6, %v5590_v63 }
 0x6e2   :  { %v6085_v43 = vadd.f32 %v13789_v12, %v6084_v58  ;;  %v9954_v3 = vpop.f32.mrf.mxu1 }
 0x6e3   :  { %v10071_v27 = vpop.f32.mrf.mxu0  ;;  %v5834_v11 = vmax.f32 %v5591_v34, 0.0 }
 0x6e4   :  { %v5593_v25 = vpop.f32.mrf.mxu1  ;;  %10363 = vmatmul.mubr.f32.gmra.mxu1 %v6553_v55  ;;  %v6554_v33 = vmax.f32 %v6085_v43, 0.0 }
 0x6e5   :  { %v5594_v47 = vadd.f32 %v13600_v6, %v5593_v25  ;;  %v6089_v54 = vpop.f32.mrf.mxu0  ;;  %10169 = vmatmul.mubr.bf16.gmra.mxu0 %v13707_v51  ;;  %10365 = vmatprep.mubr.msk.f32.mxu1 %vm10940_vm2, %v10939_v0 }
 0x6e6   :  { %v6090_v60 = vadd.f32 %v13789_v12, %v6089_v54  ;;  %v9955_v19 = vpop.f32.mrf.mxu1  ;;  %10172 = vmatprep.mubr.msk.bf16.mxu0 %vm10940_vm2, %v10939_v0 }
 0x6e7   :  { %v5835_v61 = vmax.f32 %v5594_v47, 0.0  ;;  %v10074_v26 = vpop.f32.mrf.mxu0 }
 0x6e8   :  { %v5598_v45 = vpop.f32.mrf.mxu1  ;;  %10366 = vmatmul.mubr.f32.gmra.mxu1 %v6554_v33  ;;  %v6555_v51 = vmax.f32 %v6090_v60, 0.0 }
 0x6e9   :  { %v13865_v62 = vpack.c.bf16 %v5835_v61, %v5834_v11  ;;  %v6092_v44 = vpop.f32.mrf.mxu0  ;;  %10368 = vmatprep.mubr.msk.f32.mxu1 %vm10940_vm2, %v10939_v0  ;;  %v5599_v4 = vadd.f32 %v13600_v6, %v5598_v45 }
 0x6ea   :  { %v6093_v36 = vadd.f32 %v13789_v12, %v6092_v44  ;;  %v9958_v56 = vpop.f32.mrf.mxu1 }
 0x6eb   :  { %v10075_v30 = vpop.f32.mrf.mxu0  ;;  %v5836_v59 = vmax.f32 %v5599_v4, 0.0 }
 0x6ec   :  { %v5601_v37 = vpop.f32.mrf.mxu1  ;;  %10369 = vmatmul.mubr.f32.gmra.mxu1 %v6555_v51  ;;  %v6556_v46 = vmax.f32 %v6093_v36, 0.0 }
 0x6ed   :  { %v5602_v52 = vadd.f32 %v13874_v48, %v5601_v37  ;;  %v6097_v39 = vpop.f32.mrf.mxu0  ;;  %10173 = vmatmul.mubr.bf16.gmra.mxu0 %v13718_v1  ;;  %10371 = vmatprep.mubr.msk.f32.mxu1 %vm10940_vm2, %v10939_v0 }
 0x6ee   :  { %v6098_v9 = vadd.f32 %v13789_v12, %v6097_v39  ;;  %v9959_v6 = vpop.f32.mrf.mxu1  ;;  %10176 = vmatprep.mubr.msk.bf16.mxu0 %vm10940_vm2, %v10939_v0 }
 0x6ef   :  { %v5837_v32 = vmax.f32 %v5602_v52, 0.0  ;;  %v10078_v41 = vpop.f32.mrf.mxu0 }
 0x6f0   :  { %v5606_v50 = vpop.f32.mrf.mxu1  ;;  %10372 = vmatmul.mubr.f32.gmra.mxu1 %v6556_v46  ;;  %v6557_v1 = vmax.f32 %v6098_v9, 0.0 }
 0x6f1   :  { %v13883_v35 = vpack.c.bf16 %v5837_v32, %v5836_v59  ;;  %v6100_v14 = vpop.f32.mrf.mxu0  ;;  %10374 = vmatprep.mubr.msk.f32.mxu1 %vm10940_vm2, %v10939_v0  ;;  %v5607_v49 = vadd.f32 %v13874_v48, %v5606_v50 }
 0x6f2   :  { %v6101_v42 = vadd.f32 %v13789_v12, %v6100_v14  ;;  %v9962_v57 = vpop.f32.mrf.mxu1 }
 0x6f3   :  { %v10079_v16 = vpop.f32.mrf.mxu0  ;;  %v5838_v20 = vmax.f32 %v5607_v49, 0.0 }
 0x6f4   :  { %v5609_v31 = vpop.f32.mrf.mxu1  ;;  %10375 = vmatmul.mubr.f32.gmra.mxu1 %v6557_v1  ;;  %v6558_v2 = vmax.f32 %v6101_v42, 0.0 }
 0x6f5   :  { %v5610_v15 = vadd.f32 %v13874_v48, %v5609_v31  ;;  %v6105_v40 = vpop.f32.mrf.mxu0  ;;  %10177 = vmatmul.mubr.bf16.gmra.mxu0 %v13729_v13  ;;  %10377 = vmatprep.mubr.msk.f32.mxu1 %vm10940_vm2, %v10939_v0 }
 0x6f6   :  { %v6106_v28 = vadd.f32 %v13789_v12, %v6105_v40  ;;  %v9963_v38 = vpop.f32.mrf.mxu1  ;;  %10180 = vmatprep.mubr.msk.bf16.mxu0 %vm10940_vm2, %v10939_v0 }
 0x6f7   :  { %v5839_v5 = vmax.f32 %v5610_v15, 0.0  ;;  %v10082_v63 = vpop.f32.mrf.mxu0 }
 0x6f8   :  { %v5614_v58 = vpop.f32.mrf.mxu1  ;;  %10378 = vmatmul.mubr.f32.gmra.mxu1 %v6558_v2  ;;  %v6559_v13 = vmax.f32 %v6106_v28, 0.0 }
 0x6f9   :  { %v13896_v55 = vpack.c.bf16 %v5839_v5, %v5838_v20  ;;  %v6108_v43 = vpop.f32.mrf.mxu0  ;;  %10380 = vmatprep.mubr.msk.f32.mxu1 %vm10940_vm2, %v10939_v0  ;;  %v5615_v27 = vadd.f32 %v13874_v48, %v5614_v58 }
 0x6fa   :  { %v6109_v3 = vadd.f32 %v13789_v12, %v6108_v43  ;;  %v9966_v34 = vpop.f32.mrf.mxu1 }
 0x6fb   :  { %v10083_v25 = vpop.f32.mrf.mxu0  ;;  %v5840_v61 = vmax.f32 %v5615_v27, 0.0 }
 0x6fc   :  { %v5617_v47 = vpop.f32.mrf.mxu1  ;;  %10381 = vmatmul.mubr.f32.gmra.mxu1 %v6559_v13  ;;  %v6560_v60 = vmax.f32 %v6109_v3, 0.0 }
 0x6fd   :  { %v5618_v54 = vadd.f32 %v13874_v48, %v5617_v47  ;;  %v6113_v33 = vpop.f32.mrf.mxu0  ;;  %10181 = vmatmul.mubr.bf16.gmra.mxu0 %v13740_v21  ;;  %10383 = vmatprep.mubr.msk.f32.mxu1 %vm10940_vm2, %v10939_v0 }
 0x6fe   :  { %v6114_v19 = vadd.f32 %v13789_v12, %v6113_v33  ;;  %v9967_v11 = vpop.f32.mrf.mxu1  ;;  %10184 = vmatprep.mubr.msk.bf16.mxu0 %vm10940_vm2, %v10939_v0 }
 0x6ff   :  { %v5841_v26 = vmax.f32 %v5618_v54, 0.0  ;;  %v10086_v45 = vpop.f32.mrf.mxu0 }
 0x700   :  { %v5622_v44 = vpop.f32.mrf.mxu1  ;;  %10384 = vmatmul.mubr.f32.gmra.mxu1 %v6560_v60  ;;  %v6561_v21 = vmax.f32 %v6114_v19, 0.0 }
 0x701   :  { %v13909_v51 = vpack.c.bf16 %v5841_v26, %v5840_v61  ;;  %v6116_v36 = vpop.f32.mrf.mxu0  ;;  %10386 = vmatprep.mubr.msk.f32.mxu1 %vm10940_vm2, %v10939_v0  ;;  %v5623_v30 = vadd.f32 %v13874_v48, %v5622_v44 }
 0x702   :  { %v6117_v56 = vadd.f32 %v13789_v12, %v6116_v36  ;;  %v9970_v4 = vpop.f32.mrf.mxu1 }
 0x703   :  { %v10087_v37 = vpop.f32.mrf.mxu0  ;;  %v5842_v32 = vmax.f32 %v5623_v30, 0.0 }
 0x704   :  { %v5625_v52 = vpop.f32.mrf.mxu1  ;;  %10387 = vmatmul.mubr.f32.gmra.mxu1 %v6561_v21  ;;  %v6562_v9 = vmax.f32 %v6117_v56, 0.0 }
 0x705   :  { %v5626_v39 = vadd.f32 %v13874_v48, %v5625_v52  ;;  %v6121_v46 = vpop.f32.mrf.mxu0  ;;  %10185 = vmatmul.mubr.bf16.gmra.mxu0 %v13751_v22  ;;  %10389 = vmatprep.mubr.msk.f32.mxu1 %vm10940_vm2, %v10939_v0 }
 0x706   :  { %v6122_v6 = vadd.f32 %v13789_v12, %v6121_v46  ;;  %v9971_v59 = vpop.f32.mrf.mxu1  ;;  %10188 = vmatprep.mubr.msk.bf16.mxu0 %vm10940_vm2, %v10939_v0 }
 0x707   :  { %v5843_v41 = vmax.f32 %v5626_v39, 0.0  ;;  %v10090_v50 = vpop.f32.mrf.mxu0 }
 0x708   :  { %v5630_v14 = vpop.f32.mrf.mxu1  ;;  %10390 = vmatmul.mubr.f32.gmra.mxu1 %v6562_v9  ;;  %v6563_v22 = vmax.f32 %v6122_v6, 0.0 }
 0x709   :  { %v13922_v1 = vpack.c.bf16 %v5843_v41, %v5842_v32  ;;  %v6124_v42 = vpop.f32.mrf.mxu0  ;;  %10392 = vmatprep.mubr.msk.f32.mxu1 %vm10940_vm2, %v10939_v0  ;;  %v5631_v16 = vadd.f32 %v13874_v48, %v5630_v14 }
 0x70a   :  { %v6125_v57 = vadd.f32 %v13789_v12, %v6124_v42  ;;  %v9974_v49 = vpop.f32.mrf.mxu1 }
 0x70b   :  { %v10091_v31 = vpop.f32.mrf.mxu0  ;;  %v5844_v5 = vmax.f32 %v5631_v16, 0.0 }
 0x70c   :  { %v5633_v15 = vpop.f32.mrf.mxu1  ;;  %10393 = vmatmul.mubr.f32.gmra.mxu1 %v6563_v22  ;;  %v6564_v28 = vmax.f32 %v6125_v57, 0.0 }
 0x70d   :  { %v5634_v40 = vadd.f32 %v13874_v48, %v5633_v15  ;;  %v6129_v2 = vpop.f32.mrf.mxu0  ;;  %10189 = vmatmul.mubr.bf16.gmra.mxu0 %v13762_v18  ;;  %10395 = vmatprep.mubr.msk.f32.mxu1 %vm10940_vm2, %v10939_v0 }
 0x70e   :  { %v6130_v38 = vadd.f32 %v13789_v12, %v6129_v2  ;;  %v9975_v20 = vpop.f32.mrf.mxu1  ;;  %10192 = vmatprep.mubr.msk.bf16.mxu0 %vm10940_vm2, %v10939_v0 }
 0x70f   :  { %v5845_v63 = vmax.f32 %v5634_v40, 0.0  ;;  %v10094_v58 = vpop.f32.mrf.mxu0 }
 0x710   :  { %v5638_v43 = vpop.f32.mrf.mxu1  ;;  %10396 = vmatmul.mubr.f32.gmra.mxu1 %v6564_v28  ;;  %v6565_v18 = vmax.f32 %v6130_v38, 0.0 }
 0x711   :  { %v13935_v13 = vpack.c.bf16 %v5845_v63, %v5844_v5  ;;  %v6132_v3 = vpop.f32.mrf.mxu0  ;;  %10398 = vmatprep.mubr.msk.f32.mxu1 %vm10940_vm2, %v10939_v0  ;;  %v5639_v25 = vadd.f32 %v13874_v48, %v5638_v43 }
 0x712   :  { %v6133_v34 = vadd.f32 %v13789_v12, %v6132_v3  ;;  %v9978_v27 = vpop.f32.mrf.mxu1 }
 0x713   :  { %v10095_v47 = vpop.f32.mrf.mxu0  ;;  %v5846_v26 = vmax.f32 %v5639_v25, 0.0 }
 0x714   :  { %v5641_v54 = vpop.f32.mrf.mxu1  ;;  %10399 = vmatmul.mubr.f32.gmra.mxu1 %v6565_v18  ;;  %v6566_v19 = vmax.f32 %v6133_v34, 0.0 }
 0x715   :  { %v5642_v33 = vadd.f32 %v13874_v48, %v5641_v54  ;;  %v6137_v60 = vpop.f32.mrf.mxu0  ;;  %10193 = vmatmul.mubr.bf16.gmra.mxu0 %v13773_v29  ;;  %10401 = vmatprep.mubr.msk.f32.mxu1 %vm10940_vm2, %v10939_v0 }
 0x716   :  { %v6138_v11 = vadd.f32 %v13789_v12, %v6137_v60  ;;  %v9979_v61 = vpop.f32.mrf.mxu1  ;;  %10196 = vmatprep.mubr.msk.bf16.mxu0 %vm10940_vm2, %v10939_v0 }
 0x717   :  { %v5847_v45 = vmax.f32 %v5642_v33, 0.0  ;;  %v10098_v44 = vpop.f32.mrf.mxu0 }
 0x718   :  { %v5646_v36 = vpop.f32.mrf.mxu1  ;;  %10402 = vmatmul.mubr.f32.gmra.mxu1 %v6566_v19  ;;  %v6567_v29 = vmax.f32 %v6138_v11, 0.0 }
 0x719   :  { %v13948_v21 = vpack.c.bf16 %v5847_v45, %v5846_v26  ;;  %v6140_v56 = vpop.f32.mrf.mxu0  ;;  %10404 = vmatprep.mubr.msk.f32.mxu1 %vm10940_vm2, %v10939_v0  ;;  %v5647_v37 = vadd.f32 %v13874_v48, %v5646_v36 }
 0x71a   :  { %v6141_v4 = vadd.f32 %v13789_v12, %v6140_v56  ;;  %v9982_v30 = vpop.f32.mrf.mxu1 }
 0x71b   :  { %v10099_v52 = vpop.f32.mrf.mxu0  ;;  %v5848_v41 = vmax.f32 %v5647_v37, 0.0 }
 0x71c   :  { %v5649_v39 = vpop.f32.mrf.mxu1  ;;  %10405 = vmatmul.mubr.f32.gmra.mxu1 %v6567_v29  ;;  %v6568_v6 = vmax.f32 %v6141_v4, 0.0 }
 0x71d   :  { %v5650_v46 = vadd.f32 %v13874_v48, %v5649_v39  ;;  %v6145_v9 = vpop.f32.mrf.mxu0  ;;  %10197 = vmatmul.mubr.bf16.gmra.mxu0 %v13784_v53  ;;  %10407 = vmatprep.mubr.msk.f32.mxu1 %vm10940_vm2, %v10939_v0 }
 0x71e   :  { %v6146_v59 = vadd.f32 %v13789_v12, %v6145_v9  ;;  %v9983_v32 = vpop.f32.mrf.mxu1  ;;  %10200 = vmatprep.mubr.msk.bf16.mxu0 %vm10940_vm2, %v10939_v0 }
 0x71f   :  { %v5849_v50 = vmax.f32 %v5650_v46, 0.0  ;;  %v10102_v14 = vpop.f32.mrf.mxu0 }
 0x720   :  { %v5654_v42 = vpop.f32.mrf.mxu1  ;;  %10408 = vmatmul.mubr.f32.gmra.mxu1 %v6568_v6  ;;  %v6569_v53 = vmax.f32 %v6146_v59, 0.0 }
 0x721   :  { %v13961_v22 = vpack.c.bf16 %v5849_v50, %v5848_v41  ;;  %v6148_v57 = vpop.f32.mrf.mxu0  ;;  %10410 = vmatprep.mubr.msk.f32.mxu1 %vm10940_vm2, %v10939_v0  ;;  %v5655_v31 = vadd.f32 %v13874_v48, %v5654_v42 }
 0x722   :  { %v6149_v49 = vadd.f32 %v13789_v12, %v6148_v57  ;;  %v9986_v16 = vpop.f32.mrf.mxu1 }
 0x723   :  { %v10103_v15 = vpop.f32.mrf.mxu0  ;;  %v5850_v63 = vmax.f32 %v5655_v31, 0.0 }
 0x724   :  { %v5657_v40 = vpop.f32.mrf.mxu1  ;;  %10411 = vmatmul.mubr.f32.gmra.mxu1 %v6569_v53  ;;  %v6570_v38 = vmax.f32 %v6149_v49, 0.0 }
 0x725   :  { %v5658_v2 = vadd.f32 %v13874_v48, %v5657_v40  ;;  %v6153_v28 = vpop.f32.mrf.mxu0  ;;  %10201 = vmatmul.mubr.bf16.gmra.mxu0 %v13800_v23  ;;  %10413 = vmatprep.mubr.msk.f32.mxu1 %vm10940_vm2, %v10939_v0 }
 0x726   :  { %v6154_v20 = vadd.f32 %v13789_v12, %v6153_v28  ;;  %v9987_v5 = vpop.f32.mrf.mxu1  ;;  %10204 = vmatprep.mubr.msk.bf16.mxu0 %vm10940_vm2, %v10939_v0 }
 0x727   :  { %v5851_v58 = vmax.f32 %v5658_v2, 0.0  ;;  %v10106_v43 = vpop.f32.mrf.mxu0 }
 0x728   :  { %v5662_v3 = vpop.f32.mrf.mxu1  ;;  %10414 = vmatmul.mubr.f32.gmra.mxu1 %v6570_v38  ;;  %v6571_v23 = vmax.f32 %v6154_v20, 0.0 }
 0x729   :  { %v13974_v18 = vpack.c.bf16 %v5851_v58, %v5850_v63  ;;  %v6156_v34 = vpop.f32.mrf.mxu0  ;;  %10416 = vmatprep.mubr.msk.f32.mxu1 %vm10940_vm2, %v10939_v0  ;;  %v5663_v47 = vadd.f32 %v13874_v48, %v5662_v3 }
 0x72a   :  { %v6157_v27 = vadd.f32 %v13789_v12, %v6156_v34  ;;  %v9990_v25 = vpop.f32.mrf.mxu1 }
 0x72b   :  { %v10107_v54 = vpop.f32.mrf.mxu0  ;;  %v5852_v45 = vmax.f32 %v5663_v47, 0.0 }
 0x72c   :  { %v5665_v33 = vpop.f32.mrf.mxu1  ;;  %10417 = vmatmul.mubr.f32.gmra.mxu1 %v6571_v23  ;;  %v6572_v11 = vmax.f32 %v6157_v27, 0.0 }
 0x72d   :  { %v5666_v60 = vadd.f32 %v13874_v48, %v5665_v33  ;;  %v6161_v19 = vpop.f32.mrf.mxu0  ;;  %10205 = vmatmul.mubr.bf16.gmra.mxu0 %v13813_v10  ;;  %10419 = vmatprep.mubr.msk.f32.mxu1 %vm10940_vm2, %v10939_v0 }
 0x72e   :  { %v6162_v61 = vadd.f32 %v13789_v12, %v6161_v19  ;;  %v9991_v26 = vpop.f32.mrf.mxu1  ;;  %10208 = vmatprep.mubr.msk.bf16.mxu0 %vm10940_vm2, %v10939_v0 }
 0x72f   :  { %v5853_v44 = vmax.f32 %v5666_v60, 0.0  ;;  %v10110_v36 = vpop.f32.mrf.mxu0 }
 0x730   :  { %v5670_v56 = vpop.f32.mrf.mxu1  ;;  %10420 = vmatmul.mubr.f32.gmra.mxu1 %v6572_v11  ;;  %v6573_v10 = vmax.f32 %v6162_v61, 0.0 }
 0x731   :  { %v13987_v29 = vpack.c.bf16 %v5853_v44, %v5852_v45  ;;  %v6164_v4 = vpop.f32.mrf.mxu0  ;;  %10422 = vmatprep.mubr.msk.f32.mxu1 %vm10940_vm2, %v10939_v0  ;;  %v5671_v52 = vadd.f32 %v13874_v48, %v5670_v56 }
 0x732   :  { %v6165_v30 = vadd.f32 %v13789_v12, %v6164_v4  ;;  %v9994_v37 = vpop.f32.mrf.mxu1 }
 0x733   :  { %v10111_v39 = vpop.f32.mrf.mxu0  ;;  %v5854_v50 = vmax.f32 %v5671_v52, 0.0 }
 0x734   :  { %v5673_v46 = vpop.f32.mrf.mxu1  ;;  %10423 = vmatmul.mubr.f32.gmra.mxu1 %v6573_v10  ;;  %v6574_v59 = vmax.f32 %v6165_v30, 0.0 }
 0x735   :  { %v5674_v9 = vadd.f32 %v13874_v48, %v5673_v46  ;;  %v6169_v6 = vpop.f32.mrf.mxu0  ;;  %10209 = vmatmul.mubr.bf16.gmra.mxu0 %v13826_v7  ;;  %10425 = vmatprep.mubr.msk.f32.mxu1 %vm10940_vm2, %v10939_v0 }
 0x736   :  { %v6170_v32 = vadd.f32 %v13789_v12, %v6169_v6  ;;  %v9995_v41 = vpop.f32.mrf.mxu1  ;;  %10212 = vmatprep.mubr.msk.bf16.mxu0 %vm10940_vm2, %v10939_v0 }
 0x737   :  { %v5855_v14 = vmax.f32 %v5674_v9, 0.0  ;;  %v10114_v42 = vpop.f32.mrf.mxu0 }
 0x738   :  { %v5678_v57 = vpop.f32.mrf.mxu1  ;;  %10426 = vmatmul.mubr.f32.gmra.mxu1 %v6574_v59  ;;  %v6575_v7 = vmax.f32 %v6170_v32, 0.0 }
 0x739   :  { %v14000_v53 = vpack.c.bf16 %v5855_v14, %v5854_v50  ;;  %v6172_v49 = vpop.f32.mrf.mxu0  ;;  %10428 = vmatprep.mubr.msk.f32.mxu1 %vm10940_vm2, %v10939_v0  ;;  %v5679_v15 = vadd.f32 %v13874_v48, %v5678_v57 }
 0x73a   :  { %v6173_v16 = vadd.f32 %v13789_v12, %v6172_v49  ;;  %v9998_v31 = vpop.f32.mrf.mxu1 }
 0x73b   :  { %v10115_v40 = vpop.f32.mrf.mxu0  ;;  %v5856_v58 = vmax.f32 %v5679_v15, 0.0 }
 0x73c   :  { %v5681_v2 = vpop.f32.mrf.mxu1  ;;  %10429 = vmatmul.mubr.f32.gmra.mxu1 %v6575_v7  ;;  %v6576_v20 = vmax.f32 %v6173_v16, 0.0 }
 0x73d   :  { %v5682_v28 = vadd.f32 %v13874_v48, %v5681_v2  ;;  %v6177_v38 = vpop.f32.mrf.mxu0  ;;  %10213 = vmatmul.mubr.bf16.gmra.mxu0 %v13839_v24  ;;  %10431 = vmatprep.mubr.msk.f32.mxu1 %vm10940_vm2, %v10939_v0 }
 0x73e   :  { %v6178_v5 = vadd.f32 %v13789_v12, %v6177_v38  ;;  %v9999_v63 = vpop.f32.mrf.mxu1  ;;  %10216 = vmatprep.mubr.msk.bf16.mxu0 %vm10940_vm2, %v10939_v0 }
 0x73f   :  { %v5857_v43 = vmax.f32 %v5682_v28, 0.0  ;;  %v10118_v3 = vpop.f32.mrf.mxu0 }
 0x740   :  { %v5686_v34 = vpop.f32.mrf.mxu1  ;;  %10432 = vmatmul.mubr.f32.gmra.mxu1 %v6576_v20  ;;  %v6577_v24 = vmax.f32 %v6178_v5, 0.0 }
 0x741   :  { %v14013_v23 = vpack.c.bf16 %v5857_v43, %v5856_v58  ;;  %v6180_v27 = vpop.f32.mrf.mxu0  ;;  %10434 = vmatprep.mubr.msk.f32.mxu1 %vm10940_vm2, %v10939_v0  ;;  %v5687_v54 = vadd.f32 %v13874_v48, %v5686_v34 }
 0x742   :  { %v6181_v25 = vadd.f32 %v13789_v12, %v6180_v27  ;;  %v10002_v47 = vpop.f32.mrf.mxu1 }
 0x743   :  { %v10119_v33 = vpop.f32.mrf.mxu0  ;;  %v5858_v44 = vmax.f32 %v5687_v54, 0.0 }
 0x744   :  { %v5689_v60 = vpop.f32.mrf.mxu1  ;;  %10435 = vmatmul.mubr.f32.gmra.mxu1 %v6577_v24  ;;  %v6578_v61 = vmax.f32 %v6181_v25, 0.0 }
 0x745   :  { %v5690_v19 = vadd.f32 %v13874_v48, %v5689_v60  ;;  %v6185_v11 = vpop.f32.mrf.mxu0  ;;  %10217 = vmatmul.mubr.bf16.gmra.mxu0 %v13852_v8  ;;  %10437 = vmatprep.mubr.msk.f32.mxu1 %vm10940_vm2, %v10939_v0 }
 0x746   :  { %v6186_v26 = vadd.f32 %v13789_v12, %v6185_v11  ;;  %v10003_v45 = vpop.f32.mrf.mxu1  ;;  %10220 = vmatprep.mubr.msk.bf16.mxu0 %vm10940_vm2, %v10939_v0 }
 0x747   :  { %v5859_v36 = vmax.f32 %v5690_v19, 0.0  ;;  %v10122_v56 = vpop.f32.mrf.mxu0 }
 0x748   :  { %v5694_v4 = vpop.f32.mrf.mxu1  ;;  %10438 = vmatmul.mubr.f32.gmra.mxu1 %v6578_v61  ;;  %v6579_v8 = vmax.f32 %v6186_v26, 0.0 }
 0x749   :  { %v14026_v10 = vpack.c.bf16 %v5859_v36, %v5858_v44  ;;  %v6188_v30 = vpop.f32.mrf.mxu0  ;;  %10440 = vmatprep.mubr.msk.f32.mxu1 %vm10940_vm2, %v10939_v0  ;;  %v5695_v39 = vadd.f32 %v13874_v48, %v5694_v4 }
 0x74a   :  { %v6189_v37 = vadd.f32 %v13789_v12, %v6188_v30  ;;  %v10006_v52 = vpop.f32.mrf.mxu1 }
 0x74b   :  { %v10123_v46 = vpop.f32.mrf.mxu0  ;;  %v5860_v14 = vmax.f32 %v5695_v39, 0.0 }
 0x74c   :  { %v5697_v9 = vpop.f32.mrf.mxu1  ;;  %10441 = vmatmul.mubr.f32.gmra.mxu1 %v6579_v8  ;;  %v6580_v32 = vmax.f32 %v6189_v37, 0.0 }
 0x74d   :  { %v5698_v6 = vadd.f32 %v13874_v48, %v5697_v9  ;;  %v6193_v59 = vpop.f32.mrf.mxu0  ;;  %10221 = vmatmul.mubr.bf16.gmra.mxu0 %v13865_v62  ;;  %10443 = vmatprep.mubr.msk.f32.mxu1 %vm10940_vm2, %v10939_v0 }
 0x74e   :  { %v6194_v41 = vadd.f32 %v13789_v12, %v6193_v59  ;;  %v10007_v50 = vpop.f32.mrf.mxu1  ;;  %10224 = vmatprep.mubr.msk.bf16.mxu0 %vm10940_vm2, %v10939_v0 }
 0x74f   :  { %v5861_v42 = vmax.f32 %v5698_v6, 0.0  ;;  %v10126_v57 = vpop.f32.mrf.mxu0 }
 0x750   :  { %v5702_v49 = vpop.f32.mrf.mxu1  ;;  %10444 = vmatmul.mubr.f32.gmra.mxu1 %v6580_v32  ;;  %v6581_v62 = vmax.f32 %v6194_v41, 0.0 }
 0x751   :  { %v14039_v7 = vpack.c.bf16 %v5861_v42, %v5860_v14  ;;  %v6196_v16 = vpop.f32.mrf.mxu0  ;;  %10446 = vmatprep.mubr.msk.f32.mxu1 %vm10940_vm2, %v10939_v0  ;;  %v5703_v40 = vadd.f32 %v13874_v48, %v5702_v49 }
 0x752   :  { %v6197_v31 = vadd.f32 %v13789_v12, %v6196_v16  ;;  %v10010_v15 = vpop.f32.mrf.mxu1 }
 0x753   :  { %v10127_v2 = vpop.f32.mrf.mxu0  ;;  %v5862_v43 = vmax.f32 %v5703_v40, 0.0 }
 0x754   :  { %v5705_v28 = vpop.f32.mrf.mxu1  ;;  %10447 = vmatmul.mubr.f32.gmra.mxu1 %v6581_v62  ;;  %v6582_v5 = vmax.f32 %v6197_v31, 0.0 }
 0x755   :  { %v5706_v38 = vadd.f32 %v13874_v48, %v5705_v28  ;;  %v6201_v20 = vpop.f32.mrf.mxu0  ;;  %10225 = vmatmul.mubr.bf16.gmra.mxu0 %v13883_v35  ;;  %10449 = vmatprep.mubr.msk.f32.mxu1 %vm10940_vm2, %v10939_v0 }
 0x756   :  { %v6202_v63 = vadd.f32 %v13789_v12, %v6201_v20  ;;  %v10011_v58 = vpop.f32.mrf.mxu1  ;;  %10228 = vmatprep.mubr.msk.bf16.mxu0 %vm10940_vm2, %v10939_v0 }
 0x757   :  { %v5863_v3 = vmax.f32 %v5706_v38, 0.0  ;;  %v10130_v34 = vpop.f32.mrf.mxu0  ;;  %v14091_v58 = vld [vmem:[%s15045_s14] ss:$0 sm:$0xff] }
 0x758   :  { %v5710_v27 = vpop.f32.mrf.mxu1  ;;  %10450 = vmatmul.mubr.f32.gmra.mxu1 %v6582_v5  ;;  %v6583_v35 = vmax.f32 %v6202_v63, 0.0 }
 0x759   :  { %v14052_v24 = vpack.c.bf16 %v5863_v3, %v5862_v43  ;;  %v6204_v25 = vpop.f32.mrf.mxu0  ;;  %10452 = vmatprep.mubr.msk.f32.mxu1 %vm10940_vm2, %v10939_v0  ;;  %v5711_v33 = vadd.f32 %v13874_v48, %v5710_v27 }
 0x75a   :  { %v6205_v47 = vadd.f32 %v13789_v12, %v6204_v25  ;;  %v10014_v54 = vpop.f32.mrf.mxu1 }
 0x75b   :  { %v10131_v60 = vpop.f32.mrf.mxu0  ;;  %v5864_v36 = vmax.f32 %v5711_v33, 0.0 }
 0x75c   :  { %v5713_v19 = vpop.f32.mrf.mxu1  ;;  %10453 = vmatmul.mubr.f32.gmra.mxu1 %v6583_v35  ;;  %v6584_v26 = vmax.f32 %v6205_v47, 0.0 }
 0x75d   :  { %v5714_v11 = vadd.f32 %v13874_v48, %v5713_v19  ;;  %v6209_v61 = vpop.f32.mrf.mxu0  ;;  %10229 = vmatmul.mubr.bf16.gmra.mxu0 %v13896_v55  ;;  %10455 = vmatprep.mubr.msk.f32.mxu1 %vm10940_vm2, %v10939_v0 }
 0x75e   :  { %v6210_v45 = vadd.f32 %v13789_v12, %v6209_v61  ;;  %v10015_v44 = vpop.f32.mrf.mxu1  ;;  %10232 = vmatprep.mubr.msk.bf16.mxu0 %vm10940_vm2, %v10939_v0 }
 0x75f   :  { %v5865_v56 = vmax.f32 %v5714_v11, 0.0  ;;  %v10134_v4 = vpop.f32.mrf.mxu0 }
 0x760   :  { %v5718_v30 = vpop.f32.mrf.mxu1  ;;  %10456 = vmatmul.mubr.f32.gmra.mxu1 %v6584_v26  ;;  %v6585_v55 = vmax.f32 %v6210_v45, 0.0 }
 0x761   :  { %v14065_v8 = vpack.c.bf16 %v5865_v56, %v5864_v36  ;;  %v6212_v37 = vpop.f32.mrf.mxu0  ;;  %10458 = vmatprep.mubr.msk.f32.mxu1 %vm10940_vm2, %v10939_v0  ;;  %v5719_v46 = vadd.f32 %v13874_v48, %v5718_v30 }
 0x762   :  { %v6213_v52 = vadd.f32 %v13789_v12, %v6212_v37  ;;  %v10018_v39 = vpop.f32.mrf.mxu1 }
 0x763   :  { %v10135_v9 = vpop.f32.mrf.mxu0  ;;  %v5866_v42 = vmax.f32 %v5719_v46, 0.0 }
 0x764   :  { %v5721_v6 = vpop.f32.mrf.mxu1  ;;  %10459 = vmatmul.mubr.f32.gmra.mxu1 %v6585_v55  ;;  %v6586_v41 = vmax.f32 %v6213_v52, 0.0 }
 0x765   :  { %v5722_v59 = vadd.f32 %v13874_v48, %v5721_v6  ;;  %v6217_v32 = vpop.f32.mrf.mxu0  ;;  %10233 = vmatmul.mubr.bf16.gmra.mxu0 %v13909_v51  ;;  %10461 = vmatprep.mubr.msk.f32.mxu1 %vm10940_vm2, %v10939_v0 }
 0x766   :  { %v6218_v50 = vadd.f32 %v13789_v12, %v6217_v32  ;;  %v10019_v14 = vpop.f32.mrf.mxu1  ;;  %10236 = vmatprep.mubr.msk.bf16.mxu0 %vm10940_vm2, %v10939_v0 }
 0x767   :  { %v5867_v57 = vmax.f32 %v5722_v59, 0.0  ;;  %v10138_v49 = vpop.f32.mrf.mxu0 }
 0x768   :  { %v5726_v16 = vpop.f32.mrf.mxu1  ;;  %10462 = vmatmul.mubr.f32.gmra.mxu1 %v6586_v41  ;;  %v6587_v51 = vmax.f32 %v6218_v50, 0.0  ;;  %v14123_v50 = vld [vmem:[%s15046_s16] ss:$0 sm:$0xff] }
 0x769   :  { %v14078_v62 = vpack.c.bf16 %v5867_v57, %v5866_v42  ;;  %v6220_v31 = vpop.f32.mrf.mxu0  ;;  %10464 = vmatprep.mubr.msk.f32.mxu1 %vm10940_vm2, %v10939_v0  ;;  %v5727_v2 = vadd.f32 %v13874_v48, %v5726_v16 }
 0x76a   :  { %v6221_v15 = vadd.f32 %v13789_v12, %v6220_v31  ;;  %v10022_v40 = vpop.f32.mrf.mxu1 }
 0x76b   :  { %v10139_v28 = vpop.f32.mrf.mxu0  ;;  %v5868_v3 = vmax.f32 %v5727_v2, 0.0 }
 0x76c   :  { %v5729_v38 = vpop.f32.mrf.mxu1  ;;  %10465 = vmatmul.mubr.f32.gmra.mxu1 %v6587_v51  ;;  %v6588_v63 = vmax.f32 %v6221_v15, 0.0 }
 0x76d   :  { %v5730_v20 = vadd.f32 %v13874_v48, %v5729_v38  ;;  %v6225_v5 = vpop.f32.mrf.mxu0  ;;  %10237 = vmatmul.mubr.bf16.gmra.mxu0 %v13922_v1  ;;  %10467 = vmatprep.mubr.msk.f32.mxu1 %vm10940_vm2, %v10939_v0 }
 0x76e   :  { %v6226_v12 = vadd.f32 %v14091_v58, %v6225_v5  ;;  %v10023_v43 = vpop.f32.mrf.mxu1  ;;  %10240 = vmatprep.mubr.msk.bf16.mxu0 %vm10940_vm2, %v10939_v0 }
 0x76f   :  { %v5869_v34 = vmax.f32 %v5730_v20, 0.0  ;;  %v10142_v27 = vpop.f32.mrf.mxu0 }
 0x770   :  { %v5734_v25 = vpop.f32.mrf.mxu1  ;;  %10468 = vmatmul.mubr.f32.gmra.mxu1 %v6588_v63  ;;  %v6589_v47 = vmax.f32 %v6226_v12, 0.0 }
 0x771   :  { %v14096_v1 = vpack.c.bf16 %v5869_v34, %v5868_v3  ;;  %v6228_v35 = vpop.f32.mrf.mxu0  ;;  %10470 = vmatprep.mubr.msk.f32.mxu1 %vm10940_vm2, %v10939_v0  ;;  %v5735_v60 = vadd.f32 %v13874_v48, %v5734_v25 }
 0x772   :  { %v6229_v54 = vadd.f32 %v14091_v58, %v6228_v35  ;;  %v10026_v33 = vpop.f32.mrf.mxu1 }
 0x773   :  { %v10143_v19 = vpop.f32.mrf.mxu0  ;;  %v5870_v56 = vmax.f32 %v5735_v60, 0.0 }
 0x774   :  { %v5737_v11 = vpop.f32.mrf.mxu1  ;;  %10471 = vmatmul.mubr.f32.gmra.mxu1 %v6589_v47  ;;  %v6590_v45 = vmax.f32 %v6229_v54, 0.0 }
 0x775   :  { %v5738_v61 = vadd.f32 %v13874_v48, %v5737_v11  ;;  %v6233_v26 = vpop.f32.mrf.mxu0  ;;  %10241 = vmatmul.mubr.bf16.gmra.mxu0 %v13935_v13  ;;  %10473 = vmatprep.mubr.msk.f32.mxu1 %vm10940_vm2, %v10939_v0 }
 0x776   :  { %v6234_v44 = vadd.f32 %v14091_v58, %v6233_v26  ;;  %v10027_v36 = vpop.f32.mrf.mxu1  ;;  %10244 = vmatprep.mubr.msk.bf16.mxu0 %vm10940_vm2, %v10939_v0 }
 0x777   :  { %v5871_v4 = vmax.f32 %v5738_v61, 0.0  ;;  %v10146_v30 = vpop.f32.mrf.mxu0 }
 0x778   :  { %v14109_v37 = vpop.f32.mrf.mxu1  ;;  %10474 = vmatmul.mubr.f32.gmra.mxu1 %v6590_v45  ;;  %v6591_v13 = vmax.f32 %v6234_v44, 0.0 }
 0x779   :  { %v14111_v48 = vpack.c.bf16 %v5871_v4, %v5870_v56  ;;  %v6236_v55 = vpop.f32.mrf.mxu0  ;;  %10476 = vmatprep.mubr.msk.f32.mxu1 %vm10940_vm2, %v10939_v0 }
 0x77a   :  { %v6237_v52 = vadd.f32 %v14091_v58, %v6236_v55  ;;  %v10030_v39 = vpop.f32.mrf.mxu1 }
 0x77b   :  { %v10147_v46 = vpop.f32.mrf.mxu0 }
 0x77c   :  { %v5745_v9 = vpop.f32.mrf.mxu1  ;;  %10477 = vmatmul.mubr.f32.gmra.mxu1 %v6591_v13  ;;  %v6592_v59 = vmax.f32 %v6237_v52, 0.0 }
 0x77d   :  { %v6241_v6 = vpop.f32.mrf.mxu0  ;;  %10245 = vmatmul.mubr.bf16.gmra.mxu0 %v13948_v21  ;;  %10479 = vmatprep.mubr.msk.f32.mxu1 %vm10940_vm2, %v10939_v0 }
 0x77e   :  { %v6242_v32 = vadd.f32 %v14091_v58, %v6241_v6  ;;  %v10031_v41 = vpop.f32.mrf.mxu1  ;;  %10248 = vmatprep.mubr.msk.bf16.mxu0 %vm10940_vm2, %v10939_v0 }
 0x77f   :  { %v10150_v14 = vpop.f32.mrf.mxu0 }
 0x780   :  { %v6762_v42 = vpop.f32.mrf.mxu1  ;;  %10480 = vmatmul.mubr.f32.gmra.mxu1 %v6592_v59  ;;  %v6593_v49 = vmax.f32 %v6242_v32, 0.0 }
 0x781   :  { %v6763_v21 = vadd.f32 %v14123_v50, %v6762_v42  ;;  %v6244_v57 = vpop.f32.mrf.mxu0  ;;  %10482 = vmatprep.mubr.msk.f32.mxu1 %vm10940_vm2, %v10939_v0 }
 0x782   :  { %v6245_v16 = vadd.f32 %v14091_v58, %v6244_v57  ;;  %v10337_v31 = vpop.f32.mrf.mxu1 }
 0x783   :  { %7383 = vst.msk [vmem:[%s15047_s17 + $0x8] sm:$0xff] %vm7381_vm5, %v6763_v21  ;;  %v10151_v51 = vpop.f32.mrf.mxu0 }
 0x784   :  { %v6767_v15 = vpop.f32.mrf.mxu1  ;;  %10483 = vmatmul.mubr.f32.gmra.mxu1 %v6593_v49  ;;  %v6594_v28 = vmax.f32 %v6245_v16, 0.0 }
 0x785   :  { %v6768_v40 = vadd.f32 %v14123_v50, %v6767_v15  ;;  %v6249_v2 = vpop.f32.mrf.mxu0  ;;  %10249 = vmatmul.mubr.bf16.gmra.mxu0 %v13961_v22  ;;  %10485 = vmatprep.mubr.msk.f32.mxu1 %vm10940_vm2, %v10939_v0 }
 0x786   :  { %v6250_v38 = vadd.f32 %v14091_v58, %v6249_v2  ;;  %v10340_v20 = vpop.f32.mrf.mxu1  ;;  %10252 = vmatprep.mubr.msk.bf16.mxu0 %vm10940_vm2, %v10939_v0 }
 0x787   :  { %7384 = vst.msk [vmem:[%s15047_s17 + $0x10] sm:$0xff] %vm7381_vm5, %v6768_v40  ;;  %v10154_v5 = vpop.f32.mrf.mxu0 }
 0x788   :  { %v6772_v63 = vpop.f32.mrf.mxu1  ;;  %10486 = vmatmul.mubr.f32.gmra.mxu1 %v6594_v28  ;;  %v6595_v43 = vmax.f32 %v6250_v38, 0.0 }
 0x789   :  { %v6773_v22 = vadd.f32 %v14123_v50, %v6772_v63  ;;  %v6252_v12 = vpop.f32.mrf.mxu0  ;;  %10488 = vmatprep.mubr.msk.f32.mxu1 %vm10940_vm2, %v10939_v0 }
 0x78a   :  { %v6253_v3 = vadd.f32 %v14091_v58, %v6252_v12  ;;  %v10343_v34 = vpop.f32.mrf.mxu1 }
 0x78b   :  { %7385 = vst.msk [vmem:[%s15047_s17 + $0x18] sm:$0xff] %vm7381_vm5, %v6773_v22  ;;  %v10155_v27 = vpop.f32.mrf.mxu0 }
 0x78c   :  { %v6777_v25 = vpop.f32.mrf.mxu1  ;;  %10489 = vmatmul.mubr.f32.gmra.mxu1 %v6595_v43  ;;  %v6596_v54 = vmax.f32 %v6253_v3, 0.0 }
 0x78d   :  { %v6778_v35 = vadd.f32 %v14123_v50, %v6777_v25  ;;  %v6257_v47 = vpop.f32.mrf.mxu0  ;;  %10253 = vmatmul.mubr.bf16.gmra.mxu0 %v13974_v18  ;;  %10491 = vmatprep.mubr.msk.f32.mxu1 %vm10940_vm2, %v10939_v0 }
 0x78e   :  { %v6258_v33 = vadd.f32 %v14091_v58, %v6257_v47  ;;  %v10346_v60 = vpop.f32.mrf.mxu1  ;;  %10256 = vmatprep.mubr.msk.bf16.mxu0 %vm10940_vm2, %v10939_v0 }
 0x78f   :  { %7386 = vst.msk [vmem:[%s15047_s17 + $0x20] sm:$0xff] %vm7381_vm5, %v6778_v35  ;;  %v10158_v19 = vpop.f32.mrf.mxu0 }
 0x790   :  { %v6782_v11 = vpop.f32.mrf.mxu1  ;;  %10492 = vmatmul.mubr.f32.gmra.mxu1 %v6596_v54  ;;  %v6597_v26 = vmax.f32 %v6258_v33, 0.0 }
 0x791   :  { %v6783_v18 = vadd.f32 %v14123_v50, %v6782_v11  ;;  %v6260_v61 = vpop.f32.mrf.mxu0  ;;  %10494 = vmatprep.mubr.msk.f32.mxu1 %vm10940_vm2, %v10939_v0 }
 0x792   :  { %v6261_v45 = vadd.f32 %v14091_v58, %v6260_v61  ;;  %v10349_v44 = vpop.f32.mrf.mxu1 }
 0x793   :  { %7387 = vst.msk [vmem:[%s15047_s17 + $0x28] sm:$0xff] %vm7381_vm5, %v6783_v18  ;;  %v10159_v36 = vpop.f32.mrf.mxu0 }
 0x794   :  { %v6787_v56 = vpop.f32.mrf.mxu1  ;;  %10495 = vmatmul.mubr.f32.gmra.mxu1 %v6597_v26  ;;  %v6598_v55 = vmax.f32 %v6261_v45, 0.0 }
 0x795   :  { %v6788_v4 = vadd.f32 %v14123_v50, %v6787_v56  ;;  %v6265_v30 = vpop.f32.mrf.mxu0  ;;  %10257 = vmatmul.mubr.bf16.gmra.mxu0 %v13987_v29  ;;  %10497 = vmatprep.mubr.msk.f32.mxu1 %vm10940_vm2, %v10939_v0 }
 0x796   :  { %v6266_v13 = vadd.f32 %v14091_v58, %v6265_v30  ;;  %v10352_v52 = vpop.f32.mrf.mxu1  ;;  %10260 = vmatprep.mubr.msk.bf16.mxu0 %vm10940_vm2, %v10939_v0 }
 0x797   :  { %7388 = vst.msk [vmem:[%s15047_s17 + $0x30] sm:$0xff] %vm7381_vm5, %v6788_v4  ;;  %v10162_v39 = vpop.f32.mrf.mxu0 }
 0x798   :  { %v6792_v46 = vpop.f32.mrf.mxu1  ;;  %10498 = vmatmul.mubr.f32.gmra.mxu1 %v6598_v55  ;;  %v6599_v6 = vmax.f32 %v6266_v13, 0.0 }
 0x799   :  { %v6793_v29 = vadd.f32 %v14123_v50, %v6792_v46  ;;  %v6268_v9 = vpop.f32.mrf.mxu0  ;;  %10500 = vmatprep.mubr.msk.f32.mxu1 %vm10940_vm2, %v10939_v0 }
 0x79a   :  { %v6269_v59 = vadd.f32 %v14091_v58, %v6268_v9  ;;  %v10355_v32 = vpop.f32.mrf.mxu1 }
 0x79b   :  { %7389 = vst.msk [vmem:[%s15047_s17 + $0x38] sm:$0xff] %vm7381_vm5, %v6793_v29  ;;  %v10163_v41 = vpop.f32.mrf.mxu0 }
 0x79c   :  { %v6797_v14 = vpop.f32.mrf.mxu1  ;;  %10501 = vmatmul.mubr.f32.gmra.mxu1 %v6599_v6  ;;  %v6600_v57 = vmax.f32 %v6269_v59, 0.0 }
 0x79d   :  { %v6798_v42 = vadd.f32 %v14123_v50, %v6797_v14  ;;  %v6273_v21 = vpop.f32.mrf.mxu0  ;;  %10261 = vmatmul.mubr.bf16.gmra.mxu0 %v14000_v53  ;;  %10503 = vmatprep.mubr.msk.f32.mxu1 %vm10940_vm2, %v10939_v0 }
 0x79e   :  { %v6274_v49 = vadd.f32 %v14091_v58, %v6273_v21  ;;  %v10358_v16 = vpop.f32.mrf.mxu1  ;;  %10264 = vmatprep.mubr.msk.bf16.mxu0 %vm10940_vm2, %v10939_v0 }
 0x79f   :  { %7390 = vst.msk [vmem:[%s15047_s17 + $0x40] sm:$0xff] %vm7381_vm5, %v6798_v42  ;;  %v10166_v31 = vpop.f32.mrf.mxu0 }
 0x7a0   :  { %v6802_v51 = vpop.f32.mrf.mxu1  ;;  %10504 = vmatmul.mubr.f32.gmra.mxu1 %v6600_v57  ;;  %v6601_v40 = vmax.f32 %v6274_v49, 0.0 }
 0x7a1   :  { %v6803_v53 = vadd.f32 %v14123_v50, %v6802_v51  ;;  %v6276_v15 = vpop.f32.mrf.mxu0  ;;  %10506 = vmatprep.mubr.msk.f32.mxu1 %vm10940_vm2, %v10939_v0 }
 0x7a2   :  { %v6277_v2 = vadd.f32 %v14091_v58, %v6276_v15  ;;  %v10361_v28 = vpop.f32.mrf.mxu1 }
 0x7a3   :  { %7391 = vst.msk [vmem:[%s15047_s17 + $0x48] sm:$0xff] %vm7381_vm5, %v6803_v53  ;;  %v10167_v38 = vpop.f32.mrf.mxu0 }
 0x7a4   :  { %v6807_v20 = vpop.f32.mrf.mxu1  ;;  %10507 = vmatmul.mubr.f32.gmra.mxu1 %v6601_v40  ;;  %v6602_v22 = vmax.f32 %v6277_v2, 0.0 }
 0x7a5   :  { %v6808_v5 = vadd.f32 %v14123_v50, %v6807_v20  ;;  %v6281_v63 = vpop.f32.mrf.mxu0  ;;  %10265 = vmatmul.mubr.bf16.gmra.mxu0 %v14013_v23  ;;  %10509 = vmatprep.mubr.msk.f32.mxu1 %vm10940_vm2, %v10939_v0 }
 0x7a6   :  { %v6282_v12 = vadd.f32 %v14091_v58, %v6281_v63  ;;  %v10364_v43 = vpop.f32.mrf.mxu1  ;;  %10268 = vmatprep.mubr.msk.bf16.mxu0 %vm10940_vm2, %v10939_v0 }
 0x7a7   :  { %7392 = vst.msk [vmem:[%s15047_s17 + $0x50] sm:$0xff] %vm7381_vm5, %v6808_v5  ;;  %v10170_v3 = vpop.f32.mrf.mxu0 }
 0x7a8   :  { %v6812_v34 = vpop.f32.mrf.mxu1  ;;  %10510 = vmatmul.mubr.f32.gmra.mxu1 %v6602_v22  ;;  %v6603_v25 = vmax.f32 %v6282_v12, 0.0 }
 0x7a9   :  { %v6813_v23 = vadd.f32 %v14123_v50, %v6812_v34  ;;  %v6284_v27 = vpop.f32.mrf.mxu0  ;;  %10512 = vmatprep.mubr.msk.f32.mxu1 %vm10940_vm2, %v10939_v0 }
 0x7aa   :  { %v6285_v35 = vadd.f32 %v14091_v58, %v6284_v27  ;;  %v10367_v47 = vpop.f32.mrf.mxu1 }
 0x7ab   :  { %7393 = vst.msk [vmem:[%s15047_s17 + $0x58] sm:$0xff] %vm7381_vm5, %v6813_v23  ;;  %v10171_v54 = vpop.f32.mrf.mxu0 }
 0x7ac   :  { %v6817_v33 = vpop.f32.mrf.mxu1  ;;  %10513 = vmatmul.mubr.f32.gmra.mxu1 %v6603_v25  ;;  %v6604_v11 = vmax.f32 %v6285_v35, 0.0 }
 0x7ad   :  { %v6818_v60 = vadd.f32 %v14123_v50, %v6817_v33  ;;  %v6289_v19 = vpop.f32.mrf.mxu0  ;;  %10269 = vmatmul.mubr.bf16.gmra.mxu0 %v14026_v10  ;;  %10515 = vmatprep.mubr.msk.f32.mxu1 %vm10940_vm2, %v10939_v0 }
 0x7ae   :  { %v6290_v18 = vadd.f32 %v14091_v58, %v6289_v19  ;;  %v10370_v61 = vpop.f32.mrf.mxu1  ;;  %10272 = vmatprep.mubr.msk.bf16.mxu0 %vm10940_vm2, %v10939_v0 }
 0x7af   :  { %7394 = vst.msk [vmem:[%s15047_s17 + $0x60] sm:$0xff] %vm7381_vm5, %v6818_v60  ;;  %v10174_v26 = vpop.f32.mrf.mxu0 }
 0x7b0   :  { %v6822_v45 = vpop.f32.mrf.mxu1  ;;  %10516 = vmatmul.mubr.f32.gmra.mxu1 %v6604_v11  ;;  %v6605_v36 = vmax.f32 %v6290_v18, 0.0 }
 0x7b1   :  { %v6823_v10 = vadd.f32 %v14123_v50, %v6822_v45  ;;  %v6292_v44 = vpop.f32.mrf.mxu0  ;;  %10518 = vmatprep.mubr.msk.f32.mxu1 %vm10940_vm2, %v10939_v0 }
 0x7b2   :  { %v6293_v56 = vadd.f32 %v14091_v58, %v6292_v44  ;;  %v10373_v4 = vpop.f32.mrf.mxu1 }
 0x7b3   :  { %7395 = vst.msk [vmem:[%s15047_s17 + $0x68] sm:$0xff] %vm7381_vm5, %v6823_v10  ;;  %v10175_v30 = vpop.f32.mrf.mxu0 }
 0x7b4   :  { %v6827_v55 = vpop.f32.mrf.mxu1  ;;  %10519 = vmatmul.mubr.f32.gmra.mxu1 %v6605_v36  ;;  %v6606_v39 = vmax.f32 %v6293_v56, 0.0 }
 0x7b5   :  { %v6828_v13 = vadd.f32 %v14123_v50, %v6827_v55  ;;  %v6297_v52 = vpop.f32.mrf.mxu0  ;;  %10273 = vmatmul.mubr.bf16.gmra.mxu0 %v14039_v7  ;;  %10521 = vmatprep.mubr.msk.f32.mxu1 %vm10940_vm2, %v10939_v0 }
 0x7b6   :  { %v6298_v46 = vadd.f32 %v14091_v58, %v6297_v52  ;;  %v10376_v29 = vpop.f32.mrf.mxu1  ;;  %10276 = vmatprep.mubr.msk.bf16.mxu0 %vm10940_vm2, %v10939_v0 }
 0x7b7   :  { %7396 = vst.msk [vmem:[%s15047_s17 + $0x70] sm:$0xff] %vm7381_vm5, %v6828_v13  ;;  %v10178_v9 = vpop.f32.mrf.mxu0 }
 0x7b8   :  { %v6832_v6 = vpop.f32.mrf.mxu1  ;;  %10522 = vmatmul.mubr.f32.gmra.mxu1 %v6606_v39  ;;  %v6607_v32 = vmax.f32 %v6298_v46, 0.0 }
 0x7b9   :  { %v6833_v7 = vadd.f32 %v14123_v50, %v6832_v6  ;;  %v6300_v59 = vpop.f32.mrf.mxu0  ;;  %10524 = vmatprep.mubr.msk.f32.mxu1 %vm10940_vm2, %v10939_v0 }
 0x7ba   :  { %v6301_v41 = vadd.f32 %v14091_v58, %v6300_v59  ;;  %v10379_v14 = vpop.f32.mrf.mxu1 }
 0x7bb   :  { %7397 = vst.msk [vmem:[%s15047_s17 + $0x78] sm:$0xff] %vm7381_vm5, %v6833_v7  ;;  %v10179_v42 = vpop.f32.mrf.mxu0 }
 0x7bc   :  { %v6837_v21 = vpop.f32.mrf.mxu1  ;;  %10525 = vmatmul.mubr.f32.gmra.mxu1 %v6607_v32  ;;  %v6608_v16 = vmax.f32 %v6301_v41, 0.0  ;;  %v10936_v41 = vld [vmem:[%s15044_s12] ss:$0 sm:$0xff] }
 0x7bd   :  { %v6838_v57 = vadd.f32 %v14123_v50, %v6837_v21  ;;  %v6305_v49 = vpop.f32.mrf.mxu0  ;;  %10277 = vmatmul.mubr.bf16.gmra.mxu0 %v14052_v24  ;;  %10527 = vmatprep.mubr.msk.f32.mxu1 %vm10940_vm2, %v10939_v0  ;;  %v5743_v14 = vadd.f32 %v10936_v41, %v14109_v37 }
 0x7be   :  { %v6306_v31 = vadd.f32 %v14091_v58, %v6305_v49  ;;  %v10382_v51 = vpop.f32.mrf.mxu1  ;;  %10280 = vmatprep.mubr.msk.bf16.mxu0 %vm10940_vm2, %v10939_v0 }
 0x7bf   :  { %7398 = vst.msk [vmem:[%s15047_s17 + $0x80] sm:$0xff] %vm7381_vm5, %v6838_v57  ;;  %v10182_v53 = vpop.f32.mrf.mxu0  ;;  %v5872_v51 = vmax.f32 %v5743_v14, 0.0 }
 0x7c0   :  { %v6842_v15 = vpop.f32.mrf.mxu1  ;;  %10528 = vmatmul.mubr.f32.gmra.mxu1 %v6608_v16  ;;  %v6609_v2 = vmax.f32 %v6306_v31, 0.0 }
 0x7c1   :  { %v6843_v24 = vadd.f32 %v14123_v50, %v6842_v15  ;;  %v6308_v40 = vpop.f32.mrf.mxu0  ;;  %10530 = vmatprep.mubr.msk.f32.mxu1 %vm10940_vm2, %v10939_v0 }
 0x7c2   :  { %v6309_v28 = vadd.f32 %v14091_v58, %v6308_v40  ;;  %v10385_v38 = vpop.f32.mrf.mxu1 }
 0x7c3   :  { %7399 = vst.msk [vmem:[%s15047_s17 + $0x88] sm:$0xff] %vm7381_vm5, %v6843_v24  ;;  %v10183_v20 = vpop.f32.mrf.mxu0  ;;  %v5952_v38 = vpack.c.bf16 %v5872_v51, %v5872_v51 }
 0x7c4   :  { %v6847_v5 = vpop.f32.mrf.mxu1  ;;  %10531 = vmatmul.mubr.f32.gmra.mxu1 %v6609_v2  ;;  %v6610_v12 = vmax.f32 %v6309_v28, 0.0 }
 0x7c5   :  { %v6848_v63 = vadd.f32 %v14123_v50, %v6847_v5  ;;  %v6313_v22 = vpop.f32.mrf.mxu0  ;;  %10281 = vmatmul.mubr.bf16.gmra.mxu0 %v14065_v8  ;;  %10533 = vmatprep.mubr.msk.f32.mxu1 %vm10940_vm2, %v10939_v0 }
 0x7c6   :  { %v6314_v43 = vadd.f32 %v14091_v58, %v6313_v22  ;;  %v10388_v3 = vpop.f32.mrf.mxu1  ;;  %10284 = vmatprep.mubr.msk.bf16.mxu0 %vm10940_vm2, %v10939_v0 }
 0x7c7   :  { %7400 = vst.msk [vmem:[%s15047_s17 + $0x90] sm:$0xff] %vm7381_vm5, %v6848_v63  ;;  %v10186_v34 = vpop.f32.mrf.mxu0 }
 0x7c8   :  { %v6852_v23 = vpop.f32.mrf.mxu1  ;;  %10534 = vmatmul.mubr.f32.gmra.mxu1 %v6610_v12  ;;  %v6611_v25 = vmax.f32 %v6314_v43, 0.0  ;;  %v6042_v34 = vadd.f32 %v14091_v58, %v13779_v17 }
 0x7c9   :  { %v6853_v8 = vadd.f32 %v14123_v50, %v6852_v23  ;;  %v6316_v27 = vpop.f32.mrf.mxu0  ;;  %10536 = vmatprep.mubr.msk.f32.mxu1 %vm10940_vm2, %v10939_v0 }
 0x7ca   :  { %v6317_v35 = vadd.f32 %v14091_v58, %v6316_v27  ;;  %v10391_v47 = vpop.f32.mrf.mxu1 }
 0x7cb   :  { %7401 = vst.msk [vmem:[%s15047_s17 + $0x98] sm:$0xff] %vm7381_vm5, %v6853_v8  ;;  %v10187_v54 = vpop.f32.mrf.mxu0 }
 0x7cc   :  { %v6857_v33 = vpop.f32.mrf.mxu1  ;;  %10537 = vmatmul.mubr.f32.gmra.mxu1 %v6611_v25  ;;  %v6612_v11 = vmax.f32 %v6317_v35, 0.0 }
 0x7cd   :  { %v6858_v60 = vadd.f32 %v14123_v50, %v6857_v33  ;;  %v6321_v19 = vpop.f32.mrf.mxu0  ;;  %10285 = vmatmul.mubr.bf16.gmra.mxu0 %v14078_v62  ;;  %10539 = vmatprep.mubr.msk.f32.mxu1 %vm10940_vm2, %v10939_v0  ;;  %v6543_v33 = vmax.f32 %v6042_v34, 0.0 }
 0x7ce   :  { %v6322_v18 = vadd.f32 %v14091_v58, %v6321_v19  ;;  %v10394_v61 = vpop.f32.mrf.mxu1  ;;  %10288 = vmatprep.mubr.msk.bf16.mxu0 %vm10940_vm2, %v10939_v0 }
 0x7cf   :  { %7402 = vst.msk [vmem:[%s15047_s17 + $0xa0] sm:$0xff] %vm7381_vm5, %v6858_v60  ;;  %v10190_v26 = vpop.f32.mrf.mxu0 }
 0x7d0   :  { %v6862_v45 = vpop.f32.mrf.mxu1  ;;  %10540 = vmatmul.mubr.f32.gmra.mxu1 %v6612_v11  ;;  %v6613_v44 = vmax.f32 %v6322_v18, 0.0 }
 0x7d1   :  { %v6863_v62 = vadd.f32 %v14123_v50, %v6862_v45  ;;  %v6324_v10 = vpop.f32.mrf.mxu0  ;;  %10542 = vmatprep.mubr.msk.f32.mxu1 %vm10940_vm2, %v10939_v0 }
 0x7d2   :  { %v6325_v36 = vadd.f32 %v14091_v58, %v6324_v10  ;;  %v10397_v56 = vpop.f32.mrf.mxu1 }
 0x7d3   :  { %7403 = vst.msk [vmem:[%s15047_s17 + $0xa8] sm:$0xff] %vm7381_vm5, %v6863_v62  ;;  %v10191_v4 = vpop.f32.mrf.mxu0 }
 0x7d4   :  { %v6867_v30 = vpop.f32.mrf.mxu1  ;;  %10543 = vmatmul.mubr.f32.gmra.mxu1 %v6613_v44  ;;  %v6614_v52 = vmax.f32 %v6325_v36, 0.0 }
 0x7d5   :  { %v6868_v55 = vadd.f32 %v14123_v50, %v6867_v30  ;;  %v6329_v13 = vpop.f32.mrf.mxu0  ;;  %10289 = vmatmul.mubr.bf16.gmra.mxu0 %v14096_v1  ;;  %10545 = vmatprep.mubr.msk.f32.mxu1 %vm10940_vm2, %v10939_v0 }
 0x7d6   :  { %v6330_v39 = vadd.f32 %v14091_v58, %v6329_v13  ;;  %v10400_v46 = vpop.f32.mrf.mxu1  ;;  %10292 = vmatprep.mubr.msk.bf16.mxu0 %vm10940_vm2, %v10939_v0 }
 0x7d7   :  { %7404 = vst.msk [vmem:[%s15047_s17 + $0xb0] sm:$0xff] %vm7381_vm5, %v6868_v55  ;;  %v10194_v29 = vpop.f32.mrf.mxu0 }
 0x7d8   :  { %v6872_v9 = vpop.f32.mrf.mxu1  ;;  %10546 = vmatmul.mubr.f32.gmra.mxu1 %v6614_v52  ;;  %v6615_v7 = vmax.f32 %v6330_v39, 0.0 }
 0x7d9   :  { %v6873_v1 = vadd.f32 %v14123_v50, %v6872_v9  ;;  %v6332_v6 = vpop.f32.mrf.mxu0  ;;  %10548 = vmatprep.mubr.msk.f32.mxu1 %vm10940_vm2, %v10939_v0 }
 0x7da   :  { %v6333_v59 = vadd.f32 %v14091_v58, %v6332_v6  ;;  %v10403_v32 = vpop.f32.mrf.mxu1 }
 0x7db   :  { %7405 = vst.msk [vmem:[%s15047_s17 + $0xb8] sm:$0xff] %vm7381_vm5, %v6873_v1  ;;  %v10195_v42 = vpop.f32.mrf.mxu0 }
 0x7dc   :  { %v6877_v21 = vpop.f32.mrf.mxu1  ;;  %10549 = vmatmul.mubr.f32.gmra.mxu1 %v6615_v7  ;;  %v6616_v16 = vmax.f32 %v6333_v59, 0.0 }
 0x7dd   :  { %v6878_v57 = vadd.f32 %v14123_v50, %v6877_v21  ;;  %v6337_v49 = vpop.f32.mrf.mxu0  ;;  %10293 = vmatmul.mubr.bf16.gmra.mxu0 %v14111_v48  ;;  %10551 = vmatprep.mubr.msk.f32.mxu1 %vm10940_vm2, %v10939_v0 }
 0x7de   :  { %v6338_v31 = vadd.f32 %v14091_v58, %v6337_v49  ;;  %v10406_v37 = vpop.f32.mrf.mxu1  ;;  %10296 = vmatprep.mubr.msk.bf16.mxu0 %vm10940_vm2, %v10939_v0 }
 0x7df   :  { %7406 = vst.msk [vmem:[%s15047_s17 + $0xc0] sm:$0xff] %vm7381_vm5, %v6878_v57  ;;  %v10198_v53 = vpop.f32.mrf.mxu0 }
 0x7e0   :  { %v6882_v15 = vpop.f32.mrf.mxu1  ;;  %10552 = vmatmul.mubr.f32.gmra.mxu1 %v6616_v16  ;;  %v6617_v40 = vmax.f32 %v6338_v31, 0.0 }
 0x7e1   :  { %v6883_v48 = vadd.f32 %v14123_v50, %v6882_v15  ;;  %v6340_v24 = vpop.f32.mrf.mxu0  ;;  %10554 = vmatprep.mubr.msk.f32.mxu1 %vm10940_vm2, %v10939_v0 }
 0x7e2   :  { %v6341_v2 = vadd.f32 %v14091_v58, %v6340_v24  ;;  %v10409_v28 = vpop.f32.mrf.mxu1 }
 0x7e3   :  { %7407 = vst.msk [vmem:[%s15047_s17 + $0xc8] sm:$0xff] %vm7381_vm5, %v6883_v48  ;;  %v10199_v20 = vpop.f32.mrf.mxu0 }
 0x7e4   :  { %v6887_v5 = vpop.f32.mrf.mxu1  ;;  %10555 = vmatmul.mubr.f32.gmra.mxu1 %v6617_v40  ;;  %v6618_v12 = vmax.f32 %v6341_v2, 0.0 }
 0x7e5   :  { %v6888_v63 = vadd.f32 %v14123_v50, %v6887_v5  ;;  %v6345_v22 = vpop.f32.mrf.mxu0  ;;  %10297 = vmatmul.mubr.bf16.gmra.mxu0 %v5952_v38  ;;  %10557 = vmatprep.mubr.msk.f32.mxu1 %vm10940_vm2, %v10939_v0 }
 0x7e6   :  { %v6346_v43 = vadd.f32 %v14091_v58, %v6345_v22  ;;  %v10412_v3 = vpop.f32.mrf.mxu1  ;;  %10332 = vmatprep.mubr.msk.f32.mxu0 %vm10940_vm2, %v10939_v0 }
 0x7e7   :  { %7408 = vst.msk [vmem:[%s15047_s17 + $0xd0] sm:$0xff] %vm7381_vm5, %v6888_v63  ;;  %v10202_v23 = vpop.f32.mrf.mxu0 }
 0x7e8   :  { %v6892_v8 = vpop.f32.mrf.mxu1  ;;  %10558 = vmatmul.mubr.f32.gmra.mxu1 %v6618_v12  ;;  %v6619_v35 = vmax.f32 %v6346_v43, 0.0 }
 0x7e9   :  { %v6893_v27 = vadd.f32 %v14123_v50, %v6892_v8  ;;  %v6348_v25 = vpop.f32.mrf.mxu0  ;;  %10560 = vmatprep.mubr.msk.f32.mxu1 %vm10940_vm2, %v10939_v0 }
 0x7ea   :  { %v6349_v47 = vadd.f32 %v14091_v58, %v6348_v25  ;;  %v10415_v54 = vpop.f32.mrf.mxu1 }
 0x7eb   :  { %7409 = vst.msk [vmem:[%s15047_s17 + $0xd8] sm:$0xff] %vm7381_vm5, %v6893_v27  ;;  %v10203_v17 = vpop.f32.mrf.mxu0 }
 0x7ec   :  { %v6897_v60 = vpop.f32.mrf.mxu1  ;;  %10561 = vmatmul.mubr.f32.gmra.mxu1 %v6619_v35  ;;  %v6620_v18 = vmax.f32 %v6349_v47, 0.0 }
 0x7ed   :  { %v6898_v19 = vadd.f32 %v14123_v50, %v6897_v60  ;;  %v6353_v11 = vpop.f32.mrf.mxu0  ;;  %10333 = vmatmul.mubr.f32.vlgmr.msra.gmra.mxu0 %v6543_v33  ;;  %10563 = vmatprep.mubr.msk.f32.mxu1 %vm10940_vm2, %v10939_v0 }
 0x7ee   :  { %v6354_v61 = vadd.f32 %v14091_v58, %v6353_v11  ;;  %v10418_v26 = vpop.f32.mrf.mxu1 }
 0x7ef   :  { %7410 = vst.msk [vmem:[%s15047_s17 + $0xe0] sm:$0xff] %vm7381_vm5, %v6898_v19  ;;  %v10206_v45 = vpop.f32.mrf.mxu0 }
 0x7f0   :  { %v6902_v62 = vpop.f32.mrf.mxu1  ;;  %10564 = vmatmul.mubr.f32.gmra.mxu1 %v6620_v18  ;;  %v6621_v36 = vmax.f32 %v6354_v61, 0.0 }
 0x7f1   :  { %v6903_v10 = vadd.f32 %v14123_v50, %v6902_v62  ;;  %v6356_v44 = vpop.f32.mrf.mxu0  ;;  %10566 = vmatprep.mubr.msk.f32.mxu1 %vm10940_vm2, %v10939_v0 }
 0x7f2   :  { %v6357_v56 = vadd.f32 %v14091_v58, %v6356_v44  ;;  %v10421_v4 = vpop.f32.mrf.mxu1 }
 0x7f3   :  { %7411 = vst.msk [vmem:[%s15047_s17 + $0xe8] sm:$0xff] %vm7381_vm5, %v6903_v10  ;;  %v10207_v30 = vpop.f32.mrf.mxu0 }
 0x7f4   :  { %v6907_v55 = vpop.f32.mrf.mxu1  ;;  %10567 = vmatmul.mubr.f32.gmra.mxu1 %v6621_v36  ;;  %v6622_v39 = vmax.f32 %v6357_v56, 0.0 }
 0x7f5   :  { %v6908_v13 = vadd.f32 %v14123_v50, %v6907_v55  ;;  %v6361_v52 = vpop.f32.mrf.mxu0  ;;  %10569 = vmatprep.mubr.msk.f32.mxu1 %vm10940_vm2, %v10939_v0 }
 0x7f6   :  { %v6362_v46 = vadd.f32 %v14091_v58, %v6361_v52  ;;  %v10424_v29 = vpop.f32.mrf.mxu1 }
 0x7f7   :  { %7412 = vst.msk [vmem:[%s15047_s17 + $0xf0] sm:$0xff] %vm7381_vm5, %v6908_v13  ;;  %v10210_v9 = vpop.f32.mrf.mxu0 }
 0x7f8   :  { %v6912_v1 = vpop.f32.mrf.mxu1  ;;  %10570 = vmatmul.mubr.f32.gmra.mxu1 %v6622_v39  ;;  %v6623_v59 = vmax.f32 %v6362_v46, 0.0 }
 0x7f9   :  { %v6913_v6 = vadd.f32 %v14123_v50, %v6912_v1  ;;  %v6364_v7 = vpop.f32.mrf.mxu0  ;;  %10572 = vmatprep.mubr.msk.f32.mxu1 %vm10940_vm2, %v10939_v0 }
 0x7fa   :  { %v6365_v32 = vadd.f32 %v14091_v58, %v6364_v7  ;;  %v10427_v41 = vpop.f32.mrf.mxu1 }
 0x7fb   :  { %7413 = vst.msk [vmem:[%s15047_s17 + $0xf8] sm:$0xff] %vm7381_vm5, %v6913_v6  ;;  %v10211_v14 = vpop.f32.mrf.mxu0 }
 0x7fc   :  { %v6917_v42 = vpop.f32.mrf.mxu1  ;;  %10573 = vmatmul.mubr.f32.gmra.mxu1 %v6623_v59  ;;  %v6624_v49 = vmax.f32 %v6365_v32, 0.0 }
 0x7fd   :  { %v6918_v21 = vadd.f32 %v14123_v50, %v6917_v42  ;;  %v6369_v57 = vpop.f32.mrf.mxu0  ;;  %10575 = vmatprep.mubr.msk.f32.mxu1 %vm10940_vm2, %v10939_v0 }
 0x7fe   :  { %v6370_v16 = vadd.f32 %v14091_v58, %v6369_v57  ;;  %v10430_v31 = vpop.f32.mrf.mxu1 }
 0x7ff   :  { %7414 = vst.msk [vmem:[%s15047_s17 + $0x100] sm:$0xff] %vm7381_vm5, %v6918_v21  ;;  %v10214_v37 = vpop.f32.mrf.mxu0 }
 0x800   :  { %v6922_v51 = vpop.f32.mrf.mxu1  ;;  %10576 = vmatmul.mubr.f32.gmra.mxu1 %v6624_v49  ;;  %v6625_v48 = vmax.f32 %v6370_v16, 0.0 }
 0x801   :  { %v6923_v53 = vadd.f32 %v14123_v50, %v6922_v51  ;;  %v6372_v15 = vpop.f32.mrf.mxu0  ;;  %10578 = vmatprep.mubr.msk.f32.mxu1 %vm10940_vm2, %v10939_v0 }
 0x802   :  { %v6373_v24 = vadd.f32 %v14091_v58, %v6372_v15  ;;  %v10433_v40 = vpop.f32.mrf.mxu1 }
 0x803   :  { %7415 = vst.msk [vmem:[%s15047_s17 + $0x108] sm:$0xff] %vm7381_vm5, %v6923_v53  ;;  %v10215_v2 = vpop.f32.mrf.mxu0 }
 0x804   :  { %v6927_v28 = vpop.f32.mrf.mxu1  ;;  %10579 = vmatmul.mubr.f32.gmra.mxu1 %v6625_v48  ;;  %v6626_v5 = vmax.f32 %v6373_v24, 0.0 }
 0x805   :  { %v6928_v38 = vadd.f32 %v14123_v50, %v6927_v28  ;;  %v6377_v20 = vpop.f32.mrf.mxu0  ;;  %10581 = vmatprep.mubr.msk.f32.mxu1 %vm10940_vm2, %v10939_v0 }
 0x806   :  { %v6378_v63 = vadd.f32 %v14091_v58, %v6377_v20  ;;  %v10436_v22 = vpop.f32.mrf.mxu1 }
 0x807   :  { %7416 = vst.msk [vmem:[%s15047_s17 + $0x110] sm:$0xff] %vm7381_vm5, %v6928_v38  ;;  %v10218_v12 = vpop.f32.mrf.mxu0 }
 0x808   :  { %v6932_v43 = vpop.f32.mrf.mxu1  ;;  %10582 = vmatmul.mubr.f32.gmra.mxu1 %v6626_v5  ;;  %v6627_v23 = vmax.f32 %v6378_v63, 0.0 }
 0x809   :  { %v6933_v3 = vadd.f32 %v14123_v50, %v6932_v43  ;;  %v6380_v34 = vpop.f32.mrf.mxu0  ;;  %10584 = vmatprep.mubr.msk.f32.mxu1 %vm10940_vm2, %v10939_v0 }
 0x80a   :  { %v6381_v8 = vadd.f32 %v14091_v58, %v6380_v34  ;;  %v10439_v27 = vpop.f32.mrf.mxu1 }
 0x80b   :  { %7417 = vst.msk [vmem:[%s15047_s17 + $0x118] sm:$0xff] %vm7381_vm5, %v6933_v3  ;;  %v10219_v25 = vpop.f32.mrf.mxu0 }
 0x80c   :  { %v6937_v35 = vpop.f32.mrf.mxu1  ;;  %10585 = vmatmul.mubr.f32.gmra.mxu1 %v6627_v23  ;;  %v6628_v33 = vmax.f32 %v6381_v8, 0.0 }
 0x80d   :  { %v6938_v47 = vadd.f32 %v14123_v50, %v6937_v35  ;;  %v6385_v54 = vpop.f32.mrf.mxu0  ;;  %10587 = vmatprep.mubr.msk.f32.mxu1 %vm10940_vm2, %v10939_v0 }
 0x80e   :  { %v6386_v17 = vadd.f32 %v14091_v58, %v6385_v54  ;;  %v10442_v60 = vpop.f32.mrf.mxu1 }
 0x80f   :  { %7418 = vst.msk [vmem:[%s15047_s17 + $0x120] sm:$0xff] %vm7381_vm5, %v6938_v47  ;;  %v10222_v19 = vpop.f32.mrf.mxu0 }
 0x810   :  { %v6942_v11 = vpop.f32.mrf.mxu1  ;;  %10588 = vmatmul.mubr.f32.gmra.mxu1 %v6628_v33  ;;  %v6629_v26 = vmax.f32 %v6386_v17, 0.0 }
 0x811   :  { %v6943_v18 = vadd.f32 %v14123_v50, %v6942_v11  ;;  %v6388_v61 = vpop.f32.mrf.mxu0  ;;  %10590 = vmatprep.mubr.msk.f32.mxu1 %vm10940_vm2, %v10939_v0 }
 0x812   :  { %v6389_v45 = vadd.f32 %v14091_v58, %v6388_v61  ;;  %v10445_v62 = vpop.f32.mrf.mxu1 }
 0x813   :  { %7419 = vst.msk [vmem:[%s15047_s17 + $0x128] sm:$0xff] %vm7381_vm5, %v6943_v18  ;;  %v10223_v10 = vpop.f32.mrf.mxu0 }
 0x814   :  { %v6947_v44 = vpop.f32.mrf.mxu1  ;;  %10591 = vmatmul.mubr.f32.gmra.mxu1 %v6629_v26  ;;  %v6630_v4 = vmax.f32 %v6389_v45, 0.0 }
 0x815   :  { %v6948_v36 = vadd.f32 %v14123_v50, %v6947_v44  ;;  %v6393_v56 = vpop.f32.mrf.mxu0  ;;  %10593 = vmatprep.mubr.msk.f32.mxu1 %vm10940_vm2, %v10939_v0 }
 0x816   :  { %v6394_v30 = vadd.f32 %v14091_v58, %v6393_v56  ;;  %v10448_v55 = vpop.f32.mrf.mxu1 }
 0x817   :  { %7420 = vst.msk [vmem:[%s15047_s17 + $0x130] sm:$0xff] %vm7381_vm5, %v6948_v36  ;;  %v10226_v13 = vpop.f32.mrf.mxu0 }
 0x818   :  { %v6952_v52 = vpop.f32.mrf.mxu1  ;;  %10594 = vmatmul.mubr.f32.gmra.mxu1 %v6630_v4  ;;  %v6631_v29 = vmax.f32 %v6394_v30, 0.0 }
 0x819   :  { %v6953_v39 = vadd.f32 %v14123_v50, %v6952_v52  ;;  %v6396_v46 = vpop.f32.mrf.mxu0  ;;  %10596 = vmatprep.mubr.msk.f32.mxu1 %vm10940_vm2, %v10939_v0 }
 0x81a   :  { %v6397_v9 = vadd.f32 %v14091_v58, %v6396_v46  ;;  %v10451_v1 = vpop.f32.mrf.mxu1 }
 0x81b   :  { %7421 = vst.msk [vmem:[%s15047_s17 + $0x138] sm:$0xff] %vm7381_vm5, %v6953_v39  ;;  %v10227_v6 = vpop.f32.mrf.mxu0 }
 0x81c   :  { %v6957_v7 = vpop.f32.mrf.mxu1  ;;  %10597 = vmatmul.mubr.f32.gmra.mxu1 %v6631_v29  ;;  %v6632_v41 = vmax.f32 %v6397_v9, 0.0 }
 0x81d   :  { %v6958_v59 = vadd.f32 %v14123_v50, %v6957_v7  ;;  %v6401_v32 = vpop.f32.mrf.mxu0  ;;  %10599 = vmatprep.mubr.msk.f32.mxu1 %vm10940_vm2, %v10939_v0 }
 0x81e   :  { %v6402_v14 = vadd.f32 %v14091_v58, %v6401_v32  ;;  %v10454_v42 = vpop.f32.mrf.mxu1 }
 0x81f   :  { %7422 = vst.msk [vmem:[%s15047_s17 + $0x140] sm:$0xff] %vm7381_vm5, %v6958_v59  ;;  %v10230_v21 = vpop.f32.mrf.mxu0 }
 0x820   :  { %v6962_v57 = vpop.f32.mrf.mxu1  ;;  %10600 = vmatmul.mubr.f32.gmra.mxu1 %v6632_v41  ;;  %v6633_v31 = vmax.f32 %v6402_v14, 0.0 }
 0x821   :  { %v6963_v49 = vadd.f32 %v14123_v50, %v6962_v57  ;;  %v6404_v16 = vpop.f32.mrf.mxu0  ;;  %10602 = vmatprep.mubr.msk.f32.mxu1 %vm10940_vm2, %v10939_v0 }
 0x822   :  { %v6405_v37 = vadd.f32 %v14091_v58, %v6404_v16  ;;  %v10457_v51 = vpop.f32.mrf.mxu1 }
 0x823   :  { %7423 = vst.msk [vmem:[%s15047_s17 + $0x148] sm:$0xff] %vm7381_vm5, %v6963_v49  ;;  %v10231_v53 = vpop.f32.mrf.mxu0 }
 0x824   :  { %v6967_v15 = vpop.f32.mrf.mxu1  ;;  %10603 = vmatmul.mubr.f32.gmra.mxu1 %v6633_v31  ;;  %v6634_v40 = vmax.f32 %v6405_v37, 0.0 }
 0x825   :  { %v6968_v48 = vadd.f32 %v14123_v50, %v6967_v15  ;;  %v6409_v24 = vpop.f32.mrf.mxu0  ;;  %10605 = vmatprep.mubr.msk.f32.mxu1 %vm10940_vm2, %v10939_v0 }
 0x826   :  { %v6410_v2 = vadd.f32 %v14091_v58, %v6409_v24  ;;  %v10460_v28 = vpop.f32.mrf.mxu1 }
 0x827   :  { %7424 = vst.msk [vmem:[%s15047_s17 + $0x150] sm:$0xff] %vm7381_vm5, %v6968_v48  ;;  %v10234_v38 = vpop.f32.mrf.mxu0 }
 0x828   :  { %v6972_v20 = vpop.f32.mrf.mxu1  ;;  %10606 = vmatmul.mubr.f32.gmra.mxu1 %v6634_v40  ;;  %v6635_v22 = vmax.f32 %v6410_v2, 0.0 }
 0x829   :  { %v6973_v5 = vadd.f32 %v14123_v50, %v6972_v20  ;;  %v6412_v63 = vpop.f32.mrf.mxu0  ;;  %10608 = vmatprep.mubr.msk.f32.mxu1 %vm10940_vm2, %v10939_v0 }
 0x82a   :  { %v6413_v12 = vadd.f32 %v14091_v58, %v6412_v63  ;;  %v10463_v43 = vpop.f32.mrf.mxu1  ;;  %v14521_v58 = vld [vmem:[%s15045_s14] ss:$0 sm:$0xff] }
 0x82b   :  { %7425 = vst.msk [vmem:[%s15047_s17 + $0x158] sm:$0xff] %vm7381_vm5, %v6973_v5  ;;  %v10235_v3 = vpop.f32.mrf.mxu0 }
 0x82c   :  { %v6977_v34 = vpop.f32.mrf.mxu1  ;;  %10609 = vmatmul.mubr.f32.gmra.mxu1 %v6635_v22  ;;  %v6636_v27 = vmax.f32 %v6413_v12, 0.0 }
 0x82d   :  { %v6978_v23 = vadd.f32 %v14123_v50, %v6977_v34  ;;  %v6417_v8 = vpop.f32.mrf.mxu0  ;;  %10611 = vmatprep.mubr.msk.f32.mxu1 %vm10940_vm2, %v10939_v0 }
 0x82e   :  { %v6418_v25 = vadd.f32 %v14521_v58, %v6417_v8  ;;  %v10466_v35 = vpop.f32.mrf.mxu1 }
 0x82f   :  { %7426 = vst.msk [vmem:[%s15047_s17 + $0x160] sm:$0xff] %vm7381_vm5, %v6978_v23  ;;  %v10238_v47 = vpop.f32.mrf.mxu0 }
 0x830   :  { %v6982_v54 = vpop.f32.mrf.mxu1  ;;  %10612 = vmatmul.mubr.f32.gmra.mxu1 %v6636_v27  ;;  %v6637_v60 = vmax.f32 %v6418_v25, 0.0 }
 0x831   :  { %v6983_v33 = vadd.f32 %v14123_v50, %v6982_v54  ;;  %v6420_v17 = vpop.f32.mrf.mxu0  ;;  %10614 = vmatprep.mubr.msk.f32.mxu1 %vm10940_vm2, %v10939_v0 }
 0x832   :  { %v6421_v19 = vadd.f32 %v14521_v58, %v6420_v17  ;;  %v10469_v11 = vpop.f32.mrf.mxu1 }
 0x833   :  { %7427 = vst.msk [vmem:[%s15047_s17 + $0x168] sm:$0xff] %vm7381_vm5, %v6983_v33  ;;  %v10239_v18 = vpop.f32.mrf.mxu0 }
 0x834   :  { %v6987_v61 = vpop.f32.mrf.mxu1  ;;  %10615 = vmatmul.mubr.f32.gmra.mxu1 %v6637_v60  ;;  %v6638_v62 = vmax.f32 %v6421_v19, 0.0 }
 0x835   :  { %v6988_v26 = vadd.f32 %v14123_v50, %v6987_v61  ;;  %v6425_v45 = vpop.f32.mrf.mxu0  ;;  %10617 = vmatprep.mubr.msk.f32.mxu1 %vm10940_vm2, %v10939_v0 }
 0x836   :  { %v6426_v10 = vadd.f32 %v14521_v58, %v6425_v45  ;;  %v10472_v44 = vpop.f32.mrf.mxu1 }
 0x837   :  { %7428 = vst.msk [vmem:[%s15047_s17 + $0x170] sm:$0xff] %vm7381_vm5, %v6988_v26  ;;  %v10242_v36 = vpop.f32.mrf.mxu0 }
 0x838   :  { %v6992_v56 = vpop.f32.mrf.mxu1  ;;  %10618 = vmatmul.mubr.f32.gmra.mxu1 %v6638_v62  ;;  %v6639_v55 = vmax.f32 %v6426_v10, 0.0 }
 0x839   :  { %v6993_v4 = vadd.f32 %v14123_v50, %v6992_v56  ;;  %v6428_v30 = vpop.f32.mrf.mxu0  ;;  %10620 = vmatprep.mubr.msk.f32.mxu1 %vm10940_vm2, %v10939_v0 }
 0x83a   :  { %v6429_v13 = vadd.f32 %v14521_v58, %v6428_v30  ;;  %v10475_v52 = vpop.f32.mrf.mxu1 }
 0x83b   :  { %7429 = vst.msk [vmem:[%s15047_s17 + $0x178] sm:$0xff] %vm7381_vm5, %v6993_v4  ;;  %v10243_v39 = vpop.f32.mrf.mxu0 }
 0x83c   :  { %v6997_v46 = vpop.f32.mrf.mxu1  ;;  %10621 = vmatmul.mubr.f32.gmra.mxu1 %v6639_v55  ;;  %v6640_v1 = vmax.f32 %v6429_v13, 0.0 }
 0x83d   :  { %v6998_v29 = vadd.f32 %v14123_v50, %v6997_v46  ;;  %v6433_v9 = vpop.f32.mrf.mxu0  ;;  %10623 = vmatprep.mubr.msk.f32.mxu1 %vm10940_vm2, %v10939_v0  ;;  %v14563_v50 = vld [vmem:[%s15046_s16] ss:$0 sm:$0xff] }
 0x83e   :  { %v6434_v6 = vadd.f32 %v14521_v58, %v6433_v9  ;;  %v10478_v7 = vpop.f32.mrf.mxu1 }
 0x83f   :  { %7430 = vst.msk [vmem:[%s15047_s17 + $0x180] sm:$0xff] %vm7381_vm5, %v6998_v29  ;;  %v10246_v59 = vpop.f32.mrf.mxu0 }
 0x840   :  { %v7002_v32 = vpop.f32.mrf.mxu1  ;;  %10624 = vmatmul.mubr.f32.gmra.mxu1 %v6640_v1  ;;  %v6641_v42 = vmax.f32 %v6434_v6, 0.0 }
 0x841   :  { %v7003_v41 = vadd.f32 %v14563_v50, %v7002_v32  ;;  %v6436_v14 = vpop.f32.mrf.mxu0  ;;  %10626 = vmatprep.mubr.msk.f32.mxu1 %vm10940_vm2, %v10939_v0 }
 0x842   :  { %v6437_v21 = vadd.f32 %v14521_v58, %v6436_v14  ;;  %v10481_v57 = vpop.f32.mrf.mxu1 }
 0x843   :  { %7431 = vst.msk [vmem:[%s15047_s17 + $0x188] sm:$0xff] %vm7381_vm5, %v7003_v41  ;;  %v10247_v49 = vpop.f32.mrf.mxu0 }
 0x844   :  { %v7007_v16 = vpop.f32.mrf.mxu1  ;;  %10627 = vmatmul.mubr.f32.gmra.mxu1 %v6641_v42  ;;  %v6642_v51 = vmax.f32 %v6437_v21, 0.0 }
 0x845   :  { %v7008_v31 = vadd.f32 %v14563_v50, %v7007_v16  ;;  %v6441_v37 = vpop.f32.mrf.mxu0  ;;  %10629 = vmatprep.mubr.msk.f32.mxu1 %vm10940_vm2, %v10939_v0 }
 0x846   :  { %v6442_v53 = vadd.f32 %v14521_v58, %v6441_v37  ;;  %v10484_v15 = vpop.f32.mrf.mxu1 }
 0x847   :  { %7432 = vst.msk [vmem:[%s15047_s17 + $0x190] sm:$0xff] %vm7381_vm5, %v7008_v31  ;;  %v10250_v48 = vpop.f32.mrf.mxu0 }
 0x848   :  { %v7012_v24 = vpop.f32.mrf.mxu1  ;;  %10630 = vmatmul.mubr.f32.gmra.mxu1 %v6642_v51  ;;  %v6643_v28 = vmax.f32 %v6442_v53, 0.0 }
 0x849   :  { %v7013_v40 = vadd.f32 %v14563_v50, %v7012_v24  ;;  %v6444_v2 = vpop.f32.mrf.mxu0  ;;  %10632 = vmatprep.mubr.msk.f32.mxu1 %vm10940_vm2, %v10939_v0 }
 0x84a   :  { %v6445_v38 = vadd.f32 %v14521_v58, %v6444_v2  ;;  %v10487_v20 = vpop.f32.mrf.mxu1 }
 0x84b   :  { %7433 = vst.msk [vmem:[%s15047_s17 + $0x198] sm:$0xff] %vm7381_vm5, %v7013_v40  ;;  %v10251_v5 = vpop.f32.mrf.mxu0 }
 0x84c   :  { %v7017_v63 = vpop.f32.mrf.mxu1  ;;  %10633 = vmatmul.mubr.f32.gmra.mxu1 %v6643_v28  ;;  %v6644_v43 = vmax.f32 %v6445_v38, 0.0 }
 0x84d   :  { %v7018_v22 = vadd.f32 %v14563_v50, %v7017_v63  ;;  %v6449_v12 = vpop.f32.mrf.mxu0  ;;  %10635 = vmatprep.mubr.msk.f32.mxu1 %vm10940_vm2, %v10939_v0 }
 0x84e   :  { %v6450_v3 = vadd.f32 %v14521_v58, %v6449_v12  ;;  %v10490_v34 = vpop.f32.mrf.mxu1 }
 0x84f   :  { %7434 = vst.msk [vmem:[%s15047_s17 + $0x1a0] sm:$0xff] %vm7381_vm5, %v7018_v22  ;;  %v10254_v23 = vpop.f32.mrf.mxu0 }
 0x850   :  { %v7022_v8 = vpop.f32.mrf.mxu1  ;;  %10636 = vmatmul.mubr.f32.gmra.mxu1 %v6644_v43  ;;  %v6645_v35 = vmax.f32 %v6450_v3, 0.0 }
 0x851   :  { %v7023_v27 = vadd.f32 %v14563_v50, %v7022_v8  ;;  %v6452_v25 = vpop.f32.mrf.mxu0  ;;  %10638 = vmatprep.mubr.msk.f32.mxu1 %vm10940_vm2, %v10939_v0 }
 0x852   :  { %v6453_v47 = vadd.f32 %v14521_v58, %v6452_v25  ;;  %v10493_v54 = vpop.f32.mrf.mxu1 }
 0x853   :  { %7435 = vst.msk [vmem:[%s15047_s17 + $0x1a8] sm:$0xff] %vm7381_vm5, %v7023_v27  ;;  %v10255_v33 = vpop.f32.mrf.mxu0 }
 0x854   :  { %v7027_v17 = vpop.f32.mrf.mxu1  ;;  %10639 = vmatmul.mubr.f32.gmra.mxu1 %v6645_v35  ;;  %v6646_v11 = vmax.f32 %v6453_v47, 0.0 }
 0x855   :  { %v7028_v60 = vadd.f32 %v14563_v50, %v7027_v17  ;;  %v6457_v19 = vpop.f32.mrf.mxu0  ;;  %10641 = vmatprep.mubr.msk.f32.mxu1 %vm10940_vm2, %v10939_v0 }
 0x856   :  { %v6458_v18 = vadd.f32 %v14521_v58, %v6457_v19  ;;  %v10496_v61 = vpop.f32.mrf.mxu1 }
 0x857   :  { %7436 = vst.msk [vmem:[%s15047_s17 + $0x1b0] sm:$0xff] %vm7381_vm5, %v7028_v60  ;;  %v10258_v26 = vpop.f32.mrf.mxu0 }
 0x858   :  { %v7032_v45 = vpop.f32.mrf.mxu1  ;;  %10642 = vmatmul.mubr.f32.gmra.mxu1 %v6646_v11  ;;  %v6647_v44 = vmax.f32 %v6458_v18, 0.0 }
 0x859   :  { %v7033_v62 = vadd.f32 %v14563_v50, %v7032_v45  ;;  %v6460_v10 = vpop.f32.mrf.mxu0  ;;  %10644 = vmatprep.mubr.msk.f32.mxu1 %vm10940_vm2, %v10939_v0 }
 0x85a   :  { %v6461_v36 = vadd.f32 %v14521_v58, %v6460_v10  ;;  %v10499_v56 = vpop.f32.mrf.mxu1 }
 0x85b   :  { %7437 = vst.msk [vmem:[%s15047_s17 + $0x1b8] sm:$0xff] %vm7381_vm5, %v7033_v62  ;;  %v10259_v4 = vpop.f32.mrf.mxu0 }
 0x85c   :  { %v7037_v30 = vpop.f32.mrf.mxu1  ;;  %10645 = vmatmul.mubr.f32.gmra.mxu1 %v6647_v44  ;;  %v6648_v52 = vmax.f32 %v6461_v36, 0.0 }
 0x85d   :  { %v7038_v55 = vadd.f32 %v14563_v50, %v7037_v30  ;;  %v6465_v13 = vpop.f32.mrf.mxu0  ;;  %10647 = vmatprep.mubr.msk.f32.mxu1 %vm10940_vm2, %v10939_v0 }
 0x85e   :  { %v6466_v39 = vadd.f32 %v14521_v58, %v6465_v13  ;;  %v10502_v46 = vpop.f32.mrf.mxu1 }
 0x85f   :  { %7438 = vst.msk [vmem:[%s15047_s17 + $0x1c0] sm:$0xff] %vm7381_vm5, %v7038_v55  ;;  %v10262_v29 = vpop.f32.mrf.mxu0 }
 0x860   :  { %v7042_v9 = vpop.f32.mrf.mxu1  ;;  %10648 = vmatmul.mubr.f32.gmra.mxu1 %v6648_v52  ;;  %v6649_v7 = vmax.f32 %v6466_v39, 0.0 }
 0x861   :  { %v7043_v1 = vadd.f32 %v14563_v50, %v7042_v9  ;;  %v6468_v6 = vpop.f32.mrf.mxu0  ;;  %10650 = vmatprep.mubr.msk.f32.mxu1 %vm10940_vm2, %v10939_v0 }
 0x862   :  { %v6469_v59 = vadd.f32 %v14521_v58, %v6468_v6  ;;  %v10505_v32 = vpop.f32.mrf.mxu1 }
 0x863   :  { %7439 = vst.msk [vmem:[%s15047_s17 + $0x1c8] sm:$0xff] %vm7381_vm5, %v7043_v1  ;;  %v10263_v41 = vpop.f32.mrf.mxu0 }
 0x864   :  { %v7047_v14 = vpop.f32.mrf.mxu1  ;;  %10651 = vmatmul.mubr.f32.gmra.mxu1 %v6649_v7  ;;  %v6650_v57 = vmax.f32 %v6469_v59, 0.0 }
 0x865   :  { %v7048_v42 = vadd.f32 %v14563_v50, %v7047_v14  ;;  %v6473_v21 = vpop.f32.mrf.mxu0  ;;  %10653 = vmatprep.mubr.msk.f32.mxu1 %vm10940_vm2, %v10939_v0 }
 0x866   :  { %v6474_v49 = vadd.f32 %v14521_v58, %v6473_v21  ;;  %v10508_v16 = vpop.f32.mrf.mxu1 }
 0x867   :  { %7440 = vst.msk [vmem:[%s15047_s17 + $0x1d0] sm:$0xff] %vm7381_vm5, %v7048_v42  ;;  %v10266_v31 = vpop.f32.mrf.mxu0 }
 0x868   :  { %v7052_v37 = vpop.f32.mrf.mxu1  ;;  %10654 = vmatmul.mubr.f32.gmra.mxu1 %v6650_v57  ;;  %v6651_v15 = vmax.f32 %v6474_v49, 0.0 }
 0x869   :  { %v7053_v51 = vadd.f32 %v14563_v50, %v7052_v37  ;;  %v6476_v53 = vpop.f32.mrf.mxu0  ;;  %10656 = vmatprep.mubr.msk.f32.mxu1 %vm10940_vm2, %v10939_v0 }
 0x86a   :  { %v6477_v48 = vadd.f32 %v14521_v58, %v6476_v53  ;;  %v10511_v24 = vpop.f32.mrf.mxu1 }
 0x86b   :  { %7441 = vst.msk [vmem:[%s15047_s17 + $0x1d8] sm:$0xff] %vm7381_vm5, %v7053_v51  ;;  %v10267_v40 = vpop.f32.mrf.mxu0 }
 0x86c   :  { %v7057_v2 = vpop.f32.mrf.mxu1  ;;  %10657 = vmatmul.mubr.f32.gmra.mxu1 %v6651_v15  ;;  %v6652_v20 = vmax.f32 %v6477_v48, 0.0 }
 0x86d   :  { %v7058_v28 = vadd.f32 %v14563_v50, %v7057_v2  ;;  %v6481_v38 = vpop.f32.mrf.mxu0  ;;  %10659 = vmatprep.mubr.msk.f32.mxu1 %vm10940_vm2, %v10939_v0 }
 0x86e   :  { %v6482_v5 = vadd.f32 %v14521_v58, %v6481_v38  ;;  %v10514_v63 = vpop.f32.mrf.mxu1 }
 0x86f   :  { %7442 = vst.msk [vmem:[%s15047_s17 + $0x1e0] sm:$0xff] %vm7381_vm5, %v7058_v28  ;;  %v10270_v22 = vpop.f32.mrf.mxu0 }
 0x870   :  { %v7062_v12 = vpop.f32.mrf.mxu1  ;;  %10660 = vmatmul.mubr.f32.gmra.mxu1 %v6652_v20  ;;  %v6653_v34 = vmax.f32 %v6482_v5, 0.0 }
 0x871   :  { %v7063_v43 = vadd.f32 %v14563_v50, %v7062_v12  ;;  %v6484_v3 = vpop.f32.mrf.mxu0  ;;  %10662 = vmatprep.mubr.msk.f32.mxu1 %vm10940_vm2, %v10939_v0 }
 0x872   :  { %v6485_v23 = vadd.f32 %v14521_v58, %v6484_v3  ;;  %v10517_v8 = vpop.f32.mrf.mxu1 }
 0x873   :  { %7443 = vst.msk [vmem:[%s15047_s17 + $0x1e8] sm:$0xff] %vm7381_vm5, %v7063_v43  ;;  %v10271_v27 = vpop.f32.mrf.mxu0 }
 0x874   :  { %v7067_v25 = vpop.f32.mrf.mxu1  ;;  %10663 = vmatmul.mubr.f32.gmra.mxu1 %v6653_v34  ;;  %v6654_v54 = vmax.f32 %v6485_v23, 0.0 }
 0x875   :  { %v7068_v35 = vadd.f32 %v14563_v50, %v7067_v25  ;;  %v6489_v47 = vpop.f32.mrf.mxu0  ;;  %10665 = vmatprep.mubr.msk.f32.mxu1 %vm10940_vm2, %v10939_v0 }
 0x876   :  { %v6490_v33 = vadd.f32 %v14521_v58, %v6489_v47  ;;  %v10520_v17 = vpop.f32.mrf.mxu1 }
 0x877   :  { %7444 = vst.msk [vmem:[%s15047_s17 + $0x1f0] sm:$0xff] %vm7381_vm5, %v7068_v35  ;;  %v10274_v60 = vpop.f32.mrf.mxu0 }
 0x878   :  { %v7072_v19 = vpop.f32.mrf.mxu1  ;;  %10666 = vmatmul.mubr.f32.gmra.mxu1 %v6654_v54  ;;  %v6655_v61 = vmax.f32 %v6490_v33, 0.0 }
 0x879   :  { %v7073_v11 = vadd.f32 %v14563_v50, %v7072_v19  ;;  %v6492_v18 = vpop.f32.mrf.mxu0  ;;  %10668 = vmatprep.mubr.msk.f32.mxu1 %vm10940_vm2, %v10939_v0 }
 0x87a   :  { %v6493_v26 = vadd.f32 %v14521_v58, %v6492_v18  ;;  %v10523_v45 = vpop.f32.mrf.mxu1 }
 0x87b   :  { %7445 = vst.msk [vmem:[%s15047_s17 + $0x1f8] sm:$0xff] %vm7381_vm5, %v7073_v11  ;;  %v10275_v62 = vpop.f32.mrf.mxu0 }
 0x87c   :  { %v7077_v10 = vpop.f32.mrf.mxu1  ;;  %10669 = vmatmul.mubr.f32.gmra.mxu1 %v6655_v61  ;;  %v6656_v56 = vmax.f32 %v6493_v26, 0.0 }
 0x87d   :  { %v7078_v44 = vadd.f32 %v14563_v50, %v7077_v10  ;;  %v6497_v36 = vpop.f32.mrf.mxu0  ;;  %10671 = vmatprep.mubr.msk.f32.mxu1 %vm10940_vm2, %v10939_v0 }
 0x87e   :  { %v6498_v4 = vadd.f32 %v14521_v58, %v6497_v36  ;;  %v10526_v30 = vpop.f32.mrf.mxu1 }
 0x87f   :  { %7446 = vst.msk [vmem:[%s15047_s17 + $0x200] sm:$0xff] %vm7381_vm5, %v7078_v44  ;;  %v10278_v55 = vpop.f32.mrf.mxu0 }
 0x880   :  { %v7082_v13 = vpop.f32.mrf.mxu1  ;;  %10672 = vmatmul.mubr.f32.gmra.mxu1 %v6656_v56  ;;  %v6657_v46 = vmax.f32 %v6498_v4, 0.0 }
 0x881   :  { %v7083_v52 = vadd.f32 %v14563_v50, %v7082_v13  ;;  %v6500_v39 = vpop.f32.mrf.mxu0  ;;  %10674 = vmatprep.mubr.msk.f32.mxu1 %vm10940_vm2, %v10939_v0 }
 0x882   :  { %v6501_v29 = vadd.f32 %v14521_v58, %v6500_v39  ;;  %v10529_v9 = vpop.f32.mrf.mxu1 }
 0x883   :  { %7447 = vst.msk [vmem:[%s15047_s17 + $0x208] sm:$0xff] %vm7381_vm5, %v7083_v52  ;;  %v10279_v1 = vpop.f32.mrf.mxu0 }
 0x884   :  { %v7087_v6 = vpop.f32.mrf.mxu1  ;;  %10675 = vmatmul.mubr.f32.gmra.mxu1 %v6657_v46  ;;  %v6658_v32 = vmax.f32 %v6501_v29, 0.0 }
 0x885   :  { %v7088_v7 = vadd.f32 %v14563_v50, %v7087_v6  ;;  %v6505_v59 = vpop.f32.mrf.mxu0  ;;  %10677 = vmatprep.mubr.msk.f32.mxu1 %vm10940_vm2, %v10939_v0 }
 0x886   :  { %v6506_v41 = vadd.f32 %v14521_v58, %v6505_v59  ;;  %v10532_v14 = vpop.f32.mrf.mxu1 }
 0x887   :  { %7448 = vst.msk [vmem:[%s15047_s17 + $0x210] sm:$0xff] %vm7381_vm5, %v7088_v7  ;;  %v10282_v42 = vpop.f32.mrf.mxu0 }
 0x888   :  { %v7092_v21 = vpop.f32.mrf.mxu1  ;;  %10678 = vmatmul.mubr.f32.gmra.mxu1 %v6658_v32  ;;  %v6659_v16 = vmax.f32 %v6506_v41, 0.0 }
 0x889   :  { %v7093_v57 = vadd.f32 %v14563_v50, %v7092_v21  ;;  %v6508_v49 = vpop.f32.mrf.mxu0  ;;  %10680 = vmatprep.mubr.msk.f32.mxu1 %vm10940_vm2, %v10939_v0 }
 0x88a   :  { %v6509_v31 = vadd.f32 %v14521_v58, %v6508_v49  ;;  %v10535_v37 = vpop.f32.mrf.mxu1 }
 0x88b   :  { %7449 = vst.msk [vmem:[%s15047_s17 + $0x218] sm:$0xff] %vm7381_vm5, %v7093_v57  ;;  %v10283_v51 = vpop.f32.mrf.mxu0 }
 0x88c   :  { %v7097_v53 = vpop.f32.mrf.mxu1  ;;  %10681 = vmatmul.mubr.f32.gmra.mxu1 %v6659_v16  ;;  %v6660_v24 = vmax.f32 %v6509_v31, 0.0 }
 0x88d   :  { %v7098_v15 = vadd.f32 %v14563_v50, %v7097_v53  ;;  %v6513_v48 = vpop.f32.mrf.mxu0  ;;  %10683 = vmatprep.mubr.msk.f32.mxu1 %vm10940_vm2, %v10939_v0 }
 0x88e   :  { %v6514_v40 = vadd.f32 %v14521_v58, %v6513_v48  ;;  %v10538_v2 = vpop.f32.mrf.mxu1 }
 0x88f   :  { %7450 = vst.msk [vmem:[%s15047_s17 + $0x220] sm:$0xff] %vm7381_vm5, %v7098_v15  ;;  %v10286_v28 = vpop.f32.mrf.mxu0 }
 0x890   :  { %v7102_v38 = vpop.f32.mrf.mxu1  ;;  %10684 = vmatmul.mubr.f32.gmra.mxu1 %v6660_v24  ;;  %v6661_v63 = vmax.f32 %v6514_v40, 0.0 }
 0x891   :  { %v7103_v20 = vadd.f32 %v14563_v50, %v7102_v38  ;;  %v6516_v5 = vpop.f32.mrf.mxu0  ;;  %10686 = vmatprep.mubr.msk.f32.mxu1 %vm10940_vm2, %v10939_v0 }
 0x892   :  { %v6517_v22 = vadd.f32 %v14521_v58, %v6516_v5  ;;  %v10541_v12 = vpop.f32.mrf.mxu1 }
 0x893   :  { %7451 = vst.msk [vmem:[%s15047_s17 + $0x228] sm:$0xff] %vm7381_vm5, %v7103_v20  ;;  %v10287_v43 = vpop.f32.mrf.mxu0 }
 0x894   :  { %v7107_v3 = vpop.f32.mrf.mxu1  ;;  %10687 = vmatmul.mubr.f32.gmra.mxu1 %v6661_v63  ;;  %v6662_v8 = vmax.f32 %v6517_v22, 0.0 }
 0x895   :  { %v7108_v34 = vadd.f32 %v14563_v50, %v7107_v3  ;;  %v6521_v23 = vpop.f32.mrf.mxu0  ;;  %10689 = vmatprep.mubr.msk.f32.mxu1 %vm10940_vm2, %v10939_v0 }
 0x896   :  { %v6522_v27 = vadd.f32 %v14521_v58, %v6521_v23  ;;  %v10544_v25 = vpop.f32.mrf.mxu1 }
 0x897   :  { %7452 = vst.msk [vmem:[%s15047_s17 + $0x230] sm:$0xff] %vm7381_vm5, %v7108_v34  ;;  %v10290_v35 = vpop.f32.mrf.mxu0 }
 0x898   :  { %v7112_v47 = vpop.f32.mrf.mxu1  ;;  %10690 = vmatmul.mubr.f32.gmra.mxu1 %v6662_v8  ;;  %v6663_v17 = vmax.f32 %v6522_v27, 0.0 }
 0x899   :  { %v7113_v54 = vadd.f32 %v14563_v50, %v7112_v47  ;;  %v6524_v33 = vpop.f32.mrf.mxu0  ;;  %10692 = vmatprep.mubr.msk.f32.mxu1 %vm10940_vm2, %v10939_v0 }
 0x89a   :  { %v6525_v60 = vadd.f32 %v14521_v58, %v6524_v33  ;;  %v10547_v19 = vpop.f32.mrf.mxu1 }
 0x89b   :  { %7453 = vst.msk [vmem:[%s15047_s17 + $0x238] sm:$0xff] %vm7381_vm5, %v7113_v54  ;;  %v10291_v11 = vpop.f32.mrf.mxu0 }
 0x89c   :  { %v7117_v18 = vpop.f32.mrf.mxu1  ;;  %10693 = vmatmul.mubr.f32.gmra.mxu1 %v6663_v17  ;;  %v6664_v45 = vmax.f32 %v6525_v60, 0.0 }
 0x89d   :  { %v7118_v61 = vadd.f32 %v14563_v50, %v7117_v18  ;;  %v6529_v26 = vpop.f32.mrf.mxu0  ;;  %10695 = vmatprep.mubr.msk.f32.mxu1 %vm10940_vm2, %v10939_v0 }
 0x89e   :  { %v6530_v62 = vadd.f32 %v14521_v58, %v6529_v26  ;;  %v10550_v10 = vpop.f32.mrf.mxu1 }
 0x89f   :  { %7454 = vst.msk [vmem:[%s15047_s17 + $0x240] sm:$0xff] %vm7381_vm5, %v7118_v61  ;;  %v10294_v44 = vpop.f32.mrf.mxu0 }
 0x8a0   :  { %v7122_v36 = vpop.f32.mrf.mxu1  ;;  %10696 = vmatmul.mubr.f32.gmra.mxu1 %v6664_v45  ;;  %v6665_v30 = vmax.f32 %v6530_v62, 0.0 }
 0x8a1   :  { %v7123_v56 = vadd.f32 %v14563_v50, %v7122_v36  ;;  %v6532_v4 = vpop.f32.mrf.mxu0  ;;  %10698 = vmatprep.mubr.msk.f32.mxu1 %vm10940_vm2, %v10939_v0 }
 0x8a2   :  { %v6533_v55 = vadd.f32 %v14521_v58, %v6532_v4  ;;  %v10553_v13 = vpop.f32.mrf.mxu1 }
 0x8a3   :  { %7455 = vst.msk [vmem:[%s15047_s17 + $0x248] sm:$0xff] %vm7381_vm5, %v7123_v56  ;;  %v10295_v52 = vpop.f32.mrf.mxu0 }
 0x8a4   :  { %v7127_v39 = vpop.f32.mrf.mxu1  ;;  %10699 = vmatmul.mubr.f32.gmra.mxu1 %v6665_v30  ;;  %v6666_v9 = vmax.f32 %v6533_v55, 0.0 }
 0x8a5   :  { %v7128_v46 = vadd.f32 %v14563_v50, %v7127_v39  ;;  %v6537_v29 = vpop.f32.mrf.mxu0  ;;  %10701 = vmatprep.mubr.msk.f32.mxu1 %vm10940_vm2, %v10939_v0 }
 0x8a6   :  { %v6538_v1 = vadd.f32 %v14521_v58, %v6537_v29  ;;  %v10556_v6 = vpop.f32.mrf.mxu1 }
 0x8a7   :  { %7456 = vst.msk [vmem:[%s15047_s17 + $0x250] sm:$0xff] %vm7381_vm5, %v7128_v46  ;;  %v10298_v7 = vpop.f32.mrf.mxu0 }
 0x8a8   :  { %v7132_v59 = vpop.f32.mrf.mxu1  ;;  %10702 = vmatmul.mubr.f32.gmra.mxu1 %v6666_v9  ;;  %v6667_v14 = vmax.f32 %v6538_v1, 0.0 }
 0x8a9   :  { %v7133_v32 = vadd.f32 %v14563_v50, %v7132_v59  ;;  %v6540_v41 = vpop.f32.mrf.mxu0  ;;  %10704 = vmatprep.mubr.msk.f32.mxu1 %vm10940_vm2, %v10939_v0 }
 0x8aa   :  { %v10559_v42 = vpop.f32.mrf.mxu1 }
 0x8ab   :  { %7457 = vst.msk [vmem:[%s15047_s17 + $0x258] sm:$0xff] %vm7381_vm5, %v7133_v32  ;;  %v10299_v58 = vpop.f32.mrf.mxu0 }
 0x8ac   :  { %v7137_v21 = vpop.f32.mrf.mxu1  ;;  %10705 = vmatmul.mubr.f32.gmra.mxu1 %v6667_v14 }
 0x8ad   :  { %v7138_v57 = vadd.f32 %v14563_v50, %v7137_v21  ;;  %v6757_v49 = vpop.f32.mrf.mxu0 }
 0x8ae   :  { %v6758_v16 = vadd.f32 %v14563_v50, %v6757_v49  ;;  %v10562_v31 = vpop.f32.mrf.mxu1 }
 0x8af   :  { %7458 = vst.msk [vmem:[%s15047_s17 + $0x260] sm:$0xff] %vm7381_vm5, %v7138_v57  ;;  %v10334_v0 = vpop.f32.mrf.mxu0 }
 0x8b0   :  { %7382 = vst.msk [vmem:[%s15047_s17] sm:$0xff] %vm7381_vm5, %v6758_v16  ;;  %v7142_v37 = vpop.f32.mrf.mxu1 }
 0x8b1   :  { %v7143_v51 = vadd.f32 %v14563_v50, %v7142_v37 }
 0x8b2   :  { %v10565_v53 = vpop.f32.mrf.mxu1 }
 0x8b3   :  { %7459 = vst.msk [vmem:[%s15047_s17 + $0x268] sm:$0xff] %vm7381_vm5, %v7143_v51 }
 0x8b4   :  { %v7147_v15 = vpop.f32.mrf.mxu1 }
 0x8b5   :  { %v7148_v48 = vadd.f32 %v14563_v50, %v7147_v15 }
 0x8b6   :  { %v10568_v24 = vpop.f32.mrf.mxu1 }
 0x8b7   :  { %7460 = vst.msk [vmem:[%s15047_s17 + $0x270] sm:$0xff] %vm7381_vm5, %v7148_v48 }
 0x8b8   :  { %v7152_v40 = vpop.f32.mrf.mxu1 }
 0x8b9   :  { %v7153_v2 = vadd.f32 %v14563_v50, %v7152_v40 }
 0x8ba   :  { %v10571_v28 = vpop.f32.mrf.mxu1 }
 0x8bb   :  { %7461 = vst.msk [vmem:[%s15047_s17 + $0x278] sm:$0xff] %vm7381_vm5, %v7153_v2 }
 0x8bc   :  { %v7157_v38 = vpop.f32.mrf.mxu1 }
 0x8bd   :  { %v7158_v20 = vadd.f32 %v14563_v50, %v7157_v38 }
 0x8be   :  { %v10574_v5 = vpop.f32.mrf.mxu1 }
 0x8bf   :  { %7462 = vst.msk [vmem:[%s15047_s17 + $0x280] sm:$0xff] %vm7381_vm5, %v7158_v20 }
 0x8c0   :  { %v7162_v63 = vpop.f32.mrf.mxu1 }
 0x8c1   :  { %v7163_v22 = vadd.f32 %v14563_v50, %v7162_v63 }
 0x8c2   :  { %v10577_v12 = vpop.f32.mrf.mxu1 }
 0x8c3   :  { %7463 = vst.msk [vmem:[%s15047_s17 + $0x288] sm:$0xff] %vm7381_vm5, %v7163_v22 }
 0x8c4   :  { %v7167_v43 = vpop.f32.mrf.mxu1 }
 0x8c5   :  { %v7168_v3 = vadd.f32 %v14563_v50, %v7167_v43 }
 0x8c6   :  { %v10580_v34 = vpop.f32.mrf.mxu1 }
 0x8c7   :  { %7464 = vst.msk [vmem:[%s15047_s17 + $0x290] sm:$0xff] %vm7381_vm5, %v7168_v3 }
 0x8c8   :  { %v7172_v23 = vpop.f32.mrf.mxu1 }
 0x8c9   :  { %v7173_v8 = vadd.f32 %v14563_v50, %v7172_v23 }
 0x8ca   :  { %v10583_v27 = vpop.f32.mrf.mxu1 }
 0x8cb   :  { %7465 = vst.msk [vmem:[%s15047_s17 + $0x298] sm:$0xff] %vm7381_vm5, %v7173_v8 }
 0x8cc   :  { %v7177_v25 = vpop.f32.mrf.mxu1 }
 0x8cd   :  { %v7178_v35 = vadd.f32 %v14563_v50, %v7177_v25 }
 0x8ce   :  { %v10586_v47 = vpop.f32.mrf.mxu1 }
 0x8cf   :  { %7466 = vst.msk [vmem:[%s15047_s17 + $0x2a0] sm:$0xff] %vm7381_vm5, %v7178_v35 }
 0x8d0   :  { %v7182_v54 = vpop.f32.mrf.mxu1 }
 0x8d1   :  { %v7183_v33 = vadd.f32 %v14563_v50, %v7182_v54 }
 0x8d2   :  { %v10589_v17 = vpop.f32.mrf.mxu1 }
 0x8d3   :  { %7467 = vst.msk [vmem:[%s15047_s17 + $0x2a8] sm:$0xff] %vm7381_vm5, %v7183_v33 }
 0x8d4   :  { %v7187_v60 = vpop.f32.mrf.mxu1 }
 0x8d5   :  { %v7188_v19 = vadd.f32 %v14563_v50, %v7187_v60 }
 0x8d6   :  { %v10592_v11 = vpop.f32.mrf.mxu1 }
 0x8d7   :  { %7468 = vst.msk [vmem:[%s15047_s17 + $0x2b0] sm:$0xff] %vm7381_vm5, %v7188_v19 }
 0x8d8   :  { %v7192_v18 = vpop.f32.mrf.mxu1 }
 0x8d9   :  { %v7193_v61 = vadd.f32 %v14563_v50, %v7192_v18 }
 0x8da   :  { %v10595_v26 = vpop.f32.mrf.mxu1 }
 0x8db   :  { %7469 = vst.msk [vmem:[%s15047_s17 + $0x2b8] sm:$0xff] %vm7381_vm5, %v7193_v61 }
 0x8dc   :  { %v7197_v45 = vpop.f32.mrf.mxu1 }
 0x8dd   :  { %v7198_v62 = vadd.f32 %v14563_v50, %v7197_v45 }
 0x8de   :  { %v10598_v10 = vpop.f32.mrf.mxu1 }
 0x8df   :  { %7470 = vst.msk [vmem:[%s15047_s17 + $0x2c0] sm:$0xff] %vm7381_vm5, %v7198_v62 }
 0x8e0   :  { %v7202_v44 = vpop.f32.mrf.mxu1 }
 0x8e1   :  { %v7203_v36 = vadd.f32 %v14563_v50, %v7202_v44 }
 0x8e2   :  { %v10601_v56 = vpop.f32.mrf.mxu1 }
 0x8e3   :  { %7471 = vst.msk [vmem:[%s15047_s17 + $0x2c8] sm:$0xff] %vm7381_vm5, %v7203_v36 }
 0x8e4   :  { %v7207_v4 = vpop.f32.mrf.mxu1 }
 0x8e5   :  { %v7208_v30 = vadd.f32 %v14563_v50, %v7207_v4 }
 0x8e6   :  { %v10604_v55 = vpop.f32.mrf.mxu1 }
 0x8e7   :  { %7472 = vst.msk [vmem:[%s15047_s17 + $0x2d0] sm:$0xff] %vm7381_vm5, %v7208_v30 }
 0x8e8   :  { %v7212_v13 = vpop.f32.mrf.mxu1 }
 0x8e9   :  { %v7213_v52 = vadd.f32 %v14563_v50, %v7212_v13 }
 0x8ea   :  { %v10607_v39 = vpop.f32.mrf.mxu1 }
 0x8eb   :  { %7473 = vst.msk [vmem:[%s15047_s17 + $0x2d8] sm:$0xff] %vm7381_vm5, %v7213_v52 }
 0x8ec   :  { %v7217_v46 = vpop.f32.mrf.mxu1 }
 0x8ed   :  { %v7218_v29 = vadd.f32 %v14563_v50, %v7217_v46 }
 0x8ee   :  { %v10610_v9 = vpop.f32.mrf.mxu1 }
 0x8ef   :  { %7474 = vst.msk [vmem:[%s15047_s17 + $0x2e0] sm:$0xff] %vm7381_vm5, %v7218_v29 }
 0x8f0   :  { %v7222_v1 = vpop.f32.mrf.mxu1 }
 0x8f1   :  { %v7223_v6 = vadd.f32 %v14563_v50, %v7222_v1 }
 0x8f2   :  { %v10613_v7 = vpop.f32.mrf.mxu1 }
 0x8f3   :  { %7475 = vst.msk [vmem:[%s15047_s17 + $0x2e8] sm:$0xff] %vm7381_vm5, %v7223_v6 }
 0x8f4   :  { %v7227_v59 = vpop.f32.mrf.mxu1 }
 0x8f5   :  { %v7228_v32 = vadd.f32 %v14563_v50, %v7227_v59 }
 0x8f6   :  { %v10616_v41 = vpop.f32.mrf.mxu1 }
 0x8f7   :  { %7476 = vst.msk [vmem:[%s15047_s17 + $0x2f0] sm:$0xff] %vm7381_vm5, %v7228_v32 }
 0x8f8   :  { %v7232_v14 = vpop.f32.mrf.mxu1 }
 0x8f9   :  { %v7233_v42 = vadd.f32 %v14563_v50, %v7232_v14 }
 0x8fa   :  { %v10619_v58 = vpop.f32.mrf.mxu1 }
 0x8fb   :  { %7477 = vst.msk [vmem:[%s15047_s17 + $0x2f8] sm:$0xff] %vm7381_vm5, %v7233_v42 }
 0x8fc   :  { %v7237_v21 = vpop.f32.mrf.mxu1 }
 0x8fd   :  { %v7238_v57 = vadd.f32 %v14563_v50, %v7237_v21 }
 0x8fe   :  { %v10622_v49 = vpop.f32.mrf.mxu1 }
 0x8ff   :  { %7478 = vst.msk [vmem:[%s15047_s17 + $0x300] sm:$0xff] %vm7381_vm5, %v7238_v57 }
 0x900   :  { %v7242_v16 = vpop.f32.mrf.mxu1 }
 0x901   :  { %v7243_v31 = vadd.f32 %v14563_v50, %v7242_v16 }
 0x902   :  { %v10625_v0 = vpop.f32.mrf.mxu1 }
 0x903   :  { %7479 = vst.msk [vmem:[%s15047_s17 + $0x308] sm:$0xff] %vm7381_vm5, %v7243_v31 }
 0x904   :  { %v7247_v37 = vpop.f32.mrf.mxu1 }
 0x905   :  { %v7248_v51 = vadd.f32 %v14563_v50, %v7247_v37 }
 0x906   :  { %v10628_v53 = vpop.f32.mrf.mxu1 }
 0x907   :  { %7480 = vst.msk [vmem:[%s15047_s17 + $0x310] sm:$0xff] %vm7381_vm5, %v7248_v51 }
 0x908   :  { %v7252_v15 = vpop.f32.mrf.mxu1 }
 0x909   :  { %v7253_v48 = vadd.f32 %v14563_v50, %v7252_v15 }
 0x90a   :  { %v10631_v24 = vpop.f32.mrf.mxu1 }
 0x90b   :  { %7481 = vst.msk [vmem:[%s15047_s17 + $0x318] sm:$0xff] %vm7381_vm5, %v7253_v48 }
 0x90c   :  { %v7257_v40 = vpop.f32.mrf.mxu1 }
 0x90d   :  { %v7258_v2 = vadd.f32 %v14563_v50, %v7257_v40 }
 0x90e   :  { %v10634_v28 = vpop.f32.mrf.mxu1 }
 0x90f   :  { %7482 = vst.msk [vmem:[%s15047_s17 + $0x320] sm:$0xff] %vm7381_vm5, %v7258_v2 }
 0x910   :  { %v7262_v38 = vpop.f32.mrf.mxu1 }
 0x911   :  { %v7263_v20 = vadd.f32 %v14563_v50, %v7262_v38 }
 0x912   :  { %v10637_v5 = vpop.f32.mrf.mxu1 }
 0x913   :  { %7483 = vst.msk [vmem:[%s15047_s17 + $0x328] sm:$0xff] %vm7381_vm5, %v7263_v20 }
 0x914   :  { %v7267_v63 = vpop.f32.mrf.mxu1 }
 0x915   :  { %v7268_v22 = vadd.f32 %v14563_v50, %v7267_v63 }
 0x916   :  { %v10640_v12 = vpop.f32.mrf.mxu1 }
 0x917   :  { %7484 = vst.msk [vmem:[%s15047_s17 + $0x330] sm:$0xff] %vm7381_vm5, %v7268_v22 }
 0x918   :  { %v7272_v43 = vpop.f32.mrf.mxu1 }
 0x919   :  { %v7273_v3 = vadd.f32 %v14563_v50, %v7272_v43 }
 0x91a   :  { %v10643_v34 = vpop.f32.mrf.mxu1 }
 0x91b   :  { %7485 = vst.msk [vmem:[%s15047_s17 + $0x338] sm:$0xff] %vm7381_vm5, %v7273_v3 }
 0x91c   :  { %v7277_v23 = vpop.f32.mrf.mxu1 }
 0x91d   :  { %v7278_v8 = vadd.f32 %v14563_v50, %v7277_v23 }
 0x91e   :  { %v10646_v27 = vpop.f32.mrf.mxu1 }
 0x91f   :  { %7486 = vst.msk [vmem:[%s15047_s17 + $0x340] sm:$0xff] %vm7381_vm5, %v7278_v8 }
 0x920   :  { %v7282_v25 = vpop.f32.mrf.mxu1 }
 0x921   :  { %v7283_v35 = vadd.f32 %v14563_v50, %v7282_v25 }
 0x922   :  { %v10649_v47 = vpop.f32.mrf.mxu1 }
 0x923   :  { %7487 = vst.msk [vmem:[%s15047_s17 + $0x348] sm:$0xff] %vm7381_vm5, %v7283_v35 }
 0x924   :  { %v7287_v54 = vpop.f32.mrf.mxu1 }
 0x925   :  { %v7288_v33 = vadd.f32 %v14563_v50, %v7287_v54 }
 0x926   :  { %v10652_v17 = vpop.f32.mrf.mxu1 }
 0x927   :  { %7488 = vst.msk [vmem:[%s15047_s17 + $0x350] sm:$0xff] %vm7381_vm5, %v7288_v33 }
 0x928   :  { %v7292_v60 = vpop.f32.mrf.mxu1 }
 0x929   :  { %v7293_v19 = vadd.f32 %v14563_v50, %v7292_v60 }
 0x92a   :  { %v10655_v11 = vpop.f32.mrf.mxu1 }
 0x92b   :  { %7489 = vst.msk [vmem:[%s15047_s17 + $0x358] sm:$0xff] %vm7381_vm5, %v7293_v19 }
 0x92c   :  { %v7297_v18 = vpop.f32.mrf.mxu1 }
 0x92d   :  { %v7298_v61 = vadd.f32 %v14563_v50, %v7297_v18 }
 0x92e   :  { %v10658_v26 = vpop.f32.mrf.mxu1 }
 0x92f   :  { %7490 = vst.msk [vmem:[%s15047_s17 + $0x360] sm:$0xff] %vm7381_vm5, %v7298_v61 }
 0x930   :  { %v7302_v45 = vpop.f32.mrf.mxu1 }
 0x931   :  { %v7303_v62 = vadd.f32 %v14563_v50, %v7302_v45 }
 0x932   :  { %v10661_v10 = vpop.f32.mrf.mxu1 }
 0x933   :  { %7491 = vst.msk [vmem:[%s15047_s17 + $0x368] sm:$0xff] %vm7381_vm5, %v7303_v62 }
 0x934   :  { %v7307_v44 = vpop.f32.mrf.mxu1 }
 0x935   :  { %v7308_v36 = vadd.f32 %v14563_v50, %v7307_v44 }
 0x936   :  { %v10664_v56 = vpop.f32.mrf.mxu1 }
 0x937   :  { %7492 = vst.msk [vmem:[%s15047_s17 + $0x370] sm:$0xff] %vm7381_vm5, %v7308_v36 }
 0x938   :  { %v7312_v4 = vpop.f32.mrf.mxu1 }
 0x939   :  { %v7313_v30 = vadd.f32 %v14563_v50, %v7312_v4 }
 0x93a   :  { %v10667_v55 = vpop.f32.mrf.mxu1 }
 0x93b   :  { %7493 = vst.msk [vmem:[%s15047_s17 + $0x378] sm:$0xff] %vm7381_vm5, %v7313_v30 }
 0x93c   :  { %v7317_v13 = vpop.f32.mrf.mxu1 }
 0x93d   :  { %v7318_v52 = vadd.f32 %v14563_v50, %v7317_v13 }
 0x93e   :  { %v10670_v39 = vpop.f32.mrf.mxu1 }
 0x93f   :  { %7494 = vst.msk [vmem:[%s15047_s17 + $0x380] sm:$0xff] %vm7381_vm5, %v7318_v52 }
 0x940   :  { %v7322_v46 = vpop.f32.mrf.mxu1 }
 0x941   :  { %v7323_v29 = vadd.f32 %v14563_v50, %v7322_v46 }
 0x942   :  { %v10673_v9 = vpop.f32.mrf.mxu1 }
 0x943   :  { %7495 = vst.msk [vmem:[%s15047_s17 + $0x388] sm:$0xff] %vm7381_vm5, %v7323_v29 }
 0x944   :  { %v7327_v1 = vpop.f32.mrf.mxu1 }
 0x945   :  { %v7328_v6 = vadd.f32 %v14563_v50, %v7327_v1 }
 0x946   :  { %v10676_v7 = vpop.f32.mrf.mxu1 }
 0x947   :  { %7496 = vst.msk [vmem:[%s15047_s17 + $0x390] sm:$0xff] %vm7381_vm5, %v7328_v6 }
 0x948   :  { %v7332_v59 = vpop.f32.mrf.mxu1 }
 0x949   :  { %v7333_v32 = vadd.f32 %v14563_v50, %v7332_v59 }
 0x94a   :  { %v10679_v41 = vpop.f32.mrf.mxu1 }
 0x94b   :  { %7497 = vst.msk [vmem:[%s15047_s17 + $0x398] sm:$0xff] %vm7381_vm5, %v7333_v32 }
 0x94c   :  { %v7337_v14 = vpop.f32.mrf.mxu1 }
 0x94d   :  { %v7338_v42 = vadd.f32 %v14563_v50, %v7337_v14 }
 0x94e   :  { %v10682_v58 = vpop.f32.mrf.mxu1 }
 0x94f   :  { %7498 = vst.msk [vmem:[%s15047_s17 + $0x3a0] sm:$0xff] %vm7381_vm5, %v7338_v42 }
 0x950   :  { %v7342_v21 = vpop.f32.mrf.mxu1 }
 0x951   :  { %v7343_v57 = vadd.f32 %v14563_v50, %v7342_v21 }
 0x952   :  { %v10685_v49 = vpop.f32.mrf.mxu1 }
 0x953   :  { %7499 = vst.msk [vmem:[%s15047_s17 + $0x3a8] sm:$0xff] %vm7381_vm5, %v7343_v57 }
 0x954   :  { %v7347_v16 = vpop.f32.mrf.mxu1 }
 0x955   :  { %v7348_v31 = vadd.f32 %v14563_v50, %v7347_v16 }
 0x956   :  { %v10688_v0 = vpop.f32.mrf.mxu1 }
 0x957   :  { %7500 = vst.msk [vmem:[%s15047_s17 + $0x3b0] sm:$0xff] %vm7381_vm5, %v7348_v31 }
 0x958   :  { %v7352_v37 = vpop.f32.mrf.mxu1 }
 0x959   :  { %v7353_v51 = vadd.f32 %v14563_v50, %v7352_v37 }
 0x95a   :  { %v10691_v53 = vpop.f32.mrf.mxu1 }
 0x95b   :  { %7501 = vst.msk [vmem:[%s15047_s17 + $0x3b8] sm:$0xff] %vm7381_vm5, %v7353_v51 }
 0x95c   :  { %v7357_v15 = vpop.f32.mrf.mxu1 }
 0x95d   :  { %v7358_v48 = vadd.f32 %v14563_v50, %v7357_v15 }
 0x95e   :  { %v10694_v24 = vpop.f32.mrf.mxu1 }
 0x95f   :  { %7502 = vst.msk [vmem:[%s15047_s17 + $0x3c0] sm:$0xff] %vm7381_vm5, %v7358_v48 }
 0x960   :  { %v7362_v40 = vpop.f32.mrf.mxu1 }
 0x961   :  { %v7363_v2 = vadd.f32 %v14563_v50, %v7362_v40 }
 0x962   :  { %v10697_v28 = vpop.f32.mrf.mxu1 }
 0x963   :  { %7503 = vst.msk [vmem:[%s15047_s17 + $0x3c8] sm:$0xff] %vm7381_vm5, %v7363_v2 }
 0x964   :  { %v7367_v38 = vpop.f32.mrf.mxu1 }
 0x965   :  { %v7368_v20 = vadd.f32 %v14563_v50, %v7367_v38 }
 0x966   :  { %v10700_v5 = vpop.f32.mrf.mxu1 }
 0x967   :  { %7504 = vst.msk [vmem:[%s15047_s17 + $0x3d0] sm:$0xff] %vm7381_vm5, %v7368_v20 }
 0x968   :  { %v7372_v63 = vpop.f32.mrf.mxu1 }
 0x969   :  { %v7373_v22 = vadd.f32 %v14563_v50, %v7372_v63 }
 0x96a   :  { %v10703_v12 = vpop.f32.mrf.mxu1 }
 0x96b   :  { %7505 = vst.msk [vmem:[%s15047_s17 + $0x3d8] sm:$0xff] %vm7381_vm5, %v7373_v22 }
 0x96c   :  { %v7377_v43 = vpop.f32.mrf.mxu1 }
 0x96d   :  { %v7378_v3 = vadd.f32 %v14563_v50, %v7377_v43 }
 0x96e   :  { %v10706_v34 = vpop.f32.mrf.mxu1 }
 0x96f   :  { %7506 = vst.msk [vmem:[%s15047_s17 + $0x3e0] sm:$0xff] %vm7381_vm5, %v7378_v3 }

</bundles_post_ra>
